<compile_context>
chip_gen: v7x
topology: tpu7x:2x2x1
jax: 0.10.0
libtpu: 0.0.40
codegen_flags: <defaults>
</compile_context>

<pallas_src>
import math

import jax
import jax.numpy as jnp
from jax import lax
from jax.experimental import pallas as pl
from jax.experimental.pallas import tpu as pltpu


def _round_up(n, m):
    return ((n + m - 1) // m) * m


def _device_kind():
    try:
        return jax.devices()[0].device_kind.lower()
    except Exception:
        return ""


def _epilogue_dtype():
    """bf16 layer-1 epilogue on chips with a bf16 VPU (v6e/v7x), f32 otherwise."""
    kind = _device_kind()
    if ("v6" in kind) or ("v7" in kind):
        return jnp.bfloat16
    return jnp.float32


def _pick_vmem_limit_bytes():
    """Scoped-VMEM limit derived per chip generation."""
    kind = _device_kind()
    if "v7" in kind:
        return 48 * 1024 * 1024            # 64 MiB/TC part: leave headroom
    if ("v6" in kind) or ("v5" in kind) or ("v4" in kind):
        return 96 * 1024 * 1024            # 128 MiB VMEM parts
    return 48 * 1024 * 1024                # conservative default for unknown chips


# ---------------------------------------------------------------------------
# Pallas kernel: fused PointConv MLP (layers >= 2) + masked running max over
# neighbor chunks.  Layer 1 is folded into per-point partial sums on the host.
# ---------------------------------------------------------------------------
def _pointconv_kernel(maxdeg_ref,    # SMEM [num_m_tiles]           int32 (scalar prefetch)
                      hedge_ref,     # VMEM [k_chunk, m_tile, H1p]  bf16  (gathered h_pt[j])
                      hci_ref,       # VMEM [m_tile, H1p]           bf16/f32 (per-centroid h_ci)
                      deg_ref,       # VMEM [m_tile, 1]             int32 (valid-neighbor count)
                      w2_ref,        # VMEM [H1p, H2p]              bf16  (resident)
                      b2_ref,        # VMEM [1, H2p]                f32   (resident)
                      w3_ref,        # VMEM [H2p, Cp]               bf16  (resident)
                      b3_ref,        # VMEM [1, Cp]                 f32   (resident)
                      o_ref):        # VMEM [m_tile, Cp]            f32   (resident accumulator)
    k_chunk, m_tile, h1p = hedge_ref.shape
    c_out = o_ref.shape[1]
    i = pl.program_id(0)             # centroid tile  ("parallel")
    k = pl.program_id(1)             # neighbor chunk ("arbitrary", innermost)

    @pl.when(k == 0)
    def _init():
        o_ref[...] = jnp.full(o_ref.shape, -jnp.inf, dtype=o_ref.dtype)

    # Skip chunks that lie entirely past every centroid's neighbor count in this tile.
    @pl.when(k * k_chunk < maxdeg_ref[i])
    def _compute():
        h_e = hedge_ref[...]                                  # [k_chunk, m_tile, H1p] bf16
        h_c = hci_ref[...]                                    # [m_tile, H1p]

        # Layer-1 epilogue: relu(h_pt[j] - h_ci[i]).  The dtype of h_ci selects the
        # precision path: bf16 (v6e/v7x bf16 VPU) or f32 (v5e and older).
        if h_c.dtype == jnp.float32:
            a1 = jnp.maximum(h_e.astype(jnp.float32) - h_c[None, :, :], 0.0)
            a1 = a1.astype(jnp.bfloat16)
        else:
            a1 = jnp.maximum(h_e - h_c[None, :, :], 0.0)      # stays bf16
        a1 = a1.reshape(k_chunk * m_tile, h1p)                # lane-dense 2-D for the MXU

        # Fused Lin -> ReLU layers: bf16 on the MXU, f32 accumulation, f32 epilogue.
        a2 = jnp.dot(a1, w2_ref[...], preferred_element_type=jnp.float32) + b2_ref[...]
        a2 = jnp.maximum(a2, 0.0).astype(jnp.bfloat16)
        a3 = jnp.dot(a2, w3_ref[...], preferred_element_type=jnp.float32) + b3_ref[...]
        msg = jnp.maximum(a3, 0.0).reshape(k_chunk, m_tile, c_out)

        # Vectorized masked running max: one iota mask, one where, one max-reduce over
        # the chunk axis (elementwise across vregs), one maximum into the accumulator.
        nbr_id = lax.broadcasted_iota(jnp.int32, (k_chunk, m_tile, 1), 0) + k * k_chunk
        valid = nbr_id < deg_ref[...][None, :, :]             # [k_chunk, m_tile, 1]
        msg = jnp.where(valid, msg, -jnp.inf)
        o_ref[...] = jnp.maximum(o_ref[...], msg.max(axis=0))


def pointconv_max_pallas(h_edge, h_ci, degree, w2p, b2p, w3p, b3p,
                         *, m_tile=256, k_chunk=32):
    """h_edge: [K, M, H1p] bf16 neighbor-major per-edge layer-1 per-point partials.
       h_ci:   [M, H1p]  bf16/f32 per-centroid layer-1 partial (subtracted per edge).
       degree: [M]       int32 number of valid neighbors per centroid.
       Returns [M, Cp] f32 max-aggregated PointConv features (padded channels)."""
    k_total, m, h1p = h_edge.shape
    h2p = w2p.shape[1]
    cp = w3p.shape[1]

    # --- tile-size selection --------------------------------------------------
    m_tile = max(8, _round_up(min(m_tile, _round_up(m, 8)), 8))
    # Prefer >= 2 M tiles so the "parallel" axis can feed both TensorCores (v7x).
    if _round_up(m, m_tile) // m_tile < 2 and m_tile >= 16:
        m_tile = max(8, _round_up((m + 1) // 2, 8))
    k_chunk = max(1, min(k_chunk, k_total))
    k_pad = _round_up(k_total, k_chunk)
    if k_pad != k_total:
        h_edge = jnp.pad(h_edge, ((0, k_pad - k_total), (0, 0), (0, 0)))

    m_pad = _round_up(max(m, m_tile), m_tile)
    if m_pad != m:
        h_edge = jnp.pad(h_edge, ((0, 0), (0, m_pad - m), (0, 0)))
        h_ci = jnp.pad(h_ci, ((0, m_pad - m), (0, 0)))
        degree = jnp.pad(degree, (0, m_pad - m))

    num_m_tiles = m_pad // m_tile
    num_k_chunks = k_pad // k_chunk
    deg2d = degree.astype(jnp.int32).reshape(m_pad, 1)
    # Per-tile max degree -> SMEM via scalar prefetch -> pl.when chunk skipping.
    maxdeg = degree.astype(jnp.int32).reshape(num_m_tiles, m_tile).max(axis=1)

    grid_spec = pltpu.PrefetchScalarGridSpec(
        num_scalar_prefetch=1,
        grid=(num_m_tiles, num_k_chunks),
        in_specs=[
            pl.BlockSpec((k_chunk, m_tile, h1p), lambda i, k, md: (k, i, 0)),
            pl.BlockSpec((m_tile, h1p), lambda i, k, md: (i, 0)),
            pl.BlockSpec((m_tile, 1), lambda i, k, md: (i, 0)),
            pl.BlockSpec((h1p, h2p), lambda i, k, md: (0, 0)),   # weights: VMEM resident
            pl.BlockSpec((1, h2p), lambda i, k, md: (0, 0)),
            pl.BlockSpec((h2p, cp), lambda i, k, md: (0, 0)),
            pl.BlockSpec((1, cp), lambda i, k, md: (0, 0)),
        ],
        out_specs=pl.BlockSpec((m_tile, cp), lambda i, k, md: (i, 0)),
    )

    # Advisory cost: two fused matmul layers over all (padded) edges + slab traffic.
    cost = pl.CostEstimate(
        flops=2 * k_pad * m_pad * (h1p * h2p + h2p * cp),
        transcendentals=0,
        bytes_accessed=(k_pad * m_pad * h1p * 2          # hedge slab (bf16)
                        + m_pad * h1p * h_ci.dtype.itemsize
                        + m_pad * cp * 4                 # output (f32)
                        + h1p * h2p * 2 + h2p * cp * 2), # resident weights
    )

    out = pl.pallas_call(
        _pointconv_kernel,
        out_shape=jax.ShapeDtypeStruct((m_pad, cp), jnp.float32),
        grid_spec=grid_spec,
        compiler_params=pltpu.CompilerParams(
            dimension_semantics=("parallel", "arbitrary"),
            vmem_limit_bytes=_pick_vmem_limit_bytes(),
        ),
        cost_estimate=cost,
    )(maxdeg, h_edge, h_ci, deg2d, w2p, b2p, w3p, b3p)
    return out[:m]


# ---------------------------------------------------------------------------
# Host-side glue: FPS, radius grouping, layer-1 folding, weight padding.
# ---------------------------------------------------------------------------
def farthest_point_sampling(pos_b, n_sample):
    """Deterministic FPS on one batch's points [n, 3] -> [n_sample] local indices."""
    def body(i, carry):
        min_d2, idxs = carry
        nxt = jnp.argmax(min_d2).astype(jnp.int32)
        idxs = idxs.at[i].set(nxt)
        d2 = jnp.sum((pos_b - pos_b[nxt]) ** 2, axis=-1)
        return jnp.minimum(min_d2, d2), idxs

    idxs = jnp.zeros((n_sample,), jnp.int32)            # start at local point 0
    min_d2 = jnp.sum((pos_b - pos_b[0]) ** 2, axis=-1)
    _, idxs = lax.fori_loop(1, n_sample, body, (min_d2, idxs))
    return idxs


def radius_group(pos, batch, pos_c, batch_c, r, max_neighbors):
    """Up to `max_neighbors` same-batch points within radius r of each centroid
    (smallest point indices first), via top_k instead of a full [M, N] sort."""
    n = pos.shape[0]
    d2 = jnp.sum((pos_c[:, None, :] - pos[None, :, :]) ** 2, axis=-1)       # [M, N]
    within = (d2 <= r * r) & (batch_c[:, None] == batch[None, :])
    # Valid neighbors keyed by -index; invalid get -n (smaller than any valid key),
    # so top_k picks the max_neighbors smallest valid indices in ascending order.
    neg_key = jnp.where(within, -jnp.arange(n, dtype=jnp.int32)[None, :], -n)
    vals, _ = lax.top_k(neg_key, max_neighbors)                             # descending
    order = -vals                                                           # ascending idx
    nbr_idx = jnp.where(order < n, order, 0).astype(jnp.int32)              # pad idx 0 (masked)
    degree = jnp.minimum(within.sum(axis=1), max_neighbors).astype(jnp.int32)
    return nbr_idx, degree


def init_mlp_params(key, in_channels, hidden=(64, 64), out_channels=128):
    """Lin->ReLU stack matching Seq(Lin, ReLU, Lin, ReLU, Lin, ReLU)."""
    dims = (in_channels,) + tuple(hidden) + (out_channels,)
    keys = jax.random.split(key, 2 * (len(dims) - 1))
    params = {}
    for li in range(len(dims) - 1):
        fan_in, fan_out = dims[li], dims[li + 1]
        params[f"w{li + 1}"] = (jax.random.normal(keys[2 * li], (fan_in, fan_out), jnp.float32)
                                / math.sqrt(fan_in))
        params[f"b{li + 1}"] = 0.1 * jax.random.normal(keys[2 * li + 1], (fan_out,), jnp.float32)
    return params


def pad_tail_weights(params):
    """Zero-pad layer-2/3 weights to 128-multiples; bf16 weights, f32 biases."""
    # NOTE(v5e): padding the 64-wide hidden dims to 128 quadruples layer-2 MXU work;
    # acceptable on v6e/v7x (256x256 MXU underutilized regardless), watch on v5e.
    w2, b2, w3, b3 = params["w2"], params["b2"], params["w3"], params["b3"]
    h1, h2 = w2.shape
    c_out = w3.shape[1]
    h1p, h2p, cp = _round_up(h1, 128), _round_up(h2, 128), _round_up(c_out, 128)
    w2p = jnp.zeros((h1p, h2p), jnp.float32).at[:h1, :h2].set(w2).astype(jnp.bfloat16)
    b2p = jnp.zeros((1, h2p), jnp.float32).at[0, :h2].set(b2)
    w3p = jnp.zeros((h2p, cp), jnp.float32).at[:h2, :c_out].set(w3).astype(jnp.bfloat16)
    b3p = jnp.zeros((1, cp), jnp.float32).at[0, :c_out].set(b3)
    return w2p, b2p, w3p, b3p


def sa_module_forward(x, pos, batch, params, *, ratio, r, max_neighbors=64,
                      m_tile=256, k_chunk=32):
    """Pallas-backed SAModule.forward.  Returns (x_out, pos_out, batch_out)."""
    n = pos.shape[0]
    num_batches = int(batch.max()) + 1
    assert n % num_batches == 0, "demo assumes equal-sized contiguous batches"
    # TODO(synk): ragged batches would need per-batch FPS with masking.
    n_per = n // num_batches
    n_sample = int(math.ceil(ratio * n_per))

    # --- farthest point sampling (per batch) ---------------------------------
    local = jax.vmap(lambda p: farthest_point_sampling(p, n_sample))(
        pos.reshape(num_batches, n_per, 3))
    idx = (local + jnp.arange(num_batches, dtype=jnp.int32)[:, None] * n_per).reshape(-1)
    pos_c, batch_c = pos[idx], batch[idx]

    # --- radius grouping -> dense neighbor table ------------------------------
    nbr_idx, degree = radius_group(pos, batch, pos_c, batch_c, r, max_neighbors)

    # --- fold MLP layer 1 into per-point / per-centroid matmuls ---------------
    w1, b1 = params["w1"], params["b1"]
    f_in = w1.shape[0] - 3
    w1x, w1p = w1[:f_in], w1[f_in:]
    if x is None:
        h_pt = pos @ w1p + b1                      # [N, H1]
    else:
        h_pt = x @ w1x + pos @ w1p + b1            # [N, H1]
    h_ci = pos_c @ w1p                             # [M, H1]

    h1p = _round_up(h_pt.shape[1], 128)
    h_pt = jnp.pad(h_pt, ((0, 0), (0, h1p - h_pt.shape[1])))
    h_ci = jnp.pad(h_ci, ((0, 0), (0, h1p - h_ci.shape[1])))

    # Gathered per-edge slab, neighbor-major [K, M, H1p]; cast to bf16 BEFORE the
    # gather so the gather only moves/materializes half the bytes.
    h_edge = h_pt.astype(jnp.bfloat16)[nbr_idx.T]

    # --- padded / bf16 weights for the fused in-kernel layers -----------------
    w2p, b2p, w3p, b3p = pad_tail_weights(params)

    epi_dtype = _epilogue_dtype()                  # bf16 on v6e/v7x, f32 on v5e/older
    out = pointconv_max_pallas(h_edge, h_ci.astype(epi_dtype), degree,
                               w2p, b2p, w3p, b3p, m_tile=m_tile, k_chunk=k_chunk)
    c_out = params["w3"].shape[1]
    return out[:, :c_out], pos_c, batch_c


# ---------------------------------------------------------------------------
# Pure-JAX reference (same FPS / grouping) to validate the kernel math.
# ---------------------------------------------------------------------------
def sa_module_reference(x, pos, batch, params, *, ratio, r, max_neighbors=64):
    n = pos.shape[0]
    num_batches = int(batch.max()) + 1
    n_per = n // num_batches
    n_sample = int(math.ceil(ratio * n_per))
    local = jax.vmap(lambda p: farthest_point_sampling(p, n_sample))(
        pos.reshape(num_batches, n_per, 3))
    idx = (local + jnp.arange(num_batches, dtype=jnp.int32)[:, None] * n_per).reshape(-1)
    pos_c, batch_c = pos[idx], batch[idx]
    nbr_idx, degree = radius_group(pos, batch, pos_c, batch_c, r, max_neighbors)

    dpos = pos[nbr_idx] - pos_c[:, None, :]                       # [M, K, 3]
    feat = dpos if x is None else jnp.concatenate([x[nbr_idx], dpos], axis=-1)
    h = jax.nn.relu(feat @ params["w1"] + params["b1"])
    h = jax.nn.relu(h @ params["w2"] + params["b2"])
    h = jax.nn.relu(h @ params["w3"] + params["b3"])
    mask = jnp.arange(max_neighbors)[None, :] < degree[:, None]
    h = jnp.where(mask[:, :, None], h, -jnp.inf)
    return h.max(axis=1), pos_c, batch_c


if __name__ == "__main__":
    key = jax.random.PRNGKey(0)
    k_pos, k_x, k_mlp = jax.random.split(key, 3)

    num_batches, n_per_batch, feat_dim = 2, 128, 13
    ratio, r = 0.5, 0.3

    pos = jax.random.uniform(k_pos, (num_batches * n_per_batch, 3), jnp.float32)
    x = 0.5 * jax.random.normal(k_x, (num_batches * n_per_batch, feat_dim), jnp.float32)
    batch = jnp.repeat(jnp.arange(num_batches, dtype=jnp.int32), n_per_batch)

    params = init_mlp_params(k_mlp, feat_dim + 3, hidden=(64, 64), out_channels=128)

    x_out, pos_out, batch_out = sa_module_forward(x, pos, batch, params, ratio=ratio, r=r)
    jax.block_until_ready(x_out)

    x_ref, _, _ = sa_module_reference(x, pos, batch, params, ratio=ratio, r=r)
    err = float(jnp.max(jnp.abs(x_out - x_ref)))
    assert err < 0.1, f"kernel/reference mismatch: max abs err {err}"
    print("KERNEL_OK")
</pallas_src>

<mosaic_0001>
module attributes {stable_mosaic.version = 11 : i64} {
  func.func @_pointconv_kernel(%arg0: i32, %arg1: i32, %arg2: memref<2xi32, #tpu.memory_space<smem>>, %arg3: memref<32x64x128xbf16, #tpu.memory_space<vmem>>, %arg4: memref<64x128xf32, #tpu.memory_space<vmem>>, %arg5: memref<64x1xi32, #tpu.memory_space<vmem>>, %arg6: memref<128x128xbf16, #tpu.memory_space<vmem>>, %arg7: memref<1x128xf32, #tpu.memory_space<vmem>>, %arg8: memref<128x128xbf16, #tpu.memory_space<vmem>>, %arg9: memref<1x128xf32, #tpu.memory_space<vmem>>, %arg10: memref<64x128xf32, #tpu.memory_space<vmem>>) attributes {dimension_semantics = [#tpu.dimension_semantics<parallel>, #tpu.dimension_semantics<arbitrary>], iteration_bounds = array<i64: 2, 2>, scalar_prefetch = 1 : i64, scratch_operands = 0 : i64, tpu.core_type = #tpu.core_type<tc>, window_params = [{transform_indices = @transform_0, window_bounds = array<i64: 32, 64, 128>}, {transform_indices = @transform_1, window_bounds = array<i64: 64, 128>}, {transform_indices = @transform_2, window_bounds = array<i64: 64, 1>}, {pipeline_mode = #tpu.pipeline_mode<synchronous>, transform_indices = @transform_3, window_bounds = array<i64: 128, 128>}, {pipeline_mode = #tpu.pipeline_mode<synchronous>, transform_indices = @transform_4, window_bounds = array<i64: 1, 128>}, {pipeline_mode = #tpu.pipeline_mode<synchronous>, transform_indices = @transform_5, window_bounds = array<i64: 128, 128>}, {pipeline_mode = #tpu.pipeline_mode<synchronous>, transform_indices = @transform_6, window_bounds = array<i64: 1, 128>}, {transform_indices = @transform_7, window_bounds = array<i64: 64, 128>}]} {
    %c0_i32 = arith.constant 0 : i32
    %0 = arith.cmpi eq, %arg1, %c0_i32 : i32
    %1 = arith.extui %0 : i1 to i32
    %c0_i32_0 = arith.constant 0 : i32
    %2 = arith.cmpi ne, %1, %c0_i32_0 : i32
    scf.if %2 {
      %cst = arith.constant 0xFF800000 : f32
      %9 = vector.broadcast %cst : f32 to vector<64x128xf32>
      %c0 = arith.constant 0 : index
      %c0_2 = arith.constant 0 : index
      %10 = vector.load %arg10[%c0, %c0_2] : memref<64x128xf32, #tpu.memory_space<vmem>>, vector<64x128xf32>
      tpu.vector_store %arg10[%c0, %c0_2], %9 {strides = array<i32>} : memref<64x128xf32, #tpu.memory_space<vmem>>, vector<64x128xf32>,
    } else {
    }
    %c32_i32 = arith.constant 32 : i32
    %3 = arith.muli %arg1, %c32_i32 : i32
    %4 = arith.index_cast %arg0 : i32 to index
    %5 = memref.load %arg2[%4] : memref<2xi32, #tpu.memory_space<smem>>
    %6 = arith.cmpi slt, %3, %5 : i32
    %7 = arith.extui %6 : i1 to i32
    %c0_i32_1 = arith.constant 0 : i32
    %8 = arith.cmpi ne, %7, %c0_i32_1 : i32
    scf.if %8 {
      %c0 = arith.constant 0 : index
      %c0_2 = arith.constant 0 : index
      %c0_3 = arith.constant 0 : index
      %9 = vector.load %arg3[%c0, %c0_2, %c0_3] : memref<32x64x128xbf16, #tpu.memory_space<vmem>>, vector<32x64x128xbf16>
      %c0_4 = arith.constant 0 : index
      %c0_5 = arith.constant 0 : index
      %10 = vector.load %arg4[%c0_4, %c0_5] : memref<64x128xf32, #tpu.memory_space<vmem>>, vector<64x128xf32>
      %11 = arith.extf %9 : vector<32x64x128xbf16> to vector<32x64x128xf32>
      %12 = vector.shape_cast %10 : vector<64x128xf32> to vector<1x64x128xf32>
      %13 = vector.broadcast %12 : vector<1x64x128xf32> to vector<32x64x128xf32>
      %14 = arith.subf %11, %13 : vector<32x64x128xf32>
      %cst = arith.constant 0.000000e+00 : f32
      %15 = vector.broadcast %cst : f32 to vector<32x64x128xf32>
      %16 = arith.maximumf %14, %15 : vector<32x64x128xf32>
      %17 = arith.truncf %16 : vector<32x64x128xf32> to vector<32x64x128xbf16>
      %18 = vector.shape_cast %17 : vector<32x64x128xbf16> to vector<2048x128xbf16>
      %c0_6 = arith.constant 0 : index
      %c0_7 = arith.constant 0 : index
      %19 = vector.load %arg6[%c0_6, %c0_7] : memref<128x128xbf16, #tpu.memory_space<vmem>>, vector<128x128xbf16>
      %cst_8 = arith.constant dense<0.000000e+00> : vector<2048x128xf32>
      %20 = tpu.matmul %18, %19, %cst_8 {dimension_numbers = #tpu.dot_dimension_numbers<[1], [0], [0], [1], [0, 0, 1, 1], [], []>} : vector<2048x128xbf16>, vector<128x128xbf16>, vector<2048x128xf32> -> vector<2048x128xf32>
      %c0_9 = arith.constant 0 : index
      %c0_10 = arith.constant 0 : index
      %21 = vector.load %arg7[%c0_9, %c0_10] : memref<1x128xf32, #tpu.memory_space<vmem>>, vector<1x128xf32>
      %22 = vector.broadcast %21 : vector<1x128xf32> to vector<2048x128xf32>
      %23 = arith.addf %20, %22 : vector<2048x128xf32>
      %cst_11 = arith.constant 0.000000e+00 : f32
      %24 = vector.broadcast %cst_11 : f32 to vector<2048x128xf32>
      %25 = arith.maximumf %23, %24 : vector<2048x128xf32>
      %26 = arith.truncf %25 : vector<2048x128xf32> to vector<2048x128xbf16>
      %c0_12 = arith.constant 0 : index
      %c0_13 = arith.constant 0 : index
      %27 = vector.load %arg8[%c0_12, %c0_13] : memref<128x128xbf16, #tpu.memory_space<vmem>>, vector<128x128xbf16>
      %cst_14 = arith.constant dense<0.000000e+00> : vector<2048x128xf32>
      %28 = tpu.matmul %26, %27, %cst_14 {dimension_numbers = #tpu.dot_dimension_numbers<[1], [0], [0], [1], [0, 0, 1, 1], [], []>} : vector<2048x128xbf16>, vector<128x128xbf16>, vector<2048x128xf32> -> vector<2048x128xf32>
      %c0_15 = arith.constant 0 : index
      %c0_16 = arith.constant 0 : index
      %29 = vector.load %arg9[%c0_15, %c0_16] : memref<1x128xf32, #tpu.memory_space<vmem>>, vector<1x128xf32>
      %30 = vector.broadcast %29 : vector<1x128xf32> to vector<2048x128xf32>
      %31 = arith.addf %28, %30 : vector<2048x128xf32>
      %cst_17 = arith.constant 0.000000e+00 : f32
      %32 = vector.broadcast %cst_17 : f32 to vector<2048x128xf32>
      %33 = arith.maximumf %31, %32 : vector<2048x128xf32>
      %34 = vector.shape_cast %33 : vector<2048x128xf32> to vector<32x64x128xf32>
      %35 = tpu.iota {dimensions = array<i32: 0>} : vector<32x64x1xi32>
      %c32_i32_18 = arith.constant 32 : i32
      %36 = arith.muli %arg1, %c32_i32_18 : i32
      %37 = vector.broadcast %36 : i32 to vector<32x64x1xi32>
      %38 = arith.addi %35, %37 : vector<32x64x1xi32>
      %c0_19 = arith.constant 0 : index
      %c0_20 = arith.constant 0 : index
      %39 = vector.load %arg5[%c0_19, %c0_20] : memref<64x1xi32, #tpu.memory_space<vmem>>, vector<64x1xi32>
      %40 = vector.shape_cast %39 : vector<64x1xi32> to vector<1x64x1xi32>
      %41 = vector.broadcast %40 : vector<1x64x1xi32> to vector<32x64x1xi32>
      %42 = arith.cmpi slt, %38, %41 : vector<32x64x1xi32>
      %cst_21 = arith.constant 0xFF800000 : f32
      %43 = vector.shape_cast %42 : vector<32x64x1xi1> to vector<32x64x1xi1>
      %44 = vector.broadcast %43 : vector<32x64x1xi1> to vector<32x64x128xi1>
      %45 = vector.broadcast %cst_21 : f32 to vector<32x64x128xf32>
      %46 = arith.select %44, %34, %45 : vector<32x64x128xi1>, vector<32x64x128xf32>
      %c0_22 = arith.constant 0 : index
      %c0_23 = arith.constant 0 : index
      %47 = vector.load %arg10[%c0_22, %c0_23] : memref<64x128xf32, #tpu.memory_space<vmem>>, vector<64x128xf32>
      %cst_24 = arith.constant dense<0xFF800000> : vector<64x128xf32>
      %48 = vector.multi_reduction <maximumf>, %46, %cst_24 [0] : vector<32x64x128xf32> to vector<64x128xf32>
      %49 = arith.maximumf %47, %48 : vector<64x128xf32>
      %c0_25 = arith.constant 0 : index
      %c0_26 = arith.constant 0 : index
      %50 = vector.load %arg10[%c0_25, %c0_26] : memref<64x128xf32, #tpu.memory_space<vmem>>, vector<64x128xf32>
      tpu.vector_store %arg10[%c0_25, %c0_26], %49 {strides = array<i32>} : memref<64x128xf32, #tpu.memory_space<vmem>>, vector<64x128xf32>,
    } else {
    }
    return
  }
  func.func @transform_0(%arg0: i32, %arg1: i32, %arg2: memref<2xi32, #tpu.memory_space<smem>>) -> (i32, i32, i32) {
    %c0_i32 = arith.constant 0 : i32
    %c0_i32_0 = arith.constant 0 : i32
    return %arg1, %arg0, %c0_i32 : i32, i32, i32
  }
  func.func @transform_1(%arg0: i32, %arg1: i32, %arg2: memref<2xi32, #tpu.memory_space<smem>>) -> (i32, i32) {
    %c0_i32 = arith.constant 0 : i32
    %c0_i32_0 = arith.constant 0 : i32
    return %arg0, %c0_i32 : i32, i32
  }
  func.func @transform_2(%arg0: i32, %arg1: i32, %arg2: memref<2xi32, #tpu.memory_space<smem>>) -> (i32, i32) {
    %c0_i32 = arith.constant 0 : i32
    %c0_i32_0 = arith.constant 0 : i32
    return %arg0, %c0_i32 : i32, i32
  }
  func.func @transform_3(%arg0: i32, %arg1: i32, %arg2: memref<2xi32, #tpu.memory_space<smem>>) -> (i32, i32) {
    %c0_i32 = arith.constant 0 : i32
    %c0_i32_0 = arith.constant 0 : i32
    %c0_i32_1 = arith.constant 0 : i32
    return %c0_i32, %c0_i32_0 : i32, i32
  }
  func.func @transform_4(%arg0: i32, %arg1: i32, %arg2: memref<2xi32, #tpu.memory_space<smem>>) -> (i32, i32) {
    %c0_i32 = arith.constant 0 : i32
    %c0_i32_0 = arith.constant 0 : i32
    %c0_i32_1 = arith.constant 0 : i32
    return %c0_i32, %c0_i32_0 : i32, i32
  }
  func.func @transform_5(%arg0: i32, %arg1: i32, %arg2: memref<2xi32, #tpu.memory_space<smem>>) -> (i32, i32) {
    %c0_i32 = arith.constant 0 : i32
    %c0_i32_0 = arith.constant 0 : i32
    %c0_i32_1 = arith.constant 0 : i32
    return %c0_i32, %c0_i32_0 : i32, i32
  }
  func.func @transform_6(%arg0: i32, %arg1: i32, %arg2: memref<2xi32, #tpu.memory_space<smem>>) -> (i32, i32) {
    %c0_i32 = arith.constant 0 : i32
    %c0_i32_0 = arith.constant 0 : i32
    %c0_i32_1 = arith.constant 0 : i32
    return %c0_i32, %c0_i32_0 : i32, i32
  }
  func.func @transform_7(%arg0: i32, %arg1: i32, %arg2: memref<2xi32, #tpu.memory_space<smem>>) -> (i32, i32) {
    %c0_i32 = arith.constant 0 : i32
    %c0_i32_0 = arith.constant 0 : i32
    return %arg0, %c0_i32 : i32, i32
  }
}

</mosaic_0001>

<bundles_post_ra>
// kernel: tpu_custom_call.1
= control target key start
LH: loop header
LB: loop body
LE: loop exit
PB: predicated region body
PF: predicated region fallthrough
CT: control target
= control target key end

     0   :  { %s14546_s0 = inlined_call_operand.hbm [shape: s32[2], index: 0, kind: input, shape index: {}]   ;;  %s14547_s1 = inlined_call_operand.hbm [shape: bf16[64,128,128], index: 1, kind: input, shape index: {}]   ;;  %s14548_s2 = inlined_call_operand.hbm [shape: f32[128,128], index: 2, kind: input, shape index: {}]   ;;  %s14549_s3 = inlined_call_operand.vmem [shape: s32[128,1], index: 3, kind: input, shape index: {}]   ;;  %s14550_s4 = inlined_call_operand.hbm [shape: bf16[128,128], index: 4, kind: input, shape index: {}]   ;;  %s14551_s5 = inlined_call_operand.hbm [shape: f32[1,128], index: 5, kind: input, shape index: {}]   ;;  %s14552_s6 = inlined_call_operand.hbm [shape: bf16[128,128], index: 6, kind: input, shape index: {}]   ;;  %s14553_s7 = inlined_call_operand.hbm [shape: f32[1,128], index: 7, kind: input, shape index: {}]   ;;  %s14554_s8 = inlined_call_operand.hbm [shape: f32[128,128], index: 8, kind: output, shape index: {}]  }
   0x1   :  { %14675 = sst [smem:[#allocation193_spill]] %s14549_s3  ;;  %s8583_s29 = scalar_lea.hbm %s14546_s0, 16 }
   0x2   :  { %14676 = sst [smem:[#allocation194_spill]] %s14551_s5  ;;  %p8584_p0 = scmp.ne.s32.totalorder %s14546_s0, %s8583_s29 }
   0x3   :  { %14677 = sst [smem:[#allocation195_spill]] %s14554_s8  ;;  %p8587_p1 = scmp.lt.u32.totalorder %s8583_s29, %s14546_s0 }
   0x5   :  { %p8589_p2 = pnand %p8587_p1, %p8584_p0 }
   0x7   :  { %8592 = shalt.err (!%p8589_p2)  }
   0x8   :  { %s8875_s12 = smov [#allocation3]  }
   0x9   :  { %14 = dma.hbm_to_smem %s14546_s0, 16, %s8875_s12, [#allocation2] }
   0xa   :  { %8805 = dma.done.wait [#allocation2], 16 }
   0xb   :  { %8806 = vsyncadd [#allocation2], 4294967280 }
   0xc   :  { %16 = sfence }
   0xd   :  { %17 = vsyncpa [#allocation5], 0 }
   0xe   :  { %19 = vsyncpa [#allocation5 + $0x1], 0 }
   0xf   :  { %20 = vsyncpa [#allocation8], 0 }
  0x10   :  { %22 = vsyncpa [#allocation8 + $0x1], 0 }
  0x11   :  { %23 = vsyncpa [#allocation11], 0 }
  0x12   :  { %24 = vsyncpa [#allocation14], 0 }
  0x13   :  { %25 = vsyncpa [#allocation6], 0 }
  0x14   :  { %27 = vsyncpa [#allocation6 + $0x1], 0  ;;  %s8953_s15 = smov 0   ;;  %s8955_s16 = smov 0  }
  0x15   :  { %s8957_s17 = smov 0   ;;  %s8959_s18 = smov 0  }
  0x16   :  { %s8961_s0 = smov 0   ;;  %s8963_s19 = smov 0  }
  0x17   :  { %s8965_s20 = smov 0   ;;  %s8967_s21 = smov 0  }
  0x18   :  { %s8969_s22 = smov 0   ;;  %s8971_s23 = smov 0  }
  0x19   :  { %s8973_s24 = smov 0  }
  0x1a LB: > { %14678 = sst [smem:[#allocation26_spill]] %s8833_s15  ;;  %s9007_s25 = sadd.s32 4294967295, %s8873_s24   ;;  %s8873_s24 = sphi %s8973_s24, %s33_s24   ;;  %s8869_s23 = sphi %s8971_s23, %s15154_s23   ;;  %s8865_s22 = sphi %s8969_s22, %s15153_s22   ;;  %s8861_s21 = sphi %s8967_s21, %s15152_s21   ;;  %s8857_s20 = sphi %s8965_s20, %s15151_s20   ;;  %s8853_s19 = sphi %s8963_s19, %s15150_s19   ;;  %s8849_s0 = sphi %s8961_s0, %s15149_s0   ;;  %s8845_s18 = sphi %s8959_s18, %s15148_s18   ;;  %s8841_s17 = sphi %s8957_s17, %s15147_s17   ;;  %s8837_s16 = sphi %s8955_s16, %s15146_s16   ;;  %s8833_s15 = sphi %s8953_s15, %s15141_s15  }
  0x1b   : > { %14679 = sst [smem:[#allocation27_spill]] %s8837_s16  ;;  %s6818_s26 = sadd.s32 4294967294, %s8873_s24  }
  0x1c   : > { %14680 = sst [smem:[#allocation28_spill]] %s8857_s20  ;;  %s42_s27 = sadd.s32 1, %s8865_s22 }
  0x1d   : > { %14681 = sst [smem:[#allocation29_spill]] %s8861_s21  ;;  %s45_s28 = sadd.s32 1, %s8869_s23 }
  0x1e   : > { %14682 = sst [smem:[#allocation30_spill]] %s9007_s25  ;;  %p43_p3 = scmp.ge.s32.totalorder %s42_s27, 2 }
  0x1f   : > { %s54_s29 = sadd.s32 1, %s8853_s19  ;;  %p61_p4 = scmp.ne.s32.totalorder %s8853_s19, %s8849_s0 }
  0x20   : > { %p62_p5 = scmp.eq.s32.totalorder %s8873_s24, 0  ;;  %s15156_s27 = smov (%p43_p3, %s42_s27), 0 }
  0x21   : > { %14683 = sst [smem:[#allocation31_spill]] %s15156_s27  ;;  %s15158_s28 = smov (!%p43_p3, %s45_s28), %s8869_s23 }
  0x22   : > { %s49_s30 = ssub.s32 %s8865_s22, %s15156_s27  ;;  %p9023_p6 = por %p62_p5, %p61_p4 }
  0x23   : > { %p47_p7 = scmp.ge.s32.totalorder %s15158_s28, 2  ;;  %p67_p8 = scmp.ne.s32.totalorder %s8849_s0, %s8845_s18 }
  0x24   : > { %s14684_s9 = scalar_select %p9023_p6, 1, 0 }
  0x25   : > { %p14557_p9 = scmp.eq.s32.totalorder %s9007_s25, 0  ;;  %s80_s10 = sadd.s32 1, %s8841_s17 }
  0x26   : > { %s15160_s28 = smov (%p47_p7, %s15158_s28), 0  ;;  %p87_p11 = scmp.ne.s32.totalorder %s8841_s17, %s8837_s16 }
  0x27   : > { %14685 = sst [smem:[#allocation32_spill]] %s15160_s28  ;;  %p9034_p10 = por %p14557_p9, %p67_p8 }
  0x28   : > { %s50_s12 = ssub.s32 %s8869_s23, %s15160_s28  ;;  %p93_p12 = scmp.ne.s32.totalorder %s8837_s16, %s8833_s15 }
  0x29   : > { %s14686_s11 = scalar_select %p9034_p10, 1, 0 }
  0x2a   : > { %s51_s13 = sor.u32 %s50_s12, %s49_s30  ;;  %p78_p13 = scmp.eq.s32.totalorder %s50_s12, 0 }
  0x2b   : > { %p52_p0 = scmp.eq.s32.totalorder %s51_s13, 0  ;;  %p9049_p1 = por %p87_p11, %p62_p5 }
  0x2c   : > { %s9054_s18 = scalar_select %p78_p13, %s8841_s17, %s80_s10  }
  0x2d   : > { %s14687_s14 = scalar_select %p9049_p1, 1, 0 }
  0x2e   : > { %14688 = sst [smem:[#allocation33_spill]] %s9054_s18  ;;  %p9064_p2 = por %p93_p12, %p14557_p9 }
  0x2f   : > { %s9057_s27 = scalar_select %p52_p0, %s8853_s19, %s54_s29  }
  0x30   : > { %s14690_s8 = scalar_select %p9064_p2, 1, 0 }
  0x31   : > { %14689 = sst [smem:[#allocation34_spill]] %s9057_s27  ;;  %p227_p3 = scmp.eq.s32.totalorder %s9007_s25, 3 }
  0x32   : > { %14691 = sst [smem:[#allocation35_spill]] %s14690_s8  ;;  %p233_p4 = scmp.eq.s32.totalorder %s6818_s26, 3 }
  0x33   : > { %p6819_p7 = scmp.ge.s32.totalorder %s8873_s24, 1  ;;  %p9073_p8 = por %p227_p3, %p87_p11 }
  0x34   : > { %p240_p5 = scmp.lt.s32.totalorder %s8873_s24, 5  ;;  %p9081_p13 = por %p233_p4, %p93_p12 }
  0x35   : > { %s14692_s30 = scalar_select %p9073_p8, 1, 0 }
  0x36   : > { %s14694_s10 = scalar_select %p9081_p13, 1, 0 }
  0x37   : > { %14693 = sst [smem:[#allocation36_spill]] %s14692_s30  ;;  %p9085_p0 = pnand %p6819_p7, %p240_p5 }
  0x38   : > { %14695 = sst [smem:[#allocation37_spill]] %s14694_s10  ;;  %s8876_s12 = smov [#allocation10]  }
  0x39   : > { %s14696_s29 = scalar_select %p9085_p0, 1, 0 }
  0x3a   : > { %s266_s13 = sshll.u32 %s8876_s12, 4  ;;  %p8358_p9 = pneg %p9085_p0  ;;  %s267_s13 = int_to_ptr.vmem [resolvable:$true] %s266_s13 }
  0x3b   : > { %p14697_p11 = scmp.eq.s32.totalorder %s9007_s25, 0  ;;  %s8877_s28 = smov [#allocation9]  }
  0x3c   : > { %s252_s27 = sshll.u32 %s8877_s28, 4  ;;  %s14699_s5 = sld [smem:[#allocation194_spill]]  ;;  %s253_s27 = int_to_ptr.vmem [resolvable:$true] %s252_s27 }
  0x3d   : > { %p9093_p3 = pnand %p8358_p9, %p14697_p11 }
  0x3f   : > { %p9105_p4 = pneg %p9093_p3 }
  0x42   : > { %s8593_s15 = scalar_lea.hbm %s14699_s5, 16 }
  0x43   : > { %p8594_p12 = scmp.ne.s32.totalorder %s14699_s5, %s8593_s15  ;;  %p8600_p5 = scmp.lt.u32.totalorder %s8593_s15, %s14699_s5 }
  0x45   : > { %p8596_p9 = pnand %p9105_p4, %p8594_p12 }
  0x47   : > { %p8597_p7 = pneg %p8596_p9 }
  0x49   : > { %p8602_p11 = pnand %p8600_p5, %p8597_p7 }
  0x4b   : > { %8605 = shalt.err (!%p8602_p11)
}
  0x4c   : > { %s8606_s28 = scalar_lea.vmem %s267_s13, 16  ;;  %s8613_s20 = scalar_lea.vmem %s267_s13, 32 }
  0x4d   : > { %p8607_p13 = scmp.ne.s32.totalorder %s267_s13, %s8606_s28  ;;  %p8614_p10 = scmp.lt.s32.totalorder %s267_s13, %s267_s13 }
  0x4e   : > { %p8615_p0 = scmp.lt.s32.totalorder %s8613_s20, %s8606_s28 }
  0x4f   : > { %p8609_p8 = pnand %p8607_p13, %p9105_p4 }
  0x50   : > { %p8616_p1 = por %p8615_p0, %p8614_p10 }
  0x51   : > { %p8610_p2 = pneg %p8609_p8 }
  0x53   : > { %p8617_p6 = pnand %p8616_p1, %p8610_p2 }
  0x55   : > { %8620 = shalt.err (!%p8617_p6)
}
  0x56   : > { %8364 = dma.hbm_to_vmem [thread:$0]  (!%p9093_p3), %s14699_s5, 16, %s267_s13, [#allocation11]  }
  0x57   : > { %s8621_s21 = scalar_lea.hbm %s14550_s4, 1024 }
  0x58   : > { %p8622_p8 = scmp.ne.s32.totalorder %s14550_s4, %s8621_s21  ;;  %p8628_p6 = scmp.lt.u32.totalorder %s8621_s21, %s14550_s4 }
  0x5a   : > { %p8624_p10 = pnand %p8622_p8, %p9105_p4 }
  0x5c   : > { %p8625_p1 = pneg %p8624_p10 }
  0x5e   : > { %p8630_p2 = pnand %p8628_p6, %p8625_p1 }
  0x60   : > { %8633 = shalt.err (!%p8630_p2)
}
  0x61   : > { %s8634_s18 = scalar_lea.vmem %s253_s27, 1024  ;;  %p8642_p9 = scmp.lt.s32.totalorder %s253_s27, %s253_s27 }
  0x62   : > { %p8635_p13 = scmp.ne.s32.totalorder %s253_s27, %s8634_s18  ;;  %p8643_p7 = scmp.lt.s32.totalorder %s8634_s18, %s8634_s18 }
  0x64   : > { %p8637_p0 = pnand %p8635_p13, %p9105_p4  ;;  %p8644_p5 = por %p8643_p7, %p8642_p9 }
  0x66   : > { %p8638_p12 = pneg %p8637_p0 }
  0x68   : > { %p8645_p11 = pnand %p8644_p5, %p8638_p12 }
  0x6a   : > { %8648 = shalt.err (!%p8645_p11)
}
  0x6b   : > { %s8878_s8 = smov 64   ;;  %s8879_s13 = smov 4  }
  0x6c   : > { %8361 = dma.hbm_to_vmem [thread:$0]  (!%p9093_p3), %s14550_s4, 1024, %s253_s27, [#allocation8], %s8878_s8, %s8878_s8, %s8879_s13  }
  0x6d   : > { %s8880_s15 = smov [#allocation12]   ;;  %s8881_s10 = smov [#allocation13]  }
  0x6e   : > { %s276_s21 = sshll.u32 %s8880_s15, 4  ;;  %s290_s28 = sshll.u32 %s8881_s10, 4  ;;  %s277_s21 = int_to_ptr.vmem [resolvable:$true] %s276_s21  ;;  %s9139_s28 = int_to_ptr.vmem [resolvable:$true] %s290_s28 }
  0x6f   : > { %s8649_s5 = scalar_lea.hbm %s14552_s6, 1024 }
  0x70   : > { %p8650_p8 = scmp.ne.s32.totalorder %s14552_s6, %s8649_s5  ;;  %p8656_p6 = scmp.lt.u32.totalorder %s8649_s5, %s14552_s6 }
  0x72   : > { %p8652_p10 = pnand %p8650_p8, %p9105_p4 }
  0x74   : > { %p8653_p1 = pneg %p8652_p10 }
  0x76   : > { %p8658_p2 = pnand %p8656_p6, %p8653_p1 }
  0x78   : > { %8661 = shalt.err (!%p8658_p2)
}
  0x79   : > { %s8662_s3 = scalar_lea.vmem %s277_s21, 1024  ;;  %p8670_p9 = scmp.lt.s32.totalorder %s277_s21, %s277_s21 }
  0x7a   : > { %p8663_p13 = scmp.ne.s32.totalorder %s277_s21, %s8662_s3  ;;  %p8671_p7 = scmp.lt.s32.totalorder %s8662_s3, %s8662_s3 }
  0x7c   : > { %p8665_p0 = pnand %p8663_p13, %p9105_p4  ;;  %p8672_p5 = por %p8671_p7, %p8670_p9 }
  0x7e   : > { %p8666_p12 = pneg %p8665_p0 }
  0x80   : > { %p8673_p11 = pnand %p8672_p5, %p8666_p12 }
  0x82   : > { %8676 = shalt.err (!%p8673_p11)
}
  0x83   : > { %8367 = dma.hbm_to_vmem [thread:$0]  (!%p9093_p3), %s14552_s6, 1024, %s277_s21, [#allocation11], %s8878_s8, %s8878_s8, %s8879_s13  }
  0x84   : > { %s8677_s10 = scalar_lea.hbm %s14553_s7, 16 }
  0x85   : > { %p8678_p8 = scmp.ne.s32.totalorder %s14553_s7, %s8677_s10  ;;  %p8684_p6 = scmp.lt.u32.totalorder %s8677_s10, %s14553_s7 }
  0x87   : > { %p8680_p10 = pnand %p8678_p8, %p9105_p4 }
  0x89   : > { %p8681_p1 = pneg %p8680_p10 }
  0x8b   : > { %p8686_p2 = pnand %p8684_p6, %p8681_p1 }
  0x8d   : > { %8689 = shalt.err (!%p8686_p2)
}
  0x8e   : > { %s8690_s8 = scalar_lea.vmem %s9139_s28, 16  ;;  %s8697_s13 = scalar_lea.vmem %s9139_s28, 32 }
  0x8f   : > { %p8691_p13 = scmp.ne.s32.totalorder %s9139_s28, %s8690_s8  ;;  %p8698_p9 = scmp.lt.s32.totalorder %s9139_s28, %s9139_s28 }
  0x90   : > { %p8699_p7 = scmp.lt.s32.totalorder %s8697_s13, %s8690_s8 }
  0x91   : > { %p8693_p0 = pnand %p8691_p13, %p9105_p4 }
  0x92   : > { %p8700_p5 = por %p8699_p7, %p8698_p9 }
  0x93   : > { %p8694_p12 = pneg %p8693_p0 }
  0x95   : > { %p8701_p11 = pnand %p8700_p5, %p8694_p12 }
  0x97   : > { %8704 = shalt.err (!%p8701_p11)
}
  0x98   : > { %8370 = dma.hbm_to_vmem [thread:$0]  (!%p9093_p3), %s14553_s7, 16, %s9139_s28, [#allocation14]  }
  0x99   : > { %p6824_p8 = scmp.ge.s32.totalorder %s8873_s24, 4 }
  0x9b   : > { %297 = sbr.rel (%p6824_p8) target bundleno = 204 (0xcc), region = 32 }
  0xa2   : > { %s301_s12 = sand.u32 1, %s8853_s19   ;;  %s6827_s16 = sshll.u32 %s8869_s23, 3 }
  0xa3   : > { %s6825_s25 = sshll.u32 %s301_s12, 10  ;;  %s6871_s26 = sshll.u32 %s8865_s22, 9 }
  0xa4   : > { %s312_s5 = sadd.s32 %s6871_s26, %s6827_s16  ;;  %s305_s15 = scalar_lea.vmem [#allocation4], %s6825_s25 }
  0xa5   : > { %s327_s10 = sshll.u32 %s305_s15, 4  ;;  %s6829_s28 = sshll.u32 %s312_s5, 6  ;;  %s328_s10 = int_to_ptr.vmem [resolvable:$true] %s327_s10 }
  0xa6   : > { %p14701_p3 = scmp.ne.s32.totalorder %s14684_s9, 0  ;;  %s8882_s18 = smov 1024  }
  0xa7   : > { %s8883_s27 = smov 512   ;;  %s8884_s8 = smov 8  }
  0xa8   : > { %s8337_s20 = scalar_select %p14701_p3, [#allocation0], [#allocation18] }
  0xa9   : > { %8338 = sst [smem:[#allocation17]] (%p14701_p3), %s8882_s18  ;;  %s8885_s13 = smov 64  }
  0xaa   : > { %s319_s30 = sld [smem:[%s8337_s20]]   ;;  %s314_s16 = scalar_lea.hbm %s14547_s1, %s6829_s28 }
  0xab   : > { %8339 = sst [smem:[#allocation17 + $0x1]] (%p14701_p3), %s8883_s27  ;;  %s8886_s25 = smov 4  }
  0xac   : > { %8340 = sst [smem:[#allocation17 + $0x2]] (%p14701_p3), %s8884_s8  ;;  %s302_s15 = scalar_lea.sflag [#allocation5], %s301_s12 }
  0xad   : > { %8341 = sst [smem:[#allocation17 + $0x3]] (%p14701_p3), %s8885_s13  ;;  %s8887_s20 = smov [#allocation16]  }
  0xae   : > { %8342 = sst [smem:[#allocation17 + $0x4]] (%p14701_p3), %s8885_s13  ;;  %s350_s18 = sand.u32 1, %s8873_s24  }
  0xaf   : > { %8343 = sst [smem:[#allocation17 + $0x5]] (%p14701_p3), %s8886_s25  ;;  %s352_s27 = sand.u32 1, %s8841_s17  }
  0xb0   : > { %s6830_s26 = sshll.u32 %s319_s30, 26  ;;  %s6832_s8 = sshll.u32 %s352_s27, 6 }
  0xb1   : > { %s6831_s5 = sadd.s32 134217728, %s6830_s26  ;;  %s6872_s21 = sshll.u32 %s8869_s23, 10 }
  0xb2   : > { %8344 = dma.general (%p14701_p3), %s314_s16, 16384, %s328_s10, %s302_s15, %s8887_s20, [#allocation17], %s6831_s5, 0  }
  0xb3   : > { %s9212_s13 = scalar_lea.hbm %s14548_s2, %s6872_s21  ;;  %s354_s12 = scalar_lea.vmem [#allocation7], %s6832_s8 }
  0xb4   : > { %s361_s9 = sshll.u32 %s354_s12, 4  ;;  %s9216_s10 = scalar_lea.sflag [#allocation8], %s350_s18  ;;  %s9214_s9 = int_to_ptr.vmem [resolvable:$true] %s361_s9 }
  0xb5   : > { %s8705_s30 = scalar_lea.hbm %s9212_s13, 1024  ;;  %p14702_p10 = scmp.ne.s32.totalorder %s14687_s14, 0 }
  0xb6   : > { %p8706_p4 = scmp.ne.s32.totalorder %s9212_s13, %s8705_s30  ;;  %s8709_s26 = scalar_lea.hbm %s14548_s2, 2048 }
  0xb7   : > { %p8710_p2 = scmp.lt.u32.totalorder %s9212_s13, %s14548_s2  ;;  %p8711_p13 = scmp.lt.u32.totalorder %s8709_s26, %s8705_s30 }
  0xb8   : > { %p8707_p1 = pnand %p8706_p4, %p14702_p10  ;;  %p8713_p12 = scmp.lt.u32.totalorder %s8705_s30, %s9212_s13 }
  0xb9   : > { %p8712_p0 = por %p8711_p13, %p8710_p2 }
  0xba   : > { %p8708_p6 = pneg %p8707_p1 }
  0xbb   : > { %p8714_p9 = por %p8713_p12, %p8712_p0 }
  0xbd   : > { %p8715_p7 = pnand %p8714_p9, %p8708_p6 }
  0xbf   : > { %8718 = shalt.err (!%p8715_p7)
}
  0xc0   : > { %s8719_s20 = scalar_lea.vmem %s9214_s9, 1024  ;;  %s8888_s18 = smov [#allocation7]  }
  0xc1   : > { %p8720_p5 = scmp.ne.s32.totalorder %s9214_s9, %s8719_s20  ;;  %s8723_s27 = sshll.u32 %s8888_s18, 4  ;;  %s8724_s27 = int_to_ptr.vmem [resolvable:$false] %s8723_s27 }
  0xc2   : > { %s8725_s8 = scalar_lea.vmem %s8724_s27, 2048  ;;  %p8726_p3 = scmp.lt.s32.totalorder %s9214_s9, %s8724_s27 }
  0xc3   : > { %p8721_p11 = pnand %p8720_p5, %p14702_p10  ;;  %p8727_p4 = scmp.lt.s32.totalorder %s8725_s8, %s8719_s20 }
  0xc5   : > { %p8722_p8 = pneg %p8721_p11  ;;  %p8728_p1 = por %p8727_p4, %p8726_p3 }
  0xc7   : > { %p8729_p2 = pnand %p8728_p1, %p8722_p8 }
  0xc9   : > { %8732 = shalt.err (!%p8729_p2)
}
  0xca   : > { %s8889_s21 = smov 128   ;;  %s8890_s28 = smov 8  }
  0xcb   : > { %8345 = dma.hbm_to_vmem [thread:$0]  (%p14702_p10), %s9212_s13, 1024, %s9214_s9, %s9216_s10, %s8889_s21, %s8889_s21, %s8890_s28  }
  0xcc PF: > { %p14703_p6 = scmp.ne.s32.totalorder %s14696_s29, 0 }
  0xcd   : > { %s384_s3 = sand.u32 (!%p14703_p6), 1, %s8849_s0   ;;  %p14704_p13 = scmp.ne.s32.totalorder (!%p14703_p6), %s14686_s11, 0 }
  0xce   : > { %382 = sbr.rel (%p14703_p6) target bundleno = 1296 (0x510), region = 48  ;;  %s6836_s12 = sshll.u32 (!%p14703_p6), %s384_s3, 10 }
  0xcf   : > { %s385_s30 = scalar_lea.sflag (!%p14703_p6), [#allocation5], %s384_s3  ;;  %s9243_s16 = scalar_lea.vmem (!%p14703_p6), [#allocation4], %s6836_s12 }
  0xd5   : > { %8808 = dma.done.wait (%p14704_p13), %s385_s30, 16384  }
  0xd6   : > { %8810 = vsyncadd (%p14704_p13), %s385_s30, 4294950912  ;;  %s14705_s25 = sld [smem:[#allocation30_spill]]  ;;  %s14707_s14 = sld [smem:[#allocation35_spill]] }
  0xd7   : > { %s14706_s26 = sld [smem:[#allocation27_spill]] }
  0xdc   : > { %s393_s13 = sand.u32 1, %s14705_s25   ;;  %p14708_p10 = scmp.ne.s32.totalorder %s14707_s14, 0 }
  0xdd   : > { %s395_s9 = sand.u32 1, %s14706_s26   ;;  %s394_s10 = scalar_lea.sflag [#allocation8], %s393_s13 }
  0xde   : > { %s6837_s29 = sshll.u32 %s395_s9, 6 }
  0xdf   : > { %s9253_s5 = scalar_lea.vmem [#allocation7], %s6837_s29 }
  0xe0   : > { %8812 = dma.done.wait (%p14708_p10), %s394_s10, 1024  }
  0xe1   : > { %8814 = vsyncadd (%p14708_p10), %s394_s10, 4294966272  ;;  %p14709_p0 = scmp.eq.s32.totalorder %s14705_s25, 0 }
  0xe3   : > { %8816 = dma.done.wait (%p14709_p0), [#allocation8], 1024   ;;  %p14710_p12 = pmov %p14709_p0 }
  0xe4   : > { %p14711_p9 = pmov %p14709_p0 }
  0xe5   : > { %8818 = vsyncadd (%p14710_p12), [#allocation8], 4294966272 }
  0xe6   : > { %8820 = dma.done.wait (%p14711_p9), [#allocation11], 1040   ;;  %p14712_p7 = pmov %p14709_p0 }
  0xe7   : > { %p14713_p5 = pmov %p14709_p0 }
  0xe8   : > { %8822 = vsyncadd (%p14712_p7), [#allocation11], 4294966256 }
  0xe9   : > { %8824 = dma.done.wait (%p14713_p5), [#allocation14], 16   ;;  %p14714_p11 = pmov %p14709_p0 }
  0xea   : > { %s14715_s11 = sld [smem:[#allocation29_spill]]  ;;  %s14716_s8 = sld [smem:[#allocation193_spill]] }
  0xeb   : > { %8826 = vsyncadd (%p14714_p11), [#allocation14], 4294967280  ;;  %s9277_s28 = scalar_lea.vmem [#allocation15], %s6837_s29  ;;  %s14717_s3 = sld [smem:[#allocation28_spill]] }
  0xf0   : > { %s6843_s15 = sshll.u32 %s14715_s11, 3 }
  0xf1   : > { %p458_p8 = scmp.lt.s32.totalorder %s6843_s15, 15  ;;  %p6845_p3 = scmp.ne.s32.totalorder %s14717_s3, 0 }
  0xf2   : > { %v8891_v0 = vmov (!%p6845_p3), -inf  }
  0xf3   : > { %s15162_s15 = smov (!%p458_p8, %s6843_s15), 15  ;;  %468 = sbr.rel (%p6845_p3) target bundleno = 250 (0xfa), region = 76 }
  0xf4   : > { %s6844_s20 = sshll.u32 %s15162_s15, 3  ;;  %469 = vst [vmem:[%s9277_s28] sm:$0xff] (!%p6845_p3), %v8891_v0  ;;  %470 = vst [vmem:[%s9277_s28 + $0x8] sm:$0xff] (!%p6845_p3), %v8891_v0 }
  0xf5   : > { %s9275_s21 = scalar_lea.vmem %s14716_s8, %s6844_s20  ;;  %471 = vst [vmem:[%s9277_s28 + $0x10] sm:$0xff] (!%p6845_p3), %v8891_v0  ;;  %472 = vst [vmem:[%s9277_s28 + $0x18] sm:$0xff] (!%p6845_p3), %v8891_v0 }
  0xf6   : > { %473 = vst [vmem:[%s9277_s28 + $0x20] sm:$0xff] (!%p6845_p3), %v8891_v0  ;;  %474 = vst [vmem:[%s9277_s28 + $0x28] sm:$0xff] (!%p6845_p3), %v8891_v0 }
  0xf7   : > { %475 = vst [vmem:[%s9277_s28 + $0x30] sm:$0xff] (!%p6845_p3), %v8891_v0  ;;  %476 = vst [vmem:[%s9277_s28 + $0x38] sm:$0xff] (!%p6845_p3), %v8891_v0 }
  0xfa PF: > { %s14718_s12 = sld [smem:[#allocation28_spill]]  ;;  %s14719_s30 = sld [smem:[#allocation29_spill]] }
 0x100   : > { %s6846_s25 = sshll.u32 %s14718_s12, 5  ;;  %s478_s26 = sld [smem:[#allocation3 + %s14719_s30]] }
 0x106   : > { %p6847_p4 = scmp.ge.s32.totalorder %s6846_s25, %s478_s26 }
 0x108   : > { %482 = sbr.rel (%p6847_p4) target bundleno = 1268 (0x4f4), region = 80 }
 0x10f   : > { %v9290_v1 = vstv %s6846_s25  ;;  %v9293_v2 = vld [vmem:[%s9275_s21 + $0x10] sm:$0xff]  ;;  %v9296_v3 = vld [vmem:[%s9275_s21] sm:$0xff]  ;;  %v14578_v4 = vmov 0   ;;  %v9305_v6 = vld [vmem:[%s9275_s21 + $0x18] sm:$0xff] }
 0x110   : > { %8492 = vset.pattern.permute.xlu1 %v14578_v4  ;;  %8491 = vset.pattern.permute.xlu0 %v14578_v4  ;;  %vm4581_vm0 = vcmp.lt.s32.totalorder %v9290_v1, %v9293_v2  ;;  %vm4579_vm1 = vcmp.lt.s32.totalorder %v9290_v1, %v9296_v3  ;;  %v8493_v5 = vld [vmem:[#allocation9] sm:$0xff]   ;;  %vm4582_vm2 = vcmp.lt.s32.totalorder %v9290_v1, %v9305_v6  ;;  %v9312_v9 = vld [vmem:[%s9275_s21 + $0x8] sm:$0xff]  ;;  %v8495_v15 = vld [vmem:[#allocation9 + $0x10] sm:$0xff]   ;;  %v9341_v20 = vadd.s32 1, %v9290_v1 }
 0x111   : > { %v4837_v7 = vsel %vm4581_vm0, 1, %v14578_v4  ;;  %v4835_v8 = vsel %vm4579_vm1, 1, %v14578_v4  ;;  %v8494_v10 = vld [vmem:[#allocation9 + $0x8] sm:$0xff]   ;;  %vm4580_vm3 = vcmp.lt.s32.totalorder %v9290_v1, %v9312_v9  ;;  %v9320_v12 = vld [vmem:[%s9275_s21 + $0x20] sm:$0xff]  ;;  %7785 = vmatprep.subr.bf16.mxu0 %v8493_v5  ;;  %v4838_v13 = vsel %vm4582_vm2, 1, %v14578_v4  ;;  %v9329_v16 = vld [vmem:[%s9275_s21 + $0x38] sm:$0xff] }
 0x112   : > { %5098 = vperm.xlu1 %8492, %v4837_v7   ;;  %5092 = vperm.xlu0 %8491, %v4835_v8   ;;  %v9317_v11 = vld [vmem:[%s9275_s21 + $0x28] sm:$0xff]  ;;  %v4836_v14 = vsel %vm4580_vm3, 1, %v14578_v4  ;;  %vm4583_vm5 = vcmp.lt.s32.totalorder %v9290_v1, %v9320_v12  ;;  %v9332_v17 = vld [vmem:[%s9275_s21 + $0x30] sm:$0xff]  ;;  %vm4586_vm6 = vcmp.lt.s32.totalorder %v9290_v1, %v9329_v16  ;;  %v8496_v21 = vld [vmem:[#allocation9 + $0x18] sm:$0xff]   ;;  %vm4588_vm8 = vcmp.lt.s32.totalorder %v9341_v20, %v9312_v9 }
 0x113   : > { %7786 = vmatpush3.bf16.msra.mxu0 %v8493_v5  ;;  %vm4584_vm4 = vcmp.lt.s32.totalorder %v9290_v1, %v9317_v11  ;;  %v4839_v19 = vsel %vm4583_vm5, 1, %v14578_v4  ;;  %vm4585_vm7 = vcmp.lt.s32.totalorder %v9290_v1, %v9332_v17  ;;  %v6875_v22 = vld [vmem:[%s9243_s16] sm:$0xff]   ;;  %v4842_v23 = vsel %vm4586_vm6, 1, %v14578_v4  ;;  %v9350_v28 = vld [vmem:[%s9253_s5 + $0x8] sm:$0xff]  ;;  %v7387_v39 = vld [vmem:[%s9243_s16 + $0x10] sm:$0xff]  }
 0x114   : > { %7787 = vmatprep.subr.bf16.mxu0 %v8494_v10  ;;  %v4840_v18 = vsel %vm4584_vm4, 1, %v14578_v4  ;;  %v4841_v24 = vsel %vm4585_vm7, 1, %v14578_v4  ;;  %v6876_v25 = vunpack.c.l.bf16 %v6875_v22  ;;  %v6877_v26 = vunpack.c.h.bf16 %v6875_v22  ;;  %v9347_v27 = vld [vmem:[%s9253_s5] sm:$0xff]  ;;  %v7386_v36 = vld [vmem:[%s9243_s16 + $0x8] sm:$0xff]   ;;  %v9373_v44 = vld [vmem:[%s9253_s5 + $0x10] sm:$0xff] }
 0x115   : > { %vm4587_vm9 = vcmp.lt.s32.totalorder %v9341_v20, %v9296_v3  ;;  %v8497_v29 = vld [vmem:[#allocation9 + $0x20] sm:$0xff]   ;;  %v4844_v32 = vsel %vm4588_vm8, 1, %v14578_v4  ;;  %vm4590_vm10 = vcmp.lt.s32.totalorder %v9341_v20, %v9305_v6  ;;  %vm4589_vm11 = vcmp.lt.s32.totalorder %v9341_v20, %v9293_v2  ;;  %v8498_v37 = vld [vmem:[#allocation9 + $0x28] sm:$0xff]   ;;  %v9376_v45 = vld [vmem:[%s9253_s5 + $0x18] sm:$0xff] }
 0x116   : > { %5101 = vperm.xlu1 %8492, %v4838_v13   ;;  %5095 = vperm.xlu0 %8491, %v4836_v14   ;;  %v1003_v30 = vsub.f32 %v6876_v25, %v9347_v27  ;;  %v1004_v31 = vsub.f32 %v6877_v26, %v9350_v28  ;;  %v4843_v33 = vsel %vm4587_vm9, 1, %v14578_v4  ;;  %v4846_v40 = vsel %vm4590_vm10, 1, %v14578_v4  ;;  %v8499_v48 = vld [vmem:[#allocation9 + $0x30] sm:$0xff]   ;;  %v9379_v49 = vld [vmem:[%s9253_s5 + $0x20] sm:$0xff]  ;;  %v9382_v50 = vld [vmem:[%s9253_s5 + $0x28] sm:$0xff] }
 0x117   : > { %7788 = vmatpush3.bf16.msra.mxu0 %v8494_v10  ;;  %v4845_v41 = vsel %vm4589_vm11, 1, %v14578_v4  ;;  %v6880_v42 = vunpack.c.l.bf16 %v7386_v36  ;;  %v6881_v43 = vunpack.c.h.bf16 %v7386_v36  ;;  %vm4592_vm12 = vcmp.lt.s32.totalorder %v9341_v20, %v9317_v11  ;;  %v7388_v58 = vld [vmem:[%s9243_s16 + $0x18] sm:$0xff]   ;;  %v7389_v60 = vld [vmem:[%s9243_s16 + $0x20] sm:$0xff]   ;;  %v9412_v8 = vld [vmem:[%s9253_s5 + $0x30] sm:$0xff] }
 0x118   : > { %7789 = vmatprep.subr.bf16.mxu0 %v8495_v15  ;;  %v1259_v34 = vmax.f32 %v1003_v30, 0.0  ;;  %v1260_v35 = vmax.f32 %v1004_v31, 0.0  ;;  %vm4591_vm13 = vcmp.lt.s32.totalorder %v9341_v20, %v9320_v12  ;;  %v6884_v46 = vunpack.c.l.bf16 %v7387_v39  ;;  %v8500_v59 = vld [vmem:[#allocation9 + $0x38] sm:$0xff]   ;;  %v7391_v30 = vld [vmem:[%s9243_s16 + $0x30] sm:$0xff]  }
 0x119   : > { %v6885_v47 = vunpack.c.h.bf16 %v7387_v39  ;;  %vm4594_vm14 = vcmp.lt.s32.totalorder %v9341_v20, %v9329_v16  ;;  %vm4593_vm15 = vcmp.lt.s32.totalorder %v9341_v20, %v9332_v17  ;;  %v9389_v51 = vadd.s32 2, %v9290_v1  ;;  %v9415_v10 = vld [vmem:[%s9253_s5 + $0x38] sm:$0xff] }
 0x11a   : > { %5107 = vperm.xlu1 %8492, %v4840_v18   ;;  %5104 = vperm.xlu0 %8491, %v4839_v19   ;;  %v1515_v38 = vpack.c.bf16 %v1260_v35, %v1259_v34  ;;  %v4848_v52 = vsel %vm4592_vm12, 1, %v14578_v4  ;;  %v4847_v53 = vsel %vm4591_vm13, 1, %v14578_v4  ;;  %v1005_v54 = vsub.f32 %v6880_v42, %v9373_v44 }
 0x11b   : > { %7790 = vmatpush3.bf16.msra.mxu0 %v8495_v15  ;;  %v1006_v55 = vsub.f32 %v6881_v43, %v9376_v45  ;;  %v1007_v56 = vsub.f32 %v6884_v46, %v9379_v49  ;;  %v1008_v57 = vsub.f32 %v6885_v47, %v9382_v50  ;;  %v4850_v61 = vsel %vm4594_vm14, 1, %v14578_v4 }
 0x11c   : > { %7791 = vmatprep.subr.bf16.mxu0 %v8496_v21  ;;  %7801 = vmatprep.mubr.bf16.mxu0 %v1515_v38  ;;  %v4849_v62 = vsel %vm4593_vm15, 1, %v14578_v4  ;;  %vm4596_vm0 = vcmp.lt.s32.totalorder %v9389_v51, %v9312_v9  ;;  %vm4595_vm1 = vcmp.lt.s32.totalorder %v9389_v51, %v9296_v3  ;;  %v1261_v63 = vmax.f32 %v1005_v54, 0.0 }
 0x11d   : > { %v1262_v0 = vmax.f32 %v1006_v55, 0.0  ;;  %v6888_v5 = vunpack.c.l.bf16 %v7388_v58  ;;  %v6889_v7 = vunpack.c.h.bf16 %v7388_v58  ;;  %v1263_v13 = vmax.f32 %v1007_v56, 0.0  ;;  %v7392_v55 = vld [vmem:[%s9243_s16 + $0x38] sm:$0xff]   ;;  %v7393_v56 = vld [vmem:[%s9243_s16 + $0x40] sm:$0xff]  }
 0x11e   : > { %5113 = vperm.xlu1 %8492, %v4842_v23   ;;  %5110 = vperm.xlu0 %8491, %v4841_v24   ;;  %v1264_v14 = vmax.f32 %v1008_v57, 0.0  ;;  %v6892_v15 = vunpack.c.l.bf16 %v7389_v60  ;;  %v6893_v18 = vunpack.c.h.bf16 %v7389_v60  ;;  %v4852_v19 = vsel %vm4596_vm0, 1, %v14578_v4 }
 0x11f   : > { %7792 = vmatpush3.bf16.msra.mxu0 %v8496_v21  ;;  %vm4598_vm2 = vcmp.lt.s32.totalorder %v9389_v51, %v9305_v6  ;;  %vm4597_vm3 = vcmp.lt.s32.totalorder %v9389_v51, %v9293_v2  ;;  %v4851_v20 = vsel %vm4595_vm1, 1, %v14578_v4  ;;  %v1516_v21 = vpack.c.bf16 %v1262_v0, %v1261_v63 }
 0x120   : > { %7793 = vmatprep.subr.bf16.mxu0 %v8497_v29  ;;  %v1009_v22 = vsub.f32 %v6888_v5, %v9412_v8  ;;  %v1010_v23 = vsub.f32 %v6889_v7, %v9415_v10  ;;  %v1517_v24 = vpack.c.bf16 %v1264_v14, %v1263_v13  ;;  %v1011_v25 = vsub.f32 %v6892_v15, %v9347_v27 }
 0x121   : > { %v1012_v26 = vsub.f32 %v6893_v18, %v9350_v28  ;;  %v4854_v31 = vsel %vm4598_vm2, 1, %v14578_v4  ;;  %vm4600_vm4 = vcmp.lt.s32.totalorder %v9389_v51, %v9317_v11  ;;  %vm4599_vm5 = vcmp.lt.s32.totalorder %v9389_v51, %v9320_v12 }
 0x122   : > { %5119 = vperm.xlu1 %8492, %v4844_v32   ;;  %5116 = vperm.xlu0 %8491, %v4843_v33   ;;  %v4853_v32 = vsel %vm4597_vm3, 1, %v14578_v4  ;;  %v1265_v33 = vmax.f32 %v1009_v22, 0.0  ;;  %v1266_v34 = vmax.f32 %v1010_v23, 0.0  ;;  %v6900_v39 = vunpack.c.l.bf16 %v7391_v30  ;;  %v7394_v22 = vld [vmem:[%s9243_s16 + $0x48] sm:$0xff]   ;;  %v7395_v23 = vld [vmem:[%s9243_s16 + $0x50] sm:$0xff]  }
 0x123   : > { %7794 = vmatpush3.bf16.msra.mxu0 %v8497_v29  ;;  %v7390_v29 = vld [vmem:[%s9243_s16 + $0x28] sm:$0xff]   ;;  %v1268_v38 = vmax.f32 %v1012_v26, 0.0  ;;  %v4855_v42 = vsel %vm4599_vm5, 1, %v14578_v4  ;;  %vm4602_vm6 = vcmp.lt.s32.totalorder %v9389_v51, %v9329_v16  ;;  %v9446_v43 = vadd.s32 3, %v9290_v1 }
 0x124   : > { %7795 = vmatprep.subr.bf16.mxu0 %v8498_v37  ;;  %v6896_v35 = vunpack.c.l.bf16 %v7390_v29  ;;  %v6897_v36 = vunpack.c.h.bf16 %v7390_v29  ;;  %v1518_v46 = vpack.c.bf16 %v1266_v34, %v1265_v33  ;;  %vm4601_vm7 = vcmp.lt.s32.totalorder %v9389_v51, %v9332_v17 }
 0x125   : > { %v4858_v57 = vsel %vm4602_vm6, 1, %v14578_v4  ;;  %v4857_v58 = vsel %vm4601_vm7, 1, %v14578_v4  ;;  %vm4604_vm8 = vcmp.lt.s32.totalorder %v9446_v43, %v9312_v9  ;;  %vm4603_vm9 = vcmp.lt.s32.totalorder %v9446_v43, %v9296_v3 }
 0x126   : > { %5125 = vperm.xlu1 %8492, %v4846_v40   ;;  %5122 = vperm.xlu0 %8491, %v4845_v41   ;;  %v6901_v40 = vunpack.c.h.bf16 %v7391_v30  ;;  %v4856_v41 = vsel %vm4600_vm4, 1, %v14578_v4  ;;  %v1013_v47 = vsub.f32 %v6896_v35, %v9373_v44  ;;  %v6904_v60 = vunpack.c.l.bf16 %v7392_v55 }
 0x127   : > { %7796 = vmatpush3.bf16.msra.mxu0 %v8498_v37  ;;  %v1267_v37 = vmax.f32 %v1011_v25, 0.0  ;;  %v6908_v0 = vunpack.c.l.bf16 %v7393_v56  ;;  %v6909_v5 = vunpack.c.h.bf16 %v7393_v56  ;;  %v4860_v7 = vsel %vm4604_vm8, 1, %v14578_v4 }
 0x128   : > { %7797 = vmatprep.subr.bf16.mxu0 %v8499_v48  ;;  %v1016_v54 = vsub.f32 %v6901_v40, %v9382_v50  ;;  %v1269_v51 = vmax.f32 %v1013_v47, 0.0  ;;  %v4859_v13 = vsel %vm4603_vm9, 1, %v14578_v4  ;;  %vm4606_vm10 = vcmp.lt.s32.totalorder %v9446_v43, %v9305_v6 }
 0x129   : > { %vm4605_vm11 = vcmp.lt.s32.totalorder %v9446_v43, %v9293_v2  ;;  %v1017_v15 = vsub.f32 %v6904_v60, %v9412_v8  ;;  %vm4608_vm12 = vcmp.lt.s32.totalorder %v9446_v43, %v9317_v11  ;;  %vm4607_vm13 = vcmp.lt.s32.totalorder %v9446_v43, %v9320_v12 }
 0x12a   : > { %5131 = vperm.xlu1 %8492, %v4848_v52   ;;  %5128 = vperm.xlu0 %8491, %v4847_v53   ;;  %v1519_v52 = vpack.c.bf16 %v1268_v38, %v1267_v37  ;;  %v1015_v53 = vsub.f32 %v6900_v39, %v9379_v49  ;;  %v1272_v63 = vmax.f32 %v1016_v54, 0.0  ;;  %v4861_v25 = vsel %vm4605_vm11, 1, %v14578_v4 }
 0x12b   : > { %7798 = vmatpush3.bf16.msra.mxu0 %v8499_v48  ;;  %v1014_v48 = vsub.f32 %v6897_v36, %v9376_v45  ;;  %v1273_v26 = vmax.f32 %v1017_v15, 0.0  ;;  %v6912_v30 = vunpack.c.l.bf16 %v7394_v22  ;;  %v6916_v34 = vunpack.c.l.bf16 %v7395_v23  ;;  %v7398_v15 = vld [vmem:[%s9243_s16 + $0x68] sm:$0xff]  }
 0x12c   : > { %7799 = vmatprep.subr.bf16.mxu0 %v8500_v59  ;;  %v6917_v35 = vunpack.c.h.bf16 %v7395_v23  ;;  %v4864_v36 = vsel %vm4608_vm12, 1, %v14578_v4  ;;  %v4863_v37 = vsel %vm4607_vm13, 1, %v14578_v4  ;;  %vm4610_vm14 = vcmp.lt.s32.totalorder %v9446_v43, %v9329_v16 }
 0x12d   : > { %v9485_v38 = vadd.s32 4, %v9290_v1  ;;  %vm4609_vm15 = vcmp.lt.s32.totalorder %v9446_v43, %v9332_v17  ;;  %v1021_v40 = vsub.f32 %v6912_v30, %v9373_v44  ;;  %v6928_v23 = vunpack.c.l.bf16 %v7398_v15 }
 0x12e   : > { %5137 = vperm.xlu1 %8492, %v4850_v61   ;;  %5134 = vperm.xlu0 %8491, %v4849_v62   ;;  %v6905_v61 = vunpack.c.h.bf16 %v7392_v55  ;;  %v1271_v62 = vmax.f32 %v1015_v53, 0.0  ;;  %v1024_v47 = vsub.f32 %v6917_v35, %v9382_v50  ;;  %v4866_v53 = vsel %vm4610_vm14, 1, %v14578_v4 }
 0x12f   : > { %7800 = vmatpush3.bf16.msra.mxu0 %v8500_v59  ;;  %v1270_v59 = vmax.f32 %v1014_v48, 0.0  ;;  %v7396_v48 = vld [vmem:[%s9243_s16 + $0x58] sm:$0xff]   ;;  %v4865_v54 = vsel %vm4609_vm15, 1, %v14578_v4  ;;  %vm4612_vm0 = vcmp.lt.s32.totalorder %v9485_v38, %v9312_v9  ;;  %vm4611_vm1 = vcmp.lt.s32.totalorder %v9485_v38, %v9296_v3 }
 0x130   : > { %v1018_v18 = vsub.f32 %v6905_v61, %v9415_v10  ;;  %v1277_v43 = vmax.f32 %v1021_v40, 0.0  ;;  %v6920_v56 = vunpack.c.l.bf16 %v7396_v48  ;;  %v4868_v61 = vsel %vm4612_vm0, 1, %v14578_v4 }
 0x131   : > { %v1520_v14 = vpack.c.bf16 %v1270_v59, %v1269_v51  ;;  %v1280_v51 = vmax.f32 %v1024_v47, 0.0  ;;  %vm4614_vm2 = vcmp.lt.s32.totalorder %v9485_v38, %v9305_v6  ;;  %vm4613_vm3 = vcmp.lt.s32.totalorder %v9485_v38, %v9293_v2 }
 0x132   : > { %5143 = vperm.xlu1 %8492, %v4852_v19   ;;  %5140 = vperm.xlu0 %8491, %v4851_v20   ;;  %v1521_v19 = vpack.c.bf16 %v1272_v63, %v1271_v62  ;;  %v1019_v20 = vsub.f32 %v6908_v0, %v9347_v27  ;;  %v1274_v29 = vmax.f32 %v1018_v18, 0.0  ;;  %v4867_v62 = vsel %vm4611_vm1, 1, %v14578_v4  ;;  %v7399_v18 = vld [vmem:[%s9243_s16 + $0x70] sm:$0xff]  }
 0x133   : > { %7802 = vmatmul.mubr.bf16.vlgmr.msra.gmra.mrb[0].mxu0 %v1516_v21  ;;  %v1020_v21 = vsub.f32 %v6909_v5, %v9350_v28  ;;  %v1025_v0 = vsub.f32 %v6920_v56, %v9412_v8  ;;  %vm4616_vm4 = vcmp.lt.s32.totalorder %v9485_v38, %v9317_v11  ;;  %vm4615_vm5 = vcmp.lt.s32.totalorder %v9485_v38, %v9320_v12 }
 0x134   : > { %7805 = vmatprep.mubr.bf16.mxu0 %v1517_v24  ;;  %v4862_v24 = vsel %vm4606_vm10, 1, %v14578_v4  ;;  %v1522_v39 = vpack.c.bf16 %v1274_v29, %v1273_v26  ;;  %v6932_v29 = vunpack.c.l.bf16 %v7399_v18  ;;  %v6933_v30 = vunpack.c.h.bf16 %v7399_v18 }
 0x135   : > { %v1276_v33 = vmax.f32 %v1020_v21, 0.0  ;;  %v1281_v21 = vmax.f32 %v1025_v0, 0.0  ;;  %vm4618_vm6 = vcmp.lt.s32.totalorder %v9485_v38, %v9329_v16  ;;  %vm4617_vm7 = vcmp.lt.s32.totalorder %v9485_v38, %v9332_v17  ;;  %v7402_v0 = vld [vmem:[%s9243_s16 + $0x88] sm:$0xff]  }
 0x136   : > { %5149 = vperm.xlu1 %8492, %v4854_v31   ;;  %5146 = vperm.xlu0 %8491, %v4853_v32   ;;  %v6913_v31 = vunpack.c.h.bf16 %v7394_v22  ;;  %v1275_v32 = vmax.f32 %v1019_v20, 0.0  ;;  %v4869_v20 = vsel %vm4613_vm3, 1, %v14578_v4  ;;  %v1029_v35 = vsub.f32 %v6928_v23, %v9373_v44 }
 0x137   : > { %v1032_v40 = vsub.f32 %v6933_v30, %v9382_v50  ;;  %v4873_v47 = vsel %vm4617_vm7, 1, %v14578_v4  ;;  %v6944_v18 = vunpack.c.l.bf16 %v7402_v0 }
 0x138   : > { %v1285_v38 = vmax.f32 %v1029_v35, 0.0 }
 0x139   : > { %v1037_v30 = vsub.f32 %v6944_v18, %v9373_v44 }
 0x13a   : > { %5155 = vperm.xlu1 %8492, %v4856_v41   ;;  %5152 = vperm.xlu0 %8491, %v4855_v42   ;;  %v1022_v41 = vsub.f32 %v6913_v31, %v9376_v45  ;;  %v1523_v42 = vpack.c.bf16 %v1276_v33, %v1275_v32  ;;  %v4872_v31 = vsel %vm4616_vm4, 1, %v14578_v4  ;;  %v4871_v32 = vsel %vm4615_vm5, 1, %v14578_v4 }
 0x13b   : > { %7806 = vmatmul.mubr.bf16.gmra.mrb[4].mxu0 %v1518_v46  ;;  %v1023_v46 = vsub.f32 %v6916_v34, %v9379_v49  ;;  %v9524_v33 = vadd.s32 5, %v9290_v1 }
 0x13c   : > { %7809 = vmatprep.mubr.bf16.mxu0 %v1519_v52  ;;  %v7397_v52 = vld [vmem:[%s9243_s16 + $0x60] sm:$0xff]   ;;  %v1278_v55 = vmax.f32 %v1022_v41, 0.0  ;;  %v7400_v41 = vld [vmem:[%s9243_s16 + $0x78] sm:$0xff]  }
 0x13d   : > { %v6924_v59 = vunpack.c.l.bf16 %v7397_v52  ;;  %v6925_v60 = vunpack.c.h.bf16 %v7397_v52  ;;  %vm4620_vm8 = vcmp.lt.s32.totalorder %v9524_v33, %v9312_v9  ;;  %vm4619_vm9 = vcmp.lt.s32.totalorder %v9524_v33, %v9296_v3 }
 0x13e   : > { %5161 = vperm.xlu1 %8492, %v4858_v57   ;;  %5158 = vperm.xlu0 %8491, %v4857_v58   ;;  %v6921_v57 = vunpack.c.h.bf16 %v7396_v48  ;;  %v1279_v58 = vmax.f32 %v1023_v46, 0.0  ;;  %v1524_v63 = vpack.c.bf16 %v1278_v55, %v1277_v43  ;;  %v4874_v46 = vsel %vm4618_vm6, 1, %v14578_v4 }
 0x13f   : > { %v6936_v52 = vunpack.c.l.bf16 %v7400_v41  ;;  %v1288_v43 = vmax.f32 %v1032_v40, 0.0  ;;  %vm4622_vm10 = vcmp.lt.s32.totalorder %v9524_v33, %v9305_v6  ;;  %vm4621_vm11 = vcmp.lt.s32.totalorder %v9524_v33, %v9293_v2 }
 0x140   : > { %v1026_v5 = vsub.f32 %v6921_v57, %v9415_v10  ;;  %v4876_v57 = vsel %vm4620_vm8, 1, %v14578_v4  ;;  %vm4624_vm12 = vcmp.lt.s32.totalorder %v9524_v33, %v9317_v11  ;;  %vm4623_vm13 = vcmp.lt.s32.totalorder %v9524_v33, %v9320_v12 }
 0x141   : > { %vm4626_vm14 = vcmp.lt.s32.totalorder %v9524_v33, %v9329_v16  ;;  %vm4625_vm15 = vcmp.lt.s32.totalorder %v9524_v33, %v9332_v17  ;;  %v1293_v33 = vmax.f32 %v1037_v30, 0.0 }
 0x142   : > { %5167 = vperm.xlu1 %8492, %v4860_v7   ;;  %5164 = vperm.xlu0 %8491, %v4859_v13   ;;  %v1525_v7 = vpack.c.bf16 %v1280_v51, %v1279_v58  ;;  %v1027_v13 = vsub.f32 %v6924_v59, %v9347_v27  ;;  %v1282_v22 = vmax.f32 %v1026_v5, 0.0  ;;  %v4875_v58 = vsel %vm4619_vm9, 1, %v14578_v4  ;;  %v7403_v5 = vld [vmem:[%s9243_s16 + $0x90] sm:$0xff]  }
 0x143   : > { %7810 = vmatmul.mubr.bf16.gmra.mrb[8].mxu0 %v1520_v14  ;;  %v1028_v14 = vsub.f32 %v6925_v60, %v9350_v28  ;;  %v1033_v59 = vsub.f32 %v6936_v52, %v9412_v8  ;;  %v6949_v23 = vunpack.c.h.bf16 %v7403_v5  ;;  %v4881_v40 = vsel %vm4625_vm15, 1, %v14578_v4 }
 0x144   : > { %7813 = vmatprep.mubr.bf16.mxu0 %v1521_v19  ;;  %v4870_v19 = vsel %vm4614_vm2, 1, %v14578_v4  ;;  %v1526_v34 = vpack.c.bf16 %v1282_v22, %v1281_v21  ;;  %v6948_v22 = vunpack.c.l.bf16 %v7403_v5 }
 0x145   : > { %v1284_v26 = vmax.f32 %v1028_v14, 0.0  ;;  %v1289_v14 = vmax.f32 %v1033_v59, 0.0  ;;  %v1040_v35 = vsub.f32 %v6949_v23, %v9382_v50  ;;  %v9608_v23 = vadd.s32 7, %v9290_v1 }
 0x146   : > { %5173 = vperm.xlu1 %8492, %v4862_v24   ;;  %5170 = vperm.xlu0 %8491, %v4861_v25   ;;  %v6929_v24 = vunpack.c.h.bf16 %v7398_v15  ;;  %v1283_v25 = vmax.f32 %v1027_v13, 0.0  ;;  %v4877_v13 = vsel %vm4621_vm11, 1, %v14578_v4 }
 0x147   : > { %vm4636_vm8 = vcmp.lt.s32.totalorder %v9608_v23, %v9312_v9  ;;  %vm4635_vm9 = vcmp.lt.s32.totalorder %v9608_v23, %v9296_v3  ;;  %vm4637_vm11 = vcmp.lt.s32.totalorder %v9608_v23, %v9293_v2  ;;  %vm4641_vm15 = vcmp.lt.s32.totalorder %v9608_v23, %v9332_v17 }
 0x14a   : > { %5179 = vperm.xlu1 %8492, %v4864_v36   ;;  %5176 = vperm.xlu0 %8491, %v4863_v37   ;;  %v1030_v36 = vsub.f32 %v6929_v24, %v9376_v45  ;;  %v1527_v37 = vpack.c.bf16 %v1284_v26, %v1283_v25  ;;  %v4880_v24 = vsel %vm4624_vm12, 1, %v14578_v4  ;;  %v4879_v25 = vsel %vm4623_vm13, 1, %v14578_v4 }
 0x14b   : > { %7814 = vmatmul.mubr.bf16.gmra.mrb[12].mxu0 %v1522_v39  ;;  %v1031_v39 = vsub.f32 %v6932_v29, %v9379_v49  ;;  %v9563_v26 = vadd.s32 6, %v9290_v1  ;;  %vm4640_vm12 = vcmp.lt.s32.totalorder %v9608_v23, %v9317_v11  ;;  %vm4639_vm13 = vcmp.lt.s32.totalorder %v9608_v23, %v9320_v12 }
 0x14c   : > { %7817 = vmatprep.mubr.bf16.mxu0 %v1523_v42  ;;  %v7401_v42 = vld [vmem:[%s9243_s16 + $0x80] sm:$0xff]   ;;  %v1286_v48 = vmax.f32 %v1030_v36, 0.0  ;;  %v7404_v36 = vld [vmem:[%s9243_s16 + $0x98] sm:$0xff]  }
 0x14d   : > { %v6940_v55 = vunpack.c.l.bf16 %v7401_v42  ;;  %v6941_v56 = vunpack.c.h.bf16 %v7401_v42  ;;  %vm4628_vm0 = vcmp.lt.s32.totalorder %v9563_v26, %v9312_v9  ;;  %vm4627_vm1 = vcmp.lt.s32.totalorder %v9563_v26, %v9296_v3  ;;  %v7410_v3 = vld [vmem:[%s9243_s16 + $0xc8] sm:$0xff]  }
 0x14e   : > { %5185 = vperm.xlu1 %8492, %v4866_v53   ;;  %5182 = vperm.xlu0 %8491, %v4865_v54   ;;  %v6937_v53 = vunpack.c.h.bf16 %v7400_v41  ;;  %v1287_v54 = vmax.f32 %v1031_v39, 0.0  ;;  %v1528_v51 = vpack.c.bf16 %v1286_v48, %v1285_v38  ;;  %v4882_v39 = vsel %vm4626_vm14, 1, %v14578_v4 }
 0x14f   : > { %v6952_v42 = vunpack.c.l.bf16 %v7404_v36  ;;  %v1296_v38 = vmax.f32 %v1040_v35, 0.0  ;;  %vm4630_vm2 = vcmp.lt.s32.totalorder %v9563_v26, %v9305_v6  ;;  %vm4629_vm3 = vcmp.lt.s32.totalorder %v9563_v26, %v9293_v2  ;;  %v7408_v35 = vld [vmem:[%s9243_s16 + $0xb8] sm:$0xff]  }
 0x150   : > { %v1034_v60 = vsub.f32 %v6937_v53, %v9415_v10  ;;  %v4884_v53 = vsel %vm4628_vm0, 1, %v14578_v4  ;;  %vm4632_vm4 = vcmp.lt.s32.totalorder %v9563_v26, %v9317_v11  ;;  %vm4631_vm5 = vcmp.lt.s32.totalorder %v9563_v26, %v9320_v12 }
 0x151   : > { %vm4634_vm6 = vcmp.lt.s32.totalorder %v9563_v26, %v9329_v16  ;;  %vm4633_vm7 = vcmp.lt.s32.totalorder %v9563_v26, %v9332_v17  ;;  %vm4642_vm14 = vcmp.lt.s32.totalorder %v9608_v23, %v9329_v16  ;;  %v8508_v16 = vld [vmem:[#allocation12 + $0x38] sm:$0xff]  }
 0x152   : > { %5191 = vperm.xlu1 %8492, %v4868_v61   ;;  %5188 = vperm.xlu0 %8491, %v4867_v62   ;;  %v1529_v61 = vpack.c.bf16 %v1288_v43, %v1287_v54  ;;  %v1035_v62 = vsub.f32 %v6940_v55, %v9347_v27  ;;  %v1290_v15 = vmax.f32 %v1034_v60, 0.0  ;;  %v4883_v54 = vsel %vm4627_vm1, 1, %v14578_v4  ;;  %v8501_v43 = vld [vmem:[#allocation12] sm:$0xff]  }
 0x153   : > { %7818 = vmatmul.mubr.bf16.gmra.mrb[16].mxu0 %v1524_v63  ;;  %v1036_v63 = vsub.f32 %v6941_v56, %v9350_v28  ;;  %v1041_v56 = vsub.f32 %v6952_v42, %v9412_v8  ;;  %v7406_v60 = vld [vmem:[%s9243_s16 + $0xa8] sm:$0xff]   ;;  %8057 = vmatprep.subr.bf16.mxu1 %v8501_v43  ;;  %v6969_v42 = vunpack.c.h.bf16 %v7408_v35  ;;  %v4898_v17 = vsel %vm4642_vm14, 1, %v14578_v4 }
 0x154   : > { %7821 = vmatprep.mubr.bf16.mxu0 %v1525_v7  ;;  %v4878_v7 = vsel %vm4622_vm10, 1, %v14578_v4  ;;  %v1530_v29 = vpack.c.bf16 %v1290_v15, %v1289_v14  ;;  %8058 = vmatpush3.bf16.msra.mxu1 %v8501_v43  ;;  %v8502_v14 = vld [vmem:[#allocation12 + $0x8] sm:$0xff]   ;;  %vm4638_vm10 = vcmp.lt.s32.totalorder %v9608_v23, %v9305_v6 }
 0x155   : > { %v1292_v21 = vmax.f32 %v1036_v63, 0.0  ;;  %v4885_v63 = vsel %vm4629_vm3, 1, %v14578_v4  ;;  %8059 = vmatprep.subr.bf16.mxu1 %v8502_v14  ;;  %v4894_v6 = vsel %vm4638_vm10, 1, %v14578_v4 }
 0x156   : > { %5197 = vperm.xlu1 %8492, %v4870_v19   ;;  %5194 = vperm.xlu0 %8491, %v4869_v20   ;;  %v6945_v19 = vunpack.c.h.bf16 %v7402_v0  ;;  %v1291_v20 = vmax.f32 %v1035_v62, 0.0  ;;  %v4886_v62 = vsel %vm4630_vm2, 1, %v14578_v4  ;;  %v1297_v0 = vmax.f32 %v1041_v56, 0.0 }
 0x157   : > { %v1050_v56 = vsub.f32 %v6969_v42, %v9415_v10 }
 0x158   : > { %8060 = vmatpush3.bf16.msra.mxu1 %v8502_v14  ;;  %v4896_v14 = vsel %vm4640_vm12, 1, %v14578_v4 }
 0x15a   : > { %5203 = vperm.xlu1 %8492, %v4872_v31   ;;  %5200 = vperm.xlu0 %8491, %v4871_v32   ;;  %v1038_v31 = vsub.f32 %v6945_v19, %v9376_v45  ;;  %v1531_v32 = vpack.c.bf16 %v1292_v21, %v1291_v20  ;;  %v4888_v21 = vsel %vm4632_vm4, 1, %v14578_v4 }
 0x15b   : > { %7822 = vmatmul.mubr.bf16.gmra.mrb[20].mxu0 %v1526_v34  ;;  %v1039_v34 = vsub.f32 %v6948_v22, %v9379_v49  ;;  %v4887_v22 = vsel %vm4631_vm5, 1, %v14578_v4 }
 0x15c   : > { %7825 = vmatprep.mubr.bf16.mxu0 %v1527_v37  ;;  %v7405_v37 = vld [vmem:[%s9243_s16 + $0xa0] sm:$0xff]   ;;  %v1294_v41 = vmax.f32 %v1038_v31, 0.0 }
 0x15d   : > { %v6956_v48 = vunpack.c.l.bf16 %v7405_v37  ;;  %v6957_v52 = vunpack.c.h.bf16 %v7405_v37  ;;  %v4890_v37 = vsel %vm4634_vm6, 1, %v14578_v4 }
 0x15e   : > { %5209 = vperm.xlu1 %8492, %v4874_v46   ;;  %5206 = vperm.xlu0 %8491, %v4873_v47   ;;  %v6953_v46 = vunpack.c.h.bf16 %v7404_v36  ;;  %v1295_v47 = vmax.f32 %v1039_v34, 0.0  ;;  %v1532_v55 = vpack.c.bf16 %v1294_v41, %v1293_v33  ;;  %v7409_v36 = vld [vmem:[%s9243_s16 + $0xc0] sm:$0xff]   ;;  %v6968_v41 = vunpack.c.l.bf16 %v7408_v35 }
 0x15f   : > { %v1044_v59 = vsub.f32 %v6957_v52, %v9350_v28  ;;  %v6972_v26 = vunpack.c.l.bf16 %v7409_v36  ;;  %v4892_v52 = vsel %vm4636_vm8, 1, %v14578_v4 }
 0x161   : > { %v1300_v18 = vmax.f32 %v1044_v59, 0.0  ;;  %v4893_v59 = vsel %vm4637_vm11, 1, %v14578_v4 }
 0x162   : > { %5215 = vperm.xlu1 %8492, %v4876_v57   ;;  %5212 = vperm.xlu0 %8491, %v4875_v58   ;;  %v1042_v57 = vsub.f32 %v6953_v46, %v9415_v10  ;;  %v1533_v58 = vpack.c.bf16 %v1296_v38, %v1295_v47  ;;  %v8504_v46 = vld [vmem:[#allocation12 + $0x18] sm:$0xff]  }
 0x163   : > { %7826 = vmatmul.mubr.bf16.gmra.mrb[24].mxu0 %v1528_v51  ;;  %v1043_v51 = vsub.f32 %v6956_v48, %v9347_v27  ;;  %v6973_v48 = vunpack.c.h.bf16 %v7409_v36 }
 0x164   : > { %7829 = vmatprep.mubr.bf16.mxu0 %v1529_v61  ;;  %v7407_v61 = vld [vmem:[%s9243_s16 + $0xb0] sm:$0xff]   ;;  %v1298_v5 = vmax.f32 %v1042_v57, 0.0  ;;  %v1051_v57 = vsub.f32 %v6972_v26, %v9347_v27 }
 0x165   : > { %v1299_v15 = vmax.f32 %v1043_v51, 0.0  ;;  %v6964_v19 = vunpack.c.l.bf16 %v7407_v61  ;;  %v6965_v20 = vunpack.c.h.bf16 %v7407_v61  ;;  %v7411_v51 = vld [vmem:[%s9243_s16 + $0xd0] sm:$0xff]   ;;  %v6976_v61 = vunpack.c.l.bf16 %v7410_v3 }
 0x166   : > { %5221 = vperm.xlu1 %8492, %v4878_v7   ;;  %5218 = vperm.xlu0 %8491, %v4877_v13   ;;  %v6960_v7 = vunpack.c.l.bf16 %v7406_v60  ;;  %v6961_v13 = vunpack.c.h.bf16 %v7406_v60  ;;  %v1306_v60 = vmax.f32 %v1050_v56, 0.0 }
 0x167   : > { %v1535_v31 = vpack.c.bf16 %v1300_v18, %v1299_v15  ;;  %v1048_v34 = vsub.f32 %v6965_v20, %v9382_v50  ;;  %v4895_v15 = vsel %vm4639_vm13, 1, %v14578_v4  ;;  %v9662_v18 = vadd.s32 8, %v9290_v1 }
 0x168   : > { %v1046_v30 = vsub.f32 %v6961_v13, %v9376_v45  ;;  %v6981_v13 = vunpack.c.h.bf16 %v7411_v51  ;;  %v1053_v20 = vsub.f32 %v6976_v61, %v9373_v44 }
 0x169   : > { %v1304_v38 = vmax.f32 %v1048_v34, 0.0 }
 0x16a   : > { %5227 = vperm.xlu1 %8492, %v4880_v24   ;;  %5224 = vperm.xlu0 %8491, %v4879_v25   ;;  %v8503_v24 = vld [vmem:[#allocation12 + $0x10] sm:$0xff]   ;;  %v1534_v25 = vpack.c.bf16 %v1298_v5, %v1297_v0  ;;  %v1302_v33 = vmax.f32 %v1046_v30, 0.0  ;;  %v1307_v0 = vmax.f32 %v1051_v57, 0.0  ;;  %v4897_v30 = vsel %vm4641_vm15, 1, %v14578_v4 }
 0x16b   : > { %7830 = vmatmul.mubr.bf16.gmra.mrb[28].mxu0 %v1530_v29  ;;  %v1045_v29 = vsub.f32 %v6960_v7, %v9373_v44  ;;  %8061 = vmatprep.subr.bf16.mxu1 %v8503_v24  ;;  %v6980_v7 = vunpack.c.l.bf16 %v7411_v51  ;;  %v1309_v34 = vmax.f32 %v1053_v20, 0.0 }
 0x16c   : > { %7833 = vmatprep.mubr.bf16.mxu0 %v1531_v32  ;;  %v1047_v32 = vsub.f32 %v6964_v19, %v9379_v49  ;;  %8062 = vmatpush3.bf16.msra.mxu1 %v8503_v24  ;;  %v1056_v24 = vsub.f32 %v6981_v13, %v9382_v50  ;;  %v9743_v13 = vld [vmem:[%s9275_s21 + $0x38] sm:$0xff] }
 0x16d   : > { %8063 = vmatprep.subr.bf16.mxu1 %v8504_v46  ;;  %vm4650_vm6 = vcmp.lt.s32.totalorder %v9662_v18, %v9743_v13 }
 0x16e   : > { %5233 = vperm.xlu1 %8492, %v4882_v39   ;;  %5230 = vperm.xlu0 %8491, %v4881_v40   ;;  %v4889_v39 = vsel %vm4633_vm7, 1, %v14578_v4  ;;  %v1301_v40 = vmax.f32 %v1045_v29, 0.0  ;;  %v1303_v47 = vmax.f32 %v1047_v32, 0.0  ;;  %v7413_v29 = vld [vmem:[%s9243_s16 + $0xe0] sm:$0xff]  }
 0x16f   : > { %v9683_v32 = vld [vmem:[%s9275_s21] sm:$0xff] }
 0x170   : > { %v1536_v43 = vpack.c.bf16 %v1302_v33, %v1301_v40  ;;  %8064 = vmatpush3.bf16.msra.mxu1 %v8504_v46  ;;  %v1537_v9 = vpack.c.bf16 %v1304_v38, %v1303_v47  ;;  %vm4643_vm1 = vcmp.lt.s32.totalorder %v9662_v18, %v9683_v32  ;;  %v6988_v40 = vunpack.c.l.bf16 %v7413_v29  ;;  %v9696_v46 = vld [vmem:[%s9275_s21 + $0x18] sm:$0xff]  ;;  %v9701_v38 = vld [vmem:[%s9275_s21 + $0x10] sm:$0xff] }
 0x171   : > { %v6989_v33 = vunpack.c.h.bf16 %v7413_v29  ;;  %v4899_v42 = vsel %vm4643_vm1, 1, %v14578_v4  ;;  %vm4646_vm2 = vcmp.lt.s32.totalorder %v9662_v18, %v9696_v46  ;;  %vm4645_vm3 = vcmp.lt.s32.totalorder %v9662_v18, %v9701_v38 }
 0x172   : > { %5239 = vperm.xlu1 %8492, %v4884_v53   ;;  %5236 = vperm.xlu0 %8491, %v4883_v54   ;;  %v4891_v53 = vsel %vm4635_vm9, 1, %v14578_v4  ;;  %v8505_v54 = vld [vmem:[#allocation12 + $0x20] sm:$0xff]   ;;  %v4902_v57 = vsel %vm4646_vm2, 1, %v14578_v4 }
 0x173   : > { %7834 = vmatmul.mubr.bf16.gmra.mrb[32].mxu0 %v1532_v55  ;;  %v1049_v55 = vsub.f32 %v6968_v41, %v9412_v8  ;;  %8065 = vmatprep.subr.bf16.mxu1 %v8505_v54 }
 0x174   : > { %7837 = vmatprep.mubr.bf16.mxu0 %v1533_v58  ;;  %v1052_v58 = vsub.f32 %v6973_v48, %v9350_v28  ;;  %8066 = vmatpush3.bf16.msra.mxu1 %v8505_v54  ;;  %v1060_v54 = vsub.f32 %v6989_v33, %v9350_v28 }
 0x175   : > { %v1305_v2 = vmax.f32 %v1049_v55, 0.0 }
 0x176   : > { %5245 = vperm.xlu1 %8492, %v4886_v62   ;;  %5242 = vperm.xlu0 %8491, %v4885_v63   ;;  %v6977_v62 = vunpack.c.h.bf16 %v7410_v3  ;;  %v8506_v63 = vld [vmem:[#allocation12 + $0x28] sm:$0xff]   ;;  %v1308_v5 = vmax.f32 %v1052_v58, 0.0  ;;  %v4901_v58 = vsel %vm4645_vm3, 1, %v14578_v4 }
 0x177   : > { %8067 = vmatprep.subr.bf16.mxu1 %v8506_v63  ;;  %v1538_v19 = vpack.c.bf16 %v1306_v60, %v1305_v2  ;;  %v9721_v3 = vld [vmem:[%s9275_s21 + $0x28] sm:$0xff]  ;;  %v1316_v60 = vmax.f32 %v1060_v54, 0.0 }
 0x178   : > { %v1054_v11 = vsub.f32 %v6977_v62, %v9376_v45  ;;  %8068 = vmatpush3.bf16.msra.mxu1 %v8506_v63  ;;  %v1539_v12 = vpack.c.bf16 %v1308_v5, %v1307_v0  ;;  %vm4648_vm4 = vcmp.lt.s32.totalorder %v9662_v18, %v9721_v3  ;;  %v7418_v54 = vld [vmem:[%s9243_s16 + $0x108] sm:$0xff]  }
 0x179   : > { %v4904_v5 = vsel %vm4648_vm4, 1, %v14578_v4 }
 0x17a   : > { %5251 = vperm.xlu1 %8492, %v4888_v21   ;;  %5248 = vperm.xlu0 %8491, %v4887_v22   ;;  %v8507_v21 = vld [vmem:[#allocation12 + $0x30] sm:$0xff]   ;;  %v1055_v22 = vsub.f32 %v6980_v7, %v9379_v49  ;;  %v1310_v35 = vmax.f32 %v1054_v11, 0.0 }
 0x17b   : > { %7838 = vmatmul.mubr.bf16.gmra.mrb[36].mxu0 %v1534_v25  ;;  %v7412_v25 = vld [vmem:[%s9243_s16 + $0xd8] sm:$0xff]   ;;  %8069 = vmatprep.subr.bf16.mxu1 %v8507_v21 }
 0x17c   : > { %7841 = vmatprep.mubr.bf16.mxu0 %v1535_v31  ;;  %v9678_v31 = vld [vmem:[%s9275_s21 + $0x8] sm:$0xff]  ;;  %v6984_v36 = vunpack.c.l.bf16 %v7412_v25  ;;  %8070 = vmatpush3.bf16.msra.mxu1 %v8507_v21  ;;  %v1311_v23 = vmax.f32 %v1055_v22, 0.0  ;;  %v1540_v47 = vpack.c.bf16 %v1310_v35, %v1309_v34 }
 0x17d   : > { %vm4644_vm0 = vcmp.lt.s32.totalorder %v9662_v18, %v9678_v31  ;;  %8071 = vmatprep.subr.bf16.mxu1 %v8508_v16 }
 0x17e   : > { %5257 = vperm.xlu1 %8492, %v4890_v37   ;;  %5254 = vperm.xlu0 %8491, %v4889_v39   ;;  %v6985_v37 = vunpack.c.h.bf16 %v7412_v25  ;;  %v1312_v39 = vmax.f32 %v1056_v24, 0.0  ;;  %v4900_v41 = vsel %vm4644_vm0, 1, %v14578_v4  ;;  %v1057_v26 = vsub.f32 %v6984_v36, %v9412_v8  ;;  %v7416_v24 = vld [vmem:[%s9243_s16 + $0xf8] sm:$0xff]  }
 0x17f   : > { %v7001_v34 = vunpack.c.h.bf16 %v7416_v24 }
 0x180   : > { %v1058_v48 = vsub.f32 %v6985_v37, %v9415_v10  ;;  %8072 = vmatpush3.bf16.msra.mxu1 %v8508_v16  ;;  %v1313_v28 = vmax.f32 %v1057_v26, 0.0  ;;  %v9793_v26 = vld [vmem:[%s9253_s5] sm:$0xff] }
 0x182   : > { %5263 = vperm.xlu1 %8492, %v4892_v52   ;;  %5260 = vperm.xlu0 %8491, %v4891_v53   ;;  %v1541_v52 = vpack.c.bf16 %v1312_v39, %v1311_v23  ;;  %v1059_v53 = vsub.f32 %v6988_v40, %v9347_v27  ;;  %v9726_v27 = vld [vmem:[%s9275_s21 + $0x20] sm:$0xff]  ;;  %v1314_v51 = vmax.f32 %v1058_v48, 0.0 }
 0x183   : > { %7842 = vmatmul.mubr.bf16.gmra.mrb[40].mxu0 %v1536_v43  ;;  %v7414_v43 = vld [vmem:[%s9243_s16 + $0xe8] sm:$0xff]   ;;  %vm4647_vm5 = vcmp.lt.s32.totalorder %v9662_v18, %v9726_v27 }
 0x184   : > { %7845 = vmatprep.mubr.bf16.mxu0 %v1537_v9  ;;  %v7415_v9 = vld [vmem:[%s9243_s16 + $0xf0] sm:$0xff]   ;;  %v1315_v2 = vmax.f32 %v1059_v53, 0.0  ;;  %v4903_v7 = vsel %vm4647_vm5, 1, %v14578_v4 }
 0x185   : > { %v6996_v61 = vunpack.c.l.bf16 %v7415_v9  ;;  %v6997_v62 = vunpack.c.h.bf16 %v7415_v9 }
 0x186   : > { %5269 = vperm.xlu1 %8492, %v4894_v6   ;;  %5266 = vperm.xlu0 %8491, %v4893_v59   ;;  %v6992_v6 = vunpack.c.l.bf16 %v7414_v43  ;;  %v6993_v59 = vunpack.c.h.bf16 %v7414_v43  ;;  %v1543_v21 = vpack.c.bf16 %v1316_v60, %v1315_v2 }
 0x187   : > { %v1064_v22 = vsub.f32 %v6997_v62, %v9382_v50 }
 0x188   : > { %v1061_v20 = vsub.f32 %v6992_v6, %v9373_v44  ;;  %v1062_v11 = vsub.f32 %v6993_v59, %v9376_v45  ;;  %v4906_v44 = vsel %vm4650_vm6, 1, %v14578_v4  ;;  %v7009_v6 = vunpack.c.h.bf16 %v7418_v54 }
 0x189   : > { %v1320_v36 = vmax.f32 %v1064_v22, 0.0  ;;  %v9839_v22 = vld [vmem:[%s9253_s5 + $0x18] sm:$0xff] }
 0x18a   : > { %5275 = vperm.xlu1 %8492, %v4896_v14   ;;  %5272 = vperm.xlu0 %8491, %v4895_v15   ;;  %v9748_v14 = vadd.s32 9, %v9290_v1  ;;  %v1542_v15 = vpack.c.bf16 %v1314_v51, %v1313_v28  ;;  %v1318_v50 = vmax.f32 %v1062_v11, 0.0  ;;  %v7008_v51 = vunpack.c.l.bf16 %v7418_v54 }
 0x18b   : > { %7846 = vmatmul.mubr.bf16.gmra.mrb[44].mxu0 %v1538_v19  ;;  %v9751_v19 = vld [vmem:[%s9275_s21 + $0x30] sm:$0xff] }
 0x18c   : > { %7849 = vmatprep.mubr.bf16.mxu0 %v1539_v12  ;;  %vm4649_vm7 = vcmp.lt.s32.totalorder %v9662_v18, %v9751_v19  ;;  %v1063_v12 = vsub.f32 %v6996_v61, %v9379_v49  ;;  %vm4652_vm8 = vcmp.lt.s32.totalorder %v9748_v14, %v9678_v31  ;;  %vm4651_vm9 = vcmp.lt.s32.totalorder %v9748_v14, %v9683_v32 }
 0x18d   : > { %v4905_v45 = vsel %vm4649_vm7, 1, %v14578_v4  ;;  %v1317_v49 = vmax.f32 %v1061_v20, 0.0  ;;  %v4908_v39 = vsel %vm4652_vm8, 1, %v14578_v4  ;;  %v4907_v40 = vsel %vm4651_vm9, 1, %v14578_v4 }
 0x18e   : > { %5281 = vperm.xlu1 %8492, %v4898_v17   ;;  %5278 = vperm.xlu0 %8491, %v4897_v30   ;;  %v7417_v17 = vld [vmem:[%s9243_s16 + $0x100] sm:$0xff]   ;;  %v7000_v30 = vunpack.c.l.bf16 %v7416_v24  ;;  %v1319_v35 = vmax.f32 %v1063_v12, 0.0  ;;  %vm4654_vm10 = vcmp.lt.s32.totalorder %v9748_v14, %v9696_v46  ;;  %vm4653_vm11 = vcmp.lt.s32.totalorder %v9748_v14, %v9701_v38 }
 0x18f   : > { %v7004_v37 = vunpack.c.l.bf16 %v7417_v17  ;;  %v7005_v18 = vunpack.c.h.bf16 %v7417_v17  ;;  %v1544_v33 = vpack.c.bf16 %v1318_v50, %v1317_v49  ;;  %vm4656_vm12 = vcmp.lt.s32.totalorder %v9748_v14, %v9721_v3  ;;  %v9847_v49 = vld [vmem:[%s9253_s5 + $0x28] sm:$0xff] }
 0x190   : > { %vm4655_vm13 = vcmp.lt.s32.totalorder %v9748_v14, %v9726_v27  ;;  %vm4658_vm14 = vcmp.lt.s32.totalorder %v9748_v14, %v9743_v13  ;;  %v9830_v20 = vadd.s32 10, %v9290_v1  ;;  %vm4657_vm15 = vcmp.lt.s32.totalorder %v9748_v14, %v9751_v19 }
 0x191   : > { %v9710_v55 = vpop.permute.xlu1 %5098  ;;  %v9712_v56 = vpop.permute.xlu0 %5092  ;;  %v1067_v48 = vsub.f32 %v7004_v37, %v9793_v26  ;;  %v1070_v24 = vsub.f32 %v7009_v6, %v9839_v22  ;;  %v4914_v37 = vsel %vm4658_vm14, 1, %v14578_v4 }
 0x192   : > { %14720 = vst [vmem:[#allocation38_spill] sm:$0xff] %v9710_v55  ;;  %14721 = vst [vmem:[#allocation39_spill] sm:$0xff] %v9712_v56  ;;  %5287 = vperm.xlu1 %8492, %v4900_v41   ;;  %5284 = vperm.xlu0 %8491, %v4899_v42   ;;  %v1065_v41 = vsub.f32 %v7000_v30, %v9412_v8  ;;  %v1066_v42 = vsub.f32 %v7001_v34, %v9415_v10  ;;  %v4910_v8 = vsel %vm4654_vm10, 1, %v14578_v4  ;;  %v7420_v30 = vld [vmem:[%s9243_s16 + $0x118] sm:$0xff]  }
 0x193   : > { %7850 = vmatmul.mubr.bf16.gmra.mrb[48].mxu0 %v1540_v47  ;;  %v1545_v47 = vpack.c.bf16 %v1320_v36, %v1319_v35  ;;  %v4909_v10 = vsel %vm4653_vm11, 1, %v14578_v4  ;;  %v1323_v59 = vmax.f32 %v1067_v48, 0.0  ;;  %v7421_v36 = vld [vmem:[%s9243_s16 + $0x120] sm:$0xff]   ;;  %vm4660_vm0 = vcmp.lt.s32.totalorder %v9830_v20, %v9678_v31 }
 0x194   : > { %7853 = vmatprep.mubr.bf16.mxu0 %v1541_v52  ;;  %v9797_v52 = vld [vmem:[%s9253_s5 + $0x8] sm:$0xff]  ;;  %v1322_v28 = vmax.f32 %v1066_v42, 0.0  ;;  %vm4659_vm1 = vcmp.lt.s32.totalorder %v9830_v20, %v9683_v32  ;;  %v7020_v48 = vunpack.c.l.bf16 %v7421_v36  ;;  %v7021_v14 = vunpack.c.h.bf16 %v7421_v36 }
 0x195   : > { %v9730_v63 = vpop.permute.xlu1 %5101  ;;  %v9732_v0 = vpop.permute.xlu0 %5095  ;;  %v1068_v53 = vsub.f32 %v7005_v18, %v9797_v52  ;;  %v4913_v18 = vsel %vm4657_vm15, 1, %v14578_v4  ;;  %vm4662_vm2 = vcmp.lt.s32.totalorder %v9830_v20, %v9696_v46  ;;  %vm4661_vm3 = vcmp.lt.s32.totalorder %v9830_v20, %v9701_v38 }
 0x196   : > { %14722 = vst [vmem:[#allocation40_spill] sm:$0xff] %v9730_v63  ;;  %14723 = vst [vmem:[#allocation41_spill] sm:$0xff] %v9732_v0  ;;  %5293 = vperm.xlu1 %8492, %v4902_v57   ;;  %5290 = vperm.xlu0 %8491, %v4901_v58   ;;  %v7419_v57 = vld [vmem:[%s9243_s16 + $0x110] sm:$0xff]   ;;  %v1321_v58 = vmax.f32 %v1065_v41, 0.0  ;;  %v7017_v41 = vunpack.c.h.bf16 %v7420_v30  ;;  %vm4664_vm4 = vcmp.lt.s32.totalorder %v9830_v20, %v9721_v3 }
 0x197   : > { %v1324_v2 = vmax.f32 %v1068_v53, 0.0  ;;  %v7012_v60 = vunpack.c.l.bf16 %v7419_v57  ;;  %v7013_v61 = vunpack.c.h.bf16 %v7419_v57  ;;  %v4916_v57 = vsel %vm4660_vm0, 1, %v14578_v4 }
 0x198   : > { %v1546_v11 = vpack.c.bf16 %v1322_v28, %v1321_v58  ;;  %v9885_v58 = vld [vmem:[%s9253_s5 + $0x30] sm:$0xff]  ;;  %vm4663_vm5 = vcmp.lt.s32.totalorder %v9830_v20, %v9726_v27  ;;  %vm4666_vm6 = vcmp.lt.s32.totalorder %v9830_v20, %v9743_v13  ;;  %vm4665_vm7 = vcmp.lt.s32.totalorder %v9830_v20, %v9751_v19 }
 0x199   : > { %v9760_v25 = vpop.permute.xlu1 %5107  ;;  %v9762_v29 = vpop.permute.xlu0 %5104  ;;  %v1547_v17 = vpack.c.bf16 %v1324_v2, %v1323_v59  ;;  %v1072_v50 = vsub.f32 %v7013_v61, %v9847_v49  ;;  %v7422_v59 = vld [vmem:[%s9243_s16 + $0x128] sm:$0xff]   ;;  %v1076_v61 = vsub.f32 %v7021_v14, %v9797_v52 }
 0x19a   : > { %14724 = vst [vmem:[#allocation42_spill] sm:$0xff] %v9760_v25  ;;  %14725 = vst [vmem:[#allocation43_spill] sm:$0xff] %v9762_v29  ;;  %5299 = vperm.xlu1 %8492, %v4904_v5   ;;  %5296 = vperm.xlu0 %8491, %v4903_v7   ;;  %v4912_v7 = vsel %vm4656_vm12, 1, %v14578_v4  ;;  %v7025_v36 = vunpack.c.h.bf16 %v7422_v59 }
 0x19b   : > { %7854 = vmatmul.mubr.bf16.gmra.mrb[52].mxu0 %v1542_v15  ;;  %v4911_v15 = vsel %vm4655_vm13, 1, %v14578_v4 }
 0x19c   : > { %7857 = vmatprep.mubr.bf16.mxu0 %v1543_v21  ;;  %v9835_v21 = vld [vmem:[%s9253_s5 + $0x10] sm:$0xff] }
 0x19d   : > { %v9774_v16 = vpop.permute.xlu1 %5113  ;;  %v9776_v23 = vpop.permute.xlu0 %5110  ;;  %v1069_v12 = vsub.f32 %v7008_v51, %v9835_v21  ;;  %v9889_v51 = vld [vmem:[%s9253_s5 + $0x38] sm:$0xff] }
 0x19e   : > { %14726 = vst [vmem:[#allocation44_spill] sm:$0xff] %v9774_v16  ;;  %14727 = vst [vmem:[#allocation45_spill] sm:$0xff] %v9776_v23  ;;  %5305 = vperm.xlu1 %8492, %v4906_v44   ;;  %5302 = vperm.xlu0 %8491, %v4905_v45   ;;  %v9843_v44 = vld [vmem:[%s9253_s5 + $0x20] sm:$0xff]  ;;  %v1074_v6 = vsub.f32 %v7017_v41, %v9889_v51 }
 0x19f   : > { %v1071_v45 = vsub.f32 %v7012_v60, %v9843_v44  ;;  %v1075_v60 = vsub.f32 %v7020_v48, %v9793_v26 }
 0x1a1   : > { %v9801_v43 = vpop.permute.xlu1 %5119  ;;  %v9803_v9 = vpop.permute.xlu0 %5116  ;;  %v1327_v42 = vmax.f32 %v1071_v45, 0.0  ;;  %v7024_v45 = vunpack.c.l.bf16 %v7422_v59  ;;  %v1078_v59 = vsub.f32 %v7025_v36, %v9839_v22  ;;  %v7426_v36 = vld [vmem:[%s9243_s16 + $0x148] sm:$0xff]  }
 0x1a2   : > { %14728 = vst [vmem:[#allocation46_spill] sm:$0xff] %v9801_v43  ;;  %14729 = vst [vmem:[#allocation47_spill] sm:$0xff] %v9803_v9  ;;  %5311 = vperm.xlu1 %8492, %v4908_v39   ;;  %5308 = vperm.xlu0 %8491, %v4907_v40   ;;  %v1325_v39 = vmax.f32 %v1069_v12, 0.0  ;;  %v1326_v40 = vmax.f32 %v1070_v24, 0.0  ;;  %v9901_v12 = vadd.s32 11, %v9290_v1  ;;  %v7423_v24 = vld [vmem:[%s9243_s16 + $0x130] sm:$0xff]  }
 0x1a3   : > { %7858 = vmatmul.mubr.bf16.gmra.mrb[56].mxu0 %v1544_v33  ;;  %v7016_v33 = vunpack.c.l.bf16 %v7420_v30  ;;  %v1330_v30 = vmax.f32 %v1074_v6, 0.0  ;;  %v1077_v48 = vsub.f32 %v7024_v45, %v9835_v21  ;;  %v4922_v6 = vsel %vm4666_vm6, 1, %v14578_v4  ;;  %v7447_v9 = vld [vmem:[%s9243_s16 + $0x1f0] sm:$0xff]  }
 0x1a4   : > { %7861 = vmatprep.mubr.bf16.mxu0 %v1545_v47  ;;  %v1328_v47 = vmax.f32 %v1072_v50, 0.0  ;;  %vm4668_vm8 = vcmp.lt.s32.totalorder %v9901_v12, %v9678_v31  ;;  %vm4667_vm9 = vcmp.lt.s32.totalorder %v9901_v12, %v9683_v32  ;;  %vm4670_vm10 = vcmp.lt.s32.totalorder %v9901_v12, %v9696_v46 }
 0x1a5   : > { %v9815_v62 = vpop.permute.xlu1 %5125  ;;  %v9817_v5 = vpop.permute.xlu0 %5122  ;;  %v1073_v28 = vsub.f32 %v7016_v33, %v9885_v58  ;;  %v7029_v33 = vunpack.c.h.bf16 %v7423_v24  ;;  %v4924_v45 = vsel %vm4668_vm8, 1, %v14578_v4  ;;  %v4923_v20 = vsel %vm4667_vm9, 1, %v14578_v4 }
 0x1a6   : > { %14730 = vst [vmem:[#allocation48_spill] sm:$0xff] %v9815_v62  ;;  %14731 = vst [vmem:[#allocation49_spill] sm:$0xff] %v9817_v5  ;;  %5317 = vperm.xlu1 %8492, %v4910_v8   ;;  %5314 = vperm.xlu0 %8491, %v4909_v10   ;;  %v4915_v8 = vsel %vm4659_vm1, 1, %v14578_v4  ;;  %v1548_v10 = vpack.c.bf16 %v1326_v40, %v1325_v39  ;;  %v1549_v2 = vpack.c.bf16 %v1328_v47, %v1327_v42 }
 0x1a7   : > { %v1329_v50 = vmax.f32 %v1073_v28, 0.0  ;;  %v1332_v39 = vmax.f32 %v1076_v61, 0.0  ;;  %v7028_v40 = vunpack.c.l.bf16 %v7423_v24  ;;  %v4920_v47 = vsel %vm4664_vm4, 1, %v14578_v4 }
 0x1a8   : > { %vm4669_vm11 = vcmp.lt.s32.totalorder %v9901_v12, %v9701_v38  ;;  %vm4672_vm12 = vcmp.lt.s32.totalorder %v9901_v12, %v9721_v3  ;;  %vm4671_vm13 = vcmp.lt.s32.totalorder %v9901_v12, %v9726_v27  ;;  %vm4674_vm14 = vcmp.lt.s32.totalorder %v9901_v12, %v9743_v13 }
 0x1a9   : > { %v9851_v34 = vpop.permute.xlu1 %5131  ;;  %v9853_v35 = vpop.permute.xlu0 %5128  ;;  %v1550_v28 = vpack.c.bf16 %v1330_v30, %v1329_v50  ;;  %v1079_v61 = vsub.f32 %v7028_v40, %v9843_v44  ;;  %v1334_v40 = vmax.f32 %v1078_v59, 0.0  ;;  %vm4673_vm15 = vcmp.lt.s32.totalorder %v9901_v12, %v9751_v19 }
 0x1aa   : > { %14732 = vst [vmem:[#allocation50_spill] sm:$0xff] %v9851_v34  ;;  %14733 = vst [vmem:[#allocation51_spill] sm:$0xff] %v9853_v35  ;;  %5323 = vperm.xlu1 %8492, %v4912_v7   ;;  %5320 = vperm.xlu0 %8491, %v4911_v15  }
 0x1ab   : > { %7862 = vmatmul.mubr.bf16.gmra.mrb[60].mxu0 %v1546_v11  ;;  %v4918_v11 = vsel %vm4662_vm2, 1, %v14578_v4 }
 0x1ac   : > { %7865 = vmatprep.mubr.bf16.mxu0 %v1547_v17  ;;  %v4917_v17 = vsel %vm4661_vm3, 1, %v14578_v4 }
 0x1ad   : > { %v9868_v53 = vpop.permute.xlu1 %5137  ;;  %v9870_v54 = vpop.permute.xlu0 %5134 }
 0x1ae   : > { %14734 = vst [vmem:[#allocation52_spill] sm:$0xff] %v9868_v53  ;;  %14735 = vst [vmem:[#allocation53_spill] sm:$0xff] %v9870_v54  ;;  %5329 = vperm.xlu1 %8492, %v4914_v37   ;;  %5326 = vperm.xlu0 %8491, %v4913_v18   ;;  %v7424_v37 = vld [vmem:[%s9243_s16 + $0x138] sm:$0xff]   ;;  %v1331_v18 = vmax.f32 %v1075_v60, 0.0 }
 0x1af   : > { %v7032_v14 = vunpack.c.l.bf16 %v7424_v37 }
 0x1b0   : > { %v1551_v60 = vpack.c.bf16 %v1332_v39, %v1331_v18 }
 0x1b1   : > { %v9895_v7 = vpop.permute.xlu1 %5143  ;;  %v9897_v15 = vpop.permute.xlu0 %5140  ;;  %v1081_v18 = vsub.f32 %v7032_v14, %v9885_v58  ;;  %v7040_v14 = vunpack.c.l.bf16 %v7426_v36 }
 0x1b2   : > { %14736 = vst [vmem:[#allocation54_spill] sm:$0xff] %v9895_v7  ;;  %14737 = vst [vmem:[#allocation55_spill] sm:$0xff] %v9897_v15  ;;  %5335 = vperm.xlu1 %8492, %v4916_v57   ;;  %5332 = vperm.xlu0 %8491, %v4915_v8   ;;  %v7033_v57 = vunpack.c.h.bf16 %v7424_v37  ;;  %v7425_v8 = vld [vmem:[%s9243_s16 + $0x140] sm:$0xff]   ;;  %v1333_v37 = vmax.f32 %v1077_v48, 0.0  ;;  %v9967_v48 = vadd.s32 12, %v9290_v1 }
 0x1b3   : > { %7866 = vmatmul.mubr.bf16.gmra.mrb[64].mxu0 %v1548_v10  ;;  %v4919_v10 = vsel %vm4663_vm5, 1, %v14578_v4  ;;  %v7036_v50 = vunpack.c.l.bf16 %v7425_v8  ;;  %v7037_v30 = vunpack.c.h.bf16 %v7425_v8  ;;  %v7429_v7 = vld [vmem:[%s9243_s16 + $0x160] sm:$0xff]  }
 0x1b4   : > { %7869 = vmatprep.mubr.bf16.mxu0 %v1549_v2  ;;  %v4921_v2 = vsel %vm4665_vm7, 1, %v14578_v4  ;;  %v1082_v39 = vsub.f32 %v7033_v57, %v9889_v51  ;;  %vm4676_vm0 = vcmp.lt.s32.totalorder %v9967_v48, %v9678_v31  ;;  %vm4675_vm1 = vcmp.lt.s32.totalorder %v9967_v48, %v9683_v32 }
 0x1b5   : > { %v9915_v41 = vpop.permute.xlu1 %5149  ;;  %v9917_v42 = vpop.permute.xlu0 %5146  ;;  %v1084_v59 = vsub.f32 %v7037_v30, %v9797_v52  ;;  %v1552_v30 = vpack.c.bf16 %v1334_v40, %v1333_v37  ;;  %vm4678_vm2 = vcmp.lt.s32.totalorder %v9967_v48, %v9696_v46  ;;  %vm4677_vm3 = vcmp.lt.s32.totalorder %v9967_v48, %v9701_v38 }
 0x1b6   : > { %14738 = vst [vmem:[#allocation56_spill] sm:$0xff] %v9915_v41  ;;  %14739 = vst [vmem:[#allocation57_spill] sm:$0xff] %v9917_v42  ;;  %5341 = vperm.xlu1 %8492, %v4918_v11   ;;  %5338 = vperm.xlu0 %8491, %v4917_v17   ;;  %v1080_v11 = vsub.f32 %v7029_v33, %v9847_v49  ;;  %v1335_v33 = vmax.f32 %v1079_v61, 0.0  ;;  %v9985_v61 = vsel %vm4672_vm12, 1, %v14578_v4  ;;  %v7053_v15 = vunpack.c.h.bf16 %v7429_v7 }
 0x1b7   : > { %vm4680_vm4 = vcmp.lt.s32.totalorder %v9967_v48, %v9721_v3  ;;  %vm4679_vm5 = vcmp.lt.s32.totalorder %v9967_v48, %v9726_v27  ;;  %vm4682_vm6 = vcmp.lt.s32.totalorder %v9967_v48, %v9743_v13  ;;  %vm4681_vm7 = vcmp.lt.s32.totalorder %v9967_v48, %v9751_v19 }
 0x1b8   : > { %v1092_v34 = vsub.f32 %v7053_v15, %v9797_v52 }
 0x1b9   : > { %v9943_v24 = vpop.permute.xlu1 %5155  ;;  %v9945_v17 = vpop.permute.xlu0 %5152 }
 0x1ba   : > { %14740 = vst [vmem:[#allocation58_spill] sm:$0xff] %v9943_v24  ;;  %14741 = vst [vmem:[#allocation59_spill] sm:$0xff] %v9945_v17  ;;  %5347 = vperm.xlu1 %8492, %v4920_v47   ;;  %5344 = vperm.xlu0 %8491, %v4919_v10   ;;  %v1336_v47 = vmax.f32 %v1080_v11, 0.0  ;;  %v4926_v10 = vsel %vm4670_vm10, 1, %v14578_v4  ;;  %v7041_v24 = vunpack.c.h.bf16 %v7426_v36  ;;  %v7427_v17 = vld [vmem:[%s9243_s16 + $0x150] sm:$0xff]   ;;  %v1337_v11 = vmax.f32 %v1081_v18, 0.0 }
 0x1bb   : > { %7870 = vmatmul.mubr.bf16.gmra.mrb[68].mxu0 %v1550_v28  ;;  %v1083_v28 = vsub.f32 %v7036_v50, %v9793_v26  ;;  %v1338_v50 = vmax.f32 %v1082_v39, 0.0  ;;  %v1085_v36 = vsub.f32 %v7040_v14, %v9835_v21  ;;  %v7044_v18 = vunpack.c.l.bf16 %v7427_v17  ;;  %v7428_v39 = vld [vmem:[%s9243_s16 + $0x158] sm:$0xff]  }
 0x1bc   : > { %7873 = vmatprep.mubr.bf16.mxu0 %v1551_v60  ;;  %v4925_v60 = vsel %vm4669_vm11, 1, %v14578_v4 }
 0x1bd   : > { %v9969_v57 = vpop.permute.xlu1 %5161  ;;  %v9971_v8 = vpop.permute.xlu0 %5158  ;;  %v1341_v12 = vmax.f32 %v1085_v36, 0.0  ;;  %v1087_v41 = vsub.f32 %v7044_v18, %v9843_v44 }
 0x1be   : > { %14742 = vst [vmem:[#allocation60_spill] sm:$0xff] %v9969_v57  ;;  %14743 = vst [vmem:[#allocation61_spill] sm:$0xff] %v9971_v8  ;;  %5353 = vperm.xlu1 %8492, %v4922_v6   ;;  %5350 = vperm.xlu0 %8491, %v4921_v2   ;;  %v4927_v6 = vsel %vm4671_vm13, 1, %v14578_v4  ;;  %v1553_v2 = vpack.c.bf16 %v1336_v47, %v1335_v33  ;;  %v1339_v57 = vmax.f32 %v1083_v28, 0.0  ;;  %v1340_v4 = vmax.f32 %v1084_v59, 0.0 }
 0x1bf   : > { %v1086_v8 = vsub.f32 %v7041_v24, %v9839_v22  ;;  %v1554_v33 = vpack.c.bf16 %v1338_v50, %v1337_v11  ;;  %v14746_v47 = vmov 0   ;;  %v7045_v59 = vunpack.c.h.bf16 %v7427_v17 }
 0x1c0   : > { %v10011_v14 = vsel %vm4674_vm14, 1, %v14746_v47  ;;  %v10017_v28 = vsel %vm4673_vm15, 1, %v14746_v47  ;;  %v10023_v24 = vsel %vm4676_vm0, 1, %v14746_v47  ;;  %v10028_v11 = vsel %vm4675_vm1, 1, %v14746_v47 }
 0x1c1   : > { %v9999_v37 = vpop.permute.xlu1 %5167  ;;  %v10001_v40 = vpop.permute.xlu0 %5164  ;;  %v7052_v17 = vunpack.c.l.bf16 %v7429_v7  ;;  %v1088_v36 = vsub.f32 %v7045_v59, %v9847_v49 }
 0x1c2   : > { %14744 = vst [vmem:[#allocation62_spill] sm:$0xff] %v9999_v37  ;;  %14745 = vst [vmem:[#allocation63_spill] sm:$0xff] %v10001_v40  ;;  %5359 = vperm.xlu1 %8492, %v4924_v45   ;;  %5356 = vperm.xlu0 %8491, %v4923_v20   ;;  %v7048_v45 = vunpack.c.l.bf16 %v7428_v39  ;;  %v7049_v20 = vunpack.c.h.bf16 %v7428_v39  ;;  %v1555_v37 = vpack.c.bf16 %v1340_v4, %v1339_v57  ;;  %v1342_v40 = vmax.f32 %v1086_v8, 0.0  ;;  %v7430_v39 = vld [vmem:[%s9243_s16 + $0x168] sm:$0xff]   ;;  %v7431_v8 = vld [vmem:[%s9243_s16 + $0x170] sm:$0xff]  }
 0x1c3   : > { %7874 = vmatmul.mubr.bf16.gmra.mrb[72].mxu0 %v1552_v30  ;;  %v10050_v4 = vsel %vm4677_vm3, 1, %v14746_v47  ;;  %v7056_v18 = vunpack.c.l.bf16 %v7430_v39  ;;  %v7057_v59 = vunpack.c.h.bf16 %v7430_v39  ;;  %v1344_v53 = vmax.f32 %v1088_v36, 0.0 }
 0x1c4   : > { %7877 = vmatprep.mubr.bf16.mxu0 %v1553_v2  ;;  %v10042_v2 = vsel %vm4678_vm2, 1, %v14746_v47  ;;  %v1089_v7 = vsub.f32 %v7048_v45, %v9885_v58  ;;  %v1090_v57 = vsub.f32 %v7049_v20, %v9889_v51  ;;  %v1556_v42 = vpack.c.bf16 %v1342_v40, %v1341_v12 }
 0x1c5   : > { %v10032_v50 = vpop.permute.xlu1 %5173  ;;  %v10034_v30 = vpop.permute.xlu0 %5170  ;;  %v10066_v45 = vsel %vm4680_vm4, 1, %v14746_v47  ;;  %v10069_v20 = vsel %vm4679_vm5, 1, %v14746_v47  ;;  %v7060_v39 = vunpack.c.l.bf16 %v7431_v8  ;;  %v7061_v16 = vunpack.c.h.bf16 %v7431_v8 }
 0x1c6   : > { %14747 = vst [vmem:[#allocation64_spill] sm:$0xff] %v10032_v50  ;;  %14748 = vst [vmem:[#allocation65_spill] sm:$0xff] %v10034_v30  ;;  %5365 = vperm.xlu1 %8492, %v4926_v10   ;;  %5362 = vperm.xlu0 %8491, %v4925_v60   ;;  %v1091_v10 = vsub.f32 %v7052_v17, %v9793_v26  ;;  %v10059_v60 = vadd.s32 13, %v9290_v1  ;;  %v1343_v17 = vmax.f32 %v1087_v41, 0.0  ;;  %v1346_v40 = vmax.f32 %v1090_v57, 0.0 }
 0x1c7   : > { %v10078_v12 = vsel %vm4682_vm6, 1, %v14746_v47  ;;  %v1093_v41 = vsub.f32 %v7056_v18, %v9835_v21  ;;  %v1095_v18 = vsub.f32 %v7060_v39, %v9843_v44 }
 0x1c8   : > { %v1347_v15 = vmax.f32 %v1091_v10, 0.0  ;;  %vm4684_vm8 = vcmp.lt.s32.totalorder %v10059_v60, %v9678_v31  ;;  %vm4683_vm9 = vcmp.lt.s32.totalorder %v10059_v60, %v9683_v32  ;;  %v10099_v10 = vsel %vm4681_vm7, 1, %v14746_v47 }
 0x1c9   : > { %v10061_v50 = vpop.permute.xlu1 %5179  ;;  %v10063_v30 = vpop.permute.xlu0 %5176  ;;  %v1349_v48 = vmax.f32 %v1093_v41, 0.0  ;;  %vm4686_vm10 = vcmp.lt.s32.totalorder %v10059_v60, %v9696_v46  ;;  %vm4685_vm11 = vcmp.lt.s32.totalorder %v10059_v60, %v9701_v38  ;;  %v1351_v41 = vmax.f32 %v1095_v18, 0.0 }
 0x1ca   : > { %14749 = vst [vmem:[#allocation66_spill] sm:$0xff] %v10061_v50  ;;  %14750 = vst [vmem:[#allocation67_spill] sm:$0xff] %v10063_v30  ;;  %5371 = vperm.xlu1 %8492, %v9985_v61   ;;  %5368 = vperm.xlu0 %8491, %v4927_v6   ;;  %v7432_v50 = vld [vmem:[%s9243_s16 + $0x178] sm:$0xff]   ;;  %v1345_v30 = vmax.f32 %v1089_v7, 0.0  ;;  %v1094_v61 = vsub.f32 %v7057_v59, %v9839_v22  ;;  %v7433_v6 = vld [vmem:[%s9243_s16 + $0x180] sm:$0xff]   ;;  %v1348_v7 = vmax.f32 %v1092_v34, 0.0 }
 0x1cb   : > { %7878 = vmatmul.mubr.bf16.gmra.mrb[76].mxu0 %v1554_v33  ;;  %v7064_v57 = vunpack.c.l.bf16 %v7432_v50  ;;  %v7065_v8 = vunpack.c.h.bf16 %v7432_v50  ;;  %v1096_v34 = vsub.f32 %v7061_v16, %v9847_v49  ;;  %v10112_v50 = vsel %vm4683_vm9, 1, %v14746_v47 }
 0x1cc   : > { %7881 = vmatprep.mubr.bf16.mxu0 %v1555_v37  ;;  %v1557_v37 = vpack.c.bf16 %v1344_v53, %v1343_v17  ;;  %v10103_v59 = vpack.c.bf16 %v1346_v40, %v1345_v30  ;;  %v7068_v53 = vunpack.c.l.bf16 %v7433_v6  ;;  %v1350_v17 = vmax.f32 %v1094_v61, 0.0 }
 0x1cd   : > { %v10087_v33 = vpop.permute.xlu1 %5185  ;;  %v10089_v36 = vpop.permute.xlu0 %5182  ;;  %v1559_v30 = vpack.c.bf16 %v1348_v7, %v1347_v15  ;;  %v1097_v40 = vsub.f32 %v7064_v57, %v9885_v58  ;;  %v1352_v61 = vmax.f32 %v1096_v34, 0.0  ;;  %vm4688_vm12 = vcmp.lt.s32.totalorder %v10059_v60, %v9721_v3 }
 0x1ce   : > { %14751 = vst [vmem:[#allocation68_spill] sm:$0xff] %v10087_v33  ;;  %14752 = vst [vmem:[#allocation69_spill] sm:$0xff] %v10089_v36  ;;  %5377 = vperm.xlu1 %8492, %v10011_v14   ;;  %5374 = vperm.xlu0 %8491, %v10017_v28   ;;  %v10109_v14 = vsel %vm4684_vm8, 1, %v14746_v47  ;;  %v7069_v28 = vunpack.c.h.bf16 %v7433_v6  ;;  %v1098_v6 = vsub.f32 %v7065_v8, %v9889_v51  ;;  %v7434_v36 = vld [vmem:[%s9243_s16 + $0x188] sm:$0xff]   ;;  %v10144_v57 = vsel %vm4686_vm10, 1, %v14746_v47 }
 0x1cf   : > { %vm4687_vm13 = vcmp.lt.s32.totalorder %v10059_v60, %v9726_v27  ;;  %vm4690_vm14 = vcmp.lt.s32.totalorder %v10059_v60, %v9743_v13  ;;  %v1099_v15 = vsub.f32 %v7068_v53, %v9793_v26  ;;  %v7072_v8 = vunpack.c.l.bf16 %v7434_v36 }
 0x1d0   : > { %v1100_v7 = vsub.f32 %v7069_v28, %v9797_v52  ;;  %v10160_v53 = vsel %vm4687_vm13, 1, %v14746_v47  ;;  %v1353_v28 = vmax.f32 %v1097_v40, 0.0  ;;  %vm4689_vm15 = vcmp.lt.s32.totalorder %v10059_v60, %v9751_v19 }
 0x1d1   : > { %v10116_v39 = vpop.permute.xlu1 %5191  ;;  %v10118_v16 = vpop.permute.xlu0 %5188  ;;  %v1355_v40 = vmax.f32 %v1099_v15, 0.0  ;;  %v10191_v15 = vsel %vm4689_vm15, 1, %v14746_v47 }
 0x1d2   : > { %14753 = vst [vmem:[#allocation70_spill] sm:$0xff] %v10116_v39  ;;  %14754 = vst [vmem:[#allocation71_spill] sm:$0xff] %v10118_v16  ;;  %5383 = vperm.xlu1 %8492, %v10023_v24   ;;  %5380 = vperm.xlu0 %8491, %v10028_v11   ;;  %v10136_v24 = vadd.s32 14, %v9290_v1  ;;  %v10138_v11 = vpack.c.bf16 %v1350_v17, %v1349_v48  ;;  %v1354_v48 = vmax.f32 %v1098_v6, 0.0  ;;  %v7435_v17 = vld [vmem:[%s9243_s16 + $0x190] sm:$0xff]   ;;  %v7436_v16 = vld [vmem:[%s9243_s16 + $0x198] sm:$0xff]  }
 0x1d3   : > { %7882 = vmatmul.mubr.bf16.gmra.mrb[80].mxu0 %v1556_v42  ;;  %v10150_v42 = vsel %vm4685_vm11, 1, %v14746_v47  ;;  %v10165_v39 = vpack.c.bf16 %v1352_v61, %v1351_v41  ;;  %v1356_v6 = vmax.f32 %v1100_v7, 0.0  ;;  %v7076_v41 = vunpack.c.l.bf16 %v7435_v17 }
 0x1d4   : > { %7885 = vmatprep.mubr.bf16.mxu0 %v1557_v37  ;;  %v10157_v37 = vsel %vm4688_vm12, 1, %v14746_v47  ;;  %vm4692_vm0 = vcmp.lt.s32.totalorder %v10136_v24, %v9678_v31  ;;  %vm4691_vm1 = vcmp.lt.s32.totalorder %v10136_v24, %v9683_v32  ;;  %vm4694_vm2 = vcmp.lt.s32.totalorder %v10136_v24, %v9696_v46 }
 0x1d5   : > { %v10152_v18 = vpop.permute.xlu1 %5197  ;;  %v10154_v34 = vpop.permute.xlu0 %5194  ;;  %v7077_v61 = vunpack.c.h.bf16 %v7435_v17  ;;  %v7080_v7 = vunpack.c.l.bf16 %v7436_v16  ;;  %v7081_v25 = vunpack.c.h.bf16 %v7436_v16  ;;  %vm4693_vm3 = vcmp.lt.s32.totalorder %v10136_v24, %v9701_v38 }
 0x1d6   : > { %14755 = vst [vmem:[#allocation72_spill] sm:$0xff] %v10152_v18  ;;  %14756 = vst [vmem:[#allocation73_spill] sm:$0xff] %v10154_v34  ;;  %5389 = vperm.xlu1 %8492, %v10042_v2   ;;  %5386 = vperm.xlu0 %8491, %v10050_v4   ;;  %v10171_v18 = vsel %vm4690_vm14, 1, %v14746_v47  ;;  %v7073_v34 = vunpack.c.h.bf16 %v7434_v36  ;;  %v7437_v2 = vld [vmem:[%s9243_s16 + $0x1a0] sm:$0xff]   ;;  %v1101_v4 = vsub.f32 %v7072_v8, %v9835_v21  ;;  %v10232_v35 = vsel %vm4693_vm3, 1, %v14746_v47 }
 0x1d7   : > { %v10188_v36 = vpack.c.bf16 %v1354_v48, %v1353_v28  ;;  %v7084_v17 = vunpack.c.l.bf16 %v7437_v2  ;;  %v10203_v28 = vsel %vm4692_vm0, 1, %v14746_v47  ;;  %vm4696_vm4 = vcmp.lt.s32.totalorder %v10136_v24, %v9721_v3 }
 0x1d8   : > { %v1102_v8 = vsub.f32 %v7073_v34, %v9839_v22  ;;  %v1357_v16 = vmax.f32 %v1101_v4, 0.0  ;;  %v1103_v34 = vsub.f32 %v7076_v41, %v9843_v44  ;;  %v1104_v48 = vsub.f32 %v7077_v61, %v9847_v49 }
 0x1d9   : > { %v10184_v33 = vpop.permute.xlu1 %5203  ;;  %v10186_v60 = vpop.permute.xlu0 %5200  ;;  %vm4695_vm5 = vcmp.lt.s32.totalorder %v10136_v24, %v9726_v27  ;;  %v10244_v4 = vsel %vm4696_vm4, 1, %v14746_v47  ;;  %v1107_v41 = vsub.f32 %v7084_v17, %v9793_v26  ;;  %vm4698_vm6 = vcmp.lt.s32.totalorder %v10136_v24, %v9743_v13 }
 0x1da   : > { %14757 = vst [vmem:[#allocation74_spill] sm:$0xff] %v10184_v33  ;;  %14758 = vst [vmem:[#allocation75_spill] sm:$0xff] %v10186_v60  ;;  %5395 = vperm.xlu1 %8492, %v10066_v45   ;;  %5392 = vperm.xlu0 %8491, %v10069_v20   ;;  %v7085_v33 = vunpack.c.h.bf16 %v7437_v2  ;;  %v10209_v45 = vsel %vm4691_vm1, 1, %v14746_v47  ;;  %v10215_v20 = vsel %vm4694_vm2, 1, %v14746_v47  ;;  %v7438_v2 = vld [vmem:[%s9243_s16 + $0x1a8] sm:$0xff]   ;;  %vm4697_vm7 = vcmp.lt.s32.totalorder %v10136_v24, %v9751_v19 }
 0x1db   : > { %7886 = vmatmul.mubr.bf16.gmra.mrb[84].mxu0 %v10103_v59  ;;  %v10219_v59 = vpack.c.bf16 %v1356_v6, %v1355_v40  ;;  %v1106_v40 = vsub.f32 %v7081_v25, %v9889_v51  ;;  %v1358_v6 = vmax.f32 %v1102_v8, 0.0  ;;  %v10252_v25 = vadd.s32 15, %v9290_v1 }
 0x1dc   : > { %7889 = vmatprep.mubr.bf16.mxu0 %v1559_v30  ;;  %v1105_v30 = vsub.f32 %v7080_v7, %v9885_v58  ;;  %v1108_v61 = vsub.f32 %v7085_v33, %v9797_v52  ;;  %v1359_v7 = vmax.f32 %v1103_v34, 0.0  ;;  %v1360_v8 = vmax.f32 %v1104_v48, 0.0  ;;  %v7440_v34 = vld [vmem:[%s9243_s16 + $0x1b8] sm:$0xff]  }
 0x1dd   : > { %v10224_v60 = vpop.permute.xlu1 %5209  ;;  %v10226_v54 = vpop.permute.xlu0 %5206  ;;  %v1362_v23 = vmax.f32 %v1106_v40, 0.0  ;;  %v10269_v48 = vpack.c.bf16 %v1358_v6, %v1357_v16  ;;  %v10275_v62 = vsel %vm4698_vm6, 1, %v14746_v47  ;;  %vm4700_vm8 = vcmp.lt.s32.totalorder %v10252_v25, %v9678_v31 }
 0x1de   : > { %14759 = vst [vmem:[#allocation76_spill] sm:$0xff] %v10224_v60  ;;  %14760 = vst [vmem:[#allocation77_spill] sm:$0xff] %v10226_v54  ;;  %5401 = vperm.xlu1 %8492, %v10078_v12   ;;  %5398 = vperm.xlu0 %8491, %v10099_v10   ;;  %v7439_v54 = vld [vmem:[%s9243_s16 + $0x1b0] sm:$0xff]   ;;  %v7088_v12 = vunpack.c.l.bf16 %v7438_v2  ;;  %v7089_v10 = vunpack.c.h.bf16 %v7438_v2  ;;  %v10258_v60 = vsel %vm4695_vm5, 1, %v14746_v47  ;;  %v1361_v29 = vmax.f32 %v1105_v30, 0.0 }
 0x1df   : > { %v7092_v43 = vunpack.c.l.bf16 %v7439_v54  ;;  %v7093_v2 = vunpack.c.h.bf16 %v7439_v54  ;;  %vm4699_vm9 = vcmp.lt.s32.totalorder %v10252_v25, %v9683_v32  ;;  %v10290_v16 = vsel %vm4697_vm7, 1, %v14746_v47 }
 0x1e0   : > { %v1109_v54 = vsub.f32 %v7088_v12, %v9835_v21  ;;  %vm4702_vm10 = vcmp.lt.s32.totalorder %v10252_v25, %v9696_v46  ;;  %v7097_v30 = vunpack.c.h.bf16 %v7440_v34  ;;  %vm4701_vm11 = vcmp.lt.s32.totalorder %v10252_v25, %v9701_v38 }
 0x1e1   : > { %v10262_v33 = vpop.permute.xlu1 %5215  ;;  %v10264_v17 = vpop.permute.xlu0 %5212  ;;  %v1112_v24 = vsub.f32 %v7093_v2, %v9847_v49  ;;  %vm4704_vm12 = vcmp.lt.s32.totalorder %v10252_v25, %v9721_v3  ;;  %vm4703_vm13 = vcmp.lt.s32.totalorder %v10252_v25, %v9726_v27  ;;  %vm4706_vm14 = vcmp.lt.s32.totalorder %v10252_v25, %v9743_v13 }
 0x1e2   : > { %14761 = vst [vmem:[#allocation78_spill] sm:$0xff] %v10262_v33  ;;  %14762 = vst [vmem:[#allocation79_spill] sm:$0xff] %v10264_v17  ;;  %5407 = vperm.xlu1 %8492, %v10109_v14   ;;  %5404 = vperm.xlu0 %8491, %v10112_v50   ;;  %v1363_v33 = vmax.f32 %v1107_v41, 0.0  ;;  %v1364_v17 = vmax.f32 %v1108_v61, 0.0  ;;  %v1110_v14 = vsub.f32 %v7089_v10, %v9839_v22  ;;  %v7441_v50 = vld [vmem:[%s9243_s16 + $0x1c0] sm:$0xff]   ;;  %v10312_v10 = vsel %vm4700_vm8, 1, %v14746_v47 }
 0x1e3   : > { %7890 = vmatmul.mubr.bf16.gmra.mrb[88].mxu0 %v10138_v11  ;;  %v7096_v11 = vunpack.c.l.bf16 %v7440_v34  ;;  %v10298_v41 = vpack.c.bf16 %v1360_v8, %v1359_v7  ;;  %v10300_v61 = vpack.c.bf16 %v1362_v23, %v1361_v29  ;;  %v10318_v29 = vsel %vm4699_vm9, 1, %v14746_v47  ;;  %v7442_v8 = vld [vmem:[%s9243_s16 + $0x1c8] sm:$0xff]  }
 0x1e4   : > { %7893 = vmatprep.mubr.bf16.mxu0 %v10165_v39  ;;  %v1111_v39 = vsub.f32 %v7092_v43, %v9843_v44  ;;  %v10306_v12 = vpack.c.bf16 %v1364_v17, %v1363_v33  ;;  %v7100_v23 = vunpack.c.l.bf16 %v7441_v50  ;;  %v1365_v43 = vmax.f32 %v1109_v54, 0.0 }
 0x1e5   : > { %v10294_v40 = vpop.permute.xlu1 %5221  ;;  %v10296_v6 = vpop.permute.xlu0 %5218  ;;  %v7101_v7 = vunpack.c.h.bf16 %v7441_v50  ;;  %v1113_v32 = vsub.f32 %v7096_v11, %v9885_v58  ;;  %v1114_v33 = vsub.f32 %v7097_v30, %v9889_v51  ;;  %v1368_v54 = vmax.f32 %v1112_v24, 0.0 }
 0x1e6   : > { %14763 = vst [vmem:[#allocation80_spill] sm:$0xff] %v10294_v40  ;;  %14764 = vst [vmem:[#allocation81_spill] sm:$0xff] %v10296_v6  ;;  %5413 = vperm.xlu1 %8492, %v10144_v57   ;;  %5410 = vperm.xlu0 %8491, %v10150_v42   ;;  %v1366_v57 = vmax.f32 %v1110_v14, 0.0  ;;  %v10324_v42 = vsel %vm4702_vm10, 1, %v14746_v47  ;;  %v1367_v34 = vmax.f32 %v1111_v39, 0.0  ;;  %v7443_v14 = vld [vmem:[%s9243_s16 + $0x1d0] sm:$0xff]   ;;  %v1115_v50 = vsub.f32 %v7100_v23, %v9793_v26 }
 0x1e7   : > { %v10346_v11 = vadd.s32 16, %v9290_v1  ;;  %v7104_v30 = vunpack.c.l.bf16 %v7442_v8  ;;  %v7105_v39 = vunpack.c.h.bf16 %v7442_v8  ;;  %v1369_v23 = vmax.f32 %v1113_v32, 0.0  ;;  %v7444_v8 = vld [vmem:[%s9243_s16 + $0x1d8] sm:$0xff]  }
 0x1e8   : > { %v10349_v24 = vpack.c.bf16 %v1366_v57, %v1365_v43  ;;  %v7108_v43 = vunpack.c.l.bf16 %v7443_v14  ;;  %v7109_v57 = vunpack.c.h.bf16 %v7443_v14  ;;  %v10370_v40 = vpack.c.bf16 %v1368_v54, %v1367_v34  ;;  %v7445_v54 = vld [vmem:[%s9243_s16 + $0x1e0] sm:$0xff]  }
 0x1e9   : > { %v10333_v17 = vpop.permute.xlu1 %5227  ;;  %v10335_v2 = vpop.permute.xlu0 %5224  ;;  %vm4705_vm15 = vcmp.lt.s32.totalorder %v10252_v25, %v9751_v19  ;;  %v1371_v32 = vmax.f32 %v1115_v50, 0.0  ;;  %vm4708_vm0 = vcmp.lt.s32.totalorder %v10346_v11, %v9678_v31  ;;  %v1118_v34 = vsub.f32 %v7105_v39, %v9839_v22 }
 0x1ea   : > { %14765 = vst [vmem:[#allocation82_spill] sm:$0xff] %v10333_v17  ;;  %14766 = vst [vmem:[#allocation83_spill] sm:$0xff] %v10335_v2  ;;  %5419 = vperm.xlu1 %8492, %v10157_v37   ;;  %5416 = vperm.xlu0 %8491, %v10160_v53   ;;  %v10355_v17 = vsel %vm4701_vm11, 1, %v14746_v47  ;;  %v10361_v37 = vsel %vm4704_vm12, 1, %v14746_v47  ;;  %v1116_v53 = vsub.f32 %v7101_v7, %v9797_v52  ;;  %v10376_v7 = vsel %vm4703_vm13, 1, %v14746_v47 }
 0x1eb   : > { %7894 = vmatmul.mubr.bf16.gmra.mrb[92].mxu0 %v10188_v36  ;;  %v1370_v36 = vmax.f32 %v1114_v33, 0.0  ;;  %v1117_v33 = vsub.f32 %v7104_v30, %v9835_v21  ;;  %v7112_v25 = vunpack.c.l.bf16 %v7444_v8  ;;  %v1119_v31 = vsub.f32 %v7108_v43, %v9843_v44 }
 0x1ec   : > { %7897 = vmatprep.mubr.bf16.mxu0 %v10219_v59  ;;  %v10382_v59 = vsel %vm4706_vm14, 1, %v14746_v47  ;;  %v1372_v14 = vmax.f32 %v1116_v53, 0.0  ;;  %v1120_v50 = vsub.f32 %v7109_v57, %v9847_v49  ;;  %v10410_v53 = vsel %vm4708_vm0, 1, %v14746_v47 }
 0x1ed   : > { %v10366_v38 = vpop.permute.xlu1 %5233  ;;  %v10368_v2 = vpop.permute.xlu0 %5230  ;;  %vm4710_vm2 = vcmp.lt.s32.totalorder %v10346_v11, %v9696_v46  ;;  %v1373_v57 = vmax.f32 %v1117_v33, 0.0  ;;  %vm4712_vm4 = vcmp.lt.s32.totalorder %v10346_v11, %v9721_v3  ;;  %vm4711_vm5 = vcmp.lt.s32.totalorder %v10346_v11, %v9726_v27 }
 0x1ee   : > { %14767 = vst [vmem:[#allocation84_spill] sm:$0xff] %v10366_v38  ;;  %14768 = vst [vmem:[#allocation85_spill] sm:$0xff] %v10368_v2  ;;  %5425 = vperm.xlu1 %8492, %v10171_v18   ;;  %5422 = vperm.xlu0 %8491, %v10191_v15   ;;  %v10394_v2 = vld [vmem:[%s9275_s21] sm:$0xff]  ;;  %v7113_v38 = vunpack.c.h.bf16 %v7444_v8  ;;  %v10398_v18 = vpack.c.bf16 %v1370_v36, %v1369_v23  ;;  %v10401_v15 = vsel %vm4705_vm15, 1, %v14746_v47  ;;  %v7116_v23 = vunpack.c.l.bf16 %v7445_v54 }
 0x1ef   : > { %vm4707_vm1 = vcmp.lt.s32.totalorder %v10346_v11, %v10394_v2  ;;  %v7117_v36 = vunpack.c.h.bf16 %v7445_v54  ;;  %v1374_v8 = vmax.f32 %v1118_v34, 0.0  ;;  %v10426_v6 = vpack.c.bf16 %v1372_v14, %v1371_v32 }
 0x1f0   : > { %v10417_v43 = vsel %vm4707_vm1, 1, %v14746_v47  ;;  %v10437_v33 = vsel %vm4710_vm2, 1, %v14746_v47  ;;  %v1375_v34 = vmax.f32 %v1119_v31, 0.0  ;;  %vm4714_vm6 = vcmp.lt.s32.totalorder %v10346_v11, %v9743_v13 }
 0x1f1   : > { %v10405_v30 = vpop.permute.xlu1 %5239  ;;  %v10407_v39 = vpop.permute.xlu0 %5236  ;;  %v10450_v46 = vpack.c.bf16 %v1374_v8, %v1373_v57  ;;  %vm4713_vm7 = vcmp.lt.s32.totalorder %v10346_v11, %v9751_v19  ;;  %v7124_v3 = vunpack.c.l.bf16 %v7447_v9  ;;  %v7450_v19 = vld [vmem:[%s9243_s16 + $0x208] sm:$0xff]  }
 0x1f2   : > { %14769 = vst [vmem:[#allocation86_spill] sm:$0xff] %v10405_v30  ;;  %14770 = vst [vmem:[#allocation87_spill] sm:$0xff] %v10407_v39  ;;  %5431 = vperm.xlu1 %8492, %v10203_v28   ;;  %5428 = vperm.xlu0 %8491, %v10209_v45   ;;  %v10420_v30 = vld [vmem:[%s9275_s21 + $0x10] sm:$0xff]  ;;  %v7446_v39 = vld [vmem:[%s9243_s16 + $0x1e8] sm:$0xff]   ;;  %v1121_v28 = vsub.f32 %v7112_v25, %v9885_v58  ;;  %v1122_v45 = vsub.f32 %v7113_v38, %v9889_v51 }
 0x1f3   : > { %vm4709_vm3 = vcmp.lt.s32.totalorder %v10346_v11, %v10420_v30  ;;  %7898 = vmatmul.mubr.bf16.gmra.mrb[96].mxu0 %v10269_v48  ;;  %v1376_v48 = vmax.f32 %v1120_v50, 0.0  ;;  %v1123_v38 = vsub.f32 %v7116_v23, %v9793_v26  ;;  %v7120_v14 = vunpack.c.l.bf16 %v7446_v39  ;;  %v7448_v50 = vld [vmem:[%s9243_s16 + $0x1f8] sm:$0xff]  }
 0x1f4   : > { %7901 = vmatprep.mubr.bf16.mxu0 %v10298_v41  ;;  %v1124_v41 = vsub.f32 %v7117_v36, %v9797_v52  ;;  %v7121_v25 = vunpack.c.h.bf16 %v7446_v39  ;;  %v10456_v27 = vsel %vm4709_vm3, 1, %v14746_v47  ;;  %v10462_v26 = vsel %vm4712_vm4, 1, %v14746_v47 }
 0x1f5   : > { %v10441_v32 = vpop.permute.xlu1 %5245  ;;  %v10443_v54 = vpop.permute.xlu0 %5242  ;;  %v10465_v52 = vadd.s32 17, %v9290_v1  ;;  %v1378_v31 = vmax.f32 %v1122_v45, 0.0  ;;  %v10473_v39 = vpack.c.bf16 %v1376_v48, %v1375_v34  ;;  %v7125_v23 = vunpack.c.h.bf16 %v7447_v9  ;;  %v10490_v9 = vld [vmem:[%s9275_s21 + $0x8] sm:$0xff] }
 0x1f6   : > { %14771 = vst [vmem:[#allocation88_spill] sm:$0xff] %v10441_v32  ;;  %14772 = vst [vmem:[#allocation89_spill] sm:$0xff] %v10443_v54  ;;  %5437 = vperm.xlu1 %8492, %v10215_v20   ;;  %5434 = vperm.xlu0 %8491, %v10232_v35   ;;  %v10468_v35 = vsel %vm4711_vm5, 1, %v14746_v47  ;;  %v1377_v20 = vmax.f32 %v1121_v28, 0.0  ;;  %v1379_v8 = vmax.f32 %v1123_v38, 0.0  ;;  %v1380_v28 = vmax.f32 %v1124_v41, 0.0 }
 0x1f7   : > { %v1125_v45 = vsub.f32 %v7120_v14, %v9835_v21  ;;  %v1126_v13 = vsub.f32 %v7121_v25, %v9839_v22  ;;  %v7449_v32 = vld [vmem:[%s9243_s16 + $0x200] sm:$0xff]   ;;  %v10487_v34 = vsel %vm4714_vm6, 1, %v14746_v47  ;;  %vm4716_vm8 = vcmp.lt.s32.totalorder %v10465_v52, %v10490_v9 }
 0x1f8   : > { %v7128_v48 = vunpack.c.l.bf16 %v7448_v50  ;;  %v7129_v38 = vunpack.c.h.bf16 %v7448_v50  ;;  %v10495_v41 = vpack.c.bf16 %v1378_v31, %v1377_v20  ;;  %v10501_v22 = vsel %vm4713_vm7, 1, %v14746_v47 }
 0x1f9   : > { %v10477_v36 = vpop.permute.xlu1 %5251  ;;  %v10479_v57 = vpop.permute.xlu0 %5248  ;;  %vm4715_vm9 = vcmp.lt.s32.totalorder %v10465_v52, %v10394_v2  ;;  %v7132_v14 = vunpack.c.l.bf16 %v7449_v32  ;;  %v7133_v25 = vunpack.c.h.bf16 %v7449_v32  ;;  %v10518_v31 = vpack.c.bf16 %v1380_v28, %v1379_v8 }
 0x1fa   : > { %14773 = vst [vmem:[#allocation90_spill] sm:$0xff] %v10477_v36  ;;  %14774 = vst [vmem:[#allocation91_spill] sm:$0xff] %v10479_v57  ;;  %5443 = vperm.xlu1 %8492, %v10244_v4   ;;  %5440 = vperm.xlu0 %8491, %v10258_v60   ;;  %v10506_v60 = vld [vmem:[%s9275_s21 + $0x18] sm:$0xff]  ;;  %v1127_v4 = vsub.f32 %v7124_v3, %v9843_v44  ;;  %v10524_v50 = vsel %vm4716_vm8, 1, %v14746_v47  ;;  %v1381_v44 = vmax.f32 %v1125_v45, 0.0  ;;  %v7136_v8 = vunpack.c.l.bf16 %v7450_v19 }
 0x1fb   : > { %7902 = vmatmul.mubr.bf16.gmra.mrb[100].mxu0 %v10300_v61  ;;  %vm4718_vm10 = vcmp.lt.s32.totalorder %v10465_v52, %v10506_v60  ;;  %v1128_v61 = vsub.f32 %v7125_v23, %v9847_v49  ;;  %v10532_v49 = vsel %vm4715_vm9, 1, %v14746_v47  ;;  %vm4717_vm11 = vcmp.lt.s32.totalorder %v10465_v52, %v10420_v30 }
 0x1fc   : > { %7905 = vmatprep.mubr.bf16.mxu0 %v10306_v12  ;;  %v1382_v12 = vmax.f32 %v1126_v13, 0.0  ;;  %v1129_v32 = vsub.f32 %v7128_v48, %v9885_v58  ;;  %v1130_v3 = vsub.f32 %v7129_v38, %v9889_v51  ;;  %v10550_v23 = vadd.s32 18, %v9290_v1  ;;  %v10553_v51 = vld [vmem:[%s9253_s5] sm:$0xff]  ;;  %v10557_v13 = vld [vmem:[%s9253_s5 + $0x8] sm:$0xff] }
 0x1fd   : > { %v10514_v11 = vpop.permute.xlu1 %5257  ;;  %v10516_v20 = vpop.permute.xlu0 %5254  ;;  %v1383_v28 = vmax.f32 %v1127_v4, 0.0  ;;  %v1384_v58 = vmax.f32 %v1128_v61, 0.0  ;;  %v1131_v45 = vsub.f32 %v7132_v14, %v10553_v51  ;;  %v1132_v48 = vsub.f32 %v7133_v25, %v10557_v13  ;;  %v10573_v61 = vld [vmem:[%s9275_s21 + $0x20] sm:$0xff] }
 0x1fe   : > { %14775 = vst [vmem:[#allocation92_spill] sm:$0xff] %v10514_v11  ;;  %14776 = vst [vmem:[#allocation93_spill] sm:$0xff] %v10516_v20  ;;  %5449 = vperm.xlu1 %8492, %v10275_v62   ;;  %5446 = vperm.xlu0 %8491, %v10290_v16   ;;  %v10542_v62 = vsel %vm4718_vm10, 1, %v14746_v47  ;;  %v10545_v16 = vld [vmem:[%s9275_s21 + $0x28] sm:$0xff]  ;;  %v10564_v20 = vpack.c.bf16 %v1382_v12, %v1381_v44  ;;  %v10570_v4 = vsel %vm4717_vm11, 1, %v14746_v47  ;;  %v7137_v14 = vunpack.c.h.bf16 %v7450_v19  ;;  %v10580_v44 = vld [vmem:[%s9275_s21 + $0x38] sm:$0xff] }
 0x1ff   : > { %vm4720_vm12 = vcmp.lt.s32.totalorder %v10465_v52, %v10545_v16  ;;  %vm4719_vm13 = vcmp.lt.s32.totalorder %v10465_v52, %v10573_v61  ;;  %v1385_v25 = vmax.f32 %v1129_v32, 0.0  ;;  %vm4722_vm14 = vcmp.lt.s32.totalorder %v10465_v52, %v10580_v44  ;;  %v10585_v12 = vld [vmem:[%s9275_s21 + $0x30] sm:$0xff]  ;;  %v10603_v19 = vld [vmem:[#allocation10] ss:$0 sm:$0xff] }
 0x200   : > { %vm4721_vm15 = vcmp.lt.s32.totalorder %v10465_v52, %v10585_v12  ;;  %vm4724_vm0 = vcmp.lt.s32.totalorder %v10550_v23, %v10490_v9  ;;  %vm4723_vm1 = vcmp.lt.s32.totalorder %v10550_v23, %v10394_v2  ;;  %v10612_v32 = vsel %vm4719_vm13, 1, %v14746_v47  ;;  %v7451_v11 = vld [vmem:[%s9243_s16 + $0x210] sm:$0xff]  }
 0x201   : > { %v10560_v38 = vpop.permute.xlu1 %5263  ;;  %v10562_v36 = vpop.permute.xlu0 %5260  ;;  %vm4726_vm2 = vcmp.lt.s32.totalorder %v10550_v23, %v10506_v60  ;;  %v10646_v52 = vsel %vm4724_vm0, 1, %v14746_v47  ;;  %vm4725_vm3 = vcmp.lt.s32.totalorder %v10550_v23, %v10420_v30  ;;  %vm4728_vm4 = vcmp.lt.s32.totalorder %v10550_v23, %v10545_v16 }
 0x202   : > { %14777 = vst [vmem:[#allocation94_spill] sm:$0xff] %v10560_v38  ;;  %14778 = vst [vmem:[#allocation95_spill] sm:$0xff] %v10562_v36  ;;  %5455 = vperm.xlu1 %8492, %v10312_v10   ;;  %5452 = vperm.xlu0 %8491, %v10318_v29   ;;  %v1386_v38 = vmax.f32 %v1130_v3, 0.0  ;;  %v10594_v10 = vsel %vm4720_vm12, 1, %v14746_v47  ;;  %v10601_v29 = vsub.f32 %v7136_v8, %v9835_v21  ;;  %v1387_v3 = vmax.f32 %v1131_v45, 0.0  ;;  %v10632_v8 = vld [vmem:[%s9253_s5 + $0x18] sm:$0xff] }
 0x203   : > { %7906 = vmatmul.mubr.bf16.gmra.mrb[104].mxu0 %v10349_v24  ;;  %v10606_v24 = vpack.c.bf16 %v1384_v58, %v1383_v28  ;;  %v1388_v36 = vmax.f32 %v1132_v48, 0.0  ;;  %v10623_v21 = vsel %vm4722_vm14, 1, %v14746_v47  ;;  %v1134_v28 = vsub.f32 %v7137_v14, %v10632_v8  ;;  %v7452_v58 = vld [vmem:[%s9243_s16 + $0x218] sm:$0xff]   ;;  %14783 = vst [vmem:[#allocation100_spill] sm:$0xff] %v10646_v52 }
 0x204   : > { %7909 = vmatprep.mubr.bf16.mxu0 %v10370_v40  ;;  %14781 = vst [vmem:[#allocation98_spill] sm:$0xff] %v10623_v21  ;;  %v10629_v40 = vsel %vm4721_vm15, 1, %v14746_v47  ;;  %v10640_v48 = vpack.c.bf16 %v1386_v38, %v1385_v25  ;;  %v10652_v14 = vsel %vm4723_vm1, 1, %v14746_v47  ;;  %v1389_v38 = vmax.f32 %v10601_v29, 0.0 }
 0x205   : > { %v10615_v57 = vpop.permute.xlu1 %5269  ;;  %v10617_v54 = vpop.permute.xlu0 %5266  ;;  %14782 = vst [vmem:[#allocation99_spill] sm:$0xff] %v10629_v40  ;;  %14784 = vst [vmem:[#allocation101_spill] sm:$0xff] %v10652_v14  ;;  %v7140_v25 = vunpack.c.l.bf16 %v7451_v11  ;;  %v10660_v63 = vpack.c.bf16 %v1388_v36, %v1387_v3  ;;  %v10666_v56 = vsel %vm4726_vm2, 1, %v14746_v47  ;;  %v7144_v55 = vunpack.c.l.bf16 %v7452_v58 }
 0x206   : > { %14779 = vst [vmem:[#allocation96_spill] sm:$0xff] %v10615_v57  ;;  %14780 = vst [vmem:[#allocation97_spill] sm:$0xff] %v10617_v54  ;;  %v7803_v45 = vpop.f32.mrb[0].mxu0  ;;  %5461 = vperm.xlu1 %8492, %v10324_v42   ;;  %5458 = vperm.xlu0 %8491, %v10355_v17   ;;  %v7141_v57 = vunpack.c.h.bf16 %v7451_v11  ;;  %v7453_v54 = vld [vmem:[%s9243_s16 + $0x220] sm:$0xff]   ;;  %v1390_v11 = vmax.f32 %v1134_v28, 0.0  ;;  %v10675_v36 = vsel %vm4725_vm3, 1, %v14746_v47  ;;  %v7145_v3 = vunpack.c.h.bf16 %v7452_v58 }
 0x207   : > { %v1757_v42 = vadd.f32 %v7803_v45, %v10603_v19  ;;  %v1748_v17 = vpop.f32.mrb[1].mxu0  ;;  %14785 = vst [vmem:[#allocation102_spill] sm:$0xff] %v10666_v56  ;;  %14787 = vst [vmem:[#allocation104_spill] sm:$0xff] %v10675_v36  ;;  %vm4727_vm5 = vcmp.lt.s32.totalorder %v10550_v23, %v10573_v61  ;;  %v10688_v58 = vld [vmem:[%s9253_s5 + $0x20] sm:$0xff]  ;;  %v10699_v56 = vld [vmem:[%s9253_s5 + $0x30] sm:$0xff]  ;;  %vm4730_vm6 = vcmp.lt.s32.totalorder %v10550_v23, %v10580_v44 }
 0x208   : > { %v1749_v5 = vadd.f32 %v10603_v19, %v1748_v17  ;;  %v7804_v0 = vpop.f32.mrb[2].mxu0  ;;  %v10706_v21 = vpack.c.bf16 %v1390_v11, %v1389_v38  ;;  %vm4729_vm7 = vcmp.lt.s32.totalorder %v10550_v23, %v10585_v12  ;;  %v7456_v23 = vld [vmem:[%s9243_s16 + $0x238] sm:$0xff]  }
 0x209   : > { %v1760_v45 = vadd.f32 %v7804_v0, %v10603_v19  ;;  %v1751_v14 = vpop.f32.mrb[3].mxu0  ;;  %v10669_v29 = vpop.permute.xlu1 %5275  ;;  %v7148_v0 = vunpack.c.l.bf16 %v7453_v54  ;;  %v2773_v28 = vmax.f32 %v1757_v42, 0.0  ;;  %v10702_v42 = vsub.f32 %v7144_v55, %v10699_v56 }
 0x20a   : > { %14786 = vst [vmem:[#allocation103_spill] sm:$0xff] %v10669_v29  ;;  %v1752_v17 = vadd.f32 %v10603_v19, %v1751_v14  ;;  %v10678_v52 = vpop.permute.xlu0 %5272  ;;  %5467 = vperm.xlu1 %8492, %v10361_v37   ;;  %5464 = vperm.xlu0 %8491, %v10376_v7   ;;  %v10691_v14 = vsub.f32 %v7140_v25, %v10688_v58  ;;  %v10694_v37 = vld [vmem:[%s9253_s5 + $0x28] sm:$0xff] }
 0x20b   : > { %14788 = vst [vmem:[#allocation105_spill] sm:$0xff] %v10678_v52  ;;  %v2774_v29 = vmax.f32 %v1760_v45, 0.0  ;;  %7910 = vmatmul.mubr.bf16.gmra.mrb[108].mxu0 %v10398_v18  ;;  %v1136_v7 = vsub.f32 %v7141_v57, %v10694_v37  ;;  %v2771_v52 = vmax.f32 %v1749_v5, 0.0  ;;  %v7149_v18 = vunpack.c.h.bf16 %v7453_v54  ;;  %v10715_v5 = vld [vmem:[%s9253_s5 + $0x38] sm:$0xff]  ;;  %v7454_v25 = vld [vmem:[%s9243_s16 + $0x228] sm:$0xff]  }
 0x20c   : > { %v2772_v36 = vmax.f32 %v1752_v17, 0.0  ;;  %7913 = vmatprep.mubr.bf16.mxu0 %v10426_v6  ;;  %v10712_v57 = vsel %vm4728_vm4, 1, %v14746_v47  ;;  %v1138_v6 = vsub.f32 %v7145_v3, %v10715_v5  ;;  %v1139_v38 = vsub.f32 %v7148_v0, %v10553_v51 }
 0x20d   : > { %v3028_v45 = vpack.c.bf16 %v2774_v29, %v2773_v28  ;;  %v10704_v40 = vpop.permute.xlu1 %5281  ;;  %14790 = vst [vmem:[#allocation107_spill] sm:$0xff] %v10712_v57  ;;  %v10727_v29 = vadd.s32 19, %v9290_v1  ;;  %v1391_v28 = vmax.f32 %v10691_v14, 0.0  ;;  %v1140_v0 = vsub.f32 %v7149_v18, %v10557_v13 }
 0x20e   : > { %14789 = vst [vmem:[#allocation106_spill] sm:$0xff] %v10704_v40  ;;  %v10719_v17 = vpop.permute.xlu0 %5278  ;;  %v7807_v55 = vpop.f32.mrb[4].mxu0  ;;  %5473 = vperm.xlu1 %8492, %v10382_v59   ;;  %5470 = vperm.xlu0 %8491, %v10401_v15   ;;  %v3027_v54 = vpack.c.bf16 %v2772_v36, %v2771_v52  ;;  %v10735_v59 = vsel %vm4727_vm5, 1, %v14746_v47  ;;  %v1393_v36 = vmax.f32 %v10702_v42, 0.0  ;;  %v7152_v40 = vunpack.c.l.bf16 %v7454_v25 }
 0x20f   : > { %14791 = vst [vmem:[#allocation108_spill] sm:$0xff] %v10719_v17  ;;  %v1773_v11 = vadd.f32 %v7807_v55, %v10603_v19  ;;  %v1764_v3 = vpop.f32.mrb[5].mxu0  ;;  %v1392_v17 = vmax.f32 %v1136_v7, 0.0  ;;  %v10747_v7 = vsel %vm4730_vm6, 1, %v14746_v47  ;;  %v7153_v42 = vunpack.c.h.bf16 %v7454_v25 }
 0x210   : > { %v1765_v15 = vadd.f32 %v10603_v19, %v1764_v3  ;;  %v7808_v52 = vpop.f32.mrb[6].mxu0  ;;  %8073 = vmatprep.mubr.bf16.mxu1 %v3027_v54  ;;  %v1395_v3 = vmax.f32 %v1139_v38, 0.0  ;;  %vm4732_vm8 = vcmp.lt.s32.totalorder %v10727_v29, %v10490_v9  ;;  %vm4731_vm9 = vcmp.lt.s32.totalorder %v10727_v29, %v10394_v2 }
 0x211   : > { %v1776_v55 = vadd.f32 %v7808_v52, %v10603_v19  ;;  %v1767_v57 = vpop.f32.mrb[7].mxu0  ;;  %8074 = vmatmul.mubr.bf16.vlgmr.msra.gmra.mrb[0].mxu1 %v3028_v45  ;;  %v10741_v14 = vpop.permute.xlu1 %5287  ;;  %v1394_v45 = vmax.f32 %v1138_v6, 0.0  ;;  %v2777_v52 = vmax.f32 %v1773_v11, 0.0  ;;  %vm4734_vm10 = vcmp.lt.s32.totalorder %v10727_v29, %v10506_v60  ;;  %v10766_v6 = vld [vmem:[%s9253_s5 + $0x10] sm:$0xff] }
 0x212   : > { %14792 = vst [vmem:[#allocation109_spill] sm:$0xff] %v10741_v14  ;;  %v1768_v18 = vadd.f32 %v10603_v19, %v1767_v57  ;;  %v10752_v54 = vpop.permute.xlu0 %5284  ;;  %5479 = vperm.xlu1 %8492, %v10410_v53   ;;  %5476 = vperm.xlu0 %8491, %v10417_v43   ;;  %v7455_v57 = vld [vmem:[%s9243_s16 + $0x230] sm:$0xff]   ;;  %v2775_v25 = vmax.f32 %v1765_v15, 0.0  ;;  %v1396_v43 = vmax.f32 %v1140_v0, 0.0  ;;  %v1141_v38 = vsub.f32 %v7152_v40, %v10766_v6 }
 0x213   : > { %14793 = vst [vmem:[#allocation110_spill] sm:$0xff] %v10752_v54  ;;  %v2778_v14 = vmax.f32 %v1776_v55, 0.0  ;;  %7914 = vmatmul.mubr.bf16.gmra.mrb[112].mxu0 %v10450_v46  ;;  %v10771_v46 = vpack.c.bf16 %v1392_v17, %v1391_v28  ;;  %v10777_v54 = vsel %vm4729_vm7, 1, %v14746_v47  ;;  %v1142_v15 = vsub.f32 %v7153_v42, %v10632_v8 }
 0x214   : > { %v2776_v53 = vmax.f32 %v1768_v18, 0.0  ;;  %7917 = vmatprep.mubr.bf16.mxu0 %v10473_v39  ;;  %v10784_v40 = vpack.c.bf16 %v1394_v45, %v1393_v36  ;;  %vm4733_vm11 = vcmp.lt.s32.totalorder %v10727_v29, %v10420_v30  ;;  %v7156_v17 = vunpack.c.l.bf16 %v7455_v57 }
 0x215   : > { %v3030_v11 = vpack.c.bf16 %v2778_v14, %v2777_v52  ;;  %v10769_v55 = vpop.permute.xlu1 %5293  ;;  %v10794_v42 = vsel %vm4732_vm8, 1, %v14746_v47  ;;  %v10809_v52 = vpack.c.bf16 %v1396_v43, %v1395_v3  ;;  %vm4736_vm12 = vcmp.lt.s32.totalorder %v10727_v29, %v10545_v16 }
 0x216   : > { %14794 = vst [vmem:[#allocation111_spill] sm:$0xff] %v10769_v55  ;;  %v3029_v39 = vpack.c.bf16 %v2776_v53, %v2775_v25  ;;  %v10780_v0 = vpop.permute.xlu0 %5290  ;;  %v7811_v18 = vpop.f32.mrb[8].mxu0  ;;  %5485 = vperm.xlu1 %8492, %v10437_v33   ;;  %5482 = vperm.xlu0 %8491, %v10456_v27   ;;  %14796 = vst [vmem:[#allocation113_spill] sm:$0xff] %v10794_v42  ;;  %v10800_v33 = vsel %vm4731_vm9, 1, %v14746_v47  ;;  %v10806_v27 = vsel %vm4734_vm10, 1, %v14746_v47  ;;  %v1397_v25 = vmax.f32 %v1141_v38, 0.0 }
 0x217   : > { %14795 = vst [vmem:[#allocation112_spill] sm:$0xff] %v10780_v0  ;;  %v1789_v28 = vadd.f32 %v7811_v18, %v10603_v19  ;;  %v1780_v14 = vpop.f32.mrb[9].mxu0  ;;  %14797 = vst [vmem:[#allocation114_spill] sm:$0xff] %v10800_v33  ;;  %v7157_v53 = vunpack.c.h.bf16 %v7455_v57  ;;  %v7457_v18 = vld [vmem:[%s9243_s16 + $0x240] sm:$0xff]   ;;  %v1398_v42 = vmax.f32 %v1142_v15, 0.0  ;;  %v10827_v57 = vsub.f32 %v7156_v17, %v10688_v58 }
 0x218   : > { %14798 = vst [vmem:[#allocation115_spill] sm:$0xff] %v10806_v27  ;;  %v1781_v36 = vadd.f32 %v10603_v19, %v1780_v14  ;;  %v7812_v45 = vpop.f32.mrb[10].mxu0  ;;  %8077 = vmatprep.mubr.bf16.mxu1 %v3029_v39  ;;  %v10819_v27 = vsel %vm4733_vm11, 1, %v14746_v47  ;;  %v7160_v14 = vunpack.c.l.bf16 %v7456_v23  ;;  %v7161_v38 = vunpack.c.h.bf16 %v7456_v23 }
 0x219   : > { %v1792_v55 = vadd.f32 %v7812_v45, %v10603_v19  ;;  %v1783_v0 = vpop.f32.mrb[11].mxu0  ;;  %8078 = vmatmul.mubr.bf16.gmra.mrb[4].mxu1 %v3030_v11  ;;  %v10813_v33 = vpop.permute.xlu1 %5299  ;;  %v2781_v11 = vmax.f32 %v1789_v28, 0.0  ;;  %vm4735_vm13 = vcmp.lt.s32.totalorder %v10727_v29, %v10573_v61  ;;  %v7164_v39 = vunpack.c.l.bf16 %v7457_v18 }
 0x21a   : > { %14799 = vst [vmem:[#allocation116_spill] sm:$0xff] %v10813_v33  ;;  %v1784_v3 = vadd.f32 %v10603_v19, %v1783_v0  ;;  %v10822_v43 = vpop.permute.xlu0 %5296  ;;  %5491 = vperm.xlu1 %8492, %v10462_v26   ;;  %5488 = vperm.xlu0 %8491, %v10468_v35   ;;  %v2779_v0 = vmax.f32 %v1781_v36, 0.0  ;;  %v10836_v26 = vsub.f32 %v7157_v53, %v10694_v37  ;;  %v7165_v35 = vunpack.c.h.bf16 %v7457_v18 }
 0x21b   : > { %14800 = vst [vmem:[#allocation117_spill] sm:$0xff] %v10822_v43  ;;  %v2782_v15 = vmax.f32 %v1792_v55, 0.0  ;;  %7918 = vmatmul.mubr.bf16.gmra.mrb[116].mxu0 %v10495_v41  ;;  %v10840_v23 = vpack.c.bf16 %v1398_v42, %v1397_v25  ;;  %v10843_v41 = vsel %vm4736_vm12, 1, %v14746_v47  ;;  %v1145_v55 = vsub.f32 %v7160_v14, %v10699_v56  ;;  %v7458_v42 = vld [vmem:[%s9243_s16 + $0x248] sm:$0xff]  }
 0x21c   : > { %v2780_v45 = vmax.f32 %v1784_v3, 0.0  ;;  %7921 = vmatprep.mubr.bf16.mxu0 %v10518_v31  ;;  %v1399_v53 = vmax.f32 %v10827_v57, 0.0  ;;  %v1146_v18 = vsub.f32 %v7161_v38, %v10715_v5  ;;  %vm4738_vm14 = vcmp.lt.s32.totalorder %v10727_v29, %v10580_v44  ;;  %v10867_v57 = vld [vmem:[%s9243_s16 + $0x250] sm:$0xff]  }
 0x21d   : > { %v3032_v17 = vpack.c.bf16 %v2782_v15, %v2781_v11  ;;  %v10838_v33 = vpop.permute.xlu1 %5305  ;;  %v10860_v14 = vsel %vm4735_vm13, 1, %v14746_v47  ;;  %v1400_v15 = vmax.f32 %v10836_v26, 0.0  ;;  %vm4737_vm15 = vcmp.lt.s32.totalorder %v10727_v29, %v10585_v12  ;;  %v7460_v29 = vld [vmem:[%s9243_s16 + $0x258] sm:$0xff]  }
 0x21e   : > { %14801 = vst [vmem:[#allocation118_spill] sm:$0xff] %v10838_v33  ;;  %v3031_v28 = vpack.c.bf16 %v2780_v45, %v2779_v0  ;;  %v10846_v36 = vpop.permute.xlu0 %5302  ;;  %v7815_v31 = vpop.f32.mrb[12].mxu0  ;;  %5497 = vperm.xlu1 %8492, %v10487_v34   ;;  %5494 = vperm.xlu0 %8491, %v10501_v22   ;;  %v1147_v34 = vsub.f32 %v7164_v39, %v10553_v51  ;;  %v10864_v22 = vadd.s32 20, %v9290_v1 }
 0x21f   : > { %14802 = vst [vmem:[#allocation119_spill] sm:$0xff] %v10846_v36  ;;  %v1805_v25 = vadd.f32 %v7815_v31, %v10603_v19  ;;  %v1796_v3 = vpop.f32.mrb[13].mxu0  ;;  %v1148_v0 = vsub.f32 %v7165_v35, %v10557_v13  ;;  %v1401_v36 = vmax.f32 %v1145_v55, 0.0  ;;  %v1402_v35 = vmax.f32 %v1146_v18, 0.0 }
 0x220   : > { %v1797_v38 = vadd.f32 %v10603_v19, %v1796_v3  ;;  %v7816_v11 = vpop.f32.mrb[14].mxu0  ;;  %8081 = vmatprep.mubr.bf16.mxu1 %v3031_v28  ;;  %v10881_v3 = vsel %vm4738_vm14, 1, %v14746_v47  ;;  %v7168_v28 = vunpack.c.l.bf16 %v7458_v42  ;;  %v1403_v43 = vmax.f32 %v1147_v34, 0.0 }
 0x221   : > { %v1808_v45 = vadd.f32 %v7816_v11, %v10603_v19  ;;  %v1799_v31 = vpop.f32.mrb[15].mxu0  ;;  %8082 = vmatmul.mubr.bf16.gmra.mrb[8].mxu1 %v3032_v17  ;;  %v10875_v39 = vpop.permute.xlu1 %5311  ;;  %14804 = vst [vmem:[#allocation121_spill] sm:$0xff] %v10881_v3  ;;  %v7169_v17 = vunpack.c.h.bf16 %v7458_v42  ;;  %v7172_v11 = vunpack.c.l.bf16 %v10867_v57  ;;  %v2785_v55 = vmax.f32 %v1805_v25, 0.0 }
 0x222   : > { %14803 = vst [vmem:[#allocation120_spill] sm:$0xff] %v10875_v39  ;;  %v1800_v26 = vadd.f32 %v10603_v19, %v1799_v31  ;;  %v10884_v33 = vpop.permute.xlu0 %5308  ;;  %5503 = vperm.xlu1 %8492, %v10524_v50   ;;  %5500 = vperm.xlu0 %8491, %v10532_v49   ;;  %vm4740_vm0 = vcmp.lt.s32.totalorder %v10864_v22, %v10490_v9  ;;  %v2783_v3 = vmax.f32 %v1797_v38, 0.0  ;;  %v10911_v38 = vsel %vm4737_vm15, 1, %v14746_v47 }
 0x223   : > { %14805 = vst [vmem:[#allocation122_spill] sm:$0xff] %v10884_v33  ;;  %v2786_v39 = vmax.f32 %v1808_v45, 0.0  ;;  %7922 = vmatmul.mubr.bf16.gmra.mrb[120].mxu0 %v10564_v20  ;;  %v1404_v33 = vmax.f32 %v1148_v0, 0.0  ;;  %vm4739_vm1 = vcmp.lt.s32.totalorder %v10864_v22, %v10394_v2  ;;  %v1149_v18 = vsub.f32 %v7168_v28, %v10766_v6  ;;  %v7461_v28 = vld [vmem:[%s9243_s16 + $0x260] sm:$0xff]  }
 0x224   : > { %v2784_v31 = vmax.f32 %v1800_v26, 0.0  ;;  %7925 = vmatprep.mubr.bf16.mxu0 %v10606_v24  ;;  %vm4742_vm2 = vcmp.lt.s32.totalorder %v10864_v22, %v10506_v60  ;;  %v7173_v20 = vunpack.c.h.bf16 %v10867_v57  ;;  %v10905_v24 = vpack.c.bf16 %v1400_v15, %v1399_v53 }
 0x225   : > { %v3034_v50 = vpack.c.bf16 %v2786_v39, %v2785_v55  ;;  %v10895_v49 = vpop.permute.xlu1 %5317  ;;  %v1150_v0 = vsub.f32 %v7169_v17, %v10632_v8  ;;  %v10915_v39 = vpack.c.bf16 %v1402_v35, %v1401_v36  ;;  %v10937_v36 = vsel %vm4742_vm2, 1, %v14746_v47 }
 0x226   : > { %14806 = vst [vmem:[#allocation123_spill] sm:$0xff] %v10895_v49  ;;  %v3033_v42 = vpack.c.bf16 %v2784_v31, %v2783_v3  ;;  %v10901_v25 = vpop.permute.xlu0 %5314  ;;  %v7819_v34 = vpop.f32.mrb[16].mxu0  ;;  %5509 = vperm.xlu1 %8492, %v10542_v62   ;;  %5506 = vperm.xlu0 %8491, %v10570_v4   ;;  %v10921_v62 = vsel %vm4740_vm0, 1, %v14746_v47  ;;  %v10927_v4 = vsel %vm4739_vm1, 1, %v14746_v47  ;;  %v10931_v3 = vpack.c.bf16 %v1404_v33, %v1403_v43 }
 0x227   : > { %14807 = vst [vmem:[#allocation124_spill] sm:$0xff] %v10901_v25  ;;  %v1821_v57 = vadd.f32 %v7819_v34, %v10603_v19  ;;  %v1812_v45 = vpop.f32.mrb[17].mxu0  ;;  %vm4741_vm3 = vcmp.lt.s32.totalorder %v10864_v22, %v10420_v30  ;;  %v1405_v55 = vmax.f32 %v1149_v18, 0.0  ;;  %v1151_v33 = vsub.f32 %v7172_v11, %v10688_v58  ;;  %v14817_v25 = vld [vmem:[#allocation100_spill] sm:$0xff] }
 0x228   : > { %v1813_v53 = vadd.f32 %v10603_v19, %v1812_v45  ;;  %v7820_v15 = vpop.f32.mrb[18].mxu0  ;;  %8085 = vmatprep.mubr.bf16.mxu1 %v3033_v42  ;;  %v1152_v43 = vsub.f32 %v7173_v20, %v10694_v37  ;;  %v1406_v34 = vmax.f32 %v1150_v0, 0.0  ;;  %vm4744_vm4 = vcmp.lt.s32.totalorder %v10864_v22, %v10545_v16 }
 0x229   : > { %v1824_v26 = vadd.f32 %v7820_v15, %v10603_v19  ;;  %v1815_v35 = vpop.f32.mrb[19].mxu0  ;;  %8086 = vmatmul.mubr.bf16.gmra.mrb[12].mxu1 %v3034_v50  ;;  %v10943_v17 = vpop.permute.xlu1 %5323  ;;  %v7176_v50 = vunpack.c.l.bf16 %v7460_v29  ;;  %v2789_v45 = vmax.f32 %v1821_v57, 0.0  ;;  %v7177_v11 = vunpack.c.h.bf16 %v7460_v29 }
 0x22a   : > { %14808 = vst [vmem:[#allocation125_spill] sm:$0xff] %v10943_v17  ;;  %v1816_v31 = vadd.f32 %v10603_v19, %v1815_v35  ;;  %v10948_v42 = vpop.permute.xlu0 %5320  ;;  %5515 = vperm.xlu1 %8492, %v10594_v10   ;;  %5512 = vperm.xlu0 %8491, %v10612_v32   ;;  %v7180_v18 = vunpack.c.l.bf16 %v7461_v28  ;;  %v2787_v20 = vmax.f32 %v1813_v53, 0.0  ;;  %v10960_v10 = vsel %vm4741_vm3, 1, %v14746_v47  ;;  %v14812_v53 = vld [vmem:[#allocation98_spill] sm:$0xff] }
 0x22b   : > { %14809 = vst [vmem:[#allocation126_spill] sm:$0xff] %v10948_v42  ;;  %v2790_v15 = vmax.f32 %v1824_v26, 0.0  ;;  %7926 = vmatmul.mubr.bf16.gmra.mrb[124].mxu0 %v10640_v48  ;;  %v7181_v32 = vunpack.c.h.bf16 %v7461_v28  ;;  %v1407_v57 = vmax.f32 %v1151_v33, 0.0  ;;  %v1408_v26 = vmax.f32 %v1152_v43, 0.0  ;;  %v7462_v43 = vld [vmem:[%s9243_s16 + $0x268] sm:$0xff]  }
 0x22c   : > { %v2788_v17 = vmax.f32 %v1816_v31, 0.0  ;;  %7929 = vmatprep.mubr.bf16.mxu0 %v10660_v63  ;;  %vm4743_vm5 = vcmp.lt.s32.totalorder %v10864_v22, %v10573_v61  ;;  %v14813_v31 = vld [vmem:[#allocation99_spill] sm:$0xff]  ;;  %v10970_v42 = vpack.c.bf16 %v1406_v34, %v1405_v55  ;;  %v10976_v28 = vsel %vm4744_vm4, 1, %v14746_v47 }
 0x22d   : > { %v3036_v0 = vpack.c.bf16 %v2790_v15, %v2789_v45  ;;  %v10962_v35 = vpop.permute.xlu1 %5329  ;;  %v1153_v33 = vsub.f32 %v7176_v50, %v10699_v56  ;;  %v1154_v15 = vsub.f32 %v7177_v11, %v10715_v5  ;;  %vm4746_vm6 = vcmp.lt.s32.totalorder %v10864_v22, %v10580_v44 }
 0x22e   : > { %14810 = vst [vmem:[#allocation127_spill] sm:$0xff] %v10962_v35  ;;  %v3035_v48 = vpack.c.bf16 %v2788_v17, %v2787_v20  ;;  %v10966_v29 = vpop.permute.xlu0 %5326  ;;  %v7823_v63 = vpop.f32.mrb[20].mxu0  ;;  %5521 = vperm.xlu1 %8492, %v14812_v53   ;;  %5518 = vperm.xlu0 %8491, %v14813_v31   ;;  %v1155_v55 = vsub.f32 %v7180_v18, %v10553_v51  ;;  %v10990_v50 = vsel %vm4743_vm5, 1, %v14746_v47  ;;  %v10994_v53 = vadd.s32 21, %v9290_v1 }
 0x22f   : > { %14811 = vst [vmem:[#allocation128_spill] sm:$0xff] %v10966_v29  ;;  %v1837_v17 = vadd.f32 %v7823_v63, %v10603_v19  ;;  %v1828_v45 = vpop.f32.mrb[21].mxu0  ;;  %14814 = vst [vmem:[#allocation98_spill] sm:$0xff] %v10990_v50  ;;  %v1156_v63 = vsub.f32 %v7181_v32, %v10557_v13  ;;  %v7185_v29 = vunpack.c.h.bf16 %v7462_v43  ;;  %v14818_v32 = vld [vmem:[#allocation101_spill] sm:$0xff]  ;;  %v1409_v50 = vmax.f32 %v1153_v33, 0.0 }
 0x230   : > { %v1829_v34 = vadd.f32 %v10603_v19, %v1828_v45  ;;  %v7824_v20 = vpop.f32.mrb[22].mxu0  ;;  %8089 = vmatprep.mubr.bf16.mxu1 %v3035_v48  ;;  %v10999_v45 = vpack.c.bf16 %v1408_v26, %v1407_v57  ;;  %v7184_v48 = vunpack.c.l.bf16 %v7462_v43  ;;  %vm4745_vm7 = vcmp.lt.s32.totalorder %v10864_v22, %v10585_v12  ;;  %v7464_v22 = vld [vmem:[%s9243_s16 + $0x278] sm:$0xff]  }
 0x231   : > { %v1840_v11 = vadd.f32 %v7824_v20, %v10603_v19  ;;  %v1831_v31 = vpop.f32.mrb[23].mxu0  ;;  %8090 = vmatmul.mubr.bf16.gmra.mrb[16].mxu1 %v3036_v0  ;;  %v10997_v18 = vpop.permute.xlu1 %5335  ;;  %v11010_v0 = vsel %vm4746_vm6, 1, %v14746_v47  ;;  %v2793_v57 = vmax.f32 %v1837_v17, 0.0  ;;  %v1410_v43 = vmax.f32 %v1154_v15, 0.0 }
 0x232   : > { %14815 = vst [vmem:[#allocation99_spill] sm:$0xff] %v10997_v18  ;;  %v1832_v35 = vadd.f32 %v10603_v19, %v1831_v31  ;;  %v11002_v49 = vpop.permute.xlu0 %5332  ;;  %5527 = vperm.xlu1 %8492, %v14817_v25   ;;  %5524 = vperm.xlu0 %8491, %v14818_v32   ;;  %v1411_v20 = vmax.f32 %v1155_v55, 0.0  ;;  %v7463_v31 = vld [vmem:[%s9243_s16 + $0x270] sm:$0xff]   ;;  %v2791_v25 = vmax.f32 %v1829_v34, 0.0  ;;  %v1412_v33 = vmax.f32 %v1156_v63, 0.0 }
 0x233   : > { %14816 = vst [vmem:[#allocation129_spill] sm:$0xff] %v11002_v49  ;;  %v2794_v26 = vmax.f32 %v1840_v11, 0.0  ;;  %7930 = vmatmul.mubr.bf16.gmra.mrb[128].mxu0 %v10706_v21  ;;  %vm4748_vm8 = vcmp.lt.s32.totalorder %v10994_v53, %v10490_v9  ;;  %vm4747_vm9 = vcmp.lt.s32.totalorder %v10994_v53, %v10394_v2  ;;  %v1157_v21 = vsub.f32 %v7184_v48, %v10766_v6  ;;  %v14822_v34 = vld [vmem:[#allocation104_spill] sm:$0xff] }
 0x234   : > { %v2792_v18 = vmax.f32 %v1832_v35, 0.0  ;;  %7933 = vmatprep.mubr.bf16.mxu0 %v10771_v46  ;;  %v1158_v17 = vsub.f32 %v7185_v29, %v10632_v8  ;;  %v14821_v46 = vld [vmem:[#allocation102_spill] sm:$0xff]  ;;  %v11033_v63 = vsel %vm4745_vm7, 1, %v14746_v47  ;;  %vm4750_vm10 = vcmp.lt.s32.totalorder %v10994_v53, %v10506_v60 }
 0x235   : > { %v3038_v32 = vpack.c.bf16 %v2794_v26, %v2793_v57  ;;  %v11019_v49 = vpop.permute.xlu1 %5341  ;;  %v7188_v11 = vunpack.c.l.bf16 %v7463_v31  ;;  %v11038_v48 = vpack.c.bf16 %v1410_v43, %v1409_v50  ;;  %v11044_v57 = vsel %vm4748_vm8, 1, %v14746_v47  ;;  %v7465_v43 = vld [vmem:[%s9243_s16 + $0x280] sm:$0xff]  }
 0x236   : > { %14819 = vst [vmem:[#allocation100_spill] sm:$0xff] %v11019_v49  ;;  %v3037_v15 = vpack.c.bf16 %v2792_v18, %v2791_v25  ;;  %v11025_v55 = vpop.permute.xlu0 %5338  ;;  %v7827_v35 = vpop.f32.mrb[24].mxu0  ;;  %5533 = vperm.xlu1 %8492, %v14821_v46   ;;  %5530 = vperm.xlu0 %8491, %v14822_v34   ;;  %14823 = vst [vmem:[#allocation102_spill] sm:$0xff] %v11044_v57  ;;  %v7189_v26 = vunpack.c.h.bf16 %v7463_v31  ;;  %v11048_v34 = vpack.c.bf16 %v1412_v33, %v1411_v20 }
 0x237   : > { %14820 = vst [vmem:[#allocation101_spill] sm:$0xff] %v11025_v55  ;;  %v1853_v29 = vadd.f32 %v7827_v35, %v10603_v19  ;;  %v1844_v18 = vpop.f32.mrb[25].mxu0  ;;  %v11054_v50 = vsel %vm4747_vm9, 1, %v14746_v47  ;;  %vm4749_vm11 = vcmp.lt.s32.totalorder %v10994_v53, %v10420_v30  ;;  %v11066_v20 = vsel %vm4750_vm10, 1, %v14746_v47  ;;  %v14828_v55 = vld [vmem:[#allocation107_spill] sm:$0xff] }
 0x238   : > { %v1845_v25 = vadd.f32 %v10603_v19, %v1844_v18  ;;  %v7828_v46 = vpop.f32.mrb[26].mxu0  ;;  %8093 = vmatprep.mubr.bf16.mxu1 %v3037_v15  ;;  %14824 = vst [vmem:[#allocation104_spill] sm:$0xff] %v11054_v50  ;;  %v1413_v18 = vmax.f32 %v1157_v21, 0.0  ;;  %v1414_v15 = vmax.f32 %v1158_v17, 0.0  ;;  %14826 = vst [vmem:[#allocation131_spill] sm:$0xff] %v11066_v20  ;;  %v7193_v21 = vunpack.c.h.bf16 %v7464_v22  ;;  %v7466_v30 = vld [vmem:[%s9243_s16 + $0x288] sm:$0xff]  }
 0x239   : > { %v1856_v35 = vadd.f32 %v7828_v46, %v10603_v19  ;;  %v1847_v31 = vpop.f32.mrb[27].mxu0  ;;  %8094 = vmatmul.mubr.bf16.gmra.mrb[20].mxu1 %v3038_v32  ;;  %v11060_v49 = vpop.permute.xlu1 %5347  ;;  %v11074_v32 = vsub.f32 %v7188_v11, %v10688_v58  ;;  %v7192_v46 = vunpack.c.l.bf16 %v7464_v22  ;;  %v2797_v17 = vmax.f32 %v1853_v29, 0.0 }
 0x23a   : > { %14825 = vst [vmem:[#allocation130_spill] sm:$0xff] %v11060_v49  ;;  %v1848_v2 = vadd.f32 %v10603_v19, %v1847_v31  ;;  %v11069_v33 = vpop.permute.xlu0 %5344  ;;  %5539 = vperm.xlu1 %8492, %v14828_v55   ;;  %5536 = vperm.xlu0 %8491, %v10735_v59   ;;  %v1160_v50 = vsub.f32 %v7189_v26, %v10694_v37  ;;  %v7196_v20 = vunpack.c.l.bf16 %v7465_v43  ;;  %v2795_v57 = vmax.f32 %v1845_v25, 0.0 }
 0x23b   : > { %14827 = vst [vmem:[#allocation132_spill] sm:$0xff] %v11069_v33  ;;  %v2798_v49 = vmax.f32 %v1856_v35, 0.0  ;;  %7934 = vmatmul.mubr.bf16.gmra.mrb[132].mxu0 %v10784_v40  ;;  %vm4752_vm12 = vcmp.lt.s32.totalorder %v10994_v53, %v10545_v16  ;;  %v7197_v59 = vunpack.c.h.bf16 %v7465_v43  ;;  %v11083_v22 = vpack.c.bf16 %v1414_v15, %v1413_v18 }
 0x23c   : > { %v2796_v31 = vmax.f32 %v1848_v2, 0.0  ;;  %7937 = vmatprep.mubr.bf16.mxu0 %v10809_v52  ;;  %v11089_v40 = vsel %vm4749_vm11, 1, %v14746_v47  ;;  %vm4751_vm13 = vcmp.lt.s32.totalorder %v10994_v53, %v10573_v61  ;;  %v1161_v25 = vsub.f32 %v7192_v46, %v10699_v56 }
 0x23d   : > { %v3040_v55 = vpack.c.bf16 %v2798_v49, %v2797_v17  ;;  %v11081_v11 = vpop.permute.xlu1 %5353  ;;  %v1415_v49 = vmax.f32 %v11074_v32, 0.0  ;;  %v1162_v43 = vsub.f32 %v7193_v21, %v10715_v5  ;;  %v1416_v32 = vmax.f32 %v1160_v50, 0.0 }
 0x23e   : > { %14829 = vst [vmem:[#allocation107_spill] sm:$0xff] %v11081_v11  ;;  %v3039_v52 = vpack.c.bf16 %v2796_v31, %v2795_v57  ;;  %v11093_v29 = vpop.permute.xlu0 %5350  ;;  %v7831_v26 = vpop.f32.mrb[28].mxu0  ;;  %5545 = vperm.xlu1 %8492, %v10747_v7   ;;  %5542 = vperm.xlu0 %8491, %v10777_v54   ;;  %v11106_v57 = vsel %vm4752_vm12, 1, %v14746_v47  ;;  %v1163_v7 = vsub.f32 %v7196_v20, %v10553_v51  ;;  %v11110_v54 = vadd.s32 22, %v9290_v1 }
 0x23f   : > { %14830 = vst [vmem:[#allocation133_spill] sm:$0xff] %v11093_v29  ;;  %v1869_v35 = vadd.f32 %v7831_v26, %v10603_v19  ;;  %v1860_v18 = vpop.f32.mrb[29].mxu0  ;;  %14831 = vst [vmem:[#allocation134_spill] sm:$0xff] %v11106_v57  ;;  %v11117_v46 = vsel %vm4751_vm13, 1, %v14746_v47  ;;  %v1164_v21 = vsub.f32 %v7197_v59, %v10557_v13  ;;  %vm4754_vm14 = vcmp.lt.s32.totalorder %v10994_v53, %v10580_v44  ;;  %v14836_v59 = vld [vmem:[#allocation114_spill] sm:$0xff] }
 0x240   : > { %v1861_v15 = vadd.f32 %v10603_v19, %v1860_v18  ;;  %v7832_v2 = vpop.f32.mrb[30].mxu0  ;;  %8097 = vmatprep.mubr.bf16.mxu1 %v3039_v52  ;;  %14832 = vst [vmem:[#allocation135_spill] sm:$0xff] %v11117_v46  ;;  %vm4753_vm15 = vcmp.lt.s32.totalorder %v10994_v53, %v10585_v12  ;;  %v7200_v50 = vunpack.c.l.bf16 %v7466_v30  ;;  %v14835_v18 = vld [vmem:[#allocation113_spill] sm:$0xff]  ;;  %v1419_v33 = vmax.f32 %v1163_v7, 0.0  ;;  %v7467_v46 = vld [vmem:[%s9243_s16 + $0x290] sm:$0xff]  }
 0x241   : > { %v1872_v17 = vadd.f32 %v7832_v2, %v10603_v19  ;;  %v1863_v31 = vpop.f32.mrb[31].mxu0  ;;  %8098 = vmatmul.mubr.bf16.gmra.mrb[24].mxu1 %v3040_v55  ;;  %v11121_v20 = vpop.permute.xlu1 %5359  ;;  %v1417_v55 = vmax.f32 %v1161_v25, 0.0  ;;  %v1418_v2 = vmax.f32 %v1162_v43, 0.0  ;;  %v2801_v29 = vmax.f32 %v1869_v35, 0.0 }
 0x242   : > { %14833 = vst [vmem:[#allocation136_spill] sm:$0xff] %v11121_v20  ;;  %v1864_v52 = vadd.f32 %v10603_v19, %v1863_v31  ;;  %v11128_v26 = vpop.permute.xlu0 %5356  ;;  %5551 = vperm.xlu1 %8492, %v14835_v18   ;;  %5548 = vperm.xlu0 %8491, %v14836_v59   ;;  %v7201_v20 = vunpack.c.h.bf16 %v7466_v30  ;;  %vm4756_vm0 = vcmp.lt.s32.totalorder %v11110_v54, %v10490_v9  ;;  %v2799_v31 = vmax.f32 %v1861_v15, 0.0  ;;  %v11138_v18 = vld [vmem:[%s9275_s21] sm:$0xff] }
 0x243   : > { %14834 = vst [vmem:[#allocation137_spill] sm:$0xff] %v11128_v26  ;;  %v2802_v11 = vmax.f32 %v1872_v17, 0.0  ;;  %7938 = vmatmul.mubr.bf16.gmra.mrb[136].mxu0 %v10840_v23  ;;  %v1420_v26 = vmax.f32 %v1164_v21, 0.0  ;;  %vm4755_vm1 = vcmp.lt.s32.totalorder %v11110_v54, %v11138_v18  ;;  %v11144_v23 = vpack.c.bf16 %v1416_v32, %v1415_v49  ;;  %v14839_v21 = vld [vmem:[#allocation115_spill] sm:$0xff]  ;;  %v7468_v32 = vld [vmem:[%s9243_s16 + $0x298] sm:$0xff]  }
 0x244   : > { %v2800_v57 = vmax.f32 %v1864_v52, 0.0  ;;  %7941 = vmatprep.mubr.bf16.mxu0 %v10905_v24  ;;  %v11150_v30 = vsel %vm4754_vm14, 1, %v14746_v47  ;;  %v1165_v24 = vsub.f32 %v7200_v50, %v10766_v6  ;;  %v7204_v49 = vunpack.c.l.bf16 %v7467_v46 }
 0x245   : > { %v3042_v25 = vpack.c.bf16 %v2802_v11, %v2801_v29  ;;  %v11142_v43 = vpop.permute.xlu1 %5365  ;;  %v11161_v11 = vsel %vm4753_vm15, 1, %v14746_v47  ;;  %v1166_v29 = vsub.f32 %v7201_v20, %v10632_v8  ;;  %v11166_v50 = vpack.c.bf16 %v1418_v2, %v1417_v55  ;;  %v7469_v2 = vld [vmem:[%s9243_s16 + $0x2a0] sm:$0xff]  }
 0x246   : > { %14837 = vst [vmem:[#allocation113_spill] sm:$0xff] %v11142_v43  ;;  %v3041_v35 = vpack.c.bf16 %v2800_v57, %v2799_v31  ;;  %v11153_v7 = vpop.permute.xlu0 %5362  ;;  %v7835_v15 = vpop.f32.mrb[32].mxu0  ;;  %5557 = vperm.xlu1 %8492, %v14839_v21   ;;  %5554 = vperm.xlu0 %8491, %v10819_v27   ;;  %v11172_v27 = vsel %vm4756_vm0, 1, %v14746_v47  ;;  %v11178_v53 = vsel %vm4755_vm1, 1, %v14746_v47  ;;  %v11181_v59 = vpack.c.bf16 %v1420_v26, %v1419_v33  ;;  %v11190_v43 = vld [vmem:[%s9275_s21 + $0x10] sm:$0xff] }
 0x247   : > { %14838 = vst [vmem:[#allocation114_spill] sm:$0xff] %v11153_v7  ;;  %v1885_v57 = vadd.f32 %v7835_v15, %v10603_v19  ;;  %v1876_v17 = vpop.f32.mrb[33].mxu0  ;;  %vm4758_vm2 = vcmp.lt.s32.totalorder %v11110_v54, %v10506_v60  ;;  %v7205_v55 = vunpack.c.h.bf16 %v7467_v46  ;;  %v1421_v21 = vmax.f32 %v1165_v24, 0.0 }
 0x248   : > { %v1877_v20 = vadd.f32 %v10603_v19, %v1876_v17  ;;  %v7836_v52 = vpop.f32.mrb[34].mxu0  ;;  %8101 = vmatprep.mubr.bf16.mxu1 %v3041_v35  ;;  %vm4757_vm3 = vcmp.lt.s32.totalorder %v11110_v54, %v11190_v43  ;;  %v7208_v35 = vunpack.c.l.bf16 %v7468_v32  ;;  %v1422_v46 = vmax.f32 %v1166_v29, 0.0 }
 0x249   : > { %v1888_v9 = vadd.f32 %v7836_v52, %v10603_v19  ;;  %v1879_v31 = vpop.f32.mrb[35].mxu0  ;;  %8102 = vmatmul.mubr.bf16.gmra.mrb[28].mxu1 %v3042_v25  ;;  %v11187_v15 = vpop.permute.xlu1 %5371  ;;  %v11200_v25 = vsub.f32 %v7204_v49, %v10688_v58  ;;  %v7209_v17 = vunpack.c.h.bf16 %v7468_v32  ;;  %v2805_v24 = vmax.f32 %v1885_v57, 0.0 }
 0x24a   : > { %14840 = vst [vmem:[#allocation115_spill] sm:$0xff] %v11187_v15  ;;  %v1880_v33 = vadd.f32 %v10603_v19, %v1879_v31  ;;  %v11195_v26 = vpop.permute.xlu0 %5368  ;;  %5563 = vperm.xlu1 %8492, %v10843_v41   ;;  %5560 = vperm.xlu0 %8491, %v10860_v14   ;;  %vm4760_vm4 = vcmp.lt.s32.totalorder %v11110_v54, %v10545_v16  ;;  %v7212_v15 = vunpack.c.l.bf16 %v7469_v2  ;;  %v2803_v31 = vmax.f32 %v1877_v20, 0.0 }
 0x24b   : > { %14841 = vst [vmem:[#allocation138_spill] sm:$0xff] %v11195_v26  ;;  %v2806_v52 = vmax.f32 %v1888_v9, 0.0  ;;  %7942 = vmatmul.mubr.bf16.gmra.mrb[140].mxu0 %v10915_v39  ;;  %v1168_v41 = vsub.f32 %v7205_v55, %v10694_v37  ;;  %v7213_v14 = vunpack.c.h.bf16 %v7469_v2  ;;  %v11213_v49 = vsel %vm4758_vm2, 1, %v14746_v47  ;;  %v14844_v55 = vld [vmem:[#allocation121_spill] sm:$0xff] }
 0x24c   : > { %v2804_v7 = vmax.f32 %v1880_v33, 0.0  ;;  %7945 = vmatprep.mubr.bf16.mxu0 %v10931_v3  ;;  %v11219_v39 = vsel %vm4757_vm3, 1, %v14746_v47  ;;  %v11222_v3 = vsub.f32 %v7208_v35, %v10699_v56  ;;  %v11228_v60 = vpack.c.bf16 %v1422_v46, %v1421_v21  ;;  %v7470_v21 = vld [vmem:[%s9243_s16 + $0x2a8] sm:$0xff]  }
 0x24d   : > { %v3044_v29 = vpack.c.bf16 %v2806_v52, %v2805_v24  ;;  %v11207_v26 = vpop.permute.xlu1 %5377  ;;  %v11234_v2 = vsel %vm4760_vm4, 1, %v14746_v47  ;;  %v1170_v9 = vsub.f32 %v7209_v17, %v10715_v5  ;;  %vm4759_vm5 = vcmp.lt.s32.totalorder %v11110_v54, %v10573_v61 }
 0x24e   : > { %14842 = vst [vmem:[#allocation139_spill] sm:$0xff] %v11207_v26  ;;  %v3043_v32 = vpack.c.bf16 %v2804_v7, %v2803_v31  ;;  %v11224_v57 = vpop.permute.xlu0 %5374  ;;  %v7839_v20 = vpop.f32.mrb[36].mxu0  ;;  %5569 = vperm.xlu1 %8492, %v14844_v55   ;;  %5566 = vperm.xlu0 %8491, %v10911_v38   ;;  %v1171_v35 = vsub.f32 %v7212_v15, %v10553_v51  ;;  %v11242_v38 = vadd.s32 23, %v9290_v1  ;;  %v1423_v46 = vmax.f32 %v11200_v25, 0.0  ;;  %v7471_v15 = vld [vmem:[%s9243_s16 + $0x2b0] sm:$0xff]  }
 0x24f   : > { %14843 = vst [vmem:[#allocation140_spill] sm:$0xff] %v11224_v57  ;;  %v1901_v56 = vadd.f32 %v7839_v20, %v10603_v19  ;;  %v1892_v7 = vpop.f32.mrb[37].mxu0  ;;  %v1424_v17 = vmax.f32 %v1168_v41, 0.0  ;;  %v1172_v24 = vsub.f32 %v7213_v14, %v10557_v13  ;;  %v1425_v51 = vmax.f32 %v11222_v3, 0.0 }
 0x250   : > { %v1893_v33 = vadd.f32 %v10603_v19, %v1892_v7  ;;  %v7840_v16 = vpop.f32.mrb[38].mxu0  ;;  %8105 = vmatprep.mubr.bf16.mxu1 %v3043_v32  ;;  %vm4762_vm6 = vcmp.lt.s32.totalorder %v11110_v54, %v10580_v44  ;;  %vm4761_vm7 = vcmp.lt.s32.totalorder %v11110_v54, %v10585_v12  ;;  %v1426_v13 = vmax.f32 %v1170_v9, 0.0  ;;  %v11264_v7 = vld [vmem:[%s9275_s21 + $0x8] sm:$0xff]  ;;  %v7472_v54 = vld [vmem:[%s9243_s16 + $0x2b8] sm:$0xff]  }
 0x251   : > { %v1904_v52 = vadd.f32 %v7840_v16, %v10603_v19  ;;  %v1895_v31 = vpop.f32.mrb[39].mxu0  ;;  %8106 = vmatmul.mubr.bf16.gmra.mrb[32].mxu1 %v3044_v29  ;;  %v11249_v20 = vpop.permute.xlu1 %5383  ;;  %v7216_v14 = vunpack.c.l.bf16 %v7470_v21  ;;  %v7217_v29 = vunpack.c.h.bf16 %v7470_v21  ;;  %v2809_v32 = vmax.f32 %v1901_v56, 0.0 }
 0x252   : > { %14845 = vst [vmem:[#allocation121_spill] sm:$0xff] %v11249_v20  ;;  %v1896_v25 = vadd.f32 %v10603_v19, %v1895_v31  ;;  %v11258_v41 = vpop.permute.xlu0 %5380  ;;  %5575 = vperm.xlu1 %8492, %v10921_v62   ;;  %5572 = vperm.xlu0 %8491, %v10927_v4   ;;  %v1427_v55 = vmax.f32 %v1171_v35, 0.0  ;;  %vm4764_vm8 = vcmp.lt.s32.totalorder %v11242_v38, %v11264_v7  ;;  %v2807_v19 = vmax.f32 %v1893_v33, 0.0 }
 0x253   : > { %14846 = vst [vmem:[#allocation141_spill] sm:$0xff] %v11258_v41  ;;  %v2810_v3 = vmax.f32 %v1904_v52, 0.0  ;;  %7946 = vmatmul.mubr.bf16.gmra.mrb[144].mxu0 %v10970_v42  ;;  %v1428_v62 = vmax.f32 %v1172_v24, 0.0  ;;  %v7220_v31 = vunpack.c.l.bf16 %v7471_v15  ;;  %v11271_v21 = vpack.c.bf16 %v1424_v17, %v1423_v46  ;;  %v11291_v17 = vld [vmem:[#allocation10] ss:$0 sm:$0xff] }
 0x254   : > { %v2808_v16 = vmax.f32 %v1896_v25, 0.0  ;;  %7949 = vmatprep.mubr.bf16.mxu0 %v10999_v45  ;;  %v11277_v42 = vsel %vm4759_vm5, 1, %v14746_v47  ;;  %v7221_v56 = vunpack.c.h.bf16 %v7471_v15  ;;  %v11287_v45 = vsel %vm4762_vm6, 1, %v14746_v47 }
 0x255   : > { %v3046_v4 = vpack.c.bf16 %v2810_v3, %v2809_v32  ;;  %v11269_v9 = vpop.permute.xlu1 %5389  ;;  %v1173_v61 = vsub.f32 %v7216_v14, %v10766_v6  ;;  %v1174_v46 = vsub.f32 %v7217_v29, %v10632_v8  ;;  %v11300_v44 = vsel %vm4761_vm7, 1, %v14746_v47  ;;  %v11317_v29 = vld [vmem:[%s9275_s21 + $0x18] sm:$0xff] }
 0x256   : > { %14847 = vst [vmem:[#allocation142_spill] sm:$0xff] %v11269_v9  ;;  %v3045_v35 = vpack.c.bf16 %v2808_v16, %v2807_v19  ;;  %v11279_v52 = vpop.permute.xlu0 %5386  ;;  %v7843_v33 = vpop.f32.mrb[40].mxu0  ;;  %5581 = vperm.xlu1 %8492, %v10937_v36   ;;  %5578 = vperm.xlu0 %8491, %v10960_v10   ;;  %v11294_v36 = vpack.c.bf16 %v1426_v13, %v1425_v51  ;;  %v11306_v10 = vsel %vm4764_vm8, 1, %v14746_v47  ;;  %v11328_v16 = vld [vmem:[%s9275_s21 + $0x28] sm:$0xff] }
 0x257   : > { %14848 = vst [vmem:[#allocation143_spill] sm:$0xff] %v11279_v52  ;;  %v1917_v24 = vadd.f32 %v11291_v17, %v7843_v33  ;;  %v1908_v15 = vpop.f32.mrb[41].mxu0  ;;  %v11309_v14 = vpack.c.bf16 %v1428_v62, %v1427_v55  ;;  %vm4763_vm9 = vcmp.lt.s32.totalorder %v11242_v38, %v11138_v18  ;;  %v1175_v12 = vsub.f32 %v7220_v31, %v10688_v58  ;;  %v14849_v58 = vld [vmem:[#allocation98_spill] sm:$0xff] }
 0x258   : > { %v1909_v8 = vadd.f32 %v11291_v17, %v1908_v15  ;;  %v7844_v25 = vpop.f32.mrb[42].mxu0  ;;  %8109 = vmatprep.mubr.bf16.mxu1 %v3045_v35  ;;  %vm4766_vm10 = vcmp.lt.s32.totalorder %v11242_v38, %v11317_v29  ;;  %vm4765_vm11 = vcmp.lt.s32.totalorder %v11242_v38, %v11190_v43  ;;  %v1176_v32 = vsub.f32 %v7221_v56, %v10694_v37  ;;  %v7473_v62 = vld [vmem:[%s9243_s16 + $0x2c0] sm:$0xff]  }
 0x259   : > { %v1920_v51 = vadd.f32 %v11291_v17, %v7844_v25  ;;  %v1911_v13 = vpop.f32.mrb[43].mxu0  ;;  %8110 = vmatmul.mubr.bf16.gmra.mrb[36].mxu1 %v3046_v4  ;;  %v1429_v55 = vmax.f32 %v1173_v61, 0.0  ;;  %v1430_v19 = vmax.f32 %v1174_v46, 0.0  ;;  %vm4768_vm12 = vcmp.lt.s32.totalorder %v11242_v38, %v11328_v16  ;;  %v11333_v35 = vpop.permute.xlu1 %5395  ;;  %v11340_v46 = vld [vmem:[%s9275_s21 + $0x20] sm:$0xff] }
 0x25a   : > { %v1912_v3 = vadd.f32 %v11291_v17, %v1911_v13  ;;  %5587 = vperm.xlu1 %8492, %v10976_v28   ;;  %5584 = vperm.xlu0 %8491, %v14849_v58   ;;  %v2813_v31 = vmax.f32 %v1917_v24, 0.0  ;;  %14850 = vst [vmem:[#allocation98_spill] sm:$0xff] %v11333_v35  ;;  %v7224_v37 = vunpack.c.l.bf16 %v7472_v54  ;;  %v7225_v56 = vunpack.c.h.bf16 %v7472_v54  ;;  %v11336_v15 = vpop.permute.xlu0 %5392 }
 0x25b   : > { %v2814_v4 = vmax.f32 %v1920_v51, 0.0  ;;  %7950 = vmatmul.mubr.bf16.gmra.mrb[148].mxu0 %v11038_v48  ;;  %v2811_v28 = vmax.f32 %v1909_v8, 0.0  ;;  %14851 = vst [vmem:[#allocation144_spill] sm:$0xff] %v11336_v15  ;;  %v1431_v61 = vmax.f32 %v1175_v12, 0.0  ;;  %vm4767_vm13 = vcmp.lt.s32.totalorder %v11242_v38, %v11340_v46  ;;  %v11399_v15 = vld [vmem:[%s9253_s5 + $0x8] sm:$0xff] }
 0x25c   : > { %v2812_v33 = vmax.f32 %v1912_v3, 0.0  ;;  %7953 = vmatprep.mubr.bf16.mxu0 %v11048_v34  ;;  %v1432_v25 = vmax.f32 %v1176_v32, 0.0  ;;  %v7228_v51 = vunpack.c.l.bf16 %v7473_v62  ;;  %v7229_v48 = vunpack.c.h.bf16 %v7473_v62  ;;  %v11368_v3 = vld [vmem:[%s9253_s5 + $0x30] sm:$0xff] }
 0x25d   : > { %v3048_v24 = vpack.c.bf16 %v2814_v4, %v2813_v31  ;;  %v11350_v34 = vsel %vm4763_vm9, 1, %v14746_v47  ;;  %v11356_v8 = vsel %vm4766_vm10, 1, %v14746_v47  ;;  %v11362_v12 = vsel %vm4765_vm11, 1, %v14746_v47  ;;  %v7474_v31 = vld [vmem:[%s9243_s16 + $0x2c8] sm:$0xff]  }
 0x25e   : > { %v3047_v13 = vpack.c.bf16 %v2812_v33, %v2811_v28  ;;  %v7847_v54 = vpop.f32.mrb[44].mxu0  ;;  %5593 = vperm.xlu1 %8492, %v11010_v0   ;;  %5590 = vperm.xlu0 %8491, %v11033_v63   ;;  %v11365_v32 = vpack.c.bf16 %v1430_v19, %v1429_v55  ;;  %v1177_v58 = vsub.f32 %v7224_v37, %v11368_v3  ;;  %v11378_v33 = vsel %vm4768_vm12, 1, %v14746_v47  ;;  %v11389_v19 = vpop.permute.xlu1 %5401 }
 0x25f   : > { %v1933_v0 = vadd.f32 %v11291_v17, %v7847_v54  ;;  %v1924_v63 = vpop.f32.mrb[45].mxu0  ;;  %v1178_v62 = vsub.f32 %v7225_v56, %v10715_v5  ;;  %v11384_v55 = vsel %vm4767_vm13, 1, %v14746_v47  ;;  %v11387_v5 = vadd.s32 24, %v9290_v1  ;;  %14852 = vst [vmem:[#allocation145_spill] sm:$0xff] %v11389_v19  ;;  %v11395_v54 = vld [vmem:[%s9253_s5] sm:$0xff]  ;;  %v11402_v9 = vpop.permute.xlu0 %5398 }
 0x260   : > { %v1925_v4 = vadd.f32 %v11291_v17, %v1924_v63  ;;  %v7848_v28 = vpop.f32.mrb[46].mxu0  ;;  %8113 = vmatprep.mubr.bf16.mxu1 %v3047_v13  ;;  %v11392_v13 = vpack.c.bf16 %v1432_v25, %v1431_v61  ;;  %v1179_v63 = vsub.f32 %v7228_v51, %v11395_v54  ;;  %v1180_v35 = vsub.f32 %v7229_v48, %v11399_v15  ;;  %v14854_v19 = vld [vmem:[#allocation102_spill] sm:$0xff] }
 0x261   : > { %v1936_v37 = vadd.f32 %v11291_v17, %v7848_v28  ;;  %v1927_v56 = vpop.f32.mrb[47].mxu0  ;;  %8114 = vmatmul.mubr.bf16.gmra.mrb[40].mxu1 %v3048_v24  ;;  %14853 = vst [vmem:[#allocation146_spill] sm:$0xff] %v11402_v9  ;;  %v14855_v28 = vld [vmem:[#allocation104_spill] sm:$0xff]  ;;  %v7232_v61 = vunpack.c.l.bf16 %v7474_v31  ;;  %v7233_v25 = vunpack.c.h.bf16 %v7474_v31  ;;  %v2817_v51 = vmax.f32 %v1933_v0, 0.0 }
 0x262   : > { %v1928_v52 = vadd.f32 %v11291_v17, %v1927_v56  ;;  %5599 = vperm.xlu1 %8492, %v14854_v19   ;;  %5596 = vperm.xlu0 %8491, %v14855_v28   ;;  %v11408_v24 = vld [vmem:[%s9275_s21 + $0x38] sm:$0xff]  ;;  %v1433_v48 = vmax.f32 %v1177_v58, 0.0  ;;  %v1434_v9 = vmax.f32 %v1178_v62, 0.0  ;;  %v2815_v20 = vmax.f32 %v1925_v4, 0.0  ;;  %v11415_v19 = vld [vmem:[%s9275_s21 + $0x30] sm:$0xff] }
 0x263   : > { %vm4770_vm14 = vcmp.lt.s32.totalorder %v11242_v38, %v11408_v24  ;;  %v2818_v41 = vmax.f32 %v1936_v37, 0.0  ;;  %7954 = vmatmul.mubr.bf16.gmra.mrb[152].mxu0 %v11083_v22  ;;  %vm4769_vm15 = vcmp.lt.s32.totalorder %v11242_v38, %v11415_v19  ;;  %vm4772_vm0 = vcmp.lt.s32.totalorder %v11387_v5, %v11264_v7  ;;  %v7475_v22 = vld [vmem:[%s9243_s16 + $0x2d0] sm:$0xff]  }
 0x264   : > { %v2816_v56 = vmax.f32 %v1928_v52, 0.0  ;;  %7957 = vmatprep.mubr.bf16.mxu0 %v11144_v23  ;;  %v1435_v0 = vmax.f32 %v1179_v63, 0.0  ;;  %v1436_v37 = vmax.f32 %v1180_v35, 0.0  ;;  %vm4771_vm1 = vcmp.lt.s32.totalorder %v11387_v5, %v11138_v18  ;;  %v14856_v62 = vld [vmem:[#allocation131_spill] sm:$0xff]  ;;  %v11434_v35 = vld [vmem:[%s9253_s5 + $0x18] sm:$0xff]  ;;  %v11437_v63 = vpop.permute.xlu1 %5407 }
 0x265   : > { %v3050_v31 = vpack.c.bf16 %v2818_v41, %v2817_v51  ;;  %v11430_v23 = vsel %vm4770_vm14, 1, %v14746_v47  ;;  %v1181_v41 = vsub.f32 %v7232_v61, %v10766_v6  ;;  %v1182_v4 = vsub.f32 %v7233_v25, %v11434_v35  ;;  %14857 = vst [vmem:[#allocation102_spill] sm:$0xff] %v11437_v63  ;;  %v7476_v61 = vld [vmem:[%s9243_s16 + $0x2d8] sm:$0xff]   ;;  %v11455_v25 = vpop.permute.xlu0 %5404 }
 0x266   : > { %v3049_v52 = vpack.c.bf16 %v2816_v56, %v2815_v20  ;;  %v7851_v58 = vpop.f32.mrb[48].mxu0  ;;  %5605 = vperm.xlu1 %8492, %v14856_v62   ;;  %5602 = vperm.xlu0 %8491, %v11089_v40   ;;  %v11440_v51 = vpack.c.bf16 %v1434_v9, %v1433_v48  ;;  %v11446_v40 = vsel %vm4769_vm15, 1, %v14746_v47  ;;  %v11452_v6 = vsel %vm4772_vm0, 1, %v14746_v47  ;;  %14860 = vst [vmem:[#allocation147_spill] sm:$0xff] %v11455_v25  ;;  %v14863_v25 = vld [vmem:[#allocation135_spill] sm:$0xff] }
 0x267   : > { %v1949_v20 = vadd.f32 %v11291_v17, %v7851_v58  ;;  %v1940_v28 = vpop.f32.mrb[49].mxu0  ;;  %14858 = vst [vmem:[#allocation104_spill] sm:$0xff] %v11446_v40  ;;  %14859 = vst [vmem:[#allocation131_spill] sm:$0xff] %v11452_v6  ;;  %v11462_v38 = vsel %vm4771_vm1, 1, %v14746_v47  ;;  %v7236_v9 = vunpack.c.l.bf16 %v7475_v22  ;;  %v7237_v48 = vunpack.c.h.bf16 %v7475_v22 }
 0x268   : > { %v1941_v56 = vadd.f32 %v11291_v17, %v1940_v28  ;;  %v7852_v58 = vpop.f32.mrb[50].mxu0  ;;  %8117 = vmatprep.mubr.bf16.mxu1 %v3049_v52  ;;  %14861 = vst [vmem:[#allocation148_spill] sm:$0xff] %v11462_v38  ;;  %v11465_v26 = vpack.c.bf16 %v1436_v37, %v1435_v0  ;;  %vm4774_vm2 = vcmp.lt.s32.totalorder %v11387_v5, %v11317_v29  ;;  %v14862_v28 = vld [vmem:[#allocation134_spill] sm:$0xff]  ;;  %v1437_v22 = vmax.f32 %v1181_v41, 0.0 }
 0x269   : > { %v1952_v62 = vadd.f32 %v11291_v17, %v7852_v58  ;;  %v1943_v63 = vpop.f32.mrb[51].mxu0  ;;  %8118 = vmatmul.mubr.bf16.gmra.mrb[44].mxu1 %v3050_v31  ;;  %vm4773_vm3 = vcmp.lt.s32.totalorder %v11387_v5, %v11190_v43  ;;  %v1438_v58 = vmax.f32 %v1182_v4, 0.0  ;;  %v7240_v57 = vunpack.c.l.bf16 %v7476_v61  ;;  %v7477_v31 = vld [vmem:[%s9243_s16 + $0x2e0] sm:$0xff]   ;;  %v11486_v41 = vld [vmem:[%s9253_s5 + $0x28] sm:$0xff] }
 0x26a   : > { %v1944_v52 = vadd.f32 %v11291_v17, %v1943_v63  ;;  %5611 = vperm.xlu1 %8492, %v14862_v28   ;;  %5608 = vperm.xlu0 %8491, %v14863_v25   ;;  %v2821_v0 = vmax.f32 %v1949_v20, 0.0  ;;  %vm4776_vm4 = vcmp.lt.s32.totalorder %v11387_v5, %v11328_v16  ;;  %v7241_v38 = vunpack.c.h.bf16 %v7476_v61  ;;  %v11480_v63 = vld [vmem:[%s9253_s5 + $0x20] sm:$0xff]  ;;  %v11489_v20 = vpop.permute.xlu1 %5413 }
 0x26b   : > { %v2822_v37 = vmax.f32 %v1952_v62, 0.0  ;;  %7958 = vmatmul.mubr.bf16.gmra.mrb[156].mxu0 %v11166_v50  ;;  %v2819_v6 = vmax.f32 %v1941_v56, 0.0  ;;  %v11483_v25 = vsub.f32 %v7236_v9, %v11480_v63  ;;  %v1184_v4 = vsub.f32 %v7237_v48, %v11486_v41  ;;  %14864 = vst [vmem:[#allocation134_spill] sm:$0xff] %v11489_v20  ;;  %v11497_v62 = vpop.permute.xlu0 %5410 }
 0x26c   : > { %v2820_v40 = vmax.f32 %v1944_v52, 0.0  ;;  %7961 = vmatprep.mubr.bf16.mxu0 %v11181_v59  ;;  %v11495_v61 = vsel %vm4774_vm2, 1, %v14746_v47  ;;  %v7244_v59 = vunpack.c.l.bf16 %v7477_v31  ;;  %v7245_v56 = vunpack.c.h.bf16 %v7477_v31  ;;  %14866 = vst [vmem:[#allocation149_spill] sm:$0xff] %v11497_v62 }
 0x26d   : > { %v3052_v50 = vpack.c.bf16 %v2822_v37, %v2821_v0  ;;  %14865 = vst [vmem:[#allocation135_spill] sm:$0xff] %v11495_v61  ;;  %v11501_v48 = vpack.c.bf16 %v1438_v58, %v1437_v22  ;;  %v11507_v28 = vsel %vm4773_vm3, 1, %v14746_v47  ;;  %v1185_v0 = vsub.f32 %v7240_v57, %v11368_v3 }
 0x26e   : > { %v3051_v9 = vpack.c.bf16 %v2820_v40, %v2819_v6  ;;  %v7855_v52 = vpop.f32.mrb[52].mxu0  ;;  %5617 = vperm.xlu1 %8492, %v11150_v30   ;;  %5614 = vperm.xlu0 %8491, %v11161_v11   ;;  %14867 = vst [vmem:[#allocation150_spill] sm:$0xff] %v11507_v28  ;;  %v11515_v30 = vsel %vm4776_vm4, 1, %v14746_v47  ;;  %vm4775_vm5 = vcmp.lt.s32.totalorder %v11387_v5, %v11340_v46  ;;  %v11520_v11 = vld [vmem:[%s9253_s5 + $0x38] sm:$0xff]  ;;  %v7478_v6 = vld [vmem:[%s9243_s16 + $0x2e8] sm:$0xff]   ;;  %v1439_v58 = vmax.f32 %v11483_v25, 0.0 }
 0x26f   : > { %v1965_v31 = vadd.f32 %v11291_v17, %v7855_v52  ;;  %v1956_v37 = vpop.f32.mrb[53].mxu0  ;;  %14868 = vst [vmem:[#allocation151_spill] sm:$0xff] %v11515_v30  ;;  %v1186_v40 = vsub.f32 %v7241_v38, %v11520_v11  ;;  %v1440_v52 = vmax.f32 %v1184_v4, 0.0  ;;  %vm4778_vm6 = vcmp.lt.s32.totalorder %v11387_v5, %v11408_v24  ;;  %v11542_v61 = vpop.permute.xlu0 %5416 }
 0x270   : > { %v1957_v22 = vadd.f32 %v11291_v17, %v1956_v37  ;;  %v7856_v57 = vpop.f32.mrb[54].mxu0  ;;  %8121 = vmatprep.mubr.bf16.mxu1 %v3051_v9  ;;  %v1187_v30 = vsub.f32 %v7244_v59, %v11395_v54  ;;  %v1188_v28 = vsub.f32 %v7245_v56, %v11399_v15  ;;  %v11532_v38 = vadd.s32 25, %v9290_v1  ;;  %14870 = vst [vmem:[#allocation153_spill] sm:$0xff] %v11542_v61 }
 0x271   : > { %v1968_v20 = vadd.f32 %v11291_v17, %v7856_v57  ;;  %v1959_v62 = vpop.f32.mrb[55].mxu0  ;;  %8122 = vmatmul.mubr.bf16.gmra.mrb[48].mxu1 %v3052_v50  ;;  %v1441_v25 = vmax.f32 %v1185_v0, 0.0  ;;  %vm4777_vm7 = vcmp.lt.s32.totalorder %v11387_v5, %v11415_v19  ;;  %v7248_v4 = vunpack.c.l.bf16 %v7478_v6  ;;  %v11539_v50 = vpop.permute.xlu1 %5419 }
 0x272   : > { %v1960_v37 = vadd.f32 %v11291_v17, %v1959_v62  ;;  %5623 = vperm.xlu1 %8492, %v11172_v27   ;;  %5620 = vperm.xlu0 %8491, %v11178_v53   ;;  %14869 = vst [vmem:[#allocation152_spill] sm:$0xff] %v11539_v50  ;;  %v2825_v59 = vmax.f32 %v1965_v31, 0.0  ;;  %v1442_v56 = vmax.f32 %v1186_v40, 0.0  ;;  %v7249_v57 = vunpack.c.h.bf16 %v7478_v6 }
 0x273   : > { %v2826_v9 = vmax.f32 %v1968_v20, 0.0  ;;  %7962 = vmatmul.mubr.bf16.gmra.mrb[160].mxu0 %v11228_v60  ;;  %v2823_v62 = vmax.f32 %v1957_v22, 0.0  ;;  %v11549_v53 = vsel %vm4775_vm5, 1, %v14746_v47  ;;  %v11555_v60 = vsel %vm4778_vm6, 1, %v14746_v47  ;;  %v7479_v20 = vld [vmem:[%s9243_s16 + $0x2f0] sm:$0xff]   ;;  %v11593_v61 = vpop.permute.xlu0 %5422 }
 0x274   : > { %v2824_v27 = vmax.f32 %v1960_v37, 0.0  ;;  %7965 = vmatprep.mubr.bf16.mxu0 %v11271_v21  ;;  %v1443_v31 = vmax.f32 %v1187_v30, 0.0  ;;  %v1444_v40 = vmax.f32 %v1188_v28, 0.0  ;;  %vm4780_vm8 = vcmp.lt.s32.totalorder %v11532_v38, %v11264_v7  ;;  %v7480_v30 = vld [vmem:[%s9243_s16 + $0x2f8] sm:$0xff]   ;;  %14872 = vst [vmem:[#allocation155_spill] sm:$0xff] %v11593_v61 }
 0x275   : > { %v3054_v0 = vpack.c.bf16 %v2826_v9, %v2825_v59  ;;  %v11562_v22 = vpack.c.bf16 %v1440_v52, %v1439_v58  ;;  %v11568_v37 = vsel %vm4777_vm7, 1, %v14746_v47  ;;  %v11571_v59 = vld [vmem:[%s9253_s5 + $0x10] sm:$0xff]  ;;  %v11584_v5 = vsel %vm4780_vm8, 1, %v14746_v47 }
 0x276   : > { %v3053_v21 = vpack.c.bf16 %v2824_v27, %v2823_v62  ;;  %v7859_v6 = vpop.f32.mrb[56].mxu0  ;;  %5629 = vperm.xlu1 %8492, %v11213_v49   ;;  %5626 = vperm.xlu0 %8491, %v11219_v39   ;;  %v1189_v28 = vsub.f32 %v7248_v4, %v11571_v59  ;;  %v11576_v27 = vpack.c.bf16 %v1442_v56, %v1441_v25  ;;  %v7252_v39 = vunpack.c.l.bf16 %v7479_v20 }
 0x277   : > { %v1981_v9 = vadd.f32 %v11291_v17, %v7859_v6  ;;  %v1972_v62 = vpop.f32.mrb[57].mxu0  ;;  %v1190_v49 = vsub.f32 %v7249_v57, %v11434_v35  ;;  %vm4779_vm9 = vcmp.lt.s32.totalorder %v11532_v38, %v11138_v18  ;;  %v7253_v4 = vunpack.c.h.bf16 %v7479_v20  ;;  %v11588_v6 = vpop.permute.xlu1 %5425 }
 0x278   : > { %v1973_v58 = vadd.f32 %v11291_v17, %v1972_v62  ;;  %v7860_v52 = vpop.f32.mrb[58].mxu0  ;;  %8125 = vmatprep.mubr.bf16.mxu1 %v3053_v21  ;;  %14871 = vst [vmem:[#allocation154_spill] sm:$0xff] %v11588_v6  ;;  %v11591_v57 = vpack.c.bf16 %v1444_v40, %v1443_v31  ;;  %v7256_v21 = vunpack.c.l.bf16 %v7480_v30  ;;  %v7257_v62 = vunpack.c.h.bf16 %v7480_v30 }
 0x279   : > { %v1984_v25 = vadd.f32 %v11291_v17, %v7860_v52  ;;  %v1975_v56 = vpop.f32.mrb[59].mxu0  ;;  %8126 = vmatmul.mubr.bf16.gmra.mrb[52].mxu1 %v3054_v0  ;;  %v1445_v20 = vmax.f32 %v1189_v28, 0.0  ;;  %vm4782_vm10 = vcmp.lt.s32.totalorder %v11532_v38, %v11317_v29  ;;  %vm4781_vm11 = vcmp.lt.s32.totalorder %v11532_v38, %v11190_v43  ;;  %v7481_v52 = vld [vmem:[%s9243_s16 + $0x300] sm:$0xff]  }
 0x27a   : > { %v1976_v50 = vadd.f32 %v11291_v17, %v1975_v56  ;;  %5635 = vperm.xlu1 %8492, %v11234_v2   ;;  %5632 = vperm.xlu0 %8491, %v11277_v42   ;;  %v2829_v0 = vmax.f32 %v1981_v9, 0.0  ;;  %v1446_v40 = vmax.f32 %v1190_v49, 0.0  ;;  %v1191_v30 = vsub.f32 %v7252_v39, %v11480_v63 }
 0x27b   : > { %v2830_v31 = vmax.f32 %v1984_v25, 0.0  ;;  %7966 = vmatmul.mubr.bf16.gmra.mrb[164].mxu0 %v11294_v36  ;;  %v2827_v56 = vmax.f32 %v1973_v58, 0.0  ;;  %v11610_v2 = vsel %vm4779_vm9, 1, %v14746_v47  ;;  %v1192_v42 = vsub.f32 %v7253_v4, %v11486_v41  ;;  %v11631_v4 = vpop.permute.xlu1 %5431 }
 0x27c   : > { %v2828_v6 = vmax.f32 %v1976_v50, 0.0  ;;  %7969 = vmatprep.mubr.bf16.mxu0 %v11309_v14  ;;  %vm4784_vm12 = vcmp.lt.s32.totalorder %v11532_v38, %v11328_v16  ;;  %v1193_v36 = vsub.f32 %v7256_v21, %v11368_v3  ;;  %v1194_v9 = vsub.f32 %v7257_v62, %v11520_v11  ;;  %14873 = vst [vmem:[#allocation156_spill] sm:$0xff] %v11631_v4  ;;  %v11638_v21 = vpop.permute.xlu0 %5428 }
 0x27d   : > { %v3056_v28 = vpack.c.bf16 %v2830_v31, %v2829_v0  ;;  %v11623_v14 = vsel %vm4782_vm10, 1, %v14746_v47  ;;  %v11629_v39 = vsel %vm4781_vm11, 1, %v14746_v47  ;;  %v7260_v58 = vunpack.c.l.bf16 %v7481_v52  ;;  %14874 = vst [vmem:[#allocation157_spill] sm:$0xff] %v11638_v21 }
 0x27e   : > { %v3055_v49 = vpack.c.bf16 %v2828_v6, %v2827_v56  ;;  %v7863_v50 = vpop.f32.mrb[60].mxu0  ;;  %5641 = vperm.xlu1 %8492, %v11287_v45   ;;  %5638 = vperm.xlu0 %8491, %v11300_v44   ;;  %v11634_v44 = vpack.c.bf16 %v1446_v40, %v1445_v20  ;;  %v1447_v25 = vmax.f32 %v1191_v30, 0.0  ;;  %vm4783_vm13 = vcmp.lt.s32.totalorder %v11532_v38, %v11340_v46  ;;  %v7482_v20 = vld [vmem:[%s9243_s16 + $0x308] sm:$0xff]  }
 0x27f   : > { %v1997_v45 = vadd.f32 %v11291_v17, %v7863_v50  ;;  %v1988_v6 = vpop.f32.mrb[61].mxu0  ;;  %v1448_v31 = vmax.f32 %v1192_v42, 0.0  ;;  %v11645_v56 = vsel %vm4784_vm12, 1, %v14746_v47  ;;  %v7261_v50 = vunpack.c.h.bf16 %v7481_v52 }
 0x280   : > { %v1989_v62 = vadd.f32 %v11291_v17, %v1988_v6  ;;  %v7864_v0 = vpop.f32.mrb[62].mxu0  ;;  %8129 = vmatprep.mubr.bf16.mxu1 %v3055_v49  ;;  %v1449_v4 = vmax.f32 %v1193_v36, 0.0  ;;  %v1450_v61 = vmax.f32 %v1194_v9, 0.0  ;;  %vm4786_vm14 = vcmp.lt.s32.totalorder %v11532_v38, %v11408_v24 }
 0x281   : > { %v2000_v40 = vadd.f32 %v11291_v17, %v7864_v0  ;;  %v1991_v30 = vpop.f32.mrb[63].mxu0  ;;  %8130 = vmatmul.mubr.bf16.gmra.mrb[56].mxu1 %v3056_v28  ;;  %vm4785_vm15 = vcmp.lt.s32.totalorder %v11532_v38, %v11415_v19  ;;  %v11657_v52 = vsub.f32 %v7260_v58, %v11395_v54  ;;  %v11660_v42 = vadd.s32 26, %v9290_v1 }
 0x282   : > { %v1992_v49 = vadd.f32 %v11291_v17, %v1991_v30  ;;  %5647 = vperm.xlu1 %8492, %v11306_v10   ;;  %5644 = vperm.xlu0 %8491, %v11350_v34   ;;  %v2833_v28 = vmax.f32 %v1997_v45, 0.0  ;;  %v7264_v9 = vunpack.c.l.bf16 %v7482_v20  ;;  %v7265_v6 = vunpack.c.h.bf16 %v7482_v20  ;;  %v11671_v30 = vpop.permute.xlu1 %5437  ;;  %v11684_v20 = vpop.permute.xlu0 %5434 }
 0x283   : > { %v2834_v36 = vmax.f32 %v2000_v40, 0.0  ;;  %7970 = vmatmul.mubr.bf16.gmra.mrb[168].mxu0 %v11365_v32  ;;  %v2831_v0 = vmax.f32 %v1989_v62, 0.0  ;;  %v11668_v34 = vsel %vm4783_vm13, 1, %v14746_v47  ;;  %v1196_v58 = vsub.f32 %v7261_v50, %v11399_v15  ;;  %14875 = vst [vmem:[#allocation158_spill] sm:$0xff] %v11671_v30  ;;  %v7483_v62 = vld [vmem:[%s9243_s16 + $0x310] sm:$0xff]   ;;  %14876 = vst [vmem:[#allocation159_spill] sm:$0xff] %v11684_v20 }
 0x284   : > { %v2832_v10 = vmax.f32 %v1992_v49, 0.0  ;;  %7973 = vmatprep.mubr.bf16.mxu0 %v11392_v13  ;;  %v11673_v40 = vpack.c.bf16 %v1448_v31, %v1447_v25  ;;  %v11675_v32 = vpack.c.bf16 %v1450_v61, %v1449_v4  ;;  %v11681_v13 = vsel %vm4786_vm14, 1, %v14746_v47  ;;  %v7484_v4 = vld [vmem:[%s9243_s16 + $0x318] sm:$0xff]  }
 0x285   : > { %v3058_v45 = vpack.c.bf16 %v2834_v36, %v2833_v28  ;;  %v11692_v61 = vsel %vm4785_vm15, 1, %v14746_v47  ;;  %vm4788_vm0 = vcmp.lt.s32.totalorder %v11660_v42, %v11264_v7  ;;  %vm4787_vm1 = vcmp.lt.s32.totalorder %v11660_v42, %v11138_v18 }
 0x286   : > { %v3057_v49 = vpack.c.bf16 %v2832_v10, %v2831_v0  ;;  %v7867_v21 = vpop.f32.mrb[64].mxu0  ;;  %5653 = vperm.xlu1 %8492, %v11356_v8   ;;  %5650 = vperm.xlu0 %8491, %v11362_v12   ;;  %14877 = vst [vmem:[#allocation160_spill] sm:$0xff] %v11692_v61  ;;  %v1451_v8 = vmax.f32 %v11657_v52, 0.0  ;;  %v1197_v12 = vsub.f32 %v7264_v9, %v11571_v59  ;;  %v1452_v36 = vmax.f32 %v1196_v58, 0.0 }
 0x287   : > { %v2013_v25 = vadd.f32 %v11291_v17, %v7867_v21  ;;  %v2004_v31 = vpop.f32.mrb[65].mxu0  ;;  %v1198_v50 = vsub.f32 %v7265_v6, %v11434_v35  ;;  %v7268_v0 = vunpack.c.l.bf16 %v7483_v62  ;;  %v7269_v10 = vunpack.c.h.bf16 %v7483_v62 }
 0x288   : > { %v2005_v38 = vadd.f32 %v11291_v17, %v2004_v31  ;;  %v7868_v28 = vpop.f32.mrb[66].mxu0  ;;  %8133 = vmatprep.mubr.bf16.mxu1 %v3057_v49  ;;  %v11709_v21 = vsel %vm4788_vm0, 1, %v14746_v47  ;;  %v11715_v52 = vsel %vm4787_vm1, 1, %v14746_v47  ;;  %v7272_v9 = vunpack.c.l.bf16 %v7484_v4 }
 0x289   : > { %v2016_v30 = vadd.f32 %v11291_v17, %v7868_v28  ;;  %v2007_v20 = vpop.f32.mrb[67].mxu0  ;;  %8134 = vmatmul.mubr.bf16.gmra.mrb[60].mxu1 %v3058_v45  ;;  %14878 = vst [vmem:[#allocation161_spill] sm:$0xff] %v11709_v21  ;;  %14879 = vst [vmem:[#allocation162_spill] sm:$0xff] %v11715_v52  ;;  %vm4790_vm2 = vcmp.lt.s32.totalorder %v11660_v42, %v11317_v29  ;;  %vm4789_vm3 = vcmp.lt.s32.totalorder %v11660_v42, %v11190_v43  ;;  %v11724_v45 = vpop.permute.xlu1 %5443 }
 0x28a   : > { %v2008_v6 = vadd.f32 %v11291_v17, %v2007_v20  ;;  %5659 = vperm.xlu1 %8492, %v11378_v33   ;;  %5656 = vperm.xlu0 %8491, %v11384_v55   ;;  %v7273_v58 = vunpack.c.h.bf16 %v7484_v4  ;;  %14880 = vst [vmem:[#allocation163_spill] sm:$0xff] %v11724_v45  ;;  %v2837_v62 = vmax.f32 %v2013_v25, 0.0  ;;  %v1453_v49 = vmax.f32 %v1197_v12, 0.0  ;;  %v7485_v20 = vld [vmem:[%s9243_s16 + $0x320] sm:$0xff]   ;;  %v11728_v28 = vpop.permute.xlu0 %5440 }
 0x28b   : > { %v2838_v18 = vmax.f32 %v2016_v30, 0.0  ;;  %7974 = vmatmul.mubr.bf16.gmra.mrb[172].mxu0 %v11440_v51  ;;  %v1454_v31 = vmax.f32 %v1198_v50, 0.0  ;;  %14881 = vst [vmem:[#allocation164_spill] sm:$0xff] %v11728_v28  ;;  %v2835_v33 = vmax.f32 %v2005_v38, 0.0  ;;  %v1199_v52 = vsub.f32 %v7268_v0, %v11480_v63 }
 0x28c   : > { %v2836_v55 = vmax.f32 %v2008_v6, 0.0  ;;  %7977 = vmatprep.mubr.bf16.mxu0 %v11465_v26  ;;  %v1200_v21 = vsub.f32 %v7269_v10, %v11486_v41  ;;  %v11733_v61 = vpack.c.bf16 %v1452_v36, %v1451_v8  ;;  %v11739_v51 = vsel %vm4790_vm2, 1, %v14746_v47  ;;  %v14882_v26 = vld [vmem:[#allocation104_spill] sm:$0xff] }
 0x28d   : > { %v3060_v4 = vpack.c.bf16 %v2838_v18, %v2837_v62  ;;  %v1201_v30 = vsub.f32 %v7272_v9, %v11368_v3  ;;  %v11748_v8 = vsel %vm4789_vm3, 1, %v14746_v47  ;;  %v1202_v50 = vsub.f32 %v7273_v58, %v11520_v11  ;;  %v7486_v58 = vld [vmem:[%s9243_s16 + $0x328] sm:$0xff]  }
 0x28e   : > { %v3059_v25 = vpack.c.bf16 %v2836_v55, %v2835_v33  ;;  %v7871_v12 = vpop.f32.mrb[68].mxu0  ;;  %5665 = vperm.xlu1 %8492, %v11430_v23   ;;  %5662 = vperm.xlu0 %8491, %v14882_v26   ;;  %v7276_v38 = vunpack.c.l.bf16 %v7485_v20  ;;  %v11752_v10 = vpack.c.bf16 %v1454_v31, %v1453_v49  ;;  %vm4792_vm4 = vcmp.lt.s32.totalorder %v11660_v42, %v11328_v16  ;;  %v11760_v33 = vpop.permute.xlu1 %5449 }
 0x28f   : > { %v2029_v36 = vadd.f32 %v11291_v17, %v7871_v12  ;;  %v2020_v0 = vpop.f32.mrb[69].mxu0  ;;  %vm4791_vm5 = vcmp.lt.s32.totalorder %v11660_v42, %v11340_v46  ;;  %v1455_v6 = vmax.f32 %v1199_v52, 0.0  ;;  %v1456_v62 = vmax.f32 %v1200_v21, 0.0  ;;  %14883 = vst [vmem:[#allocation104_spill] sm:$0xff] %v11760_v33  ;;  %v11767_v12 = vpop.permute.xlu0 %5446  ;;  %v14885_v21 = vld [vmem:[#allocation131_spill] sm:$0xff] }
 0x290   : > { %v2021_v23 = vadd.f32 %v11291_v17, %v2020_v0  ;;  %v7872_v9 = vpop.f32.mrb[70].mxu0  ;;  %8137 = vmatprep.mubr.bf16.mxu1 %v3059_v25  ;;  %v7277_v18 = vunpack.c.h.bf16 %v7485_v20  ;;  %v1457_v31 = vmax.f32 %v1201_v30, 0.0  ;;  %vm4794_vm6 = vcmp.lt.s32.totalorder %v11660_v42, %v11408_v24  ;;  %14884 = vst [vmem:[#allocation165_spill] sm:$0xff] %v11767_v12  ;;  %v14886_v20 = vld [vmem:[#allocation148_spill] sm:$0xff] }
 0x291   : > { %v2032_v55 = vadd.f32 %v11291_v17, %v7872_v9  ;;  %v2023_v49 = vpop.f32.mrb[71].mxu0  ;;  %8138 = vmatmul.mubr.bf16.gmra.mrb[64].mxu1 %v3060_v4  ;;  %vm4793_vm7 = vcmp.lt.s32.totalorder %v11660_v42, %v11415_v19  ;;  %v1458_v25 = vmax.f32 %v1202_v50, 0.0  ;;  %v11773_v26 = vsub.f32 %v7276_v38, %v11395_v54 }
 0x292   : > { %v2024_v52 = vadd.f32 %v11291_v17, %v2023_v49  ;;  %5671 = vperm.xlu1 %8492, %v14885_v21   ;;  %5668 = vperm.xlu0 %8491, %v14886_v20   ;;  %v11776_v4 = vadd.s32 27, %v9290_v1  ;;  %v2841_v30 = vmax.f32 %v2029_v36, 0.0  ;;  %v7280_v9 = vunpack.c.l.bf16 %v7486_v58  ;;  %v7487_v36 = vld [vmem:[%s9243_s16 + $0x330] sm:$0xff]  }
 0x293   : > { %v2842_v0 = vmax.f32 %v2032_v55, 0.0  ;;  %7978 = vmatmul.mubr.bf16.gmra.mrb[176].mxu0 %v11501_v48  ;;  %v7281_v12 = vunpack.c.h.bf16 %v7486_v58  ;;  %v2839_v33 = vmax.f32 %v2021_v23, 0.0  ;;  %v11784_v50 = vsel %vm4792_vm4, 1, %v14746_v47 }
 0x294   : > { %v2840_v49 = vmax.f32 %v2024_v52, 0.0  ;;  %7981 = vmatprep.mubr.bf16.mxu0 %v11562_v22  ;;  %v1204_v38 = vsub.f32 %v7277_v18, %v11399_v15  ;;  %v11787_v20 = vpack.c.bf16 %v1456_v62, %v1455_v6  ;;  %v11793_v48 = vsel %vm4791_vm5, 1, %v14746_v47  ;;  %v14889_v18 = vld [vmem:[#allocation135_spill] sm:$0xff]  ;;  %v14890_v6 = vld [vmem:[#allocation150_spill] sm:$0xff]  ;;  %v11814_v52 = vpop.permute.xlu1 %5455 }
 0x295   : > { %v3062_v21 = vpack.c.bf16 %v2842_v0, %v2841_v30  ;;  %14887 = vst [vmem:[#allocation131_spill] sm:$0xff] %v11793_v48  ;;  %v11799_v22 = vsel %vm4794_vm6, 1, %v14746_v47  ;;  %v11804_v62 = vpack.c.bf16 %v1458_v25, %v1457_v31  ;;  %v11810_v55 = vsel %vm4793_vm7, 1, %v14746_v47  ;;  %14893 = vst [vmem:[#allocation166_spill] sm:$0xff] %v11814_v52 }
 0x296   : > { %14888 = vst [vmem:[#allocation148_spill] sm:$0xff] %v11799_v22  ;;  %v3061_v23 = vpack.c.bf16 %v2840_v49, %v2839_v33  ;;  %v7875_v58 = vpop.f32.mrb[72].mxu0  ;;  %5677 = vperm.xlu1 %8492, %v14889_v18   ;;  %5674 = vperm.xlu0 %8491, %v14890_v6   ;;  %14892 = vst [vmem:[#allocation150_spill] sm:$0xff] %v11810_v55  ;;  %vm4796_vm8 = vcmp.lt.s32.totalorder %v11776_v4, %v11264_v7  ;;  %v1459_v0 = vmax.f32 %v11773_v26, 0.0  ;;  %v7488_v49 = vld [vmem:[%s9243_s16 + $0x338] sm:$0xff]   ;;  %v11821_v18 = vpop.permute.xlu0 %5452 }
 0x297   : > { %14891 = vst [vmem:[#allocation135_spill] sm:$0xff] %v11804_v62  ;;  %v2045_v33 = vadd.f32 %v11291_v17, %v7875_v58  ;;  %v2036_v30 = vpop.f32.mrb[73].mxu0  ;;  %v1205_v31 = vsub.f32 %v7280_v9, %v11571_v59  ;;  %v1206_v25 = vsub.f32 %v7281_v12, %v11434_v35  ;;  %14894 = vst [vmem:[#allocation167_spill] sm:$0xff] %v11821_v18  ;;  %v1460_v28 = vmax.f32 %v1204_v38, 0.0  ;;  %v11832_v12 = vld [vmem:[%s9275_s21] sm:$0xff]  ;;  %v14896_v38 = vld [vmem:[#allocation151_spill] sm:$0xff] }
 0x298   : > { %v2037_v42 = vadd.f32 %v11291_v17, %v2036_v30  ;;  %v7876_v6 = vpop.f32.mrb[74].mxu0  ;;  %8141 = vmatprep.mubr.bf16.mxu1 %v3061_v23  ;;  %v7284_v45 = vunpack.c.l.bf16 %v7487_v36  ;;  %v7285_v52 = vunpack.c.h.bf16 %v7487_v36  ;;  %v11829_v26 = vsel %vm4796_vm8, 1, %v14746_v47 }
 0x299   : > { %v2048_v58 = vadd.f32 %v11291_v17, %v7876_v6  ;;  %v2039_v55 = vpop.f32.mrb[75].mxu0  ;;  %8142 = vmatmul.mubr.bf16.gmra.mrb[68].mxu1 %v3062_v21  ;;  %14895 = vst [vmem:[#allocation168_spill] sm:$0xff] %v11829_v26  ;;  %vm4795_vm9 = vcmp.lt.s32.totalorder %v11776_v4, %v11832_v12  ;;  %vm4798_vm10 = vcmp.lt.s32.totalorder %v11776_v4, %v11317_v29  ;;  %v7288_v21 = vunpack.c.l.bf16 %v7488_v49 }
 0x29a   : > { %v2040_v9 = vadd.f32 %v11291_v17, %v2039_v55  ;;  %5683 = vperm.xlu1 %8492, %v14896_v38   ;;  %5680 = vperm.xlu0 %8491, %v11549_v53   ;;  %vm4797_vm11 = vcmp.lt.s32.totalorder %v11776_v4, %v11190_v43  ;;  %v7289_v36 = vunpack.c.h.bf16 %v7488_v49  ;;  %v2845_v23 = vmax.f32 %v2045_v33, 0.0  ;;  %v11847_v38 = vpop.permute.xlu1 %5461  ;;  %v11864_v33 = vpop.permute.xlu0 %5458 }
 0x29b   : > { %v2846_v30 = vmax.f32 %v2048_v58, 0.0  ;;  %7982 = vmatmul.mubr.bf16.gmra.mrb[180].mxu0 %v11576_v27  ;;  %v1461_v6 = vmax.f32 %v1205_v31, 0.0  ;;  %v1462_v18 = vmax.f32 %v1206_v25, 0.0  ;;  %v2843_v26 = vmax.f32 %v2037_v42, 0.0  ;;  %14897 = vst [vmem:[#allocation151_spill] sm:$0xff] %v11847_v38  ;;  %14898 = vst [vmem:[#allocation169_spill] sm:$0xff] %v11864_v33 }
 0x29c   : > { %v2844_v22 = vmax.f32 %v2040_v9, 0.0  ;;  %7985 = vmatprep.mubr.bf16.mxu0 %v11591_v57  ;;  %v1207_v55 = vsub.f32 %v7284_v45, %v11480_v63  ;;  %v1208_v53 = vsub.f32 %v7285_v52, %v11486_v41  ;;  %v11849_v48 = vpack.c.bf16 %v1460_v28, %v1459_v0  ;;  %v7489_v45 = vld [vmem:[%s9243_s16 + $0x340] sm:$0xff]   ;;  %v7490_v9 = vld [vmem:[%s9243_s16 + $0x348] sm:$0xff]   ;;  %v7500_v33 = vld [vmem:[%s9243_s16 + $0x398] sm:$0xff]  }
 0x29d   : > { %v3064_v62 = vpack.c.bf16 %v2846_v30, %v2845_v23  ;;  %v11855_v27 = vsel %vm4795_vm9, 1, %v14746_v47  ;;  %v11861_v57 = vsel %vm4798_vm10, 1, %v14746_v47  ;;  %v11872_v28 = vsel %vm4797_vm11, 1, %v14746_v47 }
 0x29e   : > { %v3063_v52 = vpack.c.bf16 %v2844_v22, %v2843_v26  ;;  %v7879_v31 = vpop.f32.mrb[76].mxu0  ;;  %5689 = vperm.xlu1 %8492, %v11555_v60   ;;  %5686 = vperm.xlu0 %8491, %v11568_v37   ;;  %v1209_v0 = vsub.f32 %v7288_v21, %v11368_v3  ;;  %v1210_v25 = vsub.f32 %v7289_v36, %v11520_v11  ;;  %v1463_v37 = vmax.f32 %v1207_v55, 0.0 }
 0x29f   : > { %v2061_v49 = vadd.f32 %v11291_v17, %v7879_v31  ;;  %v2052_v42 = vpop.f32.mrb[77].mxu0  ;;  %v11877_v22 = vpack.c.bf16 %v1462_v18, %v1461_v6  ;;  %vm4800_vm12 = vcmp.lt.s32.totalorder %v11776_v4, %v11328_v16  ;;  %vm4799_vm13 = vcmp.lt.s32.totalorder %v11776_v4, %v11340_v46 }
 0x2a0   : > { %v2053_v60 = vadd.f32 %v11291_v17, %v2052_v42  ;;  %v7880_v43 = vpop.f32.mrb[78].mxu0  ;;  %8145 = vmatprep.mubr.bf16.mxu1 %v3063_v52  ;;  %v1464_v58 = vmax.f32 %v1208_v53, 0.0  ;;  %v7292_v26 = vunpack.c.l.bf16 %v7489_v45  ;;  %vm4802_vm14 = vcmp.lt.s32.totalorder %v11776_v4, %v11408_v24  ;;  %v11896_v53 = vpop.permute.xlu1 %5467 }
 0x2a1   : > { %v2064_v21 = vadd.f32 %v11291_v17, %v7880_v43  ;;  %v2055_v36 = vpop.f32.mrb[79].mxu0  ;;  %8146 = vmatmul.mubr.bf16.gmra.mrb[72].mxu1 %v3064_v62  ;;  %vm4801_vm15 = vcmp.lt.s32.totalorder %v11776_v4, %v11415_v19  ;;  %v7293_v18 = vunpack.c.h.bf16 %v7489_v45  ;;  %v1465_v30 = vmax.f32 %v1209_v0, 0.0  ;;  %14899 = vst [vmem:[#allocation170_spill] sm:$0xff] %v11896_v53  ;;  %v11899_v42 = vpop.permute.xlu0 %5464  ;;  %v12151_v53 = vld [vmem:[%s9275_s21 + $0x38] sm:$0xff] }
 0x2a2   : > { %v2056_v23 = vadd.f32 %v11291_v17, %v2055_v36  ;;  %5695 = vperm.xlu1 %8492, %v11584_v5   ;;  %5692 = vperm.xlu0 %8491, %v11610_v2   ;;  %v1466_v6 = vmax.f32 %v1210_v25, 0.0  ;;  %v11894_v55 = vadd.s32 28, %v9290_v1  ;;  %v2849_v62 = vmax.f32 %v2061_v49, 0.0  ;;  %14900 = vst [vmem:[#allocation171_spill] sm:$0xff] %v11899_v42 }
 0x2a3   : > { %v2850_v52 = vmax.f32 %v2064_v21, 0.0  ;;  %7986 = vmatmul.mubr.bf16.gmra.mrb[184].mxu0 %v11634_v44  ;;  %v7296_v31 = vunpack.c.l.bf16 %v7490_v9  ;;  %v7297_v45 = vunpack.c.h.bf16 %v7490_v9  ;;  %v2847_v43 = vmax.f32 %v2053_v60, 0.0  ;;  %v7491_v60 = vld [vmem:[%s9243_s16 + $0x350] sm:$0xff]  }
 0x2a4   : > { %v2848_v5 = vmax.f32 %v2056_v23, 0.0  ;;  %7989 = vmatprep.mubr.bf16.mxu0 %v11673_v40  ;;  %v11906_v2 = vsel %vm4800_vm12, 1, %v14746_v47  ;;  %v1211_v0 = vsub.f32 %v7292_v26, %v11395_v54  ;;  %v11909_v49 = vpack.c.bf16 %v1464_v58, %v1463_v37 }
 0x2a5   : > { %v3066_v25 = vpack.c.bf16 %v2850_v52, %v2849_v62  ;;  %v11915_v44 = vsel %vm4799_vm13, 1, %v14746_v47  ;;  %v1212_v40 = vsub.f32 %v7293_v18, %v11399_v15  ;;  %v11925_v16 = vsel %vm4802_vm14, 1, %v14746_v47  ;;  %v7492_v18 = vld [vmem:[%s9243_s16 + $0x358] sm:$0xff]  }
 0x2a6   : > { %v3065_v9 = vpack.c.bf16 %v2848_v5, %v2847_v43  ;;  %v7883_v21 = vpop.f32.mrb[80].mxu0  ;;  %5701 = vperm.xlu1 %8492, %v11623_v14   ;;  %5698 = vperm.xlu0 %8491, %v11629_v39   ;;  %v11931_v37 = vsel %vm4801_vm15, 1, %v14746_v47  ;;  %vm4804_vm0 = vcmp.lt.s32.totalorder %v11894_v55, %v11264_v7  ;;  %v11936_v26 = vpack.c.bf16 %v1466_v6, %v1465_v30  ;;  %v11944_v43 = vpop.permute.xlu1 %5473 }
 0x2a7   : > { %v2077_v58 = vadd.f32 %v11291_v17, %v7883_v21  ;;  %v2068_v14 = vpop.f32.mrb[81].mxu0  ;;  %v1213_v39 = vsub.f32 %v7296_v31, %v11571_v59  ;;  %v1214_v36 = vsub.f32 %v7297_v45, %v11434_v35  ;;  %v1467_v4 = vmax.f32 %v1211_v0, 0.0  ;;  %14901 = vst [vmem:[#allocation172_spill] sm:$0xff] %v11944_v43  ;;  %v11953_v0 = vpop.permute.xlu0 %5470 }
 0x2a8   : > { %v2069_v23 = vadd.f32 %v11291_v17, %v2068_v14  ;;  %v7884_v62 = vpop.f32.mrb[82].mxu0  ;;  %8149 = vmatprep.mubr.bf16.mxu1 %v3065_v9  ;;  %vm4803_vm1 = vcmp.lt.s32.totalorder %v11894_v55, %v11832_v12  ;;  %v7300_v52 = vunpack.c.l.bf16 %v7491_v60  ;;  %v1468_v6 = vmax.f32 %v1212_v40, 0.0  ;;  %14902 = vst [vmem:[#allocation173_spill] sm:$0xff] %v11953_v0 }
 0x2a9   : > { %v2080_v5 = vadd.f32 %v11291_v17, %v7884_v62  ;;  %v2071_v30 = vpop.f32.mrb[83].mxu0  ;;  %8150 = vmatmul.mubr.bf16.gmra.mrb[76].mxu1 %v3066_v25  ;;  %v11951_v31 = vsel %vm4804_vm0, 1, %v14746_v47  ;;  %v7301_v45 = vunpack.c.h.bf16 %v7491_v60  ;;  %vm4806_vm2 = vcmp.lt.s32.totalorder %v11894_v55, %v11317_v29 }
 0x2aa   : > { %v2072_v9 = vadd.f32 %v11291_v17, %v2071_v30  ;;  %5707 = vperm.xlu1 %8492, %v11645_v56   ;;  %5704 = vperm.xlu0 %8491, %v11668_v34   ;;  %v7304_v25 = vunpack.c.l.bf16 %v7492_v18  ;;  %v7305_v40 = vunpack.c.h.bf16 %v7492_v18  ;;  %v2853_v21 = vmax.f32 %v2077_v58, 0.0  ;;  %v11963_v17 = vld [vmem:[%s9275_s21 + $0x10] sm:$0xff]  ;;  %v7493_v58 = vld [vmem:[%s9243_s16 + $0x360] sm:$0xff]   ;;  %v11990_v30 = vpop.permute.xlu1 %5479 }
 0x2ab   : > { %v2854_v7 = vmax.f32 %v2080_v5, 0.0  ;;  %7990 = vmatmul.mubr.bf16.gmra.mrb[188].mxu0 %v11675_v32  ;;  %v1469_v60 = vmax.f32 %v1213_v39, 0.0  ;;  %v1470_v14 = vmax.f32 %v1214_v36, 0.0  ;;  %v2851_v62 = vmax.f32 %v2069_v23, 0.0  ;;  %v14903_v23 = vld [vmem:[#allocation160_spill] sm:$0xff] }
 0x2ac   : > { %v2852_v0 = vmax.f32 %v2072_v9, 0.0  ;;  %7993 = vmatprep.mubr.bf16.mxu0 %v11733_v61  ;;  %vm4805_vm3 = vcmp.lt.s32.totalorder %v11894_v55, %v11963_v17  ;;  %v11968_v56 = vsub.f32 %v7300_v52, %v11480_v63  ;;  %v11970_v18 = vpack.c.bf16 %v1468_v6, %v1467_v4  ;;  %14904 = vst [vmem:[#allocation160_spill] sm:$0xff] %v11990_v30  ;;  %v11992_v6 = vld [vmem:[#allocation10] ss:$0 sm:$0xff]  ;;  %v12004_v9 = vld [vmem:[%s9275_s21 + $0x28] sm:$0xff] }
 0x2ad   : > { %v3068_v34 = vpack.c.bf16 %v2854_v7, %v2853_v21  ;;  %v11976_v32 = vsel %vm4803_vm1, 1, %v14746_v47  ;;  %v1216_v61 = vsub.f32 %v7301_v45, %v11486_v41  ;;  %v11986_v4 = vsel %vm4806_vm2, 1, %v14746_v47 }
 0x2ae   : > { %v3067_v39 = vpack.c.bf16 %v2852_v0, %v2851_v62  ;;  %v7887_v36 = vpop.f32.mrb[84].mxu0  ;;  %5713 = vperm.xlu1 %8492, %v11681_v13   ;;  %5710 = vperm.xlu0 %8491, %v14903_v23   ;;  %v1217_v52 = vsub.f32 %v7304_v25, %v11368_v3  ;;  %v1218_v5 = vsub.f32 %v7305_v40, %v11520_v11  ;;  %v12001_v29 = vsel %vm4805_vm3, 1, %v14746_v47  ;;  %v12008_v3 = vpop.permute.xlu0 %5476 }
 0x2af   : > { %v2093_v45 = vadd.f32 %v11992_v6, %v7887_v36  ;;  %v2084_v13 = vpop.f32.mrb[85].mxu0  ;;  %v11995_v0 = vpack.c.bf16 %v1470_v14, %v1469_v60  ;;  %vm4808_vm4 = vcmp.lt.s32.totalorder %v11894_v55, %v12004_v9  ;;  %14905 = vst [vmem:[#allocation174_spill] sm:$0xff] %v12008_v3  ;;  %v1471_v21 = vmax.f32 %v11968_v56, 0.0  ;;  %v7494_v60 = vld [vmem:[%s9243_s16 + $0x368] sm:$0xff]   ;;  %v14906_v3 = vld [vmem:[#allocation161_spill] sm:$0xff] }
 0x2b0   : > { %v2085_v25 = vadd.f32 %v11992_v6, %v2084_v13  ;;  %v7888_v40 = vpop.f32.mrb[86].mxu0  ;;  %8153 = vmatprep.mubr.bf16.mxu1 %v3067_v39  ;;  %vm4807_vm5 = vcmp.lt.s32.totalorder %v11894_v55, %v11340_v46  ;;  %v7308_v7 = vunpack.c.l.bf16 %v7493_v58  ;;  %v1472_v36 = vmax.f32 %v1216_v61, 0.0  ;;  %v14907_v39 = vld [vmem:[#allocation162_spill] sm:$0xff] }
 0x2b1   : > { %v2096_v14 = vadd.f32 %v11992_v6, %v7888_v40  ;;  %v2087_v62 = vpop.f32.mrb[87].mxu0  ;;  %8154 = vmatmul.mubr.bf16.gmra.mrb[80].mxu1 %v3068_v34  ;;  %vm4810_vm6 = vcmp.lt.s32.totalorder %v11894_v55, %v11408_v24  ;;  %v7309_v23 = vunpack.c.h.bf16 %v7493_v58  ;;  %v1473_v56 = vmax.f32 %v1217_v52, 0.0  ;;  %v12029_v52 = vpop.permute.xlu1 %5485 }
 0x2b2   : > { %v2088_v13 = vadd.f32 %v11992_v6, %v2087_v62  ;;  %5719 = vperm.xlu1 %8492, %v14906_v3   ;;  %5716 = vperm.xlu0 %8491, %v14907_v39   ;;  %v1474_v30 = vmax.f32 %v1218_v5, 0.0  ;;  %vm4809_vm7 = vcmp.lt.s32.totalorder %v11894_v55, %v11415_v19  ;;  %v2857_v40 = vmax.f32 %v2093_v45, 0.0  ;;  %14908 = vst [vmem:[#allocation161_spill] sm:$0xff] %v12029_v52  ;;  %v12071_v39 = vld [vmem:[%s9275_s21 + $0x8] sm:$0xff] }
 0x2b3   : > { %v2858_v43 = vmax.f32 %v2096_v14, 0.0  ;;  %7994 = vmatmul.mubr.bf16.gmra.mrb[192].mxu0 %v11752_v10  ;;  %v7312_v34 = vunpack.c.l.bf16 %v7494_v60  ;;  %v7313_v61 = vunpack.c.h.bf16 %v7494_v60  ;;  %v2855_v42 = vmax.f32 %v2085_v25, 0.0  ;;  %v12045_v25 = vpop.permute.xlu0 %5482 }
 0x2b4   : > { %v2856_v58 = vmax.f32 %v2088_v13, 0.0  ;;  %7997 = vmatprep.mubr.bf16.mxu0 %v11787_v20  ;;  %v1219_v3 = vsub.f32 %v7308_v7, %v11395_v54  ;;  %v12027_v62 = vadd.s32 29, %v9290_v1  ;;  %v12035_v45 = vsel %vm4808_vm4, 1, %v14746_v47  ;;  %v7495_v20 = vld [vmem:[%s9243_s16 + $0x370] sm:$0xff]   ;;  %14909 = vst [vmem:[#allocation162_spill] sm:$0xff] %v12045_v25 }
 0x2b5   : > { %v3070_v5 = vpack.c.bf16 %v2858_v43, %v2857_v40  ;;  %v12041_v10 = vsel %vm4807_vm5, 1, %v14746_v47  ;;  %v1220_v54 = vsub.f32 %v7309_v23, %v11399_v15  ;;  %v12049_v60 = vpack.c.bf16 %v1472_v36, %v1471_v21  ;;  %v7496_v36 = vld [vmem:[%s9243_s16 + $0x378] sm:$0xff]  }
 0x2b6   : > { %v3069_v7 = vpack.c.bf16 %v2856_v58, %v2855_v42  ;;  %v7891_v43 = vpop.f32.mrb[88].mxu0  ;;  %5725 = vperm.xlu1 %8492, %v11739_v51   ;;  %5722 = vperm.xlu0 %8491, %v11748_v8   ;;  %v12055_v46 = vsel %vm4810_vm6, 1, %v14746_v47  ;;  %v12061_v15 = vsel %vm4809_vm7, 1, %v14746_v47  ;;  %v12064_v51 = vpack.c.bf16 %v1474_v30, %v1473_v56 }
 0x2b7   : > { %v2109_v42 = vadd.f32 %v11992_v6, %v7891_v43  ;;  %v2100_v14 = vpop.f32.mrb[89].mxu0  ;;  %v1221_v8 = vsub.f32 %v7312_v34, %v11571_v59  ;;  %v1222_v21 = vsub.f32 %v7313_v61, %v11434_v35  ;;  %v1475_v13 = vmax.f32 %v1219_v3, 0.0  ;;  %v14910_v34 = vld [vmem:[#allocation131_spill] sm:$0xff]  ;;  %v12082_v61 = vld [vmem:[%s9275_s21 + $0x18] sm:$0xff]  ;;  %v12088_v3 = vpop.permute.xlu1 %5491 }
 0x2b8   : > { %v2101_v24 = vadd.f32 %v11992_v6, %v2100_v14  ;;  %v7892_v23 = vpop.f32.mrb[90].mxu0  ;;  %8157 = vmatprep.mubr.bf16.mxu1 %v3069_v7  ;;  %vm4812_vm8 = vcmp.lt.s32.totalorder %v12027_v62, %v12071_v39  ;;  %v7316_v19 = vunpack.c.l.bf16 %v7495_v20  ;;  %v1476_v56 = vmax.f32 %v1220_v54, 0.0  ;;  %14911 = vst [vmem:[#allocation131_spill] sm:$0xff] %v12088_v3 }
 0x2b9   : > { %v2112_v55 = vadd.f32 %v11992_v6, %v7892_v23  ;;  %v2103_v30 = vpop.f32.mrb[91].mxu0  ;;  %8158 = vmatmul.mubr.bf16.gmra.mrb[84].mxu1 %v3070_v5  ;;  %vm4811_vm9 = vcmp.lt.s32.totalorder %v12027_v62, %v11832_v12  ;;  %v7317_v35 = vunpack.c.h.bf16 %v7495_v20  ;;  %vm4814_vm10 = vcmp.lt.s32.totalorder %v12027_v62, %v12082_v61  ;;  %v14912_v20 = vld [vmem:[#allocation135_spill] sm:$0xff] }
 0x2ba   : > { %v2104_v40 = vadd.f32 %v11992_v6, %v2103_v30  ;;  %5731 = vperm.xlu1 %8492, %v11784_v50   ;;  %5728 = vperm.xlu0 %8491, %v14910_v34   ;;  %vm4813_vm11 = vcmp.lt.s32.totalorder %v12027_v62, %v11963_v17  ;;  %v7320_v58 = vunpack.c.l.bf16 %v7496_v36  ;;  %v2861_v5 = vmax.f32 %v2109_v42, 0.0  ;;  %v12091_v50 = vpop.permute.xlu0 %5488 }
 0x2bb   : > { %v2862_v54 = vmax.f32 %v2112_v55, 0.0  ;;  %7998 = vmatmul.mubr.bf16.gmra.mrb[196].mxu0 %v14912_v20  ;;  %v1477_v7 = vmax.f32 %v1221_v8, 0.0  ;;  %v1478_v43 = vmax.f32 %v1222_v21, 0.0  ;;  %14913 = vst [vmem:[#allocation135_spill] sm:$0xff] %v12091_v50  ;;  %v2859_v14 = vmax.f32 %v2101_v24, 0.0  ;;  %v14914_v55 = vld [vmem:[#allocation148_spill] sm:$0xff] }
 0x2bc   : > { %v2860_v23 = vmax.f32 %v2104_v40, 0.0  ;;  %8001 = vmatprep.mubr.bf16.mxu0 %v11849_v48  ;;  %v12095_v30 = vsub.f32 %v7316_v19, %v11480_v63  ;;  %v7321_v34 = vunpack.c.h.bf16 %v7496_v36  ;;  %v12097_v3 = vpack.c.bf16 %v1476_v56, %v1475_v13  ;;  %v14915_v48 = vld [vmem:[#allocation150_spill] sm:$0xff] }
 0x2bd   : > { %v3072_v25 = vpack.c.bf16 %v2862_v54, %v2861_v5  ;;  %v12103_v42 = vsel %vm4812_vm8, 1, %v14746_v47  ;;  %v1224_v8 = vsub.f32 %v7317_v35, %v11486_v41  ;;  %v12112_v63 = vsel %vm4811_vm9, 1, %v14746_v47  ;;  %v12121_v41 = vld [vmem:[%s9253_s5 + $0x30] sm:$0xff]  ;;  %v7497_v19 = vld [vmem:[%s9243_s16 + $0x380] sm:$0xff]  }
 0x2be   : > { %v3071_v21 = vpack.c.bf16 %v2860_v23, %v2859_v14  ;;  %v7895_v24 = vpop.f32.mrb[92].mxu0  ;;  %5737 = vperm.xlu1 %8492, %v14914_v55   ;;  %5734 = vperm.xlu0 %8491, %v14915_v48   ;;  %v12118_v36 = vsel %vm4814_vm10, 1, %v14746_v47  ;;  %v12124_v13 = vsub.f32 %v7320_v58, %v12121_v41  ;;  %v12132_v40 = vsel %vm4813_vm11, 1, %v14746_v47  ;;  %v12137_v5 = vld [vmem:[%s9275_s21 + $0x20] sm:$0xff]  ;;  %v12147_v55 = vpop.permute.xlu1 %5497 }
 0x2bf   : > { %v2125_v56 = vadd.f32 %v11992_v6, %v7895_v24  ;;  %v2116_v35 = vpop.f32.mrb[93].mxu0  ;;  %vm4816_vm12 = vcmp.lt.s32.totalorder %v12027_v62, %v12004_v9  ;;  %vm4815_vm13 = vcmp.lt.s32.totalorder %v12027_v62, %v12137_v5  ;;  %v12142_v20 = vpack.c.bf16 %v1478_v43, %v1477_v7  ;;  %v7498_v24 = vld [vmem:[%s9243_s16 + $0x388] sm:$0xff]   ;;  %14916 = vst [vmem:[#allocation148_spill] sm:$0xff] %v12147_v55  ;;  %v12155_v43 = vpop.permute.xlu0 %5494 }
 0x2c0   : > { %v2117_v58 = vadd.f32 %v11992_v6, %v2116_v35  ;;  %v7896_v54 = vpop.f32.mrb[94].mxu0  ;;  %8161 = vmatprep.mubr.bf16.mxu1 %v3071_v21  ;;  %v1479_v14 = vmax.f32 %v12095_v30, 0.0  ;;  %v1226_v23 = vsub.f32 %v7321_v34, %v11520_v11  ;;  %v1480_v52 = vmax.f32 %v1224_v8, 0.0  ;;  %14917 = vst [vmem:[#allocation150_spill] sm:$0xff] %v12155_v43  ;;  %v14918_v21 = vld [vmem:[#allocation168_spill] sm:$0xff] }
 0x2c1   : > { %v2128_v48 = vadd.f32 %v11992_v6, %v7896_v54  ;;  %v2119_v50 = vpop.f32.mrb[95].mxu0  ;;  %8162 = vmatmul.mubr.bf16.gmra.mrb[88].mxu1 %v3072_v25  ;;  %vm4818_vm14 = vcmp.lt.s32.totalorder %v12027_v62, %v12151_v53  ;;  %v7324_v7 = vunpack.c.l.bf16 %v7497_v19  ;;  %v1481_v11 = vmax.f32 %v12124_v13, 0.0  ;;  %v12162_v34 = vld [vmem:[%s9275_s21 + $0x30] sm:$0xff] }
 0x2c2   : > { %v2120_v30 = vadd.f32 %v11992_v6, %v2119_v50  ;;  %5743 = vperm.xlu1 %8492, %v14918_v21   ;;  %5740 = vperm.xlu0 %8491, %v11855_v27   ;;  %vm4817_vm15 = vcmp.lt.s32.totalorder %v12027_v62, %v12162_v34  ;;  %v7325_v25 = vunpack.c.h.bf16 %v7497_v19  ;;  %v2865_v8 = vmax.f32 %v2125_v56, 0.0  ;;  %v12184_v56 = vld [vmem:[%s9253_s5] sm:$0xff] }
 0x2c3   : > { %v2866_v35 = vmax.f32 %v2128_v48, 0.0  ;;  %8002 = vmatmul.mubr.bf16.gmra.mrb[200].mxu0 %v11877_v22  ;;  %v7328_v54 = vunpack.c.l.bf16 %v7498_v24  ;;  %v7329_v43 = vunpack.c.h.bf16 %v7498_v24  ;;  %v2863_v50 = vmax.f32 %v2117_v58, 0.0 }
 0x2c4   : > { %v2864_v21 = vmax.f32 %v2120_v30, 0.0  ;;  %8005 = vmatprep.mubr.bf16.mxu0 %v11909_v49  ;;  %v1482_v27 = vmax.f32 %v1226_v23, 0.0  ;;  %v12169_v13 = vadd.s32 30, %v9290_v1  ;;  %v12175_v19 = vsel %vm4816_vm12, 1, %v14746_v47  ;;  %v12198_v30 = vld [vmem:[%s9253_s5 + $0x8] sm:$0xff] }
 0x2c5   : > { %v3074_v55 = vpack.c.bf16 %v2866_v35, %v2865_v8  ;;  %v12181_v22 = vsel %vm4815_vm13, 1, %v14746_v47  ;;  %v1227_v49 = vsub.f32 %v7324_v7, %v12184_v56  ;;  %v12189_v24 = vpack.c.bf16 %v1480_v52, %v1479_v14  ;;  %v7499_v7 = vld [vmem:[%s9243_s16 + $0x390] sm:$0xff]   ;;  %v12202_v35 = vpop.permute.xlu1 %5503  ;;  %v12213_v14 = vld [vmem:[%s9253_s5 + $0x18] sm:$0xff] }
 0x2c6   : > { %v3073_v58 = vpack.c.bf16 %v2864_v21, %v2863_v50  ;;  %v7899_v23 = vpop.f32.mrb[96].mxu0  ;;  %5749 = vperm.xlu1 %8492, %v11861_v57   ;;  %5746 = vperm.xlu0 %8491, %v11872_v28   ;;  %v12195_v48 = vsel %vm4818_vm14, 1, %v14746_v47  ;;  %v1228_v8 = vsub.f32 %v7325_v25, %v12198_v30  ;;  %14919 = vst [vmem:[#allocation168_spill] sm:$0xff] %v12202_v35  ;;  %v12209_v28 = vsel %vm4817_vm15, 1, %v14746_v47  ;;  %v12217_v25 = vpop.permute.xlu0 %5500 }
 0x2c7   : > { %v2141_v50 = vadd.f32 %v11992_v6, %v7899_v23  ;;  %v2132_v57 = vpop.f32.mrb[97].mxu0  ;;  %14920 = vst [vmem:[#allocation175_spill] sm:$0xff] %v12209_v28  ;;  %v1229_v52 = vsub.f32 %v7328_v54, %v11571_v59  ;;  %v1230_v21 = vsub.f32 %v7329_v43, %v12213_v14  ;;  %14921 = vst [vmem:[#allocation176_spill] sm:$0xff] %v12217_v25  ;;  %v1483_v43 = vmax.f32 %v1227_v49, 0.0 }
 0x2c8   : > { %v2133_v35 = vadd.f32 %v11992_v6, %v2132_v57  ;;  %v7900_v38 = vpop.f32.mrb[98].mxu0  ;;  %8165 = vmatprep.mubr.bf16.mxu1 %v3073_v58  ;;  %v12220_v23 = vpack.c.bf16 %v1482_v27, %v1481_v11  ;;  %vm4820_vm0 = vcmp.lt.s32.totalorder %v12169_v13, %v12071_v39  ;;  %vm4819_vm1 = vcmp.lt.s32.totalorder %v12169_v13, %v11832_v12 }
 0x2c9   : > { %v2144_v59 = vadd.f32 %v11992_v6, %v7900_v38  ;;  %v2135_v62 = vpop.f32.mrb[99].mxu0  ;;  %8166 = vmatmul.mubr.bf16.gmra.mrb[92].mxu1 %v3074_v55  ;;  %v7332_v54 = vunpack.c.l.bf16 %v7499_v7  ;;  %v7333_v28 = vunpack.c.h.bf16 %v7499_v7  ;;  %v1484_v11 = vmax.f32 %v1228_v8, 0.0 }
 0x2ca   : > { %v2136_v25 = vadd.f32 %v11992_v6, %v2135_v62  ;;  %5755 = vperm.xlu1 %8492, %v11906_v2   ;;  %5752 = vperm.xlu0 %8491, %v11915_v44   ;;  %vm4822_vm2 = vcmp.lt.s32.totalorder %v12169_v13, %v12082_v61  ;;  %v7336_v27 = vunpack.c.l.bf16 %v7500_v33  ;;  %v2869_v58 = vmax.f32 %v2141_v50, 0.0  ;;  %v12236_v44 = vpop.permute.xlu1 %5509 }
 0x2cb   : > { %v2870_v38 = vmax.f32 %v2144_v59, 0.0  ;;  %8006 = vmatmul.mubr.bf16.gmra.mrb[204].mxu0 %v11936_v26  ;;  %v1485_v55 = vmax.f32 %v1229_v52, 0.0  ;;  %v1486_v49 = vmax.f32 %v1230_v21, 0.0  ;;  %v2867_v7 = vmax.f32 %v2133_v35, 0.0  ;;  %14922 = vst [vmem:[#allocation177_spill] sm:$0xff] %v12236_v44  ;;  %v12245_v26 = vld [vmem:[%s9253_s5 + $0x20] sm:$0xff] }
 0x2cc   : > { %v2868_v57 = vmax.f32 %v2136_v25, 0.0  ;;  %8009 = vmatprep.mubr.bf16.mxu0 %v11970_v18  ;;  %vm4821_vm3 = vcmp.lt.s32.totalorder %v12169_v13, %v11963_v17  ;;  %v7337_v2 = vunpack.c.h.bf16 %v7500_v33  ;;  %v12242_v50 = vsel %vm4820_vm0, 1, %v14746_v47  ;;  %14923 = vst [vmem:[#allocation178_spill] sm:$0xff] %v12245_v26  ;;  %v12251_v18 = vld [vmem:[%s9253_s5 + $0x28] sm:$0xff]  ;;  %v12254_v33 = vpop.permute.xlu0 %5506 }
 0x2cd   : > { %v3076_v8 = vpack.c.bf16 %v2870_v38, %v2869_v58  ;;  %v12248_v35 = vsub.f32 %v7332_v54, %v12245_v26  ;;  %14924 = vst [vmem:[#allocation179_spill] sm:$0xff] %v12251_v18  ;;  %v1232_v52 = vsub.f32 %v7333_v28, %v12251_v18  ;;  %14925 = vst [vmem:[#allocation180_spill] sm:$0xff] %v12254_v33  ;;  %v12264_v62 = vsel %vm4819_vm1, 1, %v14746_v47  ;;  %v7501_v54 = vld [vmem:[%s9243_s16 + $0x3a0] sm:$0xff]  }
 0x2ce   : > { %v3075_v21 = vpack.c.bf16 %v2868_v57, %v2867_v7  ;;  %v7903_v25 = vpop.f32.mrb[100].mxu0  ;;  %5761 = vperm.xlu1 %8492, %v11925_v16   ;;  %5758 = vperm.xlu0 %8491, %v11931_v37   ;;  %v12258_v59 = vpack.c.bf16 %v1484_v11, %v1483_v43  ;;  %v1233_v28 = vsub.f32 %v7336_v27, %v12121_v41  ;;  %v12275_v16 = vsel %vm4822_vm2, 1, %v14746_v47  ;;  %v12289_v27 = vld [vmem:[%s9253_s5 + $0x38] sm:$0xff] }
 0x2cf   : > { %v2157_v58 = vadd.f32 %v11992_v6, %v7903_v25  ;;  %v2148_v38 = vpop.f32.mrb[101].mxu0  ;;  %v12269_v7 = vpack.c.bf16 %v1486_v49, %v1485_v55  ;;  %14926 = vst [vmem:[#allocation181_spill] sm:$0xff] %v12275_v16  ;;  %v12281_v37 = vsel %vm4821_vm3, 1, %v14746_v47  ;;  %vm4824_vm4 = vcmp.lt.s32.totalorder %v12169_v13, %v12004_v9  ;;  %14928 = vst [vmem:[#allocation183_spill] sm:$0xff] %v12289_v27  ;;  %v7502_v49 = vld [vmem:[%s9243_s16 + $0x3a8] sm:$0xff]   ;;  %v12300_v16 = vpop.permute.xlu1 %5515 }
 0x2d0   : > { %14927 = vst [vmem:[#allocation182_spill] sm:$0xff] %v12281_v37  ;;  %v2149_v43 = vadd.f32 %v11992_v6, %v2148_v38  ;;  %v7904_v11 = vpop.f32.mrb[102].mxu0  ;;  %8169 = vmatprep.mubr.bf16.mxu1 %v3075_v21  ;;  %vm4823_vm5 = vcmp.lt.s32.totalorder %v12169_v13, %v12137_v5  ;;  %v1234_v55 = vsub.f32 %v7337_v2, %v12289_v27  ;;  %v1487_v33 = vmax.f32 %v12248_v35, 0.0 }
 0x2d1   : > { %v2160_v57 = vadd.f32 %v11992_v6, %v7904_v11  ;;  %v2151_v25 = vpop.f32.mrb[103].mxu0  ;;  %8170 = vmatmul.mubr.bf16.gmra.mrb[96].mxu1 %v3076_v8  ;;  %v1488_v38 = vmax.f32 %v1232_v52, 0.0  ;;  %v7340_v44 = vunpack.c.l.bf16 %v7501_v54  ;;  %v1489_v37 = vmax.f32 %v1233_v28, 0.0  ;;  %14929 = vst [vmem:[#allocation184_spill] sm:$0xff] %v12300_v16  ;;  %v12305_v52 = vpop.permute.xlu0 %5512 }
 0x2d2   : > { %v2152_v21 = vadd.f32 %v11992_v6, %v2151_v25  ;;  %5767 = vperm.xlu1 %8492, %v11951_v31   ;;  %5764 = vperm.xlu0 %8491, %v11976_v32   ;;  %vm4826_vm6 = vcmp.lt.s32.totalorder %v12169_v13, %v12151_v53  ;;  %v7341_v2 = vunpack.c.h.bf16 %v7501_v54  ;;  %v2873_v11 = vmax.f32 %v2157_v58, 0.0  ;;  %14930 = vst [vmem:[#allocation185_spill] sm:$0xff] %v12305_v52  ;;  %v7503_v52 = vld [vmem:[%s9243_s16 + $0x3b0] sm:$0xff]  }
 0x2d3   : > { %v2874_v8 = vmax.f32 %v2160_v57, 0.0  ;;  %8010 = vmatmul.mubr.bf16.gmra.mrb[208].mxu0 %v11995_v0  ;;  %vm4825_vm7 = vcmp.lt.s32.totalorder %v12169_v13, %v12162_v34  ;;  %v7344_v35 = vunpack.c.l.bf16 %v7502_v49  ;;  %v2871_v31 = vmax.f32 %v2149_v43, 0.0 }
 0x2d4   : > { %v2872_v32 = vmax.f32 %v2152_v21, 0.0  ;;  %8013 = vmatprep.mubr.bf16.mxu0 %v12049_v60  ;;  %v1490_v28 = vmax.f32 %v1234_v55, 0.0  ;;  %v7345_v25 = vunpack.c.h.bf16 %v7502_v49  ;;  %v12312_v58 = vsel %vm4824_vm4, 1, %v14746_v47 }
 0x2d5   : > { %v3078_v54 = vpack.c.bf16 %v2874_v8, %v2873_v11  ;;  %v1235_v0 = vsub.f32 %v7340_v44, %v12184_v56  ;;  %v12316_v57 = vadd.s32 31, %v9290_v1  ;;  %v12325_v60 = vsel %vm4823_vm5, 1, %v14746_v47  ;;  %v12344_v11 = vld [vmem:[%s9253_s5 + $0x10] sm:$0xff] }
 0x2d6   : > { %v3077_v43 = vpack.c.bf16 %v2872_v32, %v2871_v31  ;;  %v7907_v21 = vpop.f32.mrb[104].mxu0  ;;  %5773 = vperm.xlu1 %8492, %v11986_v4   ;;  %5770 = vperm.xlu0 %8491, %v12001_v29   ;;  %v12331_v44 = vsel %vm4826_vm6, 1, %v14746_v47  ;;  %v1236_v1 = vsub.f32 %v7341_v2, %v12198_v30  ;;  %v12335_v4 = vpack.c.bf16 %v1488_v38, %v1487_v33  ;;  %v12351_v38 = vpop.permute.xlu1 %5521 }
 0x2d7   : > { %v2173_v55 = vadd.f32 %v11992_v6, %v7907_v21  ;;  %v2164_v49 = vpop.f32.mrb[105].mxu0  ;;  %v12341_v29 = vsel %vm4825_vm7, 1, %v14746_v47  ;;  %v1237_v8 = vsub.f32 %v7344_v35, %v12344_v11  ;;  %v12348_v2 = vpack.c.bf16 %v1490_v28, %v1489_v37  ;;  %14932 = vst [vmem:[#allocation187_spill] sm:$0xff] %v12351_v38 }
 0x2d8   : > { %14931 = vst [vmem:[#allocation186_spill] sm:$0xff] %v12341_v29  ;;  %v2165_v31 = vadd.f32 %v11992_v6, %v2164_v49  ;;  %v7908_v32 = vpop.f32.mrb[106].mxu0  ;;  %8173 = vmatprep.mubr.bf16.mxu1 %v3077_v43  ;;  %v1238_v21 = vsub.f32 %v7345_v25, %v12213_v14  ;;  %v7348_v33 = vunpack.c.l.bf16 %v7503_v52  ;;  %v1491_v29 = vmax.f32 %v1235_v0, 0.0  ;;  %v12356_v49 = vpop.permute.xlu0 %5518  ;;  %v7504_v25 = vld [vmem:[%s9243_s16 + $0x3b8] sm:$0xff]  }
 0x2d9   : > { %v2176_v13 = vadd.f32 %v11992_v6, %v7908_v32  ;;  %v2167_v16 = vpop.f32.mrb[107].mxu0  ;;  %8174 = vmatmul.mubr.bf16.gmra.mrb[100].mxu1 %v3078_v54  ;;  %vm4828_vm8 = vcmp.lt.s32.totalorder %v12316_v57, %v12071_v39  ;;  %v7349_v35 = vunpack.c.h.bf16 %v7503_v52  ;;  %14933 = vst [vmem:[#allocation188_spill] sm:$0xff] %v12356_v49  ;;  %v1492_v28 = vmax.f32 %v1236_v1, 0.0 }
 0x2da   : > { %v2168_v37 = vadd.f32 %v11992_v6, %v2167_v16  ;;  %5779 = vperm.xlu1 %8492, %v12035_v45   ;;  %5776 = vperm.xlu0 %8491, %v12041_v10   ;;  %vm4827_vm9 = vcmp.lt.s32.totalorder %v12316_v57, %v11832_v12  ;;  %vm4830_vm10 = vcmp.lt.s32.totalorder %v12316_v57, %v12082_v61  ;;  %v2877_v54 = vmax.f32 %v2173_v55, 0.0 }
 0x2db   : > { %v2878_v0 = vmax.f32 %v2176_v13, 0.0  ;;  %8014 = vmatmul.mubr.bf16.gmra.mrb[212].mxu0 %v12064_v51  ;;  %v1493_v52 = vmax.f32 %v1237_v8, 0.0  ;;  %vm4829_vm11 = vcmp.lt.s32.totalorder %v12316_v57, %v11963_v17  ;;  %v2875_v16 = vmax.f32 %v2165_v31, 0.0 }
 0x2dc   : > { %v2876_v45 = vmax.f32 %v2168_v37, 0.0  ;;  %8017 = vmatprep.mubr.bf16.mxu0 %v12097_v3  ;;  %v1494_v10 = vmax.f32 %v1238_v21, 0.0  ;;  %v12371_v43 = vsub.f32 %v7348_v33, %v12245_v26  ;;  %v12377_v55 = vsel %vm4828_vm8, 1, %v14746_v47  ;;  %v12388_v21 = vpop.permute.xlu1 %5527  ;;  %v12410_v37 = vpop.permute.xlu0 %5524 }
 0x2dd   : > { %v3080_v1 = vpack.c.bf16 %v2878_v0, %v2877_v54  ;;  %v12380_v51 = vsub.f32 %v7349_v35, %v12251_v18  ;;  %v7352_v8 = vunpack.c.l.bf16 %v7504_v25  ;;  %v12384_v3 = vpack.c.bf16 %v1492_v28, %v1491_v29  ;;  %14934 = vst [vmem:[#allocation189_spill] sm:$0xff] %v12388_v21  ;;  %v7505_v29 = vld [vmem:[%s9243_s16 + $0x3c0] sm:$0xff]   ;;  %14935 = vst [vmem:[#allocation190_spill] sm:$0xff] %v12410_v37  ;;  %v7506_v54 = vld [vmem:[%s9243_s16 + $0x3c8] sm:$0xff]  }
 0x2de   : > { %v3079_v31 = vpack.c.bf16 %v2876_v45, %v2875_v16  ;;  %v7911_v32 = vpop.f32.mrb[108].mxu0  ;;  %5785 = vperm.xlu1 %8492, %v12055_v46   ;;  %5782 = vperm.xlu0 %8491, %v12061_v15   ;;  %vm4832_vm12 = vcmp.lt.s32.totalorder %v12316_v57, %v12004_v9  ;;  %v7353_v39 = vunpack.c.h.bf16 %v7504_v25  ;;  %v12395_v35 = vsel %vm4827_vm9, 1, %v14746_v47 }
 0x2df   : > { %v2189_v33 = vadd.f32 %v11992_v6, %v7911_v32  ;;  %v2180_v13 = vpop.f32.mrb[109].mxu0  ;;  %v12401_v46 = vsel %vm4830_vm10, 1, %v14746_v47  ;;  %v12407_v15 = vsel %vm4829_vm11, 1, %v14746_v47  ;;  %v12413_v25 = vpack.c.bf16 %v1494_v10, %v1493_v52  ;;  %v7507_v10 = vld [vmem:[%s9243_s16 + $0x3d0] sm:$0xff]  }
 0x2e0   : > { %v2181_v12 = vadd.f32 %v11992_v6, %v2180_v13  ;;  %v7912_v28 = vpop.f32.mrb[110].mxu0  ;;  %8177 = vmatprep.mubr.bf16.mxu1 %v3079_v31  ;;  %v1495_v61 = vmax.f32 %v12371_v43, 0.0  ;;  %vm4831_vm13 = vcmp.lt.s32.totalorder %v12316_v57, %v12137_v5  ;;  %v1496_v16 = vmax.f32 %v12380_v51, 0.0  ;;  %v12435_v49 = vpop.permute.xlu1 %5533 }
 0x2e1   : > { %v2192_v17 = vadd.f32 %v11992_v6, %v7912_v28  ;;  %v2183_v0 = vpop.f32.mrb[111].mxu0  ;;  %8178 = vmatmul.mubr.bf16.gmra.mrb[104].mxu1 %v3080_v1  ;;  %v12425_v45 = vsel %vm4832_vm12, 1, %v14746_v47  ;;  %v1241_v52 = vsub.f32 %v7352_v8, %v12121_v41  ;;  %v1242_v31 = vsub.f32 %v7353_v39, %v12289_v27  ;;  %14936 = vst [vmem:[#allocation191_spill] sm:$0xff] %v12435_v49 }
 0x2e2   : > { %v2184_v43 = vadd.f32 %v11992_v6, %v2183_v0  ;;  %5791 = vperm.xlu1 %8492, %v12103_v42   ;;  %5788 = vperm.xlu0 %8491, %v12112_v63   ;;  %v7356_v1 = vunpack.c.l.bf16 %v7505_v29  ;;  %v7357_v32 = vunpack.c.h.bf16 %v7505_v29  ;;  %v2881_v51 = vmax.f32 %v2189_v33, 0.0  ;;  %v12445_v29 = vpop.permute.xlu0 %5530 }
 0x2e3   : > { %v2882_v13 = vmax.f32 %v2192_v17, 0.0  ;;  %8018 = vmatmul.mubr.bf16.gmra.mrb[216].mxu0 %v12142_v20  ;;  %v7360_v9 = vunpack.c.l.bf16 %v7506_v54  ;;  %v7361_v28 = vunpack.c.h.bf16 %v7506_v54  ;;  %v2879_v21 = vmax.f32 %v2181_v12, 0.0  ;;  %14937 = vst [vmem:[#allocation192_spill] sm:$0xff] %v12445_v29 }
 0x2e4   : > { %v2880_v37 = vmax.f32 %v2184_v43, 0.0  ;;  %v8075_v8 = vpop.f32.mrb[0].mxu1  ;;  %8021 = vmatprep.mubr.bf16.mxu0 %v12189_v24  ;;  %v7364_v0 = vunpack.c.l.bf16 %v7507_v10  ;;  %v7365_v42 = vunpack.c.h.bf16 %v7507_v10  ;;  %v12441_v33 = vsel %vm4831_vm13, 1, %v14746_v47  ;;  %v7508_v10 = vld [vmem:[%s9243_s16 + $0x3d8] sm:$0xff]  }
 0x2e5   : > { %v3082_v63 = vpack.c.bf16 %v2882_v13, %v2881_v51  ;;  %v3260_v39 = vpop.f32.mrb[1].mxu1  ;;  %v1497_v20 = vmax.f32 %v1241_v52, 0.0  ;;  %vm4834_vm14 = vcmp.lt.s32.totalorder %v12316_v57, %v12151_v53  ;;  %v1498_v54 = vmax.f32 %v1242_v31, 0.0 }
 0x2e6   : > { %v3081_v24 = vpack.c.bf16 %v2880_v37, %v2879_v21  ;;  %v7915_v12 = vpop.f32.mrb[112].mxu0  ;;  %5797 = vperm.xlu1 %8492, %v12118_v36   ;;  %5794 = vperm.xlu0 %8491, %v12132_v40   ;;  %v12450_v17 = vsub.f32 %v7356_v1, %v12184_v56  ;;  %v12453_v5 = vsub.f32 %v7357_v32, %v12198_v30  ;;  %v8076_v43 = vpop.f32.mrb[2].mxu1 }
 0x2e7   : > { %v2205_v52 = vadd.f32 %v11992_v6, %v7915_v12  ;;  %v2196_v51 = vpop.f32.mrb[113].mxu0  ;;  %v12457_v13 = vpack.c.bf16 %v1496_v16, %v1495_v61  ;;  %v12460_v21 = vsub.f32 %v7360_v9, %v12344_v11  ;;  %v12463_v36 = vsub.f32 %v7361_v28, %v12213_v14  ;;  %v3263_v37 = vpop.f32.mrb[3].mxu1 }
 0x2e8   : > { %v2197_v40 = vadd.f32 %v11992_v6, %v2196_v51  ;;  %v7916_v31 = vpop.f32.mrb[114].mxu0  ;;  %8181 = vmatprep.mubr.bf16.mxu1 %v3081_v24  ;;  %vm4833_vm15 = vcmp.lt.s32.totalorder %v12316_v57, %v12162_v34  ;;  %v1247_v1 = vsub.f32 %v7364_v0, %v12245_v26  ;;  %v1248_v32 = vsub.f32 %v7365_v42, %v12251_v18  ;;  %v14938_v24 = vld [vmem:[#allocation38_spill] sm:$0xff]  ;;  %v12478_v51 = vld [vmem:[#allocation13] ss:$0 sm:$0xff]  ;;  %v14939_v18 = vld [vmem:[#allocation39_spill] sm:$0xff] }
 0x2e9   : > { %v2208_v61 = vadd.f32 %v11992_v6, %v7916_v31  ;;  %v2199_v16 = vpop.f32.mrb[115].mxu0  ;;  %8182 = vmatmul.mubr.bf16.gmra.mrb[108].mxu1 %v3082_v63  ;;  %v12475_v9 = vsel %vm4834_vm14, 1, %v14746_v47  ;;  %v7368_v28 = vunpack.c.l.bf16 %v7508_v10  ;;  %v7369_v12 = vunpack.c.h.bf16 %v7508_v10 }
 0x2ea   : > { %vm5861_vm0 = vcmp.eq.s32.totalorder %v14938_v24, 1  ;;  %v2200_v0 = vadd.f32 %v11992_v6, %v2199_v16  ;;  %5803 = vperm.xlu1 %8492, %v12175_v19   ;;  %5800 = vperm.xlu0 %8491, %v12181_v22   ;;  %v12483_v42 = vpack.c.bf16 %v1498_v54, %v1497_v20  ;;  %v1499_v63 = vmax.f32 %v12450_v17, 0.0  ;;  %v7509_v54 = vld [vmem:[%s9243_s16 + $0x3e0] sm:$0xff]   ;;  %v14940_v17 = vld [vmem:[#allocation40_spill] sm:$0xff] }
 0x2eb   : > { %v1500_v53 = vmax.f32 %v12453_v5, 0.0  ;;  %v2885_v31 = vmax.f32 %v2205_v52, 0.0  ;;  %v2886_v49 = vmax.f32 %v2208_v61, 0.0  ;;  %8022 = vmatmul.mubr.bf16.gmra.mrb[220].mxu0 %v12220_v23  ;;  %v1501_v10 = vmax.f32 %v12460_v21, 0.0  ;;  %v12494_v5 = vpop.permute.xlu1 %5539 }
 0x2ec   : > { %v1502_v29 = vmax.f32 %v12463_v36, 0.0  ;;  %v2883_v16 = vmax.f32 %v2197_v40, 0.0  ;;  %v2884_v38 = vmax.f32 %v2200_v0, 0.0  ;;  %v8079_v19 = vpop.f32.mrb[4].mxu1  ;;  %8025 = vmatprep.mubr.bf16.mxu0 %v12258_v59  ;;  %v1503_v22 = vmax.f32 %v1247_v1, 0.0  ;;  %14941 = vst [vmem:[#allocation38_spill] sm:$0xff] %v12494_v5  ;;  %v12506_v1 = vpop.permute.xlu0 %5536 }
 0x2ed   : > { %v1504_v20 = vmax.f32 %v1248_v32, 0.0  ;;  %vm5859_vm1 = vcmp.eq.s32.totalorder %v14939_v18, 1  ;;  %vm5862_vm2 = vcmp.eq.s32.totalorder %v14940_v17, 1  ;;  %v3269_v23 = vadd.f32 %v8075_v8, %v12478_v51  ;;  %v12497_v21 = vpop.f32.mrb[5].mxu1  ;;  %v14942_v40 = vld [vmem:[#allocation41_spill] sm:$0xff]  ;;  %14943 = vst [vmem:[#allocation39_spill] sm:$0xff] %v12506_v1 }
 0x2ee   : > { %v3084_v52 = vpack.c.bf16 %v2886_v49, %v2885_v31  ;;  %v12500_v36 = vsub.f32 %v7368_v28, %v12121_v41  ;;  %v12503_v59 = vsub.f32 %v7369_v12, %v12289_v27  ;;  %vm5860_vm3 = vcmp.eq.s32.totalorder %v14942_v40, 1  ;;  %v7919_v5 = vpop.f32.mrb[116].mxu0  ;;  %5809 = vperm.xlu1 %8492, %v12195_v48   ;;  %v14944_v49 = vld [vmem:[#allocation175_spill] sm:$0xff]  ;;  %v12523_v12 = vpop.f32.mrb[6].mxu1  ;;  %v14946_v31 = vld [vmem:[#allocation49_spill] sm:$0xff] }
 0x2ef   : > { %v3261_v32 = vadd.f32 %v12478_v51, %v3260_v39  ;;  %v3272_v61 = vadd.f32 %v8076_v43, %v12478_v51  ;;  %v3083_v0 = vpack.c.bf16 %v2884_v38, %v2883_v16  ;;  %5806 = vperm.xlu0 %8491, %v14944_v49   ;;  %v12516_v41 = vsel %vm4833_vm15, 1, %v14746_v47  ;;  %v12519_v8 = vld [vmem:[%s9243_s16 + $0x3e8] sm:$0xff]   ;;  %v2212_v38 = vpop.f32.mrb[117].mxu0  ;;  %v12529_v49 = vpop.f32.mrb[7].mxu1 }
 0x2f0   : > { %14945 = vst [vmem:[#allocation40_spill] sm:$0xff] %v12516_v41  ;;  %v3264_v28 = vadd.f32 %v12478_v51, %v3263_v37  ;;  %v2221_v39 = vadd.f32 %v11992_v6, %v7919_v5  ;;  %v12525_v43 = vpack.c.bf16 %v1500_v53, %v1499_v63  ;;  %v7372_v48 = vunpack.c.l.bf16 %v7509_v54  ;;  %v7920_v47 = vpop.f32.mrb[118].mxu0  ;;  %v14947_v5 = vld [vmem:[#allocation47_spill] sm:$0xff] }
 0x2f1   : > { %vm5869_vm4 = vcmp.eq.s32.totalorder %v14946_v31, 1  ;;  %v2213_v16 = vadd.f32 %v11992_v6, %v2212_v38  ;;  %8185 = vmatprep.mubr.bf16.mxu1 %v3083_v0  ;;  %v12531_v34 = vpack.c.bf16 %v1502_v29, %v1501_v10  ;;  %v12533_v57 = vpack.c.bf16 %v1504_v20, %v1503_v22  ;;  %v2215_v53 = vpop.f32.mrb[119].mxu0  ;;  %v14948_v10 = vld [vmem:[#allocation48_spill] sm:$0xff]  ;;  %v14956_v31 = vld [vmem:[#allocation42_spill] sm:$0xff] }
 0x2f2   : > { %v7373_v37 = vunpack.c.h.bf16 %v7509_v54  ;;  %vm5867_vm5 = vcmp.eq.s32.totalorder %v14947_v5, 1  ;;  %v4285_v1 = vmax.f32 %v3269_v23, 0.0  ;;  %v2224_v63 = vadd.f32 %v11992_v6, %v7920_v47  ;;  %8186 = vmatmul.mubr.bf16.gmra.mrb[112].mxu1 %v3084_v52  ;;  %5815 = vperm.xlu1 %8492, %v12242_v50   ;;  %v14949_v52 = vld [vmem:[#allocation46_spill] sm:$0xff] }
 0x2f3   : > { %v4283_v26 = vmax.f32 %v3261_v32, 0.0  ;;  %v4286_v41 = vmax.f32 %v3272_v61, 0.0  ;;  %v2216_v0 = vadd.f32 %v11992_v6, %v2215_v53  ;;  %5812 = vperm.xlu0 %8491, %v12264_v62   ;;  %vm5870_vm6 = vcmp.eq.s32.totalorder %v14948_v10, 1  ;;  %8026 = vmatmul.mubr.bf16.gmra.mrb[224].mxu0 %v12269_v7  ;;  %v14951_v53 = vld [vmem:[#allocation181_spill] sm:$0xff] }
 0x2f4   : > { %v4284_v22 = vmax.f32 %v3264_v28, 0.0  ;;  %v2889_v20 = vmax.f32 %v2221_v39, 0.0  ;;  %v2890_v54 = vmax.f32 %v2224_v63, 0.0  ;;  %v12546_v23 = vsub.f32 %v7372_v48, %v12184_v56  ;;  %v8083_v62 = vpop.f32.mrb[8].mxu1  ;;  %8029 = vmatprep.mubr.bf16.mxu0 %v12335_v4  ;;  %v12556_v28 = vpop.permute.xlu1 %5545 }
 0x2f5   : > { %vm5868_vm7 = vcmp.eq.s32.totalorder %v14949_v52, 1  ;;  %v12550_v32 = vadd.f32 %v8079_v19, %v12478_v51  ;;  %v2887_v50 = vmax.f32 %v2213_v16, 0.0  ;;  %v2888_v61 = vmax.f32 %v2216_v0, 0.0  ;;  %v3292_v48 = vpop.f32.mrb[9].mxu1  ;;  %v14950_v16 = vld [vmem:[#allocation45_spill] sm:$0xff]  ;;  %v12565_v63 = vpop.permute.xlu0 %5542  ;;  %v14952_v0 = vld [vmem:[#allocation182_spill] sm:$0xff] }
 0x2f6   : > { %v12554_v47 = vsub.f32 %v7373_v37, %v12198_v30  ;;  %v12560_v7 = vsel %vm5861_vm0, %v4285_v1, -inf  ;;  %v3086_v56 = vpack.c.bf16 %v2890_v54, %v2889_v20  ;;  %v3301_v39 = vadd.f32 %v8083_v62, %v12478_v51  ;;  %v7923_v37 = vpop.f32.mrb[120].mxu0  ;;  %5821 = vperm.xlu1 %8492, %v14951_v53  }
 0x2f7   : > { %vm5865_vm8 = vcmp.eq.s32.totalorder %v14950_v16, 1  ;;  %v12569_v30 = vsel %vm5859_vm1, %v4283_v26, -inf  ;;  %v12573_v4 = vsel %vm5862_vm2, %v4286_v41, -inf  ;;  %v3085_v24 = vpack.c.bf16 %v2888_v61, %v2887_v50  ;;  %5818 = vperm.xlu0 %8491, %v14952_v0   ;;  %v8084_v41 = vpop.f32.mrb[10].mxu1  ;;  %v2228_v54 = vpop.f32.mrb[121].mxu0  ;;  %v14953_v50 = vld [vmem:[#allocation43_spill] sm:$0xff] }
 0x2f8   : > { %v3293_v1 = vadd.f32 %v12478_v51, %v3292_v48  ;;  %v12580_v20 = vsel %vm5860_vm3, %v4284_v22, -inf  ;;  %v12584_v26 = vadd.f32 %v12478_v51, %v12497_v21  ;;  %v4293_v18 = vmax.f32 %v3301_v39, 0.0  ;;  %v3295_v22 = vpop.f32.mrb[11].mxu1  ;;  %v7924_v53 = vpop.f32.mrb[122].mxu0  ;;  %v14954_v0 = vld [vmem:[#allocation51_spill] sm:$0xff]  ;;  %v14955_v21 = vld [vmem:[#allocation53_spill] sm:$0xff] }
 0x2f9   : > { %v2237_v17 = vadd.f32 %v11992_v6, %v7923_v37  ;;  %vm5863_vm9 = vcmp.eq.s32.totalorder %v14953_v50, 1  ;;  %v4289_v61 = vmax.f32 %v12550_v32, 0.0  ;;  %v3304_v48 = vadd.f32 %v8084_v41, %v12478_v51  ;;  %8189 = vmatprep.mubr.bf16.mxu1 %v3085_v24  ;;  %v2231_v41 = vpop.f32.mrb[123].mxu0 }
 0x2fa   : > { %v4291_v62 = vmax.f32 %v3293_v1, 0.0  ;;  %v2229_v40 = vadd.f32 %v11992_v6, %v2228_v54  ;;  %vm5871_vm10 = vcmp.eq.s32.totalorder %v14954_v0, 1  ;;  %vm5873_vm11 = vcmp.eq.s32.totalorder %v14955_v21, 1  ;;  %8190 = vmatmul.mubr.bf16.gmra.mrb[116].mxu1 %v3086_v56  ;;  %5827 = vperm.xlu1 %8492, %v12312_v58   ;;  %v14961_v56 = vld [vmem:[#allocation57_spill] sm:$0xff]  ;;  %v14964_v0 = vld [vmem:[#allocation54_spill] sm:$0xff] }
 0x2fb   : > { %v12595_v39 = vadd.f32 %v12523_v12, %v12478_v51  ;;  %v12599_v37 = vsel %vm5869_vm4, %v4293_v18, -inf  ;;  %v3296_v32 = vadd.f32 %v12478_v51, %v3295_v22  ;;  %v2240_v1 = vadd.f32 %v11992_v6, %v7924_v53  ;;  %5824 = vperm.xlu0 %8491, %v12325_v60   ;;  %v14957_v18 = vld [vmem:[#allocation44_spill] sm:$0xff]  ;;  %8030 = vmatmul.mubr.bf16.gmra.mrb[228].mxu0 %v12348_v2 }
 0x2fc   : > { %v12607_v54 = vsel %vm5867_vm5, %v4291_v62, -inf  ;;  %v2893_v29 = vmax.f32 %v2237_v17, 0.0  ;;  %v4294_v12 = vmax.f32 %v3304_v48, 0.0  ;;  %vm5864_vm12 = vcmp.eq.s32.totalorder %v14956_v31, 1  ;;  %v14958_v22 = vld [vmem:[#allocation52_spill] sm:$0xff]  ;;  %v14959_v17 = vld [vmem:[#allocation50_spill] sm:$0xff]  ;;  %8033 = vmatprep.mubr.bf16.mxu0 %v12384_v3 }
 0x2fd   : > { %vm5866_vm13 = vcmp.eq.s32.totalorder %v14957_v18, 1  ;;  %vm5874_vm14 = vcmp.eq.s32.totalorder %v14958_v22, 1  ;;  %v4292_v53 = vmax.f32 %v3296_v32, 0.0  ;;  %v2894_v27 = vmax.f32 %v2240_v1, 0.0  ;;  %v8087_v24 = vpop.f32.mrb[12].mxu1  ;;  %v12627_v32 = vpop.permute.xlu1 %5551 }
 0x2fe   : > { %v2232_v5 = vadd.f32 %v11992_v6, %v2231_v41  ;;  %vm5872_vm15 = vcmp.eq.s32.totalorder %v14959_v17, 1  ;;  %v4287_v58 = vmax.f32 %v12584_v26, 0.0  ;;  %v3280_v60 = vadd.f32 %v12478_v51, %v12529_v49  ;;  %v3308_v49 = vpop.f32.mrb[13].mxu1  ;;  %v12635_v41 = vpop.permute.xlu0 %5548  ;;  %5833 = vperm.xlu1 %8492, %v12331_v44   ;;  %v14960_v6 = vld [vmem:[#allocation186_spill] sm:$0xff] }
 0x2ff   : > { %v12624_v62 = vsel %vm5870_vm6, %v4294_v12, -inf  ;;  %v2891_v48 = vmax.f32 %v2229_v40, 0.0  ;;  %v12633_v2 = vsel %vm5868_vm7, %v4292_v53, -inf  ;;  %v3088_v26 = vpack.c.bf16 %v2894_v27, %v2893_v29  ;;  %v7927_v12 = vpop.f32.mrb[124].mxu0  ;;  %5830 = vperm.xlu0 %8491, %v14960_v6   ;;  %v8088_v10 = vpop.f32.mrb[14].mxu1 }
 0x300   : > { %v2892_v1 = vmax.f32 %v2232_v5, 0.0  ;;  %v3317_v40 = vadd.f32 %v8087_v24, %v12478_v51  ;;  %v3309_v3 = vadd.f32 %v12478_v51, %v3308_v49  ;;  %v12646_v27 = vsel %vm5865_vm8, %v4289_v61, -inf  ;;  %v12649_v5 = vld [vmem:[#allocation10] ss:$0 sm:$0xff]  ;;  %v2244_v49 = vpop.f32.mrb[125].mxu0  ;;  %v3311_v38 = vpop.f32.mrb[15].mxu1 }
 0x301   : > { %v4290_v29 = vmax.f32 %v12595_v39, 0.0  ;;  %v2253_v24 = vadd.f32 %v12649_v5, %v7927_v12  ;;  %vm5877_vm0 = vcmp.eq.s32.totalorder %v14961_v56, 1  ;;  %v4288_v44 = vmax.f32 %v3280_v60, 0.0  ;;  %v7928_v16 = vpop.f32.mrb[126].mxu0  ;;  %v14962_v61 = vld [vmem:[#allocation55_spill] sm:$0xff] }
 0x302   : > { %v3087_v53 = vpack.c.bf16 %v2892_v1, %v2891_v48  ;;  %v4297_v19 = vmax.f32 %v3317_v40, 0.0  ;;  %v4295_v6 = vmax.f32 %v3309_v3, 0.0  ;;  %v3320_v52 = vadd.f32 %v8088_v10, %v12478_v51  ;;  %v2247_v60 = vpop.f32.mrb[127].mxu0  ;;  %5839 = vperm.xlu1 %8492, %v12377_v55  }
 0x303   : > { %vm5875_vm1 = vcmp.eq.s32.totalorder %v14962_v61, 1  ;;  %v12657_v39 = vsel %vm5863_vm9, %v4287_v58, -inf  ;;  %v2245_v48 = vadd.f32 %v12649_v5, %v2244_v49  ;;  %v3312_v1 = vadd.f32 %v12478_v51, %v3311_v38  ;;  %v14963_v58 = vld [vmem:[#allocation56_spill] sm:$0xff]  ;;  %5836 = vperm.xlu0 %8491, %v12395_v35   ;;  %8034 = vmatmul.mubr.bf16.gmra.mrb[232].mxu0 %v12413_v25  ;;  %v12693_v35 = vpop.permute.xlu1 %5557 }
 0x304   : > { %v2256_v12 = vadd.f32 %v12649_v5, %v7928_v16  ;;  %8193 = vmatprep.mubr.bf16.mxu1 %v3087_v53  ;;  %v12664_v40 = vsel %vm5873_vm11, %v4297_v19, -inf  ;;  %v12668_v10 = vsel %vm5871_vm10, %v4295_v6, -inf  ;;  %v2897_v3 = vmax.f32 %v2253_v24, 0.0  ;;  %v8091_v49 = vpop.f32.mrb[16].mxu1  ;;  %8037 = vmatprep.mubr.bf16.mxu0 %v12457_v13  ;;  %v14966_v16 = vld [vmem:[#allocation59_spill] sm:$0xff] }
 0x305   : > { %v4298_v50 = vmax.f32 %v3320_v52, 0.0  ;;  %8194 = vmatmul.mubr.bf16.gmra.mrb[120].mxu1 %v3088_v26  ;;  %vm5878_vm2 = vcmp.eq.s32.totalorder %v14963_v58, 1  ;;  %v6565_v38 = vmax.f32 %v12646_v27, %v12664_v40  ;;  %v4296_v21 = vmax.f32 %v3312_v1, 0.0  ;;  %v3324_v22 = vpop.f32.mrb[17].mxu1  ;;  %v14985_v40 = vld [vmem:[#allocation179_spill] sm:$0xff] }
 0x306   : > { %v2898_v19 = vmax.f32 %v2256_v12, 0.0  ;;  %vm5876_vm3 = vcmp.eq.s32.totalorder %v14964_v0, 1  ;;  %v12681_v26 = vsel %vm5866_vm13, %v4290_v29, -inf  ;;  %v12685_v55 = vsel %vm5864_vm12, %v4288_v44, -inf  ;;  %v12702_v44 = vpop.permute.xlu0 %5554  ;;  %v7931_v12 = vpop.f32.mrb[128].mxu0  ;;  %5845 = vperm.xlu1 %8492, %v12401_v46  }
 0x307   : > { %v12689_v52 = vsel %vm5874_vm14, %v4298_v50, -inf  ;;  %v2248_v24 = vadd.f32 %v12649_v5, %v2247_v60  ;;  %v12699_v18 = vsel %vm5872_vm15, %v4296_v21, -inf  ;;  %v3333_v29 = vadd.f32 %v8091_v49, %v12478_v51  ;;  %v8092_v50 = vpop.f32.mrb[18].mxu1  ;;  %5842 = vperm.xlu0 %8491, %v12407_v15   ;;  %v14967_v15 = vld [vmem:[#allocation61_spill] sm:$0xff] }
 0x308   : > { %v3090_v31 = vpack.c.bf16 %v2898_v19, %v2897_v3  ;;  %v2895_v6 = vmax.f32 %v2245_v48, 0.0  ;;  %v3325_v1 = vadd.f32 %v12478_v51, %v3324_v22  ;;  %v2269_v17 = vadd.f32 %v12649_v5, %v7931_v12  ;;  %v2260_v3 = vpop.f32.mrb[129].mxu0 }
 0x309   : > { %v2896_v13 = vmax.f32 %v2248_v24, 0.0  ;;  %v4301_v60 = vmax.f32 %v3333_v29, 0.0  ;;  %v1508_v21 = vmax.f32 %v12554_v47, 0.0  ;;  %v14965_v48 = vunpack.c.l.bf16 %v12519_v8  ;;  %v3327_v29 = vpop.f32.mrb[19].mxu1  ;;  %v7932_v12 = vpop.f32.mrb[130].mxu0 }
 0x30a   : > { %v4299_v49 = vmax.f32 %v3325_v1, 0.0  ;;  %v3336_v22 = vadd.f32 %v8092_v50, %v12478_v51  ;;  %v2261_v46 = vadd.f32 %v12649_v5, %v2260_v3  ;;  %vm5879_vm4 = vcmp.eq.s32.totalorder %v14966_v16, 1  ;;  %v12730_v1 = vld [vmem:[%s9243_s16 + $0x3f0] sm:$0xff]   ;;  %5851 = vperm.xlu1 %8492, %v12425_v45  }
 0x30b   : > { %v12714_v19 = vsub.f32 %v14965_v48, %v12344_v11  ;;  %v3089_v24 = vpack.c.bf16 %v2896_v13, %v2895_v6  ;;  %vm5881_vm5 = vcmp.eq.s32.totalorder %v14967_v15, 1  ;;  %v6133_v47 = vsel %vm5877_vm0, %v4301_v60, -inf  ;;  %v2263_v48 = vpop.f32.mrb[131].mxu0  ;;  %5848 = vperm.xlu0 %8491, %v12441_v33   ;;  %8038 = vmatmul.mubr.bf16.gmra.mrb[236].mxu0 %v12483_v42 }
 0x30c   : > { %v3328_v25 = vadd.f32 %v12478_v51, %v3327_v29  ;;  %v2272_v11 = vadd.f32 %v12649_v5, %v7932_v12  ;;  %v14968_v6 = vunpack.c.h.bf16 %v12519_v8  ;;  %v14969_v50 = vmax.f32 %v12560_v7, %v12599_v37  ;;  %v14970_v12 = vld [vmem:[#allocation60_spill] sm:$0xff]  ;;  %v14972_v37 = vld [vmem:[#allocation58_spill] sm:$0xff]  ;;  %8041 = vmatprep.mubr.bf16.mxu0 %v12525_v43 }
 0x30d   : > { %v6131_v56 = vsel %vm5875_vm1, %v4299_v49, -inf  ;;  %v2901_v60 = vmax.f32 %v2269_v17, 0.0  ;;  %v4302_v29 = vmax.f32 %v3336_v22, 0.0  ;;  %8197 = vmatprep.mubr.bf16.mxu1 %v3089_v24  ;;  %vm5882_vm6 = vcmp.eq.s32.totalorder %v14970_v12, 1  ;;  %v8095_v17 = vpop.f32.mrb[20].mxu1 }
 0x30e   : > { %v12727_v13 = vsub.f32 %v14968_v6, %v12213_v14  ;;  %v12735_v3 = vmax.f32 %v14969_v50, %v6133_v47  ;;  %v14971_v14 = vmax.f32 %v12569_v30, %v12607_v54  ;;  %v4300_v6 = vmax.f32 %v3328_v25, 0.0  ;;  %8198 = vmatmul.mubr.bf16.gmra.mrb[124].mxu1 %v3090_v31  ;;  %v12759_v31 = vpop.permute.xlu1 %5563  ;;  %5857 = vperm.xlu1 %8492, %v12475_v9   ;;  %v14977_v50 = vld [vmem:[#allocation40_spill] sm:$0xff] }
 0x30f   : > { %v2902_v53 = vmax.f32 %v2272_v11, 0.0  ;;  %v2264_v7 = vadd.f32 %v12649_v5, %v2263_v48  ;;  %vm5880_vm7 = vcmp.eq.s32.totalorder %v14972_v37, 1  ;;  %v6134_v61 = vsel %vm5878_vm2, %v4302_v29, -inf  ;;  %v14979_v29 = vld [vmem:[#allocation65_spill] sm:$0xff] }
 0x310   : > { %v12744_v8 = vmax.f32 %v14971_v14, %v6131_v56  ;;  %v2899_v45 = vmax.f32 %v2261_v46, 0.0  ;;  %v14973_v30 = vmax.f32 %v12500_v36, 0.0  ;;  %v14974_v54 = vmax.f32 %v12503_v59, 0.0  ;;  %v3340_v46 = vpop.f32.mrb[21].mxu1  ;;  %v12769_v36 = vpop.permute.xlu0 %5560  ;;  %5854 = vperm.xlu0 %8491, %v14977_v50   ;;  %v14984_v50 = vld [vmem:[#allocation62_spill] sm:$0xff] }
 0x311   : > { %v7380_v24 = vunpack.c.l.bf16 %v12730_v1  ;;  %v14975_v33 = vmax.f32 %v12573_v4, %v12624_v62  ;;  %v6132_v58 = vsel %vm5876_vm3, %v4300_v6, -inf  ;;  %v3092_v42 = vpack.c.bf16 %v2902_v53, %v2901_v60  ;;  %v7935_v62 = vpop.f32.mrb[132].mxu0  ;;  %v8096_v43 = vpop.f32.mrb[22].mxu1 }
 0x312   : > { %v12756_v25 = vpack.c.bf16 %v14974_v54, %v14973_v30  ;;  %v2900_v22 = vmax.f32 %v2264_v7, 0.0  ;;  %v14976_v59 = vmax.f32 %v12580_v20, %v12633_v2  ;;  %v3349_v11 = vadd.f32 %v8095_v17, %v12478_v51  ;;  %v2276_v56 = vpop.f32.mrb[133].mxu0  ;;  %v3343_v7 = vpop.f32.mrb[23].mxu1  ;;  %v14980_v17 = vld [vmem:[#allocation63_spill] sm:$0xff] }
 0x313   : > { %v12764_v49 = vmax.f32 %v14975_v33, %v6134_v61  ;;  %v3341_v4 = vadd.f32 %v12478_v51, %v3340_v46  ;;  %v1509_v53 = vmax.f32 %v12714_v19, 0.0  ;;  %v2285_v48 = vadd.f32 %v12649_v5, %v7935_v62  ;;  %v7936_v61 = vpop.f32.mrb[134].mxu0  ;;  %v14981_v33 = vld [vmem:[#allocation178_spill] sm:$0xff]  ;;  %8042 = vmatmul.mubr.bf16.gmra.mrb[240].mxu0 %v12531_v34 }
 0x314   : > { %v12774_v47 = vmax.f32 %v14976_v59, %v6132_v58  ;;  %v3091_v0 = vpack.c.bf16 %v2900_v22, %v2899_v45  ;;  %v14978_v20 = vmax.f32 %v12546_v23, 0.0  ;;  %v1510_v60 = vmax.f32 %v12727_v13, 0.0  ;;  %v2279_v54 = vpop.f32.mrb[135].mxu0  ;;  %v12798_v22 = vld [vmem:[%s9243_s16 + $0x3f8] sm:$0xff]   ;;  %v8099_v27 = vpop.f32.mrb[24].mxu1  ;;  %8045 = vmatprep.mubr.bf16.mxu0 %v12533_v57 }
 0x315   : > { %vm5885_vm8 = vcmp.eq.s32.totalorder %v14979_v29, 1  ;;  %v4305_v14 = vmax.f32 %v3349_v11, 0.0  ;;  %v4303_v9 = vmax.f32 %v3341_v4, 0.0  ;;  %v3352_v6 = vadd.f32 %v8096_v43, %v12478_v51  ;;  %v14982_v4 = vld [vmem:[#allocation64_spill] sm:$0xff] }
 0x316   : > { %v12784_v2 = vpack.c.bf16 %v1508_v21, %v14978_v20  ;;  %v7381_v45 = vunpack.c.h.bf16 %v12730_v1  ;;  %vm5883_vm9 = vcmp.eq.s32.totalorder %v14980_v17, 1  ;;  %v2277_v30 = vadd.f32 %v12649_v5, %v2276_v56  ;;  %8201 = vmatprep.mubr.bf16.mxu1 %v3091_v0  ;;  %v14989_v29 = vld [vmem:[#allocation68_spill] sm:$0xff] }
 0x317   : > { %v3344_v23 = vadd.f32 %v12478_v51, %v3343_v7  ;;  %v2288_v21 = vadd.f32 %v12649_v5, %v7936_v61  ;;  %v12795_v58 = vsub.f32 %v7380_v24, %v14981_v33  ;;  %v6137_v46 = vsel %vm5881_vm5, %v4305_v14, -inf  ;;  %8202 = vmatmul.mubr.bf16.gmra.mrb[128].mxu1 %v3092_v42  ;;  %v3356_v14 = vpop.f32.mrb[25].mxu1 }
 0x318   : > { %v6135_v1 = vsel %vm5879_vm4, %v4303_v9, -inf  ;;  %v2905_v59 = vmax.f32 %v2285_v48, 0.0  ;;  %v4306_v11 = vmax.f32 %v3352_v6, 0.0  ;;  %vm5886_vm10 = vcmp.eq.s32.totalorder %v14982_v4, 1 }
 0x319   : > { %v12808_v62 = vmax.f32 %v6565_v38, %v6137_v46  ;;  %v14983_v24 = vmax.f32 %v12657_v39, %v12668_v10  ;;  %v4304_v43 = vmax.f32 %v3344_v23, 0.0  ;;  %v2906_v15 = vmax.f32 %v2288_v21, 0.0 }
 0x31a   : > { %vm5884_vm11 = vcmp.eq.s32.totalorder %v14984_v50, 1  ;;  %v6138_v16 = vsel %vm5882_vm6, %v4306_v11, -inf  ;;  %v2280_v48 = vadd.f32 %v12649_v5, %v2279_v54  ;;  %v12821_v38 = vsub.f32 %v7381_v45, %v14985_v40  ;;  %v8100_v45 = vpop.f32.mrb[26].mxu1 }
 0x31b   : > { %v12813_v0 = vmax.f32 %v14983_v24, %v6135_v1  ;;  %v7384_v39 = vunpack.c.l.bf16 %v12798_v22  ;;  %v14986_v10 = vmax.f32 %v12681_v26, %v12689_v52  ;;  %v6136_v42 = vsel %vm5880_vm7, %v4304_v43, -inf  ;;  %v7939_v52 = vpop.f32.mrb[136].mxu0  ;;  %v14988_v1 = vld [vmem:[#allocation67_spill] sm:$0xff]  ;;  %8046 = vmatmul.mubr.bf16.gmra.mrb[244].mxu0 %v12756_v25 }
 0x31c   : > { %v3094_v12 = vpack.c.bf16 %v2906_v15, %v2905_v59  ;;  %v3365_v20 = vadd.f32 %v8099_v27, %v12478_v51  ;;  %v2903_v34 = vmax.f32 %v2277_v30, 0.0  ;;  %v14987_v9 = vmax.f32 %v12685_v55, %v12699_v18  ;;  %v2292_v23 = vpop.f32.mrb[137].mxu0  ;;  %v3359_v18 = vpop.f32.mrb[27].mxu1  ;;  %8049 = vmatprep.mubr.bf16.mxu0 %v12784_v2 }
 0x31d   : > { %v12827_v56 = vmax.f32 %v14986_v10, %v6138_v16  ;;  %v2904_v7 = vmax.f32 %v2280_v48, 0.0  ;;  %v3357_v26 = vadd.f32 %v12478_v51, %v3356_v14  ;;  %v2301_v37 = vadd.f32 %v12649_v5, %v7939_v52  ;;  %v7940_v46 = vpop.f32.mrb[138].mxu0  ;;  %v8576_v14 = vld [vmem:[%s9253_s5 + $0x30] sm:$0xff] }
 0x31e   : > { %v12836_v6 = vmax.f32 %v14987_v9, %v6136_v42  ;;  %v4309_v61 = vmax.f32 %v3365_v20, 0.0  ;;  %v1511_v21 = vmax.f32 %v12795_v58, 0.0  ;;  %v7385_v54 = vunpack.c.h.bf16 %v12798_v22  ;;  %v2295_v24 = vpop.f32.mrb[139].mxu0  ;;  %v8103_v20 = vpop.f32.mrb[28].mxu1  ;;  %v14990_v9 = vld [vmem:[#allocation183_spill] sm:$0xff] }
 0x31f   : > { %v3093_v57 = vpack.c.bf16 %v2904_v7, %v2903_v34  ;;  %v4307_v30 = vmax.f32 %v3357_v26, 0.0  ;;  %v3368_v33 = vadd.f32 %v8100_v45, %v12478_v51  ;;  %v2293_v55 = vadd.f32 %v12649_v5, %v2292_v23  ;;  %v7943_v23 = vpop.f32.mrb[140].mxu0 }
 0x320   : > { %vm5887_vm12 = vcmp.eq.s32.totalorder %v14988_v1, 1  ;;  %v12847_v59 = vsel %vm5885_vm8, %v4309_v61, -inf  ;;  %v3360_v11 = vadd.f32 %v12478_v51, %v3359_v18  ;;  %v2304_v58 = vadd.f32 %v12649_v5, %v7940_v46  ;;  %v3372_v61 = vpop.f32.mrb[29].mxu1 }
 0x321   : > { %v1512_v22 = vmax.f32 %v12821_v38, 0.0  ;;  %v6443_v43 = vmax.f32 %v12735_v3, %v12847_v59  ;;  %v12856_v15 = vsel %vm5883_vm9, %v4307_v30, -inf  ;;  %v2909_v16 = vmax.f32 %v2301_v37, 0.0  ;;  %8205 = vmatprep.mubr.bf16.mxu1 %v3093_v57  ;;  %v14991_v37 = vld [vmem:[#allocation69_spill] sm:$0xff]  ;;  %v8104_v57 = vpop.f32.mrb[30].mxu1  ;;  %v2308_v30 = vpop.f32.mrb[141].mxu0 }
 0x322   : > { %v4310_v48 = vmax.f32 %v3368_v33, 0.0  ;;  %vm5890_vm13 = vcmp.eq.s32.totalorder %v14989_v29, 1  ;;  %v6381_v27 = vmax.f32 %v12744_v8, %v12856_v15  ;;  %v4308_v40 = vmax.f32 %v3360_v11, 0.0  ;;  %8206 = vmatmul.mubr.bf16.gmra.mrb[132].mxu1 %v3094_v12  ;;  %v3375_v11 = vpop.f32.mrb[31].mxu1 }
 0x323   : > { %v2910_v10 = vmax.f32 %v2304_v58, 0.0  ;;  %v2296_v38 = vadd.f32 %v12649_v5, %v2295_v24  ;;  %v2907_v17 = vmax.f32 %v2293_v55, 0.0  ;;  %v12868_v34 = vsub.f32 %v7384_v39, %v8576_v14  ;;  %v7944_v58 = vpop.f32.mrb[142].mxu0  ;;  %v14992_v14 = vld [vmem:[#allocation66_spill] sm:$0xff] }
 0x324   : > { %v12864_v42 = vsel %vm5886_vm10, %v4310_v48, -inf  ;;  %v1258_v7 = vsub.f32 %v7385_v54, %v14990_v9  ;;  %v12875_v52 = vsel %vm5884_vm11, %v4308_v40, -inf  ;;  %vm5889_vm14 = vcmp.eq.s32.totalorder %v14991_v37, 1  ;;  %v2311_v19 = vpop.f32.mrb[143].mxu0 }
 0x325   : > { %v6474_v26 = vmax.f32 %v12764_v49, %v12864_v42  ;;  %v3096_v12 = vpack.c.bf16 %v2910_v10, %v2909_v16  ;;  %v2908_v4 = vmax.f32 %v2296_v38, 0.0  ;;  %v6412_v25 = vmax.f32 %v12774_v47, %v12875_v52 }
 0x326   : > { %v3381_v39 = vadd.f32 %v8103_v20, %v12478_v51  ;;  %v3373_v45 = vadd.f32 %v12478_v51, %v3372_v61  ;;  %v2317_v50 = vadd.f32 %v12649_v5, %v7943_v23  ;;  %v1640_v2 = vpack.c.bf16 %v1510_v60, %v1509_v53 }
 0x327   : > { %v3095_v54 = vpack.c.bf16 %v2908_v4, %v2907_v17  ;;  %v1641_v33 = vpack.c.bf16 %v1512_v22, %v1511_v21  ;;  %v3384_v46 = vadd.f32 %v8104_v57, %v12478_v51  ;;  %v1513_v24 = vmax.f32 %v12868_v34, 0.0  ;;  %v14993_v34 = vld [vmem:[#allocation71_spill] sm:$0xff]  ;;  %v14994_v57 = vld [vmem:[#allocation73_spill] sm:$0xff] }
 0x328   : > { %v4313_v55 = vmax.f32 %v3381_v39, 0.0  ;;  %v4311_v18 = vmax.f32 %v3373_v45, 0.0  ;;  %v2309_v16 = vadd.f32 %v12649_v5, %v2308_v30  ;;  %v3376_v48 = vadd.f32 %v12478_v51, %v3375_v11  ;;  %8050 = vmatmul.mubr.bf16.gmra.mrb[248].mxu0 %v1640_v2 }
 0x329   : > { %v2320_v40 = vadd.f32 %v12649_v5, %v7944_v58  ;;  %8209 = vmatprep.mubr.bf16.mxu1 %v3095_v54  ;;  %v1514_v10 = vmax.f32 %v1258_v7, 0.0  ;;  %v2913_v60 = vmax.f32 %v2317_v50, 0.0  ;;  %v4314_v21 = vmax.f32 %v3384_v46, 0.0  ;;  %v8107_v7 = vpop.f32.mrb[32].mxu1  ;;  %8053 = vmatprep.mubr.bf16.mxu0 %v1641_v33  ;;  %v7947_v50 = vpop.f32.mrb[144].mxu0 }
 0x32a   : > { %v12895_v13 = vsel %vm5889_vm14, %v4313_v55, -inf  ;;  %v12899_v53 = vsel %vm5887_vm12, %v4311_v18, -inf  ;;  %v4312_v17 = vmax.f32 %v3376_v48, 0.0  ;;  %8210 = vmatmul.mubr.bf16.gmra.mrb[136].mxu1 %v3096_v12  ;;  %vm5888_vm15 = vcmp.eq.s32.totalorder %v14992_v14, 1  ;;  %v3388_v39 = vpop.f32.mrb[33].mxu1  ;;  %v2324_v18 = vpop.f32.mrb[145].mxu0 }
 0x32b   : > { %v6567_v22 = vmax.f32 %v12808_v62, %v12895_v13  ;;  %v6505_v38 = vmax.f32 %v12813_v0, %v12899_v53  ;;  %v2914_v20 = vmax.f32 %v2320_v40, 0.0  ;;  %vm5891_vm0 = vcmp.eq.s32.totalorder %v14993_v34, 1  ;;  %v8108_v55 = vpop.f32.mrb[34].mxu1  ;;  %v7948_v40 = vpop.f32.mrb[146].mxu0 }
 0x32c   : > { %v12909_v1 = vsel %vm5890_vm13, %v4314_v21, -inf  ;;  %v2312_v9 = vadd.f32 %v12649_v5, %v2311_v19  ;;  %v12914_v61 = vsel %vm5888_vm15, %v4312_v17, -inf  ;;  %v3397_v12 = vadd.f32 %v8107_v7, %v12478_v51  ;;  %v3391_v48 = vpop.f32.mrb[35].mxu1  ;;  %v14995_v19 = vld [vmem:[#allocation72_spill] sm:$0xff] }
 0x32d   : > { %v6598_v4 = vmax.f32 %v12827_v56, %v12909_v1  ;;  %v3098_v37 = vpack.c.bf16 %v2914_v20, %v2913_v60  ;;  %v2911_v45 = vmax.f32 %v2309_v16, 0.0  ;;  %v6536_v29 = vmax.f32 %v12836_v6, %v12914_v61  ;;  %v2327_v20 = vpop.f32.mrb[147].mxu0  ;;  %v15002_v56 = vld [vmem:[#allocation81_spill] sm:$0xff] }
 0x32e   : > { %v2912_v23 = vmax.f32 %v2312_v9, 0.0  ;;  %v3389_v54 = vadd.f32 %v12478_v51, %v3388_v39  ;;  %vm5893_vm1 = vcmp.eq.s32.totalorder %v14994_v57, 1  ;;  %v4317_v30 = vmax.f32 %v3397_v12, 0.0 }
 0x32f   : > { %v2333_v2 = vadd.f32 %v12649_v5, %v7947_v50  ;;  %v1642_v46 = vpack.c.bf16 %v1514_v10, %v1513_v24  ;;  %v3400_v33 = vadd.f32 %v8108_v55, %v12478_v51  ;;  %v2325_v16 = vadd.f32 %v12649_v5, %v2324_v18  ;;  %v14998_v18 = vld [vmem:[#allocation76_spill] sm:$0xff] }
 0x330   : > { %v3097_v11 = vpack.c.bf16 %v2912_v23, %v2911_v45  ;;  %v4315_v58 = vmax.f32 %v3389_v54, 0.0  ;;  %vm5894_vm2 = vcmp.eq.s32.totalorder %v14995_v19, 1  ;;  %v6149_v60 = vsel %vm5893_vm1, %v4317_v30, -inf  ;;  %v14996_v23 = vld [vmem:[#allocation70_spill] sm:$0xff]  ;;  %v7951_v30 = vpop.f32.mrb[148].mxu0 }
 0x331   : > { %v3392_v21 = vadd.f32 %v12478_v51, %v3391_v48  ;;  %v2336_v17 = vadd.f32 %v12649_v5, %v7948_v40  ;;  %v12930_v24 = vmax.f32 %v6443_v43, %v6149_v60  ;;  %v2917_v14 = vmax.f32 %v2333_v2, 0.0  ;;  %8054 = vmatmul.mubr.bf16.gmra.mrb[252].mxu0 %v1642_v46  ;;  %v8111_v43 = vpop.f32.mrb[36].mxu1  ;;  %v14997_v2 = vld [vmem:[#allocation75_spill] sm:$0xff] }
 0x332   : > { %v6147_v10 = vsel %vm5891_vm0, %v4315_v58, -inf  ;;  %v4318_v9 = vmax.f32 %v3400_v33, 0.0  ;;  %8213 = vmatprep.mubr.bf16.mxu1 %v3097_v11  ;;  %v2328_v45 = vadd.f32 %v12649_v5, %v2327_v20  ;;  %vm5892_vm3 = vcmp.eq.s32.totalorder %v14996_v23, 1  ;;  %v3404_v54 = vpop.f32.mrb[37].mxu1  ;;  %v14999_v58 = vld [vmem:[#allocation77_spill] sm:$0xff] }
 0x333   : > { %v12937_v7 = vmax.f32 %v6381_v27, %v6147_v10  ;;  %v4316_v12 = vmax.f32 %v3392_v21, 0.0  ;;  %v2918_v39 = vmax.f32 %v2336_v17, 0.0  ;;  %8214 = vmatmul.mubr.bf16.gmra.mrb[140].mxu1 %v3098_v37  ;;  %v2915_v59 = vmax.f32 %v2325_v16, 0.0  ;;  %v8112_v42 = vpop.f32.mrb[38].mxu1 }
 0x334   : > { %v6150_v3 = vsel %vm5894_vm2, %v4318_v9, -inf  ;;  %v2916_v27 = vmax.f32 %v2328_v45, 0.0  ;;  %v3413_v50 = vadd.f32 %v8111_v43, %v12478_v51  ;;  %v3405_v57 = vadd.f32 %v12478_v51, %v3404_v54  ;;  %v3407_v52 = vpop.f32.mrb[39].mxu1 }
 0x335   : > { %v12946_v34 = vmax.f32 %v6474_v26, %v6150_v3  ;;  %v6148_v8 = vsel %vm5892_vm3, %v4316_v12, -inf  ;;  %v3100_v15 = vpack.c.bf16 %v2918_v39, %v2917_v14  ;;  %vm5895_vm4 = vcmp.eq.s32.totalorder %v14997_v2, 1  ;;  %v2340_v26 = vpop.f32.mrb[149].mxu0  ;;  %v15000_v12 = vld [vmem:[#allocation74_spill] sm:$0xff]  ;;  %v8115_v23 = vpop.f32.mrb[40].mxu1  ;;  %v15003_v2 = vld [vmem:[#allocation80_spill] sm:$0xff] }
 0x336   : > { %v12951_v37 = vmax.f32 %v6412_v25, %v6148_v8  ;;  %v3099_v55 = vpack.c.bf16 %v2916_v27, %v2915_v59  ;;  %v2349_v49 = vadd.f32 %v12649_v5, %v7951_v30  ;;  %vm5898_vm5 = vcmp.eq.s32.totalorder %v14998_v18, 1  ;;  %v7952_v25 = vpop.f32.mrb[150].mxu0 }
 0x337   : > { %v4321_v46 = vmax.f32 %v3413_v50, 0.0  ;;  %v4319_v11 = vmax.f32 %v3405_v57, 0.0  ;;  %v3416_v47 = vadd.f32 %v8112_v42, %v12478_v51  ;;  %vm5897_vm6 = vcmp.eq.s32.totalorder %v14999_v58, 1  ;;  %v2343_v40 = vpop.f32.mrb[151].mxu0 }
 0x338   : > { %v2341_v33 = vadd.f32 %v12649_v5, %v2340_v26  ;;  %v3408_v16 = vadd.f32 %v12478_v51, %v3407_v52  ;;  %v2352_v48 = vadd.f32 %v12649_v5, %v7952_v25  ;;  %8217 = vmatprep.mubr.bf16.mxu1 %v3099_v55  ;;  %v2921_v21 = vmax.f32 %v2349_v49, 0.0  ;;  %v7955_v8 = vpop.f32.mrb[152].mxu0 }
 0x339   : > { %v6153_v19 = vsel %vm5897_vm6, %v4321_v46, -inf  ;;  %v6151_v60 = vsel %vm5895_vm4, %v4319_v11, -inf  ;;  %v4322_v17 = vmax.f32 %v3416_v47, 0.0  ;;  %vm5896_vm7 = vcmp.eq.s32.totalorder %v15000_v12, 1  ;;  %v2356_v54 = vpop.f32.mrb[153].mxu0 }
 0x33a   : > { %v12968_v20 = vmax.f32 %v6567_v22, %v6153_v19  ;;  %v12973_v10 = vmax.f32 %v6505_v38, %v6151_v60  ;;  %v4320_v14 = vmax.f32 %v3408_v16, 0.0  ;;  %v2922_v9 = vmax.f32 %v2352_v48, 0.0  ;;  %v3420_v22 = vpop.f32.mrb[41].mxu1  ;;  %v13021_v12 = vld [vmem:[#allocation13] ss:$0 sm:$0xff] }
 0x33b   : > { %8218 = vmatmul.mubr.bf16.gmra.mrb[144].mxu1 %v3100_v15  ;;  %v6154_v39 = vsel %vm5898_vm5, %v4322_v17, -inf  ;;  %v2344_v45 = vadd.f32 %v12649_v5, %v2343_v40  ;;  %v3429_v53 = vadd.f32 %v8115_v23, %v12478_v51  ;;  %v2919_v38 = vmax.f32 %v2341_v33, 0.0  ;;  %v15001_v15 = vld [vmem:[#allocation79_spill] sm:$0xff]  ;;  %v8116_v27 = vpop.f32.mrb[42].mxu1  ;;  %v15004_v33 = vld [vmem:[#allocation78_spill] sm:$0xff] }
 0x33c   : > { %v12982_v62 = vmax.f32 %v6598_v4, %v6154_v39  ;;  %v6152_v13 = vsel %vm5896_vm7, %v4320_v14, -inf  ;;  %v3102_v0 = vpack.c.bf16 %v2922_v9, %v2921_v21  ;;  %v3421_v43 = vadd.f32 %v12478_v51, %v3420_v22  ;;  %v3423_v61 = vpop.f32.mrb[43].mxu1 }
 0x33d   : > { %v12988_v3 = vmax.f32 %v6536_v29, %v6152_v13  ;;  %v2920_v59 = vmax.f32 %v2344_v45, 0.0  ;;  %vm5899_vm8 = vcmp.eq.s32.totalorder %v15001_v15, 1  ;;  %vm5901_vm9 = vcmp.eq.s32.totalorder %v15002_v56, 1  ;;  %v7956_v29 = vpop.f32.mrb[154].mxu0  ;;  %v8119_v40 = vpop.f32.mrb[44].mxu1  ;;  %v15005_v13 = vld [vmem:[#allocation83_spill] sm:$0xff] }
 0x33e   : > { %v4325_v1 = vmax.f32 %v3429_v53, 0.0  ;;  %v2365_v4 = vadd.f32 %v12649_v5, %v7955_v8  ;;  %v4323_v57 = vmax.f32 %v3421_v43, 0.0  ;;  %v3432_v30 = vadd.f32 %v8116_v27, %v12478_v51  ;;  %v2359_v26 = vpop.f32.mrb[155].mxu0  ;;  %v3436_v14 = vpop.f32.mrb[45].mxu1 }
 0x33f   : > { %v3101_v50 = vpack.c.bf16 %v2920_v59, %v2919_v38  ;;  %v2357_v6 = vadd.f32 %v12649_v5, %v2356_v54  ;;  %vm5902_vm10 = vcmp.eq.s32.totalorder %v15003_v2, 1  ;;  %v3424_v49 = vadd.f32 %v12478_v51, %v3423_v61  ;;  %v7959_v23 = vpop.f32.mrb[156].mxu0  ;;  %v8120_v22 = vpop.f32.mrb[46].mxu1  ;;  %v15006_v59 = vld [vmem:[#allocation84_spill] sm:$0xff] }
 0x340   : > { %v12997_v55 = vsel %vm5901_vm9, %v4325_v1, -inf  ;;  %v2368_v42 = vadd.f32 %v12649_v5, %v7956_v29  ;;  %v13005_v46 = vsel %vm5899_vm8, %v4323_v57, -inf  ;;  %v2925_v11 = vmax.f32 %v2365_v4, 0.0  ;;  %v2372_v38 = vpop.f32.mrb[157].mxu0  ;;  %v3439_v56 = vpop.f32.mrb[47].mxu1  ;;  %v15007_v4 = vld [vmem:[#allocation85_spill] sm:$0xff] }
 0x341   : > { %v6445_v18 = vmax.f32 %v12930_v24, %v12997_v55  ;;  %v4326_v47 = vmax.f32 %v3432_v30, 0.0  ;;  %8221 = vmatprep.mubr.bf16.mxu1 %v3101_v50  ;;  %v6383_v52 = vmax.f32 %v12937_v7, %v13005_v46  ;;  %v4324_v25 = vmax.f32 %v3424_v49, 0.0  ;;  %v7960_v1 = vpop.f32.mrb[158].mxu0 }
 0x342   : > { %v2926_v58 = vmax.f32 %v2368_v42, 0.0  ;;  %v2360_v51 = vadd.f32 %v12649_v5, %v2359_v26  ;;  %vm5900_vm11 = vcmp.eq.s32.totalorder %v15004_v33, 1  ;;  %v2923_v48 = vmax.f32 %v2357_v6, 0.0  ;;  %v2375_v57 = vpop.f32.mrb[159].mxu0 }
 0x343   : > { %8222 = vmatmul.mubr.bf16.gmra.mrb[148].mxu1 %v3102_v0  ;;  %v13013_v16 = vsel %vm5902_vm10, %v4326_v47, -inf  ;;  %v13017_v60 = vsel %vm5900_vm11, %v4324_v25, -inf  ;;  %v3445_v39 = vadd.f32 %v13021_v12, %v8119_v40  ;;  %v3437_v45 = vadd.f32 %v13021_v12, %v3436_v14 }
 0x344   : > { %v6476_v19 = vmax.f32 %v12946_v34, %v13013_v16  ;;  %v3104_v21 = vpack.c.bf16 %v2926_v58, %v2925_v11  ;;  %v2924_v17 = vmax.f32 %v2360_v51, 0.0  ;;  %v6414_v9 = vmax.f32 %v12951_v37, %v13017_v60  ;;  %v15008_v11 = vld [vmem:[#allocation82_spill] sm:$0xff]  ;;  %v8123_v58 = vpop.f32.mrb[48].mxu1 }
 0x345   : > { %vm5903_vm12 = vcmp.eq.s32.totalorder %v15005_v13, 1  ;;  %v2381_v53 = vadd.f32 %v12649_v5, %v7959_v23  ;;  %vm5906_vm13 = vcmp.eq.s32.totalorder %v15006_v59, 1  ;;  %v4329_v43 = vmax.f32 %v3445_v39, 0.0  ;;  %v15009_v13 = vld [vmem:[#allocation87_spill] sm:$0xff] }
 0x346   : > { %v3103_v0 = vpack.c.bf16 %v2924_v17, %v2923_v48  ;;  %v4327_v8 = vmax.f32 %v3437_v45, 0.0  ;;  %v3448_v15 = vadd.f32 %v13021_v12, %v8120_v22  ;;  %vm5905_vm14 = vcmp.eq.s32.totalorder %v15007_v4, 1  ;;  %v3452_v17 = vpop.f32.mrb[49].mxu1  ;;  %v7963_v23 = vpop.f32.mrb[160].mxu0 }
 0x347   : > { %v2373_v27 = vadd.f32 %v12649_v5, %v2372_v38  ;;  %v3440_v54 = vadd.f32 %v13021_v12, %v3439_v56  ;;  %v2384_v50 = vadd.f32 %v12649_v5, %v7960_v1  ;;  %v13033_v30 = vsel %vm5905_vm14, %v4329_v43, -inf  ;;  %v8124_v38 = vpop.f32.mrb[50].mxu1  ;;  %v2388_v59 = vpop.f32.mrb[161].mxu0 }
 0x348   : > { %8225 = vmatprep.mubr.bf16.mxu1 %v3103_v0  ;;  %v13037_v6 = vsel %vm5903_vm12, %v4327_v8, -inf  ;;  %v2929_v61 = vmax.f32 %v2381_v53, 0.0  ;;  %v4330_v29 = vmax.f32 %v3448_v15, 0.0  ;;  %v6569_v2 = vmax.f32 %v12968_v20, %v13033_v30  ;;  %v15010_v0 = vld [vmem:[#allocation89_spill] sm:$0xff]  ;;  %v3455_v1 = vpop.f32.mrb[51].mxu1  ;;  %v7964_v4 = vpop.f32.mrb[162].mxu0 }
 0x349   : > { %v6507_v49 = vmax.f32 %v12973_v10, %v13037_v6  ;;  %v4328_v42 = vmax.f32 %v3440_v54, 0.0  ;;  %v2930_v26 = vmax.f32 %v2384_v50, 0.0  ;;  %vm5904_vm15 = vcmp.eq.s32.totalorder %v15008_v11, 1 }
 0x34a   : > { %v13046_v47 = vsel %vm5906_vm13, %v4330_v29, -inf  ;;  %v2376_v25 = vadd.f32 %v12649_v5, %v2375_v57  ;;  %v3461_v40 = vadd.f32 %v13021_v12, %v8123_v58  ;;  %v2927_v14 = vmax.f32 %v2373_v27, 0.0  ;;  %v15011_v27 = vld [vmem:[#allocation88_spill] sm:$0xff] }
 0x34b   : > { %8226 = vmatmul.mubr.bf16.gmra.mrb[152].mxu1 %v3104_v21  ;;  %v6600_v51 = vmax.f32 %v12982_v62, %v13046_v47  ;;  %v13051_v33 = vsel %vm5904_vm15, %v4328_v42, -inf  ;;  %v3106_v48 = vpack.c.bf16 %v2930_v26, %v2929_v61  ;;  %v3453_v45 = vadd.f32 %v13021_v12, %v3452_v17  ;;  %v2391_v61 = vpop.f32.mrb[163].mxu0  ;;  %v15018_v62 = vld [vmem:[#allocation97_spill] sm:$0xff] }
 0x34c   : > { %v6538_v21 = vmax.f32 %v12988_v3, %v13051_v33  ;;  %v2928_v39 = vmax.f32 %v2376_v25, 0.0  ;;  %vm5907_vm0 = vcmp.eq.s32.totalorder %v15009_v13, 1  ;;  %vm5909_vm1 = vcmp.eq.s32.totalorder %v15010_v0, 1 }
 0x34d   : > { %v4333_v53 = vmax.f32 %v3461_v40, 0.0  ;;  %v2397_v22 = vadd.f32 %v12649_v5, %v7963_v23  ;;  %v4331_v8 = vmax.f32 %v3453_v45, 0.0  ;;  %v3464_v15 = vadd.f32 %v13021_v12, %v8124_v38  ;;  %v15014_v38 = vld [vmem:[#allocation92_spill] sm:$0xff] }
 0x34e   : > { %v3105_v43 = vpack.c.bf16 %v2928_v39, %v2927_v14  ;;  %v2389_v56 = vadd.f32 %v12649_v5, %v2388_v59  ;;  %vm5910_vm2 = vcmp.eq.s32.totalorder %v15011_v27, 1  ;;  %v3456_v50 = vadd.f32 %v13021_v12, %v3455_v1  ;;  %v15012_v14 = vld [vmem:[#allocation86_spill] sm:$0xff]  ;;  %v7967_v0 = vpop.f32.mrb[164].mxu0 }
 0x34f   : > { %v6165_v54 = vsel %vm5909_vm1, %v4333_v53, -inf  ;;  %v2400_v57 = vadd.f32 %v12649_v5, %v7964_v4  ;;  %v6163_v42 = vsel %vm5907_vm0, %v4331_v8, -inf  ;;  %v2933_v26 = vmax.f32 %v2397_v22, 0.0  ;;  %v15013_v53 = vld [vmem:[#allocation91_spill] sm:$0xff]  ;;  %v15015_v8 = vld [vmem:[#allocation93_spill] sm:$0xff] }
 0x350   : > { %v13068_v29 = vmax.f32 %v6445_v18, %v6165_v54  ;;  %v4334_v11 = vmax.f32 %v3464_v15, 0.0  ;;  %8229 = vmatprep.mubr.bf16.mxu1 %v3105_v43  ;;  %v13075_v25 = vmax.f32 %v6383_v52, %v6163_v42  ;;  %v4332_v58 = vmax.f32 %v3456_v50, 0.0  ;;  %v8127_v18 = vpop.f32.mrb[52].mxu1 }
 0x351   : > { %v2934_v40 = vmax.f32 %v2400_v57, 0.0  ;;  %v2392_v17 = vadd.f32 %v12649_v5, %v2391_v61  ;;  %vm5908_vm3 = vcmp.eq.s32.totalorder %v15012_v14, 1  ;;  %v2931_v55 = vmax.f32 %v2389_v56, 0.0  ;;  %v3468_v45 = vpop.f32.mrb[53].mxu1 }
 0x352   : > { %v6166_v24 = vsel %vm5910_vm2, %v4334_v11, -inf  ;;  %v6164_v7 = vsel %vm5908_vm3, %v4332_v58, -inf  ;;  %v3477_v23 = vadd.f32 %v13021_v12, %v8127_v18  ;;  %v3469_v13 = vadd.f32 %v13021_v12, %v3468_v45  ;;  %v8128_v16 = vpop.f32.mrb[54].mxu1  ;;  %v15016_v58 = vld [vmem:[#allocation90_spill] sm:$0xff] }
 0x353   : > { %8230 = vmatmul.mubr.bf16.gmra.mrb[156].mxu1 %v3106_v48  ;;  %v13084_v39 = vmax.f32 %v6476_v19, %v6166_v24  ;;  %v3108_v46 = vpack.c.bf16 %v2934_v40, %v2933_v26  ;;  %v2932_v52 = vmax.f32 %v2392_v17, 0.0  ;;  %v13089_v48 = vmax.f32 %v6414_v9, %v6164_v7  ;;  %v2404_v19 = vpop.f32.mrb[165].mxu0  ;;  %v3471_v60 = vpop.f32.mrb[55].mxu1 }
 0x354   : > { %vm5911_vm4 = vcmp.eq.s32.totalorder %v15013_v53, 1  ;;  %v2413_v34 = vadd.f32 %v12649_v5, %v7967_v0  ;;  %vm5914_vm5 = vcmp.eq.s32.totalorder %v15014_v38, 1  ;;  %v4337_v59 = vmax.f32 %v3477_v23, 0.0  ;;  %v7968_v9 = vpop.f32.mrb[166].mxu0  ;;  %v8131_v14 = vpop.f32.mrb[56].mxu1  ;;  %v15019_v53 = vld [vmem:[#allocation96_spill] sm:$0xff] }
 0x355   : > { %v3107_v22 = vpack.c.bf16 %v2932_v52, %v2931_v55  ;;  %v4335_v43 = vmax.f32 %v3469_v13, 0.0  ;;  %v3480_v37 = vadd.f32 %v13021_v12, %v8128_v16  ;;  %vm5913_vm6 = vcmp.eq.s32.totalorder %v15015_v8, 1  ;;  %v2407_v4 = vpop.f32.mrb[167].mxu0 }
 0x356   : > { %v2405_v15 = vadd.f32 %v12649_v5, %v2404_v19  ;;  %v3472_v56 = vadd.f32 %v13021_v12, %v3471_v60  ;;  %v2416_v1 = vadd.f32 %v12649_v5, %v7968_v9  ;;  %v6169_v27 = vsel %vm5913_vm6, %v4337_v59, -inf  ;;  %v7971_v7 = vpop.f32.mrb[168].mxu0 }
 0x357   : > { %8233 = vmatprep.mubr.bf16.mxu1 %v3107_v22  ;;  %v6167_v54 = vsel %vm5911_vm4, %v4335_v43, -inf  ;;  %v2937_v50 = vmax.f32 %v2413_v34, 0.0  ;;  %v4338_v57 = vmax.f32 %v3480_v37, 0.0  ;;  %v13106_v61 = vmax.f32 %v6569_v2, %v6169_v27  ;;  %v3484_v2 = vpop.f32.mrb[57].mxu1  ;;  %v2420_v45 = vpop.f32.mrb[169].mxu0 }
 0x358   : > { %v13111_v42 = vmax.f32 %v6507_v49, %v6167_v54  ;;  %v4336_v26 = vmax.f32 %v3472_v56, 0.0  ;;  %v2938_v11 = vmax.f32 %v2416_v1, 0.0  ;;  %vm5912_vm7 = vcmp.eq.s32.totalorder %v15016_v58, 1  ;;  %v8132_v52 = vpop.f32.mrb[58].mxu1  ;;  %v15020_v56 = vld [vmem:[#allocation94_spill] sm:$0xff] }
 0x359   : > { %v6170_v40 = vsel %vm5914_vm5, %v4338_v57, -inf  ;;  %v2408_v17 = vadd.f32 %v12649_v5, %v2407_v4  ;;  %v3493_v6 = vadd.f32 %v13021_v12, %v8131_v14  ;;  %v2935_v49 = vmax.f32 %v2405_v15, 0.0  ;;  %v3487_v33 = vpop.f32.mrb[59].mxu1  ;;  %v15021_v14 = vld [vmem:[#allocation105_spill] sm:$0xff] }
 0x35a   : > { %v13120_v20 = vmax.f32 %v6600_v51, %v6170_v40  ;;  %v6168_v30 = vsel %vm5912_vm7, %v4336_v26, -inf  ;;  %v3110_v10 = vpack.c.bf16 %v2938_v11, %v2937_v50  ;;  %v3485_v18 = vadd.f32 %v13021_v12, %v3484_v2 }
 0x35b   : > { %8234 = vmatmul.mubr.bf16.gmra.mrb[160].mxu1 %v3108_v46  ;;  %v13126_v24 = vmax.f32 %v6538_v21, %v6168_v30  ;;  %v2936_v55 = vmax.f32 %v2408_v17, 0.0  ;;  %v15017_v46 = vld [vmem:[#allocation95_spill] sm:$0xff]  ;;  %vm5917_vm9 = vcmp.eq.s32.totalorder %v15018_v62, 1  ;;  %v4341_v47 = vmax.f32 %v3493_v6, 0.0  ;;  %v7972_v21 = vpop.f32.mrb[170].mxu0 }
 0x35c   : > { %vm5915_vm8 = vcmp.eq.s32.totalorder %v15017_v46, 1  ;;  %v2429_v51 = vadd.f32 %v12649_v5, %v7971_v7  ;;  %v4339_v13 = vmax.f32 %v3485_v18, 0.0  ;;  %v3496_v0 = vadd.f32 %v13021_v12, %v8132_v52  ;;  %v2423_v19 = vpop.f32.mrb[171].mxu0  ;;  %v8135_v27 = vpop.f32.mrb[60].mxu1 }
 0x35d   : > { %v3109_v23 = vpack.c.bf16 %v2936_v55, %v2935_v49  ;;  %v2421_v3 = vadd.f32 %v12649_v5, %v2420_v45  ;;  %vm5918_vm10 = vcmp.eq.s32.totalorder %v15019_v53, 1  ;;  %v13135_v22 = vsel %vm5917_vm9, %v4341_v47, -inf  ;;  %v3500_v11 = vpop.f32.mrb[61].mxu1  ;;  %v15022_v55 = vld [vmem:[#allocation106_spill] sm:$0xff] }
 0x35e   : > { %v3488_v34 = vadd.f32 %v13021_v12, %v3487_v33  ;;  %v2432_v16 = vadd.f32 %v12649_v5, %v7972_v21  ;;  %v6447_v38 = vmax.f32 %v13068_v29, %v13135_v22  ;;  %v13143_v59 = vsel %vm5915_vm8, %v4339_v13, -inf  ;;  %v7975_v17 = vpop.f32.mrb[172].mxu0  ;;  %v8136_v2 = vpop.f32.mrb[62].mxu1 }
 0x35f   : > { %v2941_v43 = vmax.f32 %v2429_v51, 0.0  ;;  %v4342_v37 = vmax.f32 %v3496_v0, 0.0  ;;  %8237 = vmatprep.mubr.bf16.mxu1 %v3109_v23  ;;  %v6385_v60 = vmax.f32 %v13075_v25, %v13143_v59  ;;  %v2424_v15 = vadd.f32 %v12649_v5, %v2423_v19  ;;  %v2436_v49 = vpop.f32.mrb[173].mxu0  ;;  %v3503_v62 = vpop.f32.mrb[63].mxu1  ;;  %v15023_v51 = vld [vmem:[#allocation108_spill] sm:$0xff] }
 0x360   : > { %v4340_v9 = vmax.f32 %v3488_v34, 0.0  ;;  %v2942_v8 = vmax.f32 %v2432_v16, 0.0  ;;  %vm5916_vm11 = vcmp.eq.s32.totalorder %v15020_v56, 1  ;;  %v2939_v4 = vmax.f32 %v2421_v3, 0.0  ;;  %v7976_v47 = vpop.f32.mrb[174].mxu0 }
 0x361   : > { %v13151_v1 = vsel %vm5918_vm10, %v4342_v37, -inf  ;;  %v2940_v26 = vmax.f32 %v2424_v15, 0.0  ;;  %v3509_v58 = vadd.f32 %v13021_v12, %v8135_v27  ;;  %v3501_v40 = vadd.f32 %v13021_v12, %v3500_v11  ;;  %v2439_v13 = vpop.f32.mrb[175].mxu0 }
 0x362   : > { %v6478_v54 = vmax.f32 %v13084_v39, %v13151_v1  ;;  %v13155_v50 = vsel %vm5916_vm11, %v4340_v9, -inf  ;;  %v3112_v57 = vpack.c.bf16 %v2942_v8, %v2941_v43  ;;  %vm5919_vm12 = vcmp.eq.s32.totalorder %v15021_v14, 1  ;;  %v15024_v43 = vld [vmem:[#allocation103_spill] sm:$0xff]  ;;  %v15025_v14 = vld [vmem:[#allocation110_spill] sm:$0xff] }
 0x363   : > { %8238 = vmatmul.mubr.bf16.gmra.mrb[164].mxu1 %v3110_v10  ;;  %v6416_v5 = vmax.f32 %v13089_v48, %v13155_v50  ;;  %v3111_v30 = vpack.c.bf16 %v2940_v26, %v2939_v4  ;;  %v13162_v10 = vld [vmem:[#allocation10] ss:$0 sm:$0xff]  ;;  %vm5922_vm13 = vcmp.eq.s32.totalorder %v15022_v55, 1  ;;  %v4345_v18 = vmax.f32 %v3509_v58, 0.0 }
 0x364   : > { %v2445_v6 = vadd.f32 %v13162_v10, %v7975_v17  ;;  %v4343_v7 = vmax.f32 %v3501_v40, 0.0  ;;  %v3512_v46 = vadd.f32 %v13021_v12, %v8136_v2  ;;  %vm5921_vm14 = vcmp.eq.s32.totalorder %v15023_v51, 1  ;;  %v8139_v8 = vpop.f32.mrb[64].mxu1 }
 0x365   : > { %v2437_v52 = vadd.f32 %v13162_v10, %v2436_v49  ;;  %v3504_v45 = vadd.f32 %v13021_v12, %v3503_v62  ;;  %v2448_v23 = vadd.f32 %v13162_v10, %v7976_v47  ;;  %8241 = vmatprep.mubr.bf16.mxu1 %v3111_v30  ;;  %v13171_v0 = vsel %vm5921_vm14, %v4345_v18, -inf  ;;  %v3516_v26 = vpop.f32.mrb[65].mxu1  ;;  %v15026_v30 = vld [vmem:[#allocation112_spill] sm:$0xff] }
 0x366   : > { %v13175_v3 = vsel %vm5919_vm12, %v4343_v7, -inf  ;;  %v2945_v33 = vmax.f32 %v2445_v6, 0.0  ;;  %v4346_v21 = vmax.f32 %v3512_v46, 0.0  ;;  %v6571_v53 = vmax.f32 %v13106_v61, %v13171_v0  ;;  %v7979_v17 = vpop.f32.mrb[176].mxu0  ;;  %v8140_v49 = vpop.f32.mrb[66].mxu1 }
 0x367   : > { %v6509_v34 = vmax.f32 %v13111_v42, %v13175_v3  ;;  %v4344_v16 = vmax.f32 %v3504_v45, 0.0  ;;  %v2946_v19 = vmax.f32 %v2448_v23, 0.0  ;;  %vm5920_vm15 = vcmp.eq.s32.totalorder %v15024_v43, 1  ;;  %v2452_v55 = vpop.f32.mrb[177].mxu0  ;;  %v3519_v47 = vpop.f32.mrb[67].mxu1 }
 0x368   : > { %v13184_v37 = vsel %vm5922_vm13, %v4346_v21, -inf  ;;  %v2440_v9 = vadd.f32 %v13162_v10, %v2439_v13  ;;  %v3525_v27 = vadd.f32 %v13021_v12, %v8139_v8  ;;  %v2943_v11 = vmax.f32 %v2437_v52, 0.0  ;;  %v7980_v51 = vpop.f32.mrb[178].mxu0  ;;  %v15027_v52 = vld [vmem:[#allocation111_spill] sm:$0xff] }
 0x369   : > { %v6602_v15 = vmax.f32 %v13120_v20, %v13184_v37  ;;  %v13189_v56 = vsel %vm5920_vm15, %v4344_v16, -inf  ;;  %v3114_v4 = vpack.c.bf16 %v2946_v19, %v2945_v33  ;;  %v3517_v40 = vadd.f32 %v13021_v12, %v3516_v26  ;;  %v2455_v33 = vpop.f32.mrb[179].mxu0  ;;  %v15034_v20 = vld [vmem:[#allocation124_spill] sm:$0xff] }
 0x36a   : > { %v2944_v58 = vmax.f32 %v2440_v9, 0.0  ;;  %vm5923_vm0 = vcmp.eq.s32.totalorder %v15025_v14, 1  ;;  %vm5925_vm1 = vcmp.eq.s32.totalorder %v15026_v30, 1  ;;  %v4349_v6 = vmax.f32 %v3525_v27, 0.0 }
 0x36b   : > { %8242 = vmatmul.mubr.bf16.gmra.mrb[168].mxu1 %v3112_v57  ;;  %v6540_v57 = vmax.f32 %v13126_v24, %v13189_v56  ;;  %v2461_v2 = vadd.f32 %v13162_v10, %v7979_v17  ;;  %v4347_v7 = vmax.f32 %v3517_v40, 0.0  ;;  %v3528_v46 = vadd.f32 %v13021_v12, %v8140_v49  ;;  %v15030_v49 = vld [vmem:[#allocation118_spill] sm:$0xff] }
 0x36c   : > { %v3113_v18 = vpack.c.bf16 %v2944_v58, %v2943_v11  ;;  %v2453_v62 = vadd.f32 %v13162_v10, %v2452_v55  ;;  %vm5926_vm2 = vcmp.eq.s32.totalorder %v15027_v52, 1  ;;  %v6181_v45 = vsel %vm5925_vm1, %v4349_v6, -inf  ;;  %v15028_v11 = vld [vmem:[#allocation109_spill] sm:$0xff] }
 0x36d   : > { %v3520_v23 = vadd.f32 %v13021_v12, %v3519_v47  ;;  %v2464_v13 = vadd.f32 %v13162_v10, %v7980_v51  ;;  %v13206_v21 = vmax.f32 %v6447_v38, %v6181_v45  ;;  %v6179_v16 = vsel %vm5923_vm0, %v4347_v7, -inf  ;;  %v8143_v38 = vpop.f32.mrb[68].mxu1  ;;  %v15029_v6 = vld [vmem:[#allocation117_spill] sm:$0xff]  ;;  %v15031_v7 = vld [vmem:[#allocation119_spill] sm:$0xff] }
 0x36e   : > { %v2949_v19 = vmax.f32 %v2461_v2, 0.0  ;;  %v4350_v43 = vmax.f32 %v3528_v46, 0.0  ;;  %8245 = vmatprep.mubr.bf16.mxu1 %v3113_v18  ;;  %v13213_v9 = vmax.f32 %v6385_v60, %v6179_v16  ;;  %v2456_v26 = vadd.f32 %v13162_v10, %v2455_v33  ;;  %v3532_v40 = vpop.f32.mrb[69].mxu1  ;;  %v7983_v30 = vpop.f32.mrb[180].mxu0 }
 0x36f   : > { %v4348_v8 = vmax.f32 %v3520_v23, 0.0  ;;  %v2950_v27 = vmax.f32 %v2464_v13, 0.0  ;;  %vm5924_vm3 = vcmp.eq.s32.totalorder %v15028_v11, 1  ;;  %v2947_v22 = vmax.f32 %v2453_v62, 0.0  ;;  %v8144_v1 = vpop.f32.mrb[70].mxu1 }
 0x370   : > { %v6182_v29 = vsel %vm5926_vm2, %v4350_v43, -inf  ;;  %v2948_v60 = vmax.f32 %v2456_v26, 0.0  ;;  %v3541_v17 = vadd.f32 %v13021_v12, %v8143_v38  ;;  %v3533_v14 = vadd.f32 %v13021_v12, %v3532_v40  ;;  %v3535_v50 = vpop.f32.mrb[71].mxu1 }
 0x371   : > { %v13222_v58 = vmax.f32 %v6478_v54, %v6182_v29  ;;  %v6180_v25 = vsel %vm5924_vm3, %v4348_v8, -inf  ;;  %v3116_v59 = vpack.c.bf16 %v2950_v27, %v2949_v19  ;;  %vm5927_vm4 = vcmp.eq.s32.totalorder %v15029_v6, 1  ;;  %v2468_v54 = vpop.f32.mrb[181].mxu0  ;;  %v15032_v8 = vld [vmem:[#allocation116_spill] sm:$0xff]  ;;  %v15035_v6 = vld [vmem:[#allocation123_spill] sm:$0xff] }
 0x372   : > { %v3115_v2 = vpack.c.bf16 %v2948_v60, %v2947_v22  ;;  %v2477_v39 = vadd.f32 %v13162_v10, %v7983_v30  ;;  %vm5930_vm5 = vcmp.eq.s32.totalorder %v15030_v49, 1  ;;  %v4353_v55 = vmax.f32 %v3541_v17, 0.0 }
 0x373   : > { %8246 = vmatmul.mubr.bf16.gmra.mrb[172].mxu1 %v3114_v4  ;;  %v13227_v4 = vmax.f32 %v6416_v5, %v6180_v25  ;;  %v4351_v18 = vmax.f32 %v3533_v14, 0.0  ;;  %v3544_v48 = vadd.f32 %v13021_v12, %v8144_v1  ;;  %v7984_v5 = vpop.f32.mrb[182].mxu0  ;;  %vm5929_vm6 = vcmp.eq.s32.totalorder %v15031_v7, 1 }
 0x374   : > { %v2469_v46 = vadd.f32 %v13162_v10, %v2468_v54  ;;  %v3536_v62 = vadd.f32 %v13021_v12, %v3535_v50  ;;  %v2480_v47 = vadd.f32 %v13162_v10, %v7984_v5  ;;  %8249 = vmatprep.mubr.bf16.mxu1 %v3115_v2  ;;  %v2471_v51 = vpop.f32.mrb[183].mxu0  ;;  %v6185_v52 = vsel %vm5929_vm6, %v4353_v55, -inf  ;;  %v8147_v11 = vpop.f32.mrb[72].mxu1 }
 0x375   : > { %v6183_v45 = vsel %vm5927_vm4, %v4351_v18, -inf  ;;  %v2953_v23 = vmax.f32 %v2477_v39, 0.0  ;;  %v4354_v13 = vmax.f32 %v3544_v48, 0.0  ;;  %v13244_v33 = vmax.f32 %v6571_v53, %v6185_v52  ;;  %v3548_v53 = vpop.f32.mrb[73].mxu1 }
 0x376   : > { %v13249_v16 = vmax.f32 %v6509_v34, %v6183_v45  ;;  %v4352_v19 = vmax.f32 %v3536_v62, 0.0  ;;  %v2954_v43 = vmax.f32 %v2480_v47, 0.0  ;;  %vm5928_vm7 = vcmp.eq.s32.totalorder %v15032_v8, 1  ;;  %v7987_v25 = vpop.f32.mrb[184].mxu0  ;;  %v8148_v60 = vpop.f32.mrb[74].mxu1  ;;  %v15036_v62 = vld [vmem:[#allocation120_spill] sm:$0xff] }
 0x377   : > { %v6186_v27 = vsel %vm5930_vm5, %v4354_v13, -inf  ;;  %v2472_v26 = vadd.f32 %v13162_v10, %v2471_v51  ;;  %v3557_v3 = vadd.f32 %v13021_v12, %v8147_v11  ;;  %v2951_v34 = vmax.f32 %v2469_v46, 0.0  ;;  %v2484_v40 = vpop.f32.mrb[185].mxu0  ;;  %v3551_v56 = vpop.f32.mrb[75].mxu1 }
 0x378   : > { %v13258_v61 = vmax.f32 %v6602_v15, %v6186_v27  ;;  %v6184_v0 = vsel %vm5928_vm7, %v4352_v19, -inf  ;;  %v3118_v42 = vpack.c.bf16 %v2954_v43, %v2953_v23  ;;  %v3549_v38 = vadd.f32 %v13021_v12, %v3548_v53 }
 0x379   : > { %v13264_v29 = vmax.f32 %v6540_v57, %v6184_v0  ;;  %v2952_v22 = vmax.f32 %v2472_v26, 0.0  ;;  %vm5933_vm9 = vcmp.eq.s32.totalorder %v15034_v20, 1  ;;  %v4357_v37 = vmax.f32 %v3557_v3, 0.0  ;;  %v7988_v57 = vpop.f32.mrb[186].mxu0  ;;  %v15037_v0 = vld [vmem:[#allocation126_spill] sm:$0xff] }
 0x37a   : > { %v2493_v15 = vadd.f32 %v13162_v10, %v7987_v25  ;;  %v4355_v14 = vmax.f32 %v3549_v38, 0.0  ;;  %v3560_v30 = vadd.f32 %v13021_v12, %v8148_v60  ;;  %v2485_v24 = vadd.f32 %v13162_v10, %v2484_v40  ;;  %v2487_v54 = vpop.f32.mrb[187].mxu0 }
 0x37b   : > { %8250 = vmatmul.mubr.bf16.gmra.mrb[176].mxu1 %v3116_v59  ;;  %v15033_v59 = vld [vmem:[#allocation122_spill] sm:$0xff]  ;;  %v3117_v17 = vpack.c.bf16 %v2952_v22, %v2951_v34  ;;  %vm5934_vm10 = vcmp.eq.s32.totalorder %v15035_v6, 1  ;;  %v13273_v2 = vsel %vm5933_vm9, %v4357_v37, -inf  ;;  %v3552_v39 = vadd.f32 %v13021_v12, %v3551_v56  ;;  %v15038_v22 = vld [vmem:[#allocation127_spill] sm:$0xff] }
 0x37c   : > { %vm5931_vm8 = vcmp.eq.s32.totalorder %v15033_v59, 1  ;;  %v2496_v1 = vadd.f32 %v13162_v10, %v7988_v57  ;;  %v6449_v49 = vmax.f32 %v13206_v21, %v13273_v2  ;;  %v2957_v18 = vmax.f32 %v2493_v15, 0.0  ;;  %v8151_v52 = vpop.f32.mrb[76].mxu1  ;;  %v15039_v15 = vld [vmem:[#allocation128_spill] sm:$0xff] }
 0x37d   : > { %v13281_v55 = vsel %vm5931_vm8, %v4355_v14, -inf  ;;  %v4358_v48 = vmax.f32 %v3560_v30, 0.0  ;;  %8253 = vmatprep.mubr.bf16.mxu1 %v3117_v17  ;;  %v4356_v5 = vmax.f32 %v3552_v39, 0.0  ;;  %v2488_v46 = vadd.f32 %v13162_v10, %v2487_v54  ;;  %v3564_v43 = vpop.f32.mrb[77].mxu1 }
 0x37e   : > { %v6387_v50 = vmax.f32 %v13213_v9, %v13281_v55  ;;  %v2958_v7 = vmax.f32 %v2496_v1, 0.0  ;;  %vm5932_vm11 = vcmp.eq.s32.totalorder %v15036_v62, 1  ;;  %v2955_v51 = vmax.f32 %v2485_v24, 0.0  ;;  %v7991_v11 = vpop.f32.mrb[188].mxu0  ;;  %v8152_v53 = vpop.f32.mrb[78].mxu1 }
 0x37f   : > { %v13289_v47 = vsel %vm5934_vm10, %v4358_v48, -inf  ;;  %v13293_v23 = vsel %vm5932_vm11, %v4356_v5, -inf  ;;  %v2956_v19 = vmax.f32 %v2488_v46, 0.0  ;;  %v3573_v27 = vadd.f32 %v13021_v12, %v8151_v52  ;;  %v2500_v34 = vpop.f32.mrb[189].mxu0  ;;  %v3567_v20 = vpop.f32.mrb[79].mxu1 }
 0x380   : > { %v6480_v45 = vmax.f32 %v13222_v58, %v13289_v47  ;;  %v3120_v13 = vpack.c.bf16 %v2958_v7, %v2957_v18  ;;  %v6418_v8 = vmax.f32 %v13227_v4, %v13293_v23  ;;  %v3565_v26 = vadd.f32 %v13021_v12, %v3564_v43  ;;  %v7992_v37 = vpop.f32.mrb[190].mxu0  ;;  %v15040_v18 = vld [vmem:[#allocation125_spill] sm:$0xff] }
 0x381   : > { %vm5935_vm12 = vcmp.eq.s32.totalorder %v15037_v0, 1  ;;  %v2509_v3 = vadd.f32 %v13162_v10, %v7991_v11  ;;  %vm5938_vm13 = vcmp.eq.s32.totalorder %v15038_v22, 1  ;;  %v4361_v38 = vmax.f32 %v3573_v27, 0.0  ;;  %v2503_v14 = vpop.f32.mrb[191].mxu0  ;;  %v15041_v0 = vld [vmem:[#allocation129_spill] sm:$0xff] }
 0x382   : > { %v4359_v25 = vmax.f32 %v3565_v26, 0.0  ;;  %v3576_v59 = vadd.f32 %v13021_v12, %v8152_v53  ;;  %vm5937_vm14 = vcmp.eq.s32.totalorder %v15039_v15, 1  ;;  %v2501_v60 = vadd.f32 %v13162_v10, %v2500_v34 }
 0x383   : > { %8254 = vmatmul.mubr.bf16.gmra.mrb[180].mxu1 %v3118_v42  ;;  %v3119_v42 = vpack.c.bf16 %v2956_v19, %v2955_v51  ;;  %v3568_v40 = vadd.f32 %v13021_v12, %v3567_v20  ;;  %v2512_v17 = vadd.f32 %v13162_v10, %v7992_v37  ;;  %v13307_v30 = vsel %vm5937_vm14, %v4361_v38, -inf }
 0x384   : > { %v13311_v24 = vsel %vm5935_vm12, %v4359_v25, -inf  ;;  %v2961_v56 = vmax.f32 %v2509_v3, 0.0  ;;  %v4362_v57 = vmax.f32 %v3576_v59, 0.0  ;;  %v6573_v6 = vmax.f32 %v13244_v33, %v13307_v30  ;;  %v8155_v7 = vpop.f32.mrb[80].mxu1 }
 0x385   : > { %8257 = vmatprep.mubr.bf16.mxu1 %v3119_v42  ;;  %v6511_v39 = vmax.f32 %v13249_v16, %v13311_v24  ;;  %v4360_v1 = vmax.f32 %v3568_v40, 0.0  ;;  %v2962_v54 = vmax.f32 %v2512_v17, 0.0  ;;  %vm5936_vm15 = vcmp.eq.s32.totalorder %v15040_v18, 1  ;;  %v3580_v19 = vpop.f32.mrb[81].mxu1  ;;  %v15042_v42 = vld [vmem:[#allocation101_spill] sm:$0xff] }
 0x386   : > { %v13320_v48 = vsel %vm5938_vm13, %v4362_v57, -inf  ;;  %v2504_v5 = vadd.f32 %v13162_v10, %v2503_v14  ;;  %v3589_v52 = vadd.f32 %v13021_v12, %v8155_v7  ;;  %v2959_v43 = vmax.f32 %v2501_v60, 0.0  ;;  %v7995_v11 = vpop.f32.mrb[192].mxu0  ;;  %v8156_v34 = vpop.f32.mrb[82].mxu1  ;;  %v15043_v60 = vld [vmem:[#allocation100_spill] sm:$0xff] }
 0x387   : > { %v6604_v46 = vmax.f32 %v13258_v61, %v13320_v48  ;;  %v13325_v62 = vsel %vm5936_vm15, %v4360_v1, -inf  ;;  %v3122_v51 = vpack.c.bf16 %v2962_v54, %v2961_v56  ;;  %v3581_v26 = vadd.f32 %v13021_v12, %v3580_v19  ;;  %v2516_v22 = vpop.f32.mrb[193].mxu0  ;;  %v3583_v37 = vpop.f32.mrb[83].mxu1  ;;  %v15051_v48 = vld [vmem:[#allocation114_spill] sm:$0xff] }
 0x388   : > { %v2960_v27 = vmax.f32 %v2504_v5, 0.0  ;;  %vm5939_vm0 = vcmp.eq.s32.totalorder %v15041_v0, 1  ;;  %vm5941_vm1 = vcmp.eq.s32.totalorder %v15042_v42, 1  ;;  %v4365_v3 = vmax.f32 %v3589_v52, 0.0  ;;  %v7996_v15 = vpop.f32.mrb[194].mxu0 }
 0x389   : > { %v2525_v53 = vadd.f32 %v13162_v10, %v7995_v11  ;;  %v4363_v25 = vmax.f32 %v3581_v26, 0.0  ;;  %v3592_v59 = vadd.f32 %v13021_v12, %v8156_v34  ;;  %v2517_v20 = vadd.f32 %v13162_v10, %v2516_v22  ;;  %v2519_v56 = vpop.f32.mrb[195].mxu0  ;;  %v15047_v22 = vld [vmem:[#allocation107_spill] sm:$0xff] }
 0x38a   : > { %v3121_v38 = vpack.c.bf16 %v2960_v27, %v2959_v43  ;;  %vm5942_vm2 = vcmp.eq.s32.totalorder %v15043_v60, 1  ;;  %v6197_v40 = vsel %vm5941_vm1, %v4365_v3, -inf  ;;  %v3584_v17 = vadd.f32 %v13021_v12, %v3583_v37  ;;  %v15044_v43 = vld [vmem:[#allocation99_spill] sm:$0xff]  ;;  %v15045_v3 = vld [vmem:[#allocation130_spill] sm:$0xff] }
 0x38b   : > { %8258 = vmatmul.mubr.bf16.gmra.mrb[184].mxu1 %v3120_v13  ;;  %v6542_v13 = vmax.f32 %v13264_v29, %v13325_v62  ;;  %v2528_v14 = vadd.f32 %v13162_v10, %v7996_v15  ;;  %v13342_v57 = vmax.f32 %v6449_v49, %v6197_v40  ;;  %v6195_v1 = vsel %vm5939_vm0, %v4363_v25, -inf }
 0x38c   : > { %v2965_v54 = vmax.f32 %v2525_v53, 0.0  ;;  %v4366_v18 = vmax.f32 %v3592_v59, 0.0  ;;  %8261 = vmatprep.mubr.bf16.mxu1 %v3121_v38  ;;  %v13349_v5 = vmax.f32 %v6387_v50, %v6195_v1  ;;  %v4364_v7 = vmax.f32 %v3584_v17, 0.0  ;;  %v8159_v49 = vpop.f32.mrb[84].mxu1  ;;  %v15046_v53 = vld [vmem:[#allocation132_spill] sm:$0xff]  ;;  %v15048_v59 = vld [vmem:[#allocation133_spill] sm:$0xff] }
 0x38d   : > { %v2966_v52 = vmax.f32 %v2528_v14, 0.0  ;;  %v2520_v19 = vadd.f32 %v13162_v10, %v2519_v56  ;;  %vm5940_vm3 = vcmp.eq.s32.totalorder %v15044_v43, 1  ;;  %v2963_v2 = vmax.f32 %v2517_v20, 0.0  ;;  %v3596_v26 = vpop.f32.mrb[85].mxu1 }
 0x38e   : > { %v6198_v21 = vsel %vm5942_vm2, %v4366_v18, -inf  ;;  %v6196_v9 = vsel %vm5940_vm3, %v4364_v7, -inf  ;;  %v3605_v11 = vadd.f32 %v13021_v12, %v8159_v49  ;;  %v3597_v0 = vadd.f32 %v13021_v12, %v3596_v26  ;;  %v7999_v42 = vpop.f32.mrb[196].mxu0 }
 0x38f   : > { %v13358_v27 = vmax.f32 %v6480_v45, %v6198_v21  ;;  %v3124_v55 = vpack.c.bf16 %v2966_v52, %v2965_v54  ;;  %v2964_v50 = vmax.f32 %v2520_v19, 0.0  ;;  %vm5944_vm4 = vcmp.eq.s32.totalorder %v15045_v3, 1  ;;  %v8160_v45 = vpop.f32.mrb[86].mxu1  ;;  %v2532_v34 = vpop.f32.mrb[197].mxu0  ;;  %v15049_v52 = vld [vmem:[#allocation136_spill] sm:$0xff]  ;;  %v15050_v19 = vld [vmem:[#allocation137_spill] sm:$0xff] }
 0x390   : > { %vm5943_vm5 = vcmp.eq.s32.totalorder %v15046_v53, 1  ;;  %v2541_v47 = vadd.f32 %v13162_v10, %v7999_v42  ;;  %vm5946_vm6 = vcmp.eq.s32.totalorder %v15047_v22, 1  ;;  %v4369_v38 = vmax.f32 %v3605_v11, 0.0  ;;  %v8000_v25 = vpop.f32.mrb[198].mxu0 }
 0x391   : > { %v3123_v58 = vpack.c.bf16 %v2964_v50, %v2963_v2  ;;  %v4367_v4 = vmax.f32 %v3597_v0, 0.0  ;;  %v3608_v23 = vadd.f32 %v13021_v12, %v8160_v45  ;;  %vm5945_vm7 = vcmp.eq.s32.totalorder %v15048_v59, 1  ;;  %v2535_v60 = vpop.f32.mrb[199].mxu0 }
 0x392   : > { %v2533_v20 = vadd.f32 %v13162_v10, %v2532_v34  ;;  %v2544_v15 = vadd.f32 %v13162_v10, %v8000_v25  ;;  %v6201_v40 = vsel %vm5945_vm7, %v4369_v38, -inf  ;;  %v2969_v14 = vmax.f32 %v2541_v47, 0.0 }
 0x393   : > { %8262 = vmatmul.mubr.bf16.gmra.mrb[188].mxu1 %v3122_v51  ;;  %v13363_v51 = vmax.f32 %v6418_v8, %v6196_v9  ;;  %v3599_v8 = vpop.f32.mrb[87].mxu1  ;;  %v6199_v17 = vsel %vm5943_vm5, %v4367_v4, -inf  ;;  %v4370_v56 = vmax.f32 %v3608_v23, 0.0  ;;  %v13381_v1 = vmax.f32 %v6573_v6, %v6201_v40 }
 0x394   : > { %v3600_v37 = vadd.f32 %v13021_v12, %v3599_v8  ;;  %8265 = vmatprep.mubr.bf16.mxu1 %v3123_v58  ;;  %v13386_v54 = vmax.f32 %v6511_v39, %v6199_v17  ;;  %v2970_v7 = vmax.f32 %v2544_v15, 0.0  ;;  %vm5948_vm8 = vcmp.eq.s32.totalorder %v15049_v52, 1  ;;  %v8163_v33 = vpop.f32.mrb[88].mxu1  ;;  %v15052_v58 = vld [vmem:[#allocation113_spill] sm:$0xff] }
 0x395   : > { %vm5947_vm9 = vcmp.eq.s32.totalorder %v15050_v19, 1  ;;  %v6202_v43 = vsel %vm5946_vm6, %v4370_v56, -inf  ;;  %v2536_v21 = vadd.f32 %v13162_v10, %v2535_v60  ;;  %v3621_v6 = vadd.f32 %v13021_v12, %v8163_v33  ;;  %v3612_v39 = vpop.f32.mrb[89].mxu1 }
 0x396   : > { %v4368_v18 = vmax.f32 %v3600_v37, 0.0  ;;  %v13396_v30 = vmax.f32 %v6604_v46, %v6202_v43  ;;  %v3126_v24 = vpack.c.bf16 %v2970_v7, %v2969_v14  ;;  %v2967_v2 = vmax.f32 %v2533_v20, 0.0  ;;  %v8003_v50 = vpop.f32.mrb[200].mxu0  ;;  %v8164_v61 = vpop.f32.mrb[90].mxu1  ;;  %v15053_v43 = vld [vmem:[#allocation115_spill] sm:$0xff] }
 0x397   : > { %v2968_v9 = vmax.f32 %v2536_v21, 0.0  ;;  %vm5949_vm10 = vcmp.eq.s32.totalorder %v15051_v48, 1  ;;  %v4373_v46 = vmax.f32 %v3621_v6, 0.0  ;;  %v2557_v26 = vadd.f32 %v13162_v10, %v8003_v50  ;;  %v2548_v0 = vpop.f32.mrb[201].mxu0  ;;  %v3615_v42 = vpop.f32.mrb[91].mxu1  ;;  %v15054_v21 = vld [vmem:[#allocation138_spill] sm:$0xff] }
 0x398   : > { %v6200_v16 = vsel %vm5944_vm4, %v4368_v18, -inf  ;;  %v3624_v11 = vadd.f32 %v13021_v12, %v8164_v61  ;;  %v2549_v29 = vadd.f32 %v13162_v10, %v2548_v0  ;;  %v3616_v62 = vadd.f32 %v13021_v12, %v3615_v42  ;;  %v15055_v50 = vld [vmem:[#allocation140_spill] sm:$0xff] }
 0x399   : > { %v13404_v49 = vmax.f32 %v6542_v13, %v6200_v16  ;;  %v3125_v3 = vpack.c.bf16 %v2968_v9, %v2967_v2  ;;  %v8004_v13 = vpop.f32.mrb[202].mxu0  ;;  %vm5950_vm11 = vcmp.eq.s32.totalorder %v15052_v58, 1  ;;  %v13413_v47 = vsel %vm5949_vm10, %v4373_v46, -inf }
 0x39a   : > { %v4374_v45 = vmax.f32 %v3624_v11, 0.0  ;;  %v2560_v34 = vadd.f32 %v13162_v10, %v8004_v13  ;;  %v2551_v22 = vpop.f32.mrb[203].mxu0  ;;  %v6451_v38 = vmax.f32 %v13342_v57, %v13413_v47  ;;  %v2973_v23 = vmax.f32 %v2557_v26, 0.0  ;;  %v15056_v11 = vld [vmem:[#allocation139_spill] sm:$0xff] }
 0x39b   : > { %8266 = vmatmul.mubr.bf16.gmra.mrb[192].mxu1 %v3124_v55  ;;  %v3613_v55 = vadd.f32 %v13021_v12, %v3612_v39  ;;  %v4372_v8 = vmax.f32 %v3616_v62, 0.0  ;;  %v2552_v37 = vadd.f32 %v13162_v10, %v2551_v22  ;;  %v2971_v60 = vmax.f32 %v2549_v29, 0.0 }
 0x39c   : > { %8269 = vmatprep.mubr.bf16.mxu1 %v3125_v3  ;;  %v13424_v59 = vsel %vm5950_vm11, %v4374_v45, -inf  ;;  %v2974_v20 = vmax.f32 %v2560_v34, 0.0  ;;  %v8167_v17 = vpop.f32.mrb[92].mxu1  ;;  %vm5952_vm12 = vcmp.eq.s32.totalorder %v15053_v43, 1  ;;  %vm5951_vm13 = vcmp.eq.s32.totalorder %v15054_v21, 1 }
 0x39d   : > { %v4371_v53 = vmax.f32 %v3613_v55, 0.0  ;;  %v6482_v15 = vmax.f32 %v13358_v27, %v13424_v59  ;;  %v13431_v40 = vsel %vm5948_vm8, %v4372_v8, -inf  ;;  %v2972_v18 = vmax.f32 %v2552_v37, 0.0  ;;  %v3628_v19 = vpop.f32.mrb[93].mxu1  ;;  %v15061_v27 = vld [vmem:[#allocation98_spill] sm:$0xff]  ;;  %v15062_v59 = vld [vmem:[#allocation144_spill] sm:$0xff] }
 0x39e   : > { %v6420_v14 = vmax.f32 %v13363_v51, %v13431_v40  ;;  %v3128_v56 = vpack.c.bf16 %v2974_v20, %v2973_v23  ;;  %v3637_v7 = vadd.f32 %v13021_v12, %v8167_v17  ;;  %v3629_v33 = vadd.f32 %v13021_v12, %v3628_v19  ;;  %v8007_v16 = vpop.f32.mrb[204].mxu0  ;;  %v13469_v19 = vld [vmem:[#allocation13] ss:$0 sm:$0xff] }
 0x39f   : > { %v13420_v4 = vsel %vm5947_vm9, %v4371_v53, -inf  ;;  %v3127_v52 = vpack.c.bf16 %v2972_v18, %v2971_v60  ;;  %v2573_v39 = vadd.f32 %v13162_v10, %v8007_v16  ;;  %v2564_v9 = vpop.f32.mrb[205].mxu0  ;;  %vm5953_vm14 = vcmp.eq.s32.totalorder %v15055_v50, 1  ;;  %v13465_v60 = vpop.permute.xlu0 %5566  ;;  %v15058_v16 = vld [vmem:[#allocation141_spill] sm:$0xff] }
 0x3a0   : > { %v6389_v25 = vmax.f32 %v13349_v5, %v13420_v4  ;;  %v4377_v6 = vmax.f32 %v3637_v7, 0.0  ;;  %v4375_v61 = vmax.f32 %v3629_v33, 0.0  ;;  %v2565_v48 = vadd.f32 %v13162_v10, %v2564_v9  ;;  %v8008_v26 = vpop.f32.mrb[206].mxu0  ;;  %v15057_v33 = vld [vmem:[#allocation121_spill] sm:$0xff] }
 0x3a1   : > { %vm5954_vm15 = vcmp.eq.s32.totalorder %v15056_v11, 1  ;;  %v2576_v3 = vadd.f32 %v13162_v10, %v8008_v26  ;;  %v2567_v53 = vpop.f32.mrb[207].mxu0  ;;  %v2977_v13 = vmax.f32 %v2573_v39, 0.0  ;;  %vm5956_vm0 = vcmp.eq.s32.totalorder %v15057_v33, 1 }
 0x3a2   : > { %v13445_v0 = vsel %vm5953_vm14, %v4377_v6, -inf  ;;  %v13452_v62 = vsel %vm5951_vm13, %v4375_v61, -inf  ;;  %v2568_v22 = vadd.f32 %v13162_v10, %v2567_v53  ;;  %v2975_v8 = vmax.f32 %v2565_v48, 0.0  ;;  %v15059_v61 = vld [vmem:[#allocation143_spill] sm:$0xff] }
 0x3a3   : > { %8270 = vmatmul.mubr.bf16.gmra.mrb[196].mxu1 %v3126_v24  ;;  %v8168_v24 = vpop.f32.mrb[94].mxu1  ;;  %v6575_v29 = vmax.f32 %v13381_v1, %v13445_v0  ;;  %v2978_v34 = vmax.f32 %v2576_v3, 0.0  ;;  %vm5955_vm1 = vcmp.eq.s32.totalorder %v15058_v16, 1  ;;  %vm5957_vm2 = vcmp.eq.s32.totalorder %v15059_v61, 1  ;;  %v13504_v5 = vpop.permute.xlu0 %5572 }
 0x3a4   : > { %v3640_v2 = vadd.f32 %v13021_v12, %v8168_v24  ;;  %v3631_v55 = vpop.f32.mrb[95].mxu1  ;;  %8273 = vmatprep.mubr.bf16.mxu1 %v3127_v52  ;;  %v2976_v7 = vmax.f32 %v2568_v22, 0.0  ;;  %vm5960_vm4 = vcmp.eq.s32.totalorder %v15061_v27, 1  ;;  %vm5959_vm5 = vcmp.eq.s32.totalorder %v15062_v59, 1 }
 0x3a5   : > { %v3632_v46 = vadd.f32 %v13021_v12, %v3631_v55  ;;  %v6513_v12 = vmax.f32 %v13386_v54, %v13452_v62  ;;  %v8171_v37 = vpop.f32.mrb[96].mxu1  ;;  %v3130_v18 = vpack.c.bf16 %v2978_v34, %v2977_v13 }
 0x3a6   : > { %v4378_v42 = vmax.f32 %v3640_v2, 0.0  ;;  %v3644_v21 = vpop.f32.mrb[97].mxu1  ;;  %v8011_v24 = vpop.f32.mrb[208].mxu0  ;;  %v3129_v6 = vpack.c.bf16 %v2976_v7, %v2975_v8 }
 0x3a7   : > { %v4376_v58 = vmax.f32 %v3632_v46, 0.0  ;;  %v3645_v43 = vadd.f32 %v13469_v19, %v3644_v21  ;;  %v8172_v52 = vpop.f32.mrb[98].mxu1  ;;  %v2589_v2 = vadd.f32 %v13162_v10, %v8011_v24  ;;  %v2580_v55 = vpop.f32.mrb[209].mxu0 }
 0x3a8   : > { %v13456_v45 = vsel %vm5954_vm15, %v4378_v42, -inf  ;;  %v3656_v9 = vadd.f32 %v13469_v19, %v8172_v52  ;;  %v3647_v50 = vpop.f32.mrb[99].mxu1  ;;  %v2581_v46 = vadd.f32 %v13162_v10, %v2580_v55  ;;  %v8012_v11 = vpop.f32.mrb[210].mxu0  ;;  %v15060_v42 = vld [vmem:[#allocation142_spill] sm:$0xff] }
 0x3a9   : > { %v6606_v23 = vmax.f32 %v13396_v30, %v13456_v45  ;;  %v13463_v20 = vsel %vm5952_vm12, %v4376_v58, -inf  ;;  %v4379_v48 = vmax.f32 %v3645_v43, 0.0  ;;  %v3648_v26 = vadd.f32 %v13469_v19, %v3647_v50  ;;  %v2583_v58 = vpop.f32.mrb[211].mxu0  ;;  %v13495_v24 = vpop.permute.xlu1 %5569  ;;  %v15063_v50 = vld [vmem:[#allocation146_spill] sm:$0xff]  ;;  %v15066_v45 = vld [vmem:[#allocation147_spill] sm:$0xff] }
 0x3aa   : > { %v6544_v17 = vmax.f32 %v13404_v49, %v13463_v20  ;;  %vm5958_vm3 = vcmp.eq.s32.totalorder %v15060_v42, 1  ;;  %v4382_v53 = vmax.f32 %v3656_v9, 0.0  ;;  %v2592_v13 = vadd.f32 %v13162_v10, %v8012_v11  ;;  %v15064_v11 = vld [vmem:[#allocation145_spill] sm:$0xff]  ;;  %v13544_v54 = vpop.permute.xlu0 %5578  ;;  %v15065_v30 = vld [vmem:[#allocation102_spill] sm:$0xff] }
 0x3ab   : > { %8274 = vmatmul.mubr.bf16.gmra.mrb[200].mxu1 %v3128_v56  ;;  %v3653_v56 = vadd.f32 %v13469_v19, %v8171_v37  ;;  %v6211_v22 = vsel %vm5955_vm1, %v4379_v48, -inf  ;;  %v2981_v8 = vmax.f32 %v2589_v2, 0.0  ;;  %v4380_v37 = vmax.f32 %v3648_v26, 0.0 }
 0x3ac   : > { %8277 = vmatprep.mubr.bf16.mxu1 %v3129_v6  ;;  %v13492_v7 = vmax.f32 %v6389_v25, %v6211_v22  ;;  %v2982_v21 = vmax.f32 %v2592_v13, 0.0  ;;  %v2584_v43 = vadd.f32 %v13162_v10, %v2583_v58  ;;  %v2979_v47 = vmax.f32 %v2581_v46, 0.0  ;;  %v8175_v16 = vpop.f32.mrb[100].mxu1 }
 0x3ad   : > { %v4381_v39 = vmax.f32 %v3653_v56, 0.0  ;;  %v6214_v56 = vsel %vm5958_vm3, %v4382_v53, -inf  ;;  %v3669_v52 = vadd.f32 %v13469_v19, %v8175_v16  ;;  %v3660_v6 = vpop.f32.mrb[101].mxu1  ;;  %vm5961_vm6 = vcmp.eq.s32.totalorder %v15063_v50, 1 }
 0x3ae   : > { %v13500_v57 = vmax.f32 %v6482_v15, %v6214_v56  ;;  %v3132_v25 = vpack.c.bf16 %v2982_v21, %v2981_v8  ;;  %v3661_v15 = vadd.f32 %v13469_v19, %v3660_v6  ;;  %v8015_v33 = vpop.f32.mrb[212].mxu0  ;;  %vm5962_vm7 = vcmp.eq.s32.totalorder %v15064_v11, 1 }
 0x3af   : > { %v6213_v3 = vsel %vm5957_vm2, %v4381_v39, -inf  ;;  %v8176_v39 = vpop.f32.mrb[102].mxu1  ;;  %v4385_v9 = vmax.f32 %v3669_v52, 0.0  ;;  %v2605_v55 = vadd.f32 %v13162_v10, %v8015_v33  ;;  %v2596_v40 = vpop.f32.mrb[213].mxu0  ;;  %vm5964_vm8 = vcmp.eq.s32.totalorder %v15065_v30, 1 }
 0x3b0   : > { %v13485_v34 = vmax.f32 %v6451_v38, %v6213_v3  ;;  %v6212_v38 = vsel %vm5956_vm0, %v4380_v37, -inf  ;;  %v3672_v51 = vadd.f32 %v13469_v19, %v8176_v39  ;;  %v4383_v61 = vmax.f32 %v3661_v15, 0.0  ;;  %v8016_v26 = vpop.f32.mrb[214].mxu0  ;;  %v15067_v39 = vld [vmem:[#allocation149_spill] sm:$0xff] }
 0x3b1   : > { %v13509_v4 = vmax.f32 %v6420_v14, %v6212_v38  ;;  %v3663_v14 = vpop.f32.mrb[103].mxu1  ;;  %v2597_v48 = vadd.f32 %v13162_v10, %v2596_v40  ;;  %v6217_v42 = vsel %vm5961_vm6, %v4385_v9, -inf  ;;  %v2608_v53 = vadd.f32 %v13162_v10, %v8016_v26  ;;  %v2599_v13 = vpop.f32.mrb[215].mxu0  ;;  %v15068_v40 = vld [vmem:[#allocation134_spill] sm:$0xff] }
 0x3b2   : > { %v3664_v46 = vadd.f32 %v13469_v19, %v3663_v14  ;;  %v4386_v3 = vmax.f32 %v3672_v51, 0.0  ;;  %v13525_v58 = vmax.f32 %v6575_v29, %v6217_v42  ;;  %v6215_v22 = vsel %vm5959_vm5, %v4383_v61, -inf  ;;  %v13535_v38 = vpop.permute.xlu1 %5575 }
 0x3b3   : > { %8278 = vmatmul.mubr.bf16.gmra.mrb[204].mxu1 %v3130_v18  ;;  %v2980_v18 = vmax.f32 %v2584_v43, 0.0  ;;  %v2985_v8 = vmax.f32 %v2605_v55, 0.0  ;;  %v13532_v56 = vmax.f32 %v6513_v12, %v6215_v22  ;;  %v2986_v43 = vmax.f32 %v2608_v53, 0.0 }
 0x3b4   : > { %v4384_v37 = vmax.f32 %v3664_v46, 0.0  ;;  %v6218_v21 = vsel %vm5962_vm7, %v4386_v3, -inf  ;;  %v2983_v0 = vmax.f32 %v2597_v48, 0.0  ;;  %v8179_v16 = vpop.f32.mrb[104].mxu1  ;;  %vm5963_vm9 = vcmp.eq.s32.totalorder %v15066_v45, 1  ;;  %v15070_v45 = vld [vmem:[#allocation153_spill] sm:$0xff] }
 0x3b5   : > { %v3131_v2 = vpack.c.bf16 %v2980_v18, %v2979_v47  ;;  %v2600_v47 = vadd.f32 %v13162_v10, %v2599_v13  ;;  %v13540_v1 = vmax.f32 %v6606_v23, %v6218_v21  ;;  %v3134_v12 = vpack.c.bf16 %v2986_v43, %v2985_v8  ;;  %v3676_v52 = vpop.f32.mrb[105].mxu1 }
 0x3b6   : > { %v6216_v29 = vsel %vm5960_vm4, %v4384_v37, -inf  ;;  %v3685_v18 = vadd.f32 %v13469_v19, %v8179_v16  ;;  %v3677_v23 = vadd.f32 %v13469_v19, %v3676_v52  ;;  %v8019_v6 = vpop.f32.mrb[216].mxu0  ;;  %v8180_v27 = vpop.f32.mrb[106].mxu1  ;;  %vm5965_vm10 = vcmp.eq.s32.totalorder %v15067_v39, 1  ;;  %v15069_v52 = vld [vmem:[#allocation152_spill] sm:$0xff] }
 0x3b7   : > { %8281 = vmatprep.mubr.bf16.mxu1 %v3131_v2  ;;  %v13549_v62 = vmax.f32 %v6544_v17, %v6216_v29  ;;  %v2621_v33 = vadd.f32 %v13162_v10, %v8019_v6  ;;  %v3688_v49 = vadd.f32 %v13469_v19, %v8180_v27  ;;  %v2612_v20 = vpop.f32.mrb[217].mxu0  ;;  %v3679_v17 = vpop.f32.mrb[107].mxu1  ;;  %vm5966_vm11 = vcmp.eq.s32.totalorder %v15068_v40, 1 }
 0x3b8   : > { %v4389_v15 = vmax.f32 %v3685_v18, 0.0  ;;  %v4387_v2 = vmax.f32 %v3677_v23, 0.0  ;;  %v2613_v9 = vadd.f32 %v13162_v10, %v2612_v20  ;;  %v3680_v55 = vadd.f32 %v13469_v19, %v3679_v17  ;;  %v8020_v51 = vpop.f32.mrb[218].mxu0  ;;  %v13575_v8 = vpop.permute.xlu1 %5581  ;;  %v15071_v17 = vld [vmem:[#allocation155_spill] sm:$0xff] }
 0x3b9   : > { %v4390_v50 = vmax.f32 %v3688_v49, 0.0  ;;  %v2624_v61 = vadd.f32 %v13162_v10, %v8020_v51  ;;  %v2615_v48 = vpop.f32.mrb[219].mxu0  ;;  %v2989_v11 = vmax.f32 %v2621_v33, 0.0  ;;  %vm5968_vm12 = vcmp.eq.s32.totalorder %v15069_v52, 1  ;;  %v15072_v51 = vld [vmem:[#allocation154_spill] sm:$0xff] }
 0x3ba   : > { %v13561_v14 = vsel %vm5965_vm10, %v4389_v15, -inf  ;;  %v13568_v26 = vsel %vm5963_vm9, %v4387_v2, -inf  ;;  %v4388_v42 = vmax.f32 %v3680_v55, 0.0  ;;  %v2616_v22 = vadd.f32 %v13162_v10, %v2615_v48 }
 0x3bb   : > { %8282 = vmatmul.mubr.bf16.gmra.mrb[208].mxu1 %v3132_v25  ;;  %v2984_v25 = vmax.f32 %v2600_v47, 0.0  ;;  %v6453_v46 = vmax.f32 %v13485_v34, %v13561_v14  ;;  %v6391_v3 = vmax.f32 %v13492_v7, %v13568_v26  ;;  %v13572_v53 = vsel %vm5966_vm11, %v4390_v50, -inf }
 0x3bc   : > { %v2990_v13 = vmax.f32 %v2624_v61, 0.0  ;;  %v6484_v37 = vmax.f32 %v13500_v57, %v13572_v53  ;;  %v2987_v21 = vmax.f32 %v2613_v9, 0.0  ;;  %v13581_v43 = vsel %vm5964_vm8, %v4388_v42, -inf  ;;  %v8183_v47 = vpop.f32.mrb[108].mxu1  ;;  %v15077_v57 = vld [vmem:[#allocation163_spill] sm:$0xff]  ;;  %v15078_v53 = vld [vmem:[#allocation164_spill] sm:$0xff] }
 0x3bd   : > { %v3133_v59 = vpack.c.bf16 %v2984_v25, %v2983_v0  ;;  %v13583_v0 = vpop.permute.xlu0 %5584  ;;  %v6422_v29 = vmax.f32 %v13509_v4, %v13581_v43  ;;  %v2988_v25 = vmax.f32 %v2616_v22, 0.0  ;;  %v3692_v18 = vpop.f32.mrb[109].mxu1  ;;  %vm5967_vm13 = vcmp.eq.s32.totalorder %v15070_v45, 1 }
 0x3be   : > { %v3136_v16 = vpack.c.bf16 %v2990_v13, %v2989_v11  ;;  %v3693_v23 = vadd.f32 %v13469_v19, %v3692_v18  ;;  %v8023_v30 = vpop.f32.mrb[220].mxu0  ;;  %v8184_v6 = vpop.f32.mrb[110].mxu1  ;;  %vm5969_vm14 = vcmp.eq.s32.totalorder %v15071_v17, 1  ;;  %vm5970_vm15 = vcmp.eq.s32.totalorder %v15072_v51, 1  ;;  %v15074_v17 = vld [vmem:[#allocation157_spill] sm:$0xff] }
 0x3bf   : > { %8285 = vmatprep.mubr.bf16.mxu1 %v3133_v59  ;;  %v3135_v27 = vpack.c.bf16 %v2988_v25, %v2987_v21  ;;  %v2637_v15 = vadd.f32 %v13162_v10, %v8023_v30  ;;  %v3704_v33 = vadd.f32 %v13469_v19, %v8184_v6  ;;  %v2628_v49 = vpop.f32.mrb[221].mxu0  ;;  %v3695_v20 = vpop.f32.mrb[111].mxu1  ;;  %vm5971_vm1 = vcmp.eq.s32.totalorder %v15074_v17, 1 }
 0x3c0   : > { %v4391_v39 = vmax.f32 %v3693_v23, 0.0  ;;  %v2629_v2 = vadd.f32 %v13162_v10, %v2628_v49  ;;  %v3696_v9 = vadd.f32 %v13469_v19, %v3695_v20  ;;  %v8024_v55 = vpop.f32.mrb[222].mxu0  ;;  %v13613_v18 = vpop.permute.xlu1 %5587  ;;  %v15073_v20 = vld [vmem:[#allocation156_spill] sm:$0xff]  ;;  %vm5976_vm4 = vcmp.eq.s32.totalorder %v15077_v57, 1 }
 0x3c1   : > { %v4394_v50 = vmax.f32 %v3704_v33, 0.0  ;;  %v2640_v61 = vadd.f32 %v13162_v10, %v8024_v55  ;;  %v2631_v48 = vpop.f32.mrb[223].mxu0  ;;  %v2993_v13 = vmax.f32 %v2637_v15, 0.0  ;;  %vm5972_vm0 = vcmp.eq.s32.totalorder %v15073_v20, 1 }
 0x3c2   : > { %v13604_v42 = vsel %vm5967_vm13, %v4391_v39, -inf  ;;  %v4392_v22 = vmax.f32 %v3696_v9, 0.0  ;;  %v2991_v23 = vmax.f32 %v2629_v2, 0.0  ;;  %vm5975_vm5 = vcmp.eq.s32.totalorder %v15078_v53, 1 }
 0x3c3   : > { %8286 = vmatmul.mubr.bf16.gmra.mrb[212].mxu1 %v3134_v12  ;;  %v3701_v12 = vadd.f32 %v13469_v19, %v8183_v47  ;;  %v6515_v21 = vmax.f32 %v13532_v56, %v13604_v42  ;;  %v13608_v47 = vsel %vm5970_vm15, %v4394_v50, -inf  ;;  %v2994_v25 = vmax.f32 %v2640_v61, 0.0 }
 0x3c4   : > { %8289 = vmatprep.mubr.bf16.mxu1 %v3135_v27  ;;  %v13619_v30 = vsel %vm5968_vm12, %v4392_v22, -inf  ;;  %v13621_v27 = vpop.permute.xlu0 %5590 }
 0x3c5   : > { %v4393_v59 = vmax.f32 %v3701_v12, 0.0  ;;  %v13610_v12 = vld [vmem:[#allocation10] ss:$0 sm:$0xff]  ;;  %v8187_v6 = vpop.f32.mrb[112].mxu1  ;;  %v3138_v15 = vpack.c.bf16 %v2994_v25, %v2993_v13  ;;  %v15075_v13 = vld [vmem:[#allocation159_spill] sm:$0xff] }
 0x3c6   : > { %v2632_v10 = vadd.f32 %v13610_v12, %v2631_v48  ;;  %v3708_v49 = vpop.f32.mrb[113].mxu1  ;;  %v8027_v52 = vpop.f32.mrb[224].mxu0  ;;  %vm5973_vm2 = vcmp.eq.s32.totalorder %v15075_v13, 1 }
 0x3c7   : > { %v13597_v40 = vsel %vm5969_vm14, %v4393_v59, -inf  ;;  %v3709_v39 = vadd.f32 %v13469_v19, %v3708_v49  ;;  %v8188_v2 = vpop.f32.mrb[114].mxu1  ;;  %v2653_v51 = vadd.f32 %v13610_v12, %v8027_v52  ;;  %v2644_v61 = vpop.f32.mrb[225].mxu0  ;;  %v15076_v59 = vld [vmem:[#allocation158_spill] sm:$0xff] }
 0x3c8   : > { %v6577_v11 = vmax.f32 %v13525_v58, %v13597_v40  ;;  %v2992_v33 = vmax.f32 %v2632_v10, 0.0  ;;  %v3720_v50 = vadd.f32 %v13469_v19, %v8188_v2  ;;  %v3711_v48 = vpop.f32.mrb[115].mxu1  ;;  %v2645_v25 = vadd.f32 %v13610_v12, %v2644_v61  ;;  %v13649_v61 = vpop.permute.xlu1 %5593 }
 0x3c9   : > { %v4395_v22 = vmax.f32 %v3709_v39, 0.0  ;;  %v3712_v10 = vadd.f32 %v13469_v19, %v3711_v48  ;;  %vm5974_vm3 = vcmp.eq.s32.totalorder %v15076_v59, 1  ;;  %v2997_v52 = vmax.f32 %v2653_v51, 0.0  ;;  %v13658_v7 = vpop.permute.xlu0 %5596 }
 0x3ca   : > { %v3137_v9 = vpack.c.bf16 %v2992_v33, %v2991_v23  ;;  %v4398_v45 = vmax.f32 %v3720_v50, 0.0  ;;  %v2995_v14 = vmax.f32 %v2645_v25, 0.0  ;;  %v15081_v40 = vmax.f32 %v13540_v1, %v13608_v47 }
 0x3cb   : > { %8290 = vmatmul.mubr.bf16.gmra.mrb[216].mxu1 %v3136_v16  ;;  %v3717_v16 = vadd.f32 %v13469_v19, %v8187_v6  ;;  %v8028_v6 = vpop.f32.mrb[226].mxu0  ;;  %v6227_v39 = vsel %vm5971_vm1, %v4395_v22, -inf  ;;  %v4396_v2 = vmax.f32 %v3712_v10, 0.0  ;;  %v15079_v10 = vld [vmem:[#allocation104_spill] sm:$0xff] }
 0x3cc   : > { %v2656_v23 = vadd.f32 %v13610_v12, %v8028_v6  ;;  %8293 = vmatprep.mubr.bf16.mxu1 %v3137_v9  ;;  %v2647_v33 = vpop.f32.mrb[227].mxu0  ;;  %v13646_v59 = vmax.f32 %v6391_v3, %v6227_v39  ;;  %vm5978_vm6 = vcmp.eq.s32.totalorder %v15079_v10, 1  ;;  %v15080_v6 = vld [vmem:[#allocation165_spill] sm:$0xff]  ;;  %v13691_v58 = vpop.permute.xlu1 %5599 }
 0x3cd   : > { %v4397_v55 = vmax.f32 %v3717_v16, 0.0  ;;  %v2648_v9 = vadd.f32 %v13610_v12, %v2647_v33  ;;  %v8191_v17 = vpop.f32.mrb[116].mxu1  ;;  %vm5977_vm7 = vcmp.eq.s32.totalorder %v15080_v6, 1  ;;  %v13700_v56 = vpop.permute.xlu0 %5602 }
 0x3ce   : > { %v2998_v50 = vmax.f32 %v2656_v23, 0.0  ;;  %v3724_v51 = vpop.f32.mrb[117].mxu1  ;;  %v8031_v20 = vpop.f32.mrb[228].mxu0 }
 0x3cf   : > { %v6229_v49 = vsel %vm5973_vm2, %v4397_v55, -inf  ;;  %v6230_v55 = vsel %vm5974_vm3, %v4398_v45, -inf  ;;  %v2996_v45 = vmax.f32 %v2648_v9, 0.0  ;;  %v8192_v48 = vpop.f32.mrb[118].mxu1  ;;  %v2669_v25 = vadd.f32 %v13610_v12, %v8031_v20  ;;  %v2660_v43 = vpop.f32.mrb[229].mxu0 }
 0x3d0   : > { %v13639_v16 = vmax.f32 %v6453_v46, %v6229_v49  ;;  %v13654_v34 = vmax.f32 %v6484_v37, %v6230_v55  ;;  %v6228_v46 = vsel %vm5972_vm0, %v4396_v2, -inf  ;;  %v3140_v3 = vpack.c.bf16 %v2998_v50, %v2997_v52  ;;  %v8032_v33 = vpop.f32.mrb[230].mxu0 }
 0x3d1   : > { %v13663_v26 = vmax.f32 %v6422_v29, %v6228_v46  ;;  %v3725_v37 = vadd.f32 %v13469_v19, %v3724_v51  ;;  %v3139_v13 = vpack.c.bf16 %v2996_v45, %v2995_v14  ;;  %v3736_v4 = vadd.f32 %v13469_v19, %v8192_v48  ;;  %v3727_v29 = vpop.f32.mrb[119].mxu1  ;;  %v2663_v50 = vpop.f32.mrb[231].mxu0 }
 0x3d2   : > { %v3728_v23 = vadd.f32 %v13469_v19, %v3727_v29  ;;  %v2661_v2 = vadd.f32 %v13610_v12, %v2660_v43  ;;  %v2672_v55 = vadd.f32 %v13610_v12, %v8032_v33  ;;  %v3001_v46 = vmax.f32 %v2669_v25, 0.0 }
 0x3d3   : > { %8294 = vmatmul.mubr.bf16.gmra.mrb[220].mxu1 %v3138_v15  ;;  %v3733_v15 = vadd.f32 %v13469_v19, %v8191_v17  ;;  %v4399_v49 = vmax.f32 %v3725_v37, 0.0  ;;  %v4402_v52 = vmax.f32 %v3736_v4, 0.0  ;;  %v2664_v37 = vadd.f32 %v13610_v12, %v2663_v50  ;;  %v15084_v4 = vld [vmem:[#allocation167_spill] sm:$0xff] }
 0x3d4   : > { %8297 = vmatprep.mubr.bf16.mxu1 %v3139_v13  ;;  %v4400_v17 = vmax.f32 %v3728_v23, 0.0  ;;  %v3002_v51 = vmax.f32 %v2672_v55, 0.0  ;;  %v2999_v42 = vmax.f32 %v2661_v2, 0.0  ;;  %vm5979_vm9 = vcmp.eq.s32.totalorder %v15084_v4, 1 }
 0x3d5   : > { %v4401_v22 = vmax.f32 %v3733_v15, 0.0  ;;  %v6231_v14 = vsel %vm5975_vm5, %v4399_v49, -inf  ;;  %v6234_v15 = vsel %vm5978_vm6, %v4402_v52, -inf  ;;  %v15086_v52 = vld [vmem:[#allocation169_spill] sm:$0xff] }
 0x3d6   : > { %v13686_v45 = vmax.f32 %v6515_v21, %v6231_v14  ;;  %v6232_v53 = vsel %vm5976_vm4, %v4400_v17, -inf  ;;  %v15082_v21 = vmax.f32 %v13549_v62, %v13619_v30  ;;  %v3142_v48 = vpack.c.bf16 %v3002_v51, %v3001_v46  ;;  %v8035_v25 = vpop.f32.mrb[232].mxu0  ;;  %v15085_v30 = vld [vmem:[#allocation151_spill] sm:$0xff] }
 0x3d7   : > { %v6233_v39 = vsel %vm5977_vm7, %v4401_v22, -inf  ;;  %v15083_v22 = vld [vmem:[#allocation166_spill] sm:$0xff]  ;;  %v2685_v29 = vadd.f32 %v13610_v12, %v8035_v25  ;;  %v2676_v62 = vpop.f32.mrb[233].mxu0  ;;  %vm5982_vm10 = vcmp.eq.s32.totalorder %v15085_v30, 1  ;;  %vm5981_vm11 = vcmp.eq.s32.totalorder %v15086_v52, 1 }
 0x3d8   : > { %v13679_v9 = vmax.f32 %v6577_v11, %v6233_v39  ;;  %v13696_v11 = vmax.f32 %v15081_v40, %v6234_v15  ;;  %v13705_v20 = vmax.f32 %v15082_v21, %v6232_v53  ;;  %v8195_v13 = vpop.f32.mrb[120].mxu1  ;;  %vm5980_vm8 = vcmp.eq.s32.totalorder %v15083_v22, 1  ;;  %v8036_v39 = vpop.f32.mrb[234].mxu0 }
 0x3d9   : > { %v3749_v1 = vadd.f32 %v13469_v19, %v8195_v13  ;;  %v3740_v47 = vpop.f32.mrb[121].mxu1  ;;  %v2677_v23 = vadd.f32 %v13610_v12, %v2676_v62  ;;  %v2688_v50 = vadd.f32 %v13610_v12, %v8036_v39  ;;  %v2679_v14 = vpop.f32.mrb[235].mxu0  ;;  %v3005_v17 = vmax.f32 %v2685_v29, 0.0 }
 0x3da   : > { %v3741_v43 = vadd.f32 %v13469_v19, %v3740_v47  ;;  %v8196_v10 = vpop.f32.mrb[122].mxu1  ;;  %v2680_v51 = vadd.f32 %v13610_v12, %v2679_v14  ;;  %v13733_v47 = vpop.permute.xlu1 %5605 }
 0x3db   : > { %8298 = vmatmul.mubr.bf16.gmra.mrb[224].mxu1 %v3140_v3  ;;  %v3000_v3 = vmax.f32 %v2664_v37, 0.0  ;;  %v4405_v6 = vmax.f32 %v3749_v1, 0.0  ;;  %v3752_v49 = vadd.f32 %v13469_v19, %v8196_v10  ;;  %v3743_v33 = vpop.f32.mrb[123].mxu1  ;;  %v3003_v13 = vmax.f32 %v2677_v23, 0.0  ;;  %v15089_v23 = vld [vmem:[#allocation171_spill] sm:$0xff] }
 0x3dc   : > { %v4403_v2 = vmax.f32 %v3741_v43, 0.0  ;;  %v3744_v55 = vadd.f32 %v13469_v19, %v3743_v33  ;;  %v3004_v1 = vmax.f32 %v2680_v51, 0.0  ;;  %vm5983_vm13 = vcmp.eq.s32.totalorder %v15089_v23, 1  ;;  %v15091_v51 = vld [vmem:[#allocation173_spill] sm:$0xff]  ;;  %v15096_v43 = vld [vmem:[#allocation162_spill] sm:$0xff] }
 0x3dd   : > { %v3141_v57 = vpack.c.bf16 %v3000_v3, %v2999_v42  ;;  %v13718_v46 = vsel %vm5981_vm11, %v4405_v6, -inf  ;;  %v4406_v15 = vmax.f32 %v3752_v49, 0.0  ;;  %v3006_v42 = vmax.f32 %v2688_v50, 0.0  ;;  %v15088_v49 = vld [vmem:[#allocation170_spill] sm:$0xff] }
 0x3de   : > { %v13725_v40 = vsel %vm5979_vm9, %v4403_v2, -inf  ;;  %v4404_v53 = vmax.f32 %v3744_v55, 0.0  ;;  %v3143_v29 = vpack.c.bf16 %v3004_v1, %v3003_v13  ;;  %v8039_v6 = vpop.f32.mrb[236].mxu0  ;;  %vm5984_vm12 = vcmp.eq.s32.totalorder %v15088_v49, 1  ;;  %v15090_v2 = vld [vmem:[#allocation172_spill] sm:$0xff] }
 0x3df   : > { %8301 = vmatprep.mubr.bf16.mxu1 %v3141_v57  ;;  %v13731_v3 = vsel %vm5982_vm10, %v4406_v15, -inf  ;;  %v3144_v57 = vpack.c.bf16 %v3006_v42, %v3005_v17  ;;  %v2701_v33 = vadd.f32 %v13610_v12, %v8039_v6  ;;  %v2692_v52 = vpop.f32.mrb[237].mxu0  ;;  %vm5986_vm14 = vcmp.eq.s32.totalorder %v15090_v2, 1 }
 0x3e0   : > { %v13739_v4 = vsel %vm5980_vm8, %v4404_v53, -inf  ;;  %v2693_v14 = vadd.f32 %v13610_v12, %v2692_v52  ;;  %v8040_v15 = vpop.f32.mrb[238].mxu0  ;;  %vm5985_vm15 = vcmp.eq.s32.totalorder %v15091_v51, 1  ;;  %vm5989_vm3 = vcmp.eq.s32.totalorder %v15096_v43, 1 }
 0x3e1   : > { %v8199_v10 = vpop.f32.mrb[124].mxu1  ;;  %v2704_v13 = vadd.f32 %v13610_v12, %v8040_v15  ;;  %v2695_v1 = vpop.f32.mrb[239].mxu0 }
 0x3e2   : > { %v3765_v62 = vadd.f32 %v13469_v19, %v8199_v10  ;;  %v3756_v30 = vpop.f32.mrb[125].mxu1 }
 0x3e3   : > { %8302 = vmatmul.mubr.bf16.gmra.mrb[228].mxu1 %v3142_v48  ;;  %v13741_v48 = vpop.permute.xlu0 %5608  ;;  %v3757_v22 = vadd.f32 %v13469_v19, %v3756_v30  ;;  %v8200_v39 = vpop.f32.mrb[126].mxu1  ;;  %v3010_v52 = vmax.f32 %v2704_v13, 0.0 }
 0x3e4   : > { %15087 = vst [vmem:[#allocation41_spill] sm:$0xff] %v13741_v48  ;;  %8305 = vmatprep.mubr.bf16.mxu1 %v3143_v29  ;;  %v4409_v55 = vmax.f32 %v3765_v62, 0.0  ;;  %v3768_v50 = vadd.f32 %v13469_v19, %v8200_v39  ;;  %v3759_v17 = vpop.f32.mrb[127].mxu1  ;;  %v3009_v29 = vmax.f32 %v2701_v33, 0.0  ;;  %v2696_v62 = vadd.f32 %v13610_v12, %v2695_v1 }
 0x3e5   : > { %v4407_v53 = vmax.f32 %v3757_v22, 0.0  ;;  %v3760_v42 = vadd.f32 %v13469_v19, %v3759_v17  ;;  %v13765_v17 = vpop.permute.xlu1 %5611 }
 0x3e6   : > { %v13756_v10 = vsel %vm5985_vm15, %v4409_v55, -inf  ;;  %v4410_v30 = vmax.f32 %v3768_v50, 0.0  ;;  %15092 = vst [vmem:[#allocation175_spill] sm:$0xff] %v13765_v17  ;;  %v3007_v50 = vmax.f32 %v2693_v14, 0.0  ;;  %v8043_v14 = vpop.f32.mrb[240].mxu0  ;;  %v15094_v55 = vld [vmem:[#allocation174_spill] sm:$0xff] }
 0x3e7   : > { %v13763_v39 = vsel %vm5983_vm13, %v4407_v53, -inf  ;;  %v4408_v22 = vmax.f32 %v3760_v42, 0.0  ;;  %v13773_v15 = vpop.permute.xlu0 %5614  ;;  %v3146_v53 = vpack.c.bf16 %v3010_v52, %v3009_v29  ;;  %vm5987_vm1 = vcmp.eq.s32.totalorder %v15094_v55, 1  ;;  %v2708_v6 = vpop.f32.mrb[241].mxu0  ;;  %v15095_v29 = vld [vmem:[#allocation161_spill] sm:$0xff] }
 0x3e8   : > { %v13771_v33 = vsel %vm5986_vm14, %v4410_v30, -inf  ;;  %v2717_v49 = vadd.f32 %v13610_v12, %v8043_v14  ;;  %vm5990_vm2 = vcmp.eq.s32.totalorder %v15095_v29, 1 }
 0x3e9   : > { %v13779_v51 = vsel %vm5984_vm12, %v4408_v22, -inf }
 0x3ea   : > { %v8203_v42 = vpop.f32.mrb[128].mxu1  ;;  %v3013_v17 = vmax.f32 %v2717_v49, 0.0 }
 0x3eb   : > { %8306 = vmatmul.mubr.bf16.gmra.mrb[232].mxu1 %v3144_v57  ;;  %v3008_v57 = vmax.f32 %v2696_v62, 0.0  ;;  %v3781_v2 = vadd.f32 %v13469_v19, %v8203_v42  ;;  %v3772_v30 = vpop.f32.mrb[129].mxu1  ;;  %v15093_v62 = vld [vmem:[#allocation160_spill] sm:$0xff]  ;;  %v8044_v42 = vpop.f32.mrb[242].mxu0 }
 0x3ec   : > { %vm5988_vm0 = vcmp.eq.s32.totalorder %v15093_v62, 1  ;;  %v3773_v23 = vadd.f32 %v13469_v19, %v3772_v30  ;;  %v8204_v22 = vpop.f32.mrb[130].mxu1  ;;  %v2720_v30 = vadd.f32 %v13610_v12, %v8044_v42  ;;  %v2711_v14 = vpop.f32.mrb[243].mxu0 }
 0x3ed   : > { %v3145_v1 = vpack.c.bf16 %v3008_v57, %v3007_v50  ;;  %v4413_v52 = vmax.f32 %v3781_v2, 0.0  ;;  %v3784_v13 = vadd.f32 %v13469_v19, %v8204_v22  ;;  %v2709_v50 = vadd.f32 %v13610_v12, %v2708_v6  ;;  %v3775_v57 = vpop.f32.mrb[131].mxu1 }
 0x3ee   : > { %v4411_v25 = vmax.f32 %v3773_v23, 0.0  ;;  %v3776_v21 = vadd.f32 %v13469_v19, %v3775_v57  ;;  %v2712_v2 = vadd.f32 %v13610_v12, %v2711_v14  ;;  %v15097_v6 = vmax.f32 %v13639_v16, %v13718_v46  ;;  %v13802_v57 = vpop.permute.xlu1 %5617  ;;  %v13811_v16 = vpop.permute.xlu0 %5620  ;;  %v15101_v14 = vld [vmem:[#allocation131_spill] sm:$0xff] }
 0x3ef   : > { %8309 = vmatprep.mubr.bf16.mxu1 %v3145_v1  ;;  %v6245_v37 = vsel %vm5989_vm3, %v4413_v52, -inf  ;;  %v4414_v48 = vmax.f32 %v3784_v13, 0.0  ;;  %v3014_v1 = vmax.f32 %v2720_v30, 0.0  ;;  %v15098_v52 = vmax.f32 %v13646_v59, %v13725_v40  ;;  %v8047_v30 = vpop.f32.mrb[244].mxu0 }
 0x3f0   : > { %v13798_v22 = vmax.f32 %v15097_v6, %v6245_v37  ;;  %v6243_v43 = vsel %vm5987_vm1, %v4411_v25, -inf  ;;  %v4412_v23 = vmax.f32 %v3776_v21, 0.0  ;;  %v3011_v13 = vmax.f32 %v2709_v50, 0.0  ;;  %v15103_v6 = vld [vmem:[#allocation148_spill] sm:$0xff] }
 0x3f1   : > { %v13807_v49 = vmax.f32 %v15098_v52, %v6243_v43  ;;  %v3012_v42 = vmax.f32 %v2712_v2, 0.0  ;;  %v15099_v46 = vmax.f32 %v13654_v34, %v13731_v3  ;;  %v3148_v25 = vpack.c.bf16 %v3014_v1, %v3013_v17  ;;  %v15102_v34 = vld [vmem:[#allocation135_spill] sm:$0xff]  ;;  %v2724_v2 = vpop.f32.mrb[245].mxu0  ;;  %v15104_v52 = vld [vmem:[#allocation150_spill] sm:$0xff] }
 0x3f2   : > { %v6244_v21 = vsel %vm5988_vm0, %v4412_v23, -inf  ;;  %v15100_v59 = vmax.f32 %v13663_v26, %v13739_v4  ;;  %vm5992_vm4 = vcmp.eq.s32.totalorder %v15101_v14, 1  ;;  %vm5991_vm5 = vcmp.eq.s32.totalorder %v15102_v34, 1  ;;  %v8048_v1 = vpop.f32.mrb[246].mxu0 }
 0x3f3   : > { %8310 = vmatmul.mubr.bf16.gmra.mrb[236].mxu1 %v3146_v53  ;;  %v6246_v53 = vsel %vm5990_vm2, %v4414_v48, -inf  ;;  %v3147_v48 = vpack.c.bf16 %v3012_v42, %v3011_v13  ;;  %v2733_v62 = vadd.f32 %v13610_v12, %v8047_v30  ;;  %vm5994_vm6 = vcmp.eq.s32.totalorder %v15103_v6, 1 }
 0x3f4   : > { %v13816_v37 = vmax.f32 %v15099_v46, %v6246_v53  ;;  %v13823_v40 = vmax.f32 %v15100_v59, %v6244_v21  ;;  %v2725_v43 = vadd.f32 %v13610_v12, %v2724_v2  ;;  %vm5993_vm7 = vcmp.eq.s32.totalorder %v15104_v52, 1  ;;  %v2727_v46 = vpop.f32.mrb[247].mxu0  ;;  %v13844_v2 = vpop.permute.xlu1 %5623 }
 0x3f5   : > { %v8207_v55 = vpop.f32.mrb[132].mxu1  ;;  %8313 = vmatprep.mubr.bf16.mxu1 %v3147_v48  ;;  %v2736_v42 = vadd.f32 %v13610_v12, %v8048_v1  ;;  %15106 = vst [vmem:[#allocation49_spill] sm:$0xff] %v13844_v2 }
 0x3f6   : > { %v3797_v29 = vadd.f32 %v13469_v19, %v8207_v55  ;;  %v3788_v50 = vpop.f32.mrb[133].mxu1  ;;  %v3017_v55 = vmax.f32 %v2733_v62, 0.0 }
 0x3f7   : > { %v3789_v3 = vadd.f32 %v13469_v19, %v3788_v50  ;;  %v8208_v17 = vpop.f32.mrb[134].mxu1  ;;  %v15105_v50 = vmax.f32 %v13679_v9, %v13756_v10  ;;  %v13853_v9 = vpop.permute.xlu0 %5626  ;;  %v15108_v10 = vmax.f32 %v13696_v11, %v13771_v33  ;;  %v15111_v11 = vld [vmem:[#allocation176_spill] sm:$0xff] }
 0x3f8   : > { %v4417_v26 = vmax.f32 %v3797_v29, 0.0  ;;  %v3800_v4 = vadd.f32 %v13469_v19, %v8208_v17  ;;  %v3791_v23 = vpop.f32.mrb[135].mxu1  ;;  %v2728_v29 = vadd.f32 %v13610_v12, %v2727_v46  ;;  %v3018_v17 = vmax.f32 %v2736_v42, 0.0  ;;  %v15110_v46 = vld [vmem:[#allocation168_spill] sm:$0xff] }
 0x3f9   : > { %v4415_v53 = vmax.f32 %v3789_v3, 0.0  ;;  %v3792_v13 = vadd.f32 %v13469_v19, %v3791_v23  ;;  %vm5996_vm8 = vcmp.eq.s32.totalorder %v15110_v46, 1  ;;  %vm5995_vm9 = vcmp.eq.s32.totalorder %v15111_v11, 1 }
 0x3fa   : > { %v6249_v21 = vsel %vm5993_vm7, %v4417_v26, -inf  ;;  %v4418_v59 = vmax.f32 %v3800_v4, 0.0  ;;  %v15107_v26 = vmax.f32 %v13686_v45, %v13763_v39  ;;  %v3015_v4 = vmax.f32 %v2725_v43, 0.0 }
 0x3fb   : > { %8314 = vmatmul.mubr.bf16.gmra.mrb[240].mxu1 %v3148_v25  ;;  %v13840_v30 = vmax.f32 %v15105_v50, %v6249_v21  ;;  %v6247_v48 = vsel %vm5991_vm5, %v4415_v53, -inf  ;;  %v4416_v3 = vmax.f32 %v3792_v13, 0.0  ;;  %v3016_v23 = vmax.f32 %v2728_v29, 0.0  ;;  %v8051_v42 = vpop.f32.mrb[248].mxu0 }
 0x3fc   : > { %v13849_v62 = vmax.f32 %v15107_v26, %v6247_v48  ;;  %v6250_v25 = vsel %vm5994_vm6, %v4418_v59, -inf  ;;  %v3150_v52 = vpack.c.bf16 %v3018_v17, %v3017_v55  ;;  %v15109_v45 = vmax.f32 %v13705_v20, %v13779_v51  ;;  %v2740_v55 = vpop.f32.mrb[249].mxu0  ;;  %v15112_v59 = vld [vmem:[#allocation177_spill] sm:$0xff] }
 0x3fd   : > { %v13858_v34 = vmax.f32 %v15108_v10, %v6250_v25  ;;  %v6248_v1 = vsel %vm5992_vm4, %v4416_v3, -inf  ;;  %v8211_v53 = vpop.f32.mrb[136].mxu1  ;;  %v3149_v6 = vpack.c.bf16 %v3016_v23, %v3015_v4  ;;  %v2749_v14 = vadd.f32 %v13610_v12, %v8051_v42  ;;  %v8052_v48 = vpop.f32.mrb[250].mxu0  ;;  %v15113_v3 = vld [vmem:[#allocation180_spill] sm:$0xff] }
 0x3fe   : > { %v13865_v39 = vmax.f32 %v15109_v45, %v6248_v1  ;;  %v3813_v43 = vadd.f32 %v13469_v19, %v8211_v53  ;;  %v3804_v13 = vpop.f32.mrb[137].mxu1  ;;  %vm5998_vm10 = vcmp.eq.s32.totalorder %v15112_v59, 1  ;;  %v2741_v29 = vadd.f32 %v13610_v12, %v2740_v55  ;;  %v2743_v4 = vpop.f32.mrb[251].mxu0 }
 0x3ff   : > { %v3805_v33 = vadd.f32 %v13469_v19, %v3804_v13  ;;  %v8212_v21 = vpop.f32.mrb[138].mxu1  ;;  %8317 = vmatprep.mubr.bf16.mxu1 %v3149_v6  ;;  %vm5997_vm11 = vcmp.eq.s32.totalorder %v15113_v3, 1  ;;  %v2752_v25 = vadd.f32 %v13610_v12, %v8052_v48  ;;  %v3021_v10 = vmax.f32 %v2749_v14, 0.0  ;;  %v13887_v42 = vpop.permute.xlu1 %5629  ;;  %v15118_v48 = vld [vmem:[#allocation188_spill] sm:$0xff] }
 0x400   : > { %v4421_v20 = vmax.f32 %v3813_v43, 0.0  ;;  %v3816_v51 = vadd.f32 %v13469_v19, %v8212_v21  ;;  %v3807_v50 = vpop.f32.mrb[139].mxu1  ;;  %v2744_v53 = vadd.f32 %v13610_v12, %v2743_v4  ;;  %v3019_v21 = vmax.f32 %v2741_v29, 0.0  ;;  %v13895_v55 = vpop.permute.xlu0 %5632 }
 0x401   : > { %v4419_v17 = vmax.f32 %v3805_v33, 0.0  ;;  %v3808_v26 = vadd.f32 %v13469_v19, %v3807_v50  ;;  %v3022_v13 = vmax.f32 %v2752_v25, 0.0  ;;  %15114 = vst [vmem:[#allocation47_spill] sm:$0xff] %v13895_v55  ;;  %v15116_v25 = vld [vmem:[#allocation185_spill] sm:$0xff]  ;;  %vm6001_vm15 = vcmp.eq.s32.totalorder %v15118_v48, 1 }
 0x402   : > { %v13878_v23 = vsel %vm5997_vm11, %v4421_v20, -inf  ;;  %v4422_v1 = vmax.f32 %v3816_v51, 0.0  ;;  %vm5999_vm13 = vcmp.eq.s32.totalorder %v15116_v25, 1  ;;  %vm6009_vm4 = vcmp.eq.s32.totalorder %v12565_v63, 1 }
 0x403   : > { %8318 = vmatmul.mubr.bf16.gmra.mrb[244].mxu1 %v3150_v52  ;;  %v13885_v6 = vsel %vm5995_vm9, %v4419_v17, -inf  ;;  %v4420_v43 = vmax.f32 %v3808_v26, 0.0  ;;  %v3020_v52 = vmax.f32 %v2744_v53, 0.0  ;;  %v3152_v51 = vpack.c.bf16 %v3022_v13, %v3021_v10  ;;  %v15115_v26 = vld [vmem:[#allocation184_spill] sm:$0xff]  ;;  %v15117_v10 = vld [vmem:[#allocation187_spill] sm:$0xff]  ;;  %v13916_v45 = vpop.permute.xlu1 %5635 }
 0x404   : > { %v13893_v14 = vsel %vm5998_vm10, %v4422_v1, -inf  ;;  %v8055_v29 = vpop.f32.mrb[252].mxu0  ;;  %vm6000_vm12 = vcmp.eq.s32.totalorder %v15115_v26, 1  ;;  %vm6002_vm14 = vcmp.eq.s32.totalorder %v15117_v10, 1  ;;  %vm6010_vm6 = vcmp.eq.s32.totalorder %v12556_v28, 1 }
 0x405   : > { %v13901_v20 = vsel %vm5996_vm8, %v4420_v43, -inf  ;;  %v3151_v3 = vpack.c.bf16 %v3020_v52, %v3019_v21  ;;  %v2765_v46 = vadd.f32 %v13610_v12, %v8055_v29  ;;  %v2756_v53 = vpop.f32.mrb[253].mxu0  ;;  %vm6013_vm8 = vcmp.eq.s32.totalorder %v12702_v44, 1 }
 0x406   : > { %v8215_v50 = vpop.f32.mrb[140].mxu1  ;;  %v2757_v21 = vadd.f32 %v13610_v12, %v2756_v53  ;;  %vm6011_vm9 = vcmp.eq.s32.totalorder %v12635_v41, 1  ;;  %vm6014_vm10 = vcmp.eq.s32.totalorder %v12693_v35, 1  ;;  %vm6012_vm11 = vcmp.eq.s32.totalorder %v12627_v32, 1 }
 0x407   : > { %v3829_v59 = vadd.f32 %v13469_v19, %v8215_v50  ;;  %v3820_v17 = vpop.f32.mrb[141].mxu1  ;;  %v8056_v50 = vpop.f32.mrb[254].mxu0  ;;  %8321 = vmatprep.mubr.bf16.mxu1 %v3151_v3 }
 0x408   : > { %v3821_v4 = vadd.f32 %v13469_v19, %v3820_v17  ;;  %v8216_v1 = vpop.f32.mrb[142].mxu1  ;;  %v2768_v17 = vadd.f32 %v13610_v12, %v8056_v50  ;;  %v2759_v29 = vpop.f32.mrb[255].mxu0 }
 0x409   : > { %v4425_v43 = vmax.f32 %v3829_v59, 0.0  ;;  %v3832_v13 = vadd.f32 %v13469_v19, %v8216_v1  ;;  %v3823_v52 = vpop.f32.mrb[143].mxu1  ;;  %v3025_v59 = vmax.f32 %v2765_v46, 0.0  ;;  %v2760_v1 = vadd.f32 %v13610_v12, %v2759_v29  ;;  %v13942_v50 = vpop.permute.xlu1 %5641  ;;  %v15119_v29 = vld [vmem:[#allocation192_spill] sm:$0xff] }
 0x40a   : > { %v4423_v11 = vmax.f32 %v3821_v4, 0.0  ;;  %v3824_v33 = vadd.f32 %v13469_v19, %v3823_v52  ;;  %v3026_v53 = vmax.f32 %v2768_v17, 0.0  ;;  %v3023_v46 = vmax.f32 %v2757_v21, 0.0 }
 0x40b   : > { %v13918_v55 = vsel %vm6001_vm15, %v4425_v43, -inf  ;;  %v4426_v2 = vmax.f32 %v3832_v13, 0.0  ;;  %8322 = vmatmul.mubr.bf16.gmra.mrb[248].mxu1 %v3152_v51  ;;  %v3024_v13 = vmax.f32 %v2760_v1, 0.0  ;;  %v13937_v51 = vpop.permute.xlu0 %5638  ;;  %vm6005_vm0 = vcmp.eq.s32.totalorder %v15119_v29, 1  ;;  %v13946_v1 = vld [vmem:[#allocation13] ss:$0 sm:$0xff] }
 0x40c   : > { %v6581_v3 = vmax.f32 %v13840_v30, %v13918_v55  ;;  %v13925_v48 = vsel %vm5999_vm13, %v4423_v11, -inf  ;;  %v4424_v4 = vmax.f32 %v3824_v33, 0.0  ;;  %v3154_v55 = vpack.c.bf16 %v3026_v53, %v3025_v59 }
 0x40d   : > { %v6519_v52 = vmax.f32 %v13849_v62, %v13925_v48  ;;  %v13931_v43 = vsel %vm6002_vm14, %v4426_v2, -inf  ;;  %v3153_v25 = vpack.c.bf16 %v3024_v13, %v3023_v46  ;;  %v15120_v48 = vld [vmem:[#allocation190_spill] sm:$0xff]  ;;  %v15122_v46 = vmax.f32 %v13798_v22, %v13878_v23 }
 0x40e   : > { %v6612_v12 = vmax.f32 %v13858_v34, %v13931_v43  ;;  %v6256_v30 = vsel %vm6000_vm12, %v4424_v4, -inf  ;;  %v8219_v11 = vpop.f32.mrb[144].mxu1  ;;  %vm6003_vm1 = vcmp.eq.s32.totalorder %v15120_v48, 1  ;;  %v15121_v43 = vld [vmem:[#allocation191_spill] sm:$0xff]  ;;  %vm6017_vm12 = vcmp.eq.s32.totalorder %v13465_v60, 1 }
 0x40f   : > { %v6550_v33 = vmax.f32 %v13865_v39, %v6256_v30  ;;  %v3845_v62 = vadd.f32 %v13469_v19, %v8219_v11  ;;  %v3836_v10 = vpop.f32.mrb[145].mxu1  ;;  %8325 = vmatprep.mubr.bf16.mxu1 %v3153_v25  ;;  %vm6006_vm2 = vcmp.eq.s32.totalorder %v15121_v43, 1  ;;  %v15123_v11 = vld [vmem:[#allocation189_spill] sm:$0xff]  ;;  %v13957_v25 = vpop.permute.xlu0 %5644  ;;  %vm6015_vm13 = vcmp.eq.s32.totalorder %v12769_v36, 1 }
 0x410   : > { %v3837_v2 = vadd.f32 %v13469_v19, %v3836_v10  ;;  %v8220_v21 = vpop.f32.mrb[146].mxu1  ;;  %vm6004_vm3 = vcmp.eq.s32.totalorder %v15123_v11, 1  ;;  %v15128_v11 = vld [vmem:[#allocation38_spill] sm:$0xff]  ;;  %vm6018_vm14 = vcmp.eq.s32.totalorder %v13495_v24, 1  ;;  %vm6016_vm15 = vcmp.eq.s32.totalorder %v12759_v31, 1 }
 0x411   : > { %v4429_v17 = vmax.f32 %v3845_v62, 0.0  ;;  %v3848_v34 = vadd.f32 %v13469_v19, %v8220_v21  ;;  %v3839_v26 = vpop.f32.mrb[147].mxu1  ;;  %v15124_v62 = vmax.f32 %v13807_v49, %v13885_v6  ;;  %vm6008_vm7 = vcmp.eq.s32.totalorder %v15128_v11, 1 }
 0x412   : > { %v4427_v59 = vmax.f32 %v3837_v2, 0.0  ;;  %v3840_v39 = vadd.f32 %v13946_v1, %v3839_v26 }
 0x413   : > { %v6261_v4 = vsel %vm6005_vm0, %v4429_v17, -inf  ;;  %v4430_v53 = vmax.f32 %v3848_v34, 0.0  ;;  %8326 = vmatmul.mubr.bf16.gmra.mrb[252].mxu1 %v3154_v55  ;;  %v15125_v55 = vmax.f32 %v13816_v37, %v13893_v14  ;;  %v13969_v17 = vpop.permute.xlu1 %5647  ;;  %v15126_v34 = vmax.f32 %v13823_v40, %v13901_v20  ;;  %v13982_v40 = vpop.permute.xlu0 %5650 }
 0x414   : > { %v13954_v19 = vmax.f32 %v15122_v46, %v6261_v4  ;;  %v6259_v13 = vsel %vm6003_vm1, %v4427_v59, -inf  ;;  %v4428_v30 = vmax.f32 %v3840_v39, 0.0  ;;  %vm6021_vm0 = vcmp.eq.s32.totalorder %v13544_v54, 1 }
 0x415   : > { %v13962_v10 = vmax.f32 %v15124_v62, %v6259_v13  ;;  %v6262_v2 = vsel %vm6006_vm2, %v4430_v53, -inf  ;;  %v15127_v53 = vld [vmem:[#allocation39_spill] sm:$0xff]  ;;  %vm6019_vm1 = vcmp.eq.s32.totalorder %v13504_v5, 1  ;;  %vm6022_vm2 = vcmp.eq.s32.totalorder %v13575_v8, 1 }
 0x416   : > { %v13967_v21 = vmax.f32 %v15125_v55, %v6262_v2  ;;  %v6260_v22 = vsel %vm6004_vm3, %v4428_v30, -inf  ;;  %v8223_v23 = vpop.f32.mrb[148].mxu1  ;;  %vm6007_vm5 = vcmp.eq.s32.totalorder %v15127_v53, 1  ;;  %vm6020_vm3 = vcmp.eq.s32.totalorder %v13535_v38, 1 }
 0x417   : > { %v13974_v26 = vmax.f32 %v15126_v34, %v6260_v22  ;;  %v3861_v29 = vadd.f32 %v13946_v1, %v8223_v23  ;;  %v3852_v49 = vpop.f32.mrb[149].mxu1  ;;  %v13988_v62 = vpop.permute.xlu1 %5653 }
 0x418   : > { %v3853_v6 = vadd.f32 %v13946_v1, %v3852_v49  ;;  %v8224_v59 = vpop.f32.mrb[150].mxu1 }
 0x419   : > { %v4433_v39 = vmax.f32 %v3861_v29, 0.0  ;;  %v3864_v37 = vadd.f32 %v13946_v1, %v8224_v59  ;;  %v3855_v14 = vpop.f32.mrb[151].mxu1 }
 0x41a   : > { %v4431_v48 = vmax.f32 %v3853_v6, 0.0  ;;  %v3856_v4 = vadd.f32 %v13946_v1, %v3855_v14  ;;  %v13998_v6 = vpop.permute.xlu0 %5656 }
 0x41b   : > { %v6265_v20 = vsel %vm6009_vm4, %v4433_v39, -inf  ;;  %v4434_v43 = vmax.f32 %v3864_v37, 0.0  ;;  %vm6025_vm4 = vcmp.eq.s32.totalorder %v13621_v27, 1 }
 0x41c   : > { %v13985_v46 = vmax.f32 %v6581_v3, %v6265_v20  ;;  %v6263_v13 = vsel %vm6007_vm5, %v4431_v48, -inf  ;;  %v4432_v30 = vmax.f32 %v3856_v4, 0.0  ;;  %vm6023_vm5 = vcmp.eq.s32.totalorder %v13583_v0, 1 }
 0x41d   : > { %v13990_v63 = vmax.f32 %v6519_v52, %v6263_v13  ;;  %v6266_v2 = vsel %vm6010_vm6, %v4434_v43, -inf  ;;  %vm6026_vm6 = vcmp.eq.s32.totalorder %v13649_v61, 1 }
 0x41e   : > { %v13992_v55 = vmax.f32 %v6612_v12, %v6266_v2  ;;  %v6264_v22 = vsel %vm6008_vm7, %v4432_v30, -inf  ;;  %v8227_v23 = vpop.f32.mrb[152].mxu1  ;;  %v14011_v41 = vpop.permute.xlu0 %5662  ;;  %vm6024_vm7 = vcmp.eq.s32.totalorder %v13613_v18, 1 }
 0x41f   : > { %v13994_v34 = vmax.f32 %v6550_v33, %v6264_v22  ;;  %v3877_v29 = vadd.f32 %v13946_v1, %v8227_v23  ;;  %v3868_v28 = vpop.f32.mrb[153].mxu1  ;;  %v14004_v33 = vpop.permute.xlu1 %5659 }
 0x420   : > { %v3869_v3 = vadd.f32 %v13946_v1, %v3868_v28  ;;  %v8228_v49 = vpop.f32.mrb[154].mxu1 }
 0x421   : > { %v4437_v59 = vmax.f32 %v3877_v29, 0.0  ;;  %v3880_v39 = vadd.f32 %v13946_v1, %v8228_v49  ;;  %v3871_v52 = vpop.f32.mrb[155].mxu1 }
 0x422   : > { %v4435_v12 = vmax.f32 %v3869_v3, 0.0  ;;  %v3872_v37 = vadd.f32 %v13946_v1, %v3871_v52 }
 0x423   : > { %v6269_v14 = vsel %vm6013_vm8, %v4437_v59, -inf  ;;  %v4438_v48 = vmax.f32 %v3880_v39, 0.0  ;;  %v14016_v29 = vpop.permute.xlu1 %5665  ;;  %vm6029_vm8 = vcmp.eq.s32.totalorder %v13700_v56, 1 }
 0x424   : > { %v6459_v4 = vmax.f32 %v13954_v19, %v6269_v14  ;;  %v6267_v53 = vsel %vm6011_vm9, %v4435_v12, -inf  ;;  %v4436_v20 = vmax.f32 %v3872_v37, 0.0  ;;  %v14025_v12 = vpop.permute.xlu0 %5668  ;;  %vm6027_vm9 = vcmp.eq.s32.totalorder %v13658_v7, 1 }
 0x425   : > { %v6397_v43 = vmax.f32 %v13962_v10, %v6267_v53  ;;  %v6270_v44 = vsel %vm6014_vm10, %v4438_v48, -inf  ;;  %vm6030_vm10 = vcmp.eq.s32.totalorder %v13733_v47, 1 }
 0x426   : > { %v6490_v13 = vmax.f32 %v13967_v21, %v6270_v44  ;;  %v6268_v30 = vsel %vm6012_vm11, %v4436_v20, -inf  ;;  %v8231_v11 = vpop.f32.mrb[156].mxu1  ;;  %vm6028_vm11 = vcmp.eq.s32.totalorder %v13691_v58, 1 }
 0x427   : > { %v6428_v2 = vmax.f32 %v13974_v26, %v6268_v30  ;;  %v3893_v22 = vadd.f32 %v13946_v1, %v8231_v11  ;;  %v3884_v35 = vpop.f32.mrb[157].mxu1  ;;  %v14029_v36 = vpop.permute.xlu1 %5671 }
 0x428   : > { %v3885_v19 = vadd.f32 %v13946_v1, %v3884_v35  ;;  %v8232_v23 = vpop.f32.mrb[158].mxu1  ;;  %v14038_v35 = vpop.permute.xlu0 %5674 }
 0x429   : > { %v4441_v32 = vmax.f32 %v3893_v22, 0.0  ;;  %v3896_v10 = vadd.f32 %v13946_v1, %v8232_v23  ;;  %v3887_v28 = vpop.f32.mrb[159].mxu1 }
 0x42a   : > { %v4439_v21 = vmax.f32 %v3885_v19, 0.0  ;;  %v3888_v3 = vadd.f32 %v13946_v1, %v3887_v28 }
 0x42b   : > { %v6273_v26 = vsel %vm6017_vm12, %v4441_v32, -inf  ;;  %v4442_v49 = vmax.f32 %v3896_v10, 0.0  ;;  %v14044_v28 = vpop.permute.xlu1 %5677  ;;  %vm6033_vm12 = vcmp.eq.s32.totalorder %v13773_v15, 1 }
 0x42c   : > { %v6583_v59 = vmax.f32 %v13985_v46, %v6273_v26  ;;  %v6271_v39 = vsel %vm6015_vm13, %v4439_v21, -inf  ;;  %v4440_v52 = vmax.f32 %v3888_v3, 0.0 }
 0x42d   : > { %v6521_v37 = vmax.f32 %v13990_v63, %v6271_v39  ;;  %v6274_v60 = vsel %vm6018_vm14, %v4442_v49, -inf  ;;  %vm6034_vm14 = vcmp.eq.s32.totalorder %v13802_v57, 1 }
 0x42e   : > { %v6614_v14 = vmax.f32 %v13992_v55, %v6274_v60  ;;  %v6272_v48 = vsel %vm6016_vm15, %v4440_v52, -inf  ;;  %v8235_v53 = vpop.f32.mrb[160].mxu1  ;;  %v14054_v60 = vpop.permute.xlu0 %5680 }
 0x42f   : > { %v6552_v20 = vmax.f32 %v13994_v34, %v6272_v48  ;;  %v3909_v24 = vadd.f32 %v13946_v1, %v8235_v53  ;;  %v3900_v46 = vpop.f32.mrb[161].mxu1 }
 0x430   : > { %v3901_v44 = vadd.f32 %v13946_v1, %v3900_v46  ;;  %v8236_v30 = vpop.f32.mrb[162].mxu1 }
 0x431   : > { %v4445_v31 = vmax.f32 %v3909_v24, 0.0  ;;  %v3912_v11 = vadd.f32 %v13946_v1, %v8236_v30  ;;  %v3903_v22 = vpop.f32.mrb[163].mxu1 }
 0x432   : > { %v4443_v63 = vmax.f32 %v3901_v44, 0.0  ;;  %v3904_v55 = vadd.f32 %v13946_v1, %v3903_v22  ;;  %v14070_v0 = vpop.permute.xlu0 %5686 }
 0x433   : > { %v6277_v34 = vsel %vm6021_vm0, %v4445_v31, -inf  ;;  %v4446_v19 = vmax.f32 %v3912_v11, 0.0  ;;  %vm6037_vm0 = vcmp.eq.s32.totalorder %v13853_v9, 1 }
 0x434   : > { %v14041_v23 = vmax.f32 %v6459_v4, %v6277_v34  ;;  %v6275_v32 = vsel %vm6019_vm1, %v4443_v63, -inf  ;;  %v4444_v10 = vmax.f32 %v3904_v55, 0.0  ;;  %vm6035_vm1 = vcmp.eq.s32.totalorder %v13811_v16, 1 }
 0x435   : > { %v14046_v54 = vmax.f32 %v6397_v43, %v6275_v32  ;;  %v6278_v21 = vsel %vm6022_vm2, %v4446_v19, -inf  ;;  %vm6038_vm2 = vcmp.eq.s32.totalorder %v13887_v42, 1 }
 0x436   : > { %v14048_v3 = vmax.f32 %v6490_v13, %v6278_v21  ;;  %v6276_v5 = vsel %vm6020_vm3, %v4444_v10, -inf  ;;  %v8239_v26 = vpop.f32.mrb[164].mxu1 }
 0x437   : > { %v14050_v49 = vmax.f32 %v6428_v2, %v6276_v5  ;;  %v3925_v39 = vadd.f32 %v13946_v1, %v8239_v26  ;;  %v3916_v8 = vpop.f32.mrb[165].mxu1  ;;  %v14060_v2 = vpop.permute.xlu1 %5683 }
 0x438   : > { %v3917_v4 = vadd.f32 %v13946_v1, %v3916_v8  ;;  %v8240_v52 = vpop.f32.mrb[166].mxu1 }
 0x439   : > { %v4449_v38 = vmax.f32 %v3925_v39, 0.0  ;;  %v3928_v48 = vadd.f32 %v13946_v1, %v8240_v52  ;;  %v3919_v43 = vpop.f32.mrb[167].mxu1  ;;  %v14085_v52 = vpop.permute.xlu0 %5692 }
 0x43a   : > { %v4447_v13 = vmax.f32 %v3917_v4, 0.0  ;;  %v3920_v53 = vadd.f32 %v13946_v1, %v3919_v43 }
 0x43b   : > { %v6281_v24 = vsel %vm6025_vm4, %v4449_v38, -inf  ;;  %v4450_v46 = vmax.f32 %v3928_v48, 0.0  ;;  %v14076_v10 = vpop.permute.xlu1 %5689  ;;  %vm6041_vm4 = vcmp.eq.s32.totalorder %v13937_v51, 1 }
 0x43c   : > { %v14063_v44 = vmax.f32 %v6583_v59, %v6281_v24  ;;  %v6279_v30 = vsel %vm6023_vm5, %v4447_v13, -inf  ;;  %v4448_v31 = vmax.f32 %v3920_v53, 0.0 }
 0x43d   : > { %v14066_v11 = vmax.f32 %v6521_v37, %v6279_v30  ;;  %v6282_v27 = vsel %vm6026_vm6, %v4450_v46, -inf  ;;  %vm6042_vm6 = vcmp.eq.s32.totalorder %v13942_v50, 1 }
 0x43e   : > { %v14068_v22 = vmax.f32 %v6614_v14, %v6282_v27  ;;  %v6280_v63 = vsel %vm6024_vm7, %v4448_v31, -inf  ;;  %v8243_v55 = vpop.f32.mrb[168].mxu1  ;;  %v15129_v27 = vld [vmem:[#allocation41_spill] sm:$0xff]  ;;  %vm6040_vm7 = vcmp.eq.s32.totalorder %v13916_v45, 1 }
 0x43f   : > { %v14072_v34 = vmax.f32 %v6552_v20, %v6280_v63  ;;  %v3941_v19 = vadd.f32 %v13946_v1, %v8243_v55  ;;  %v3932_v61 = vpop.f32.mrb[169].mxu1  ;;  %v14089_v7 = vpop.permute.xlu1 %5695  ;;  %vm6031_vm13 = vcmp.eq.s32.totalorder %v15129_v27, 1 }
 0x440   : > { %v3933_v59 = vadd.f32 %v13946_v1, %v3932_v61  ;;  %v8244_v32 = vpop.f32.mrb[170].mxu1  ;;  %v14098_v63 = vpop.permute.xlu0 %5698 }
 0x441   : > { %v4453_v18 = vmax.f32 %v3941_v19, 0.0  ;;  %v3944_v37 = vadd.f32 %v13946_v1, %v8244_v32  ;;  %v3935_v21 = vpop.f32.mrb[171].mxu1  ;;  %v15130_v32 = vld [vmem:[#allocation175_spill] sm:$0xff] }
 0x442   : > { %v4451_v14 = vmax.f32 %v3933_v59, 0.0  ;;  %v3936_v5 = vadd.f32 %v13946_v1, %v3935_v21  ;;  %vm6032_vm15 = vcmp.eq.s32.totalorder %v15130_v32, 1 }
 0x443   : > { %v6285_v20 = vsel %vm6029_vm8, %v4453_v18, -inf  ;;  %v4454_v26 = vmax.f32 %v3944_v37, 0.0  ;;  %v14103_v18 = vpop.permute.xlu1 %5701  ;;  %vm6045_vm8 = vcmp.eq.s32.totalorder %v13982_v40, 1 }
 0x444   : > { %v6461_v39 = vmax.f32 %v14041_v23, %v6285_v20  ;;  %v6283_v8 = vsel %vm6027_vm9, %v4451_v14, -inf  ;;  %v4452_v4 = vmax.f32 %v3936_v5, 0.0  ;;  %vm6043_vm9 = vcmp.eq.s32.totalorder %v13957_v25, 1 }
 0x445   : > { %v6399_v38 = vmax.f32 %v14046_v54, %v6283_v8  ;;  %v6286_v56 = vsel %vm6030_vm10, %v4454_v26, -inf  ;;  %vm6046_vm10 = vcmp.eq.s32.totalorder %v13988_v62, 1 }
 0x446   : > { %v6492_v48 = vmax.f32 %v14048_v3, %v6286_v56  ;;  %v6284_v43 = vsel %vm6028_vm11, %v4452_v4, -inf  ;;  %v8247_v13 = vpop.f32.mrb[172].mxu1  ;;  %v14110_v4 = vpop.permute.xlu0 %5704  ;;  %vm6044_vm11 = vcmp.eq.s32.totalorder %v13969_v17, 1 }
 0x447   : > { %v6430_v53 = vmax.f32 %v14050_v49, %v6284_v43  ;;  %v3957_v47 = vadd.f32 %v13946_v1, %v8247_v13  ;;  %v3948_v23 = vpop.f32.mrb[173].mxu1 }
 0x448   : > { %v3949_v24 = vadd.f32 %v13946_v1, %v3948_v23  ;;  %v8248_v46 = vpop.f32.mrb[174].mxu1 }
 0x449   : > { %v4457_v58 = vmax.f32 %v3957_v47, 0.0  ;;  %v3960_v30 = vadd.f32 %v13946_v1, %v8248_v46  ;;  %v3951_v31 = vpop.f32.mrb[175].mxu1 }
 0x44a   : > { %v4455_v54 = vmax.f32 %v3949_v24, 0.0  ;;  %v3952_v3 = vadd.f32 %v13946_v1, %v3951_v31  ;;  %v14126_v16 = vpop.permute.xlu0 %5710 }
 0x44b   : > { %v6289_v49 = vsel %vm6033_vm12, %v4457_v58, -inf  ;;  %v4458_v55 = vmax.f32 %v3960_v30, 0.0  ;;  %v15131_v30 = vld [vmem:[#allocation49_spill] sm:$0xff]  ;;  %vm6049_vm12 = vcmp.eq.s32.totalorder %v14011_v41, 1 }
 0x44c   : > { %v6585_v19 = vmax.f32 %v14063_v44, %v6289_v49  ;;  %v6287_v61 = vsel %vm6031_vm13, %v4455_v54, -inf  ;;  %v4456_v59 = vmax.f32 %v3952_v3, 0.0  ;;  %vm6036_vm3 = vcmp.eq.s32.totalorder %v15131_v30, 1 }
 0x44d   : > { %v6523_v15 = vmax.f32 %v14066_v11, %v6287_v61  ;;  %v6290_v37 = vsel %vm6034_vm14, %v4458_v55, -inf  ;;  %vm6047_vm13 = vcmp.eq.s32.totalorder %v13998_v6, 1  ;;  %vm6050_vm14 = vcmp.eq.s32.totalorder %v14016_v29, 1 }
 0x44e   : > { %v6616_v21 = vmax.f32 %v14068_v22, %v6290_v37  ;;  %v6288_v14 = vsel %vm6032_vm15, %v4456_v59, -inf  ;;  %v8251_v5 = vpop.f32.mrb[176].mxu1  ;;  %vm6048_vm15 = vcmp.eq.s32.totalorder %v14004_v33, 1 }
 0x44f   : > { %v6554_v20 = vmax.f32 %v14072_v34, %v6288_v14  ;;  %v3973_v26 = vadd.f32 %v13946_v1, %v8251_v5  ;;  %v3964_v57 = vpop.f32.mrb[177].mxu1  ;;  %v14116_v34 = vpop.permute.xlu1 %5707  ;;  %v15132_v5 = vld [vmem:[#allocation47_spill] sm:$0xff] }
 0x450   : > { %v3965_v44 = vadd.f32 %v13946_v1, %v3964_v57  ;;  %v8252_v8 = vpop.f32.mrb[178].mxu1  ;;  %vm6039_vm5 = vcmp.eq.s32.totalorder %v15132_v5, 1 }
 0x451   : > { %v4461_v56 = vmax.f32 %v3973_v26, 0.0  ;;  %v3976_v43 = vadd.f32 %v13946_v1, %v8252_v8  ;;  %v3967_v13 = vpop.f32.mrb[179].mxu1 }
 0x452   : > { %v4459_v11 = vmax.f32 %v3965_v44, 0.0  ;;  %v3968_v22 = vadd.f32 %v13946_v1, %v3967_v13 }
 0x453   : > { %v6293_v47 = vsel %vm6037_vm0, %v4461_v56, -inf  ;;  %v4462_v23 = vmax.f32 %v3976_v43, 0.0  ;;  %v14132_v59 = vpop.permute.xlu1 %5713  ;;  %v14142_v56 = vpop.permute.xlu0 %5716  ;;  %vm6053_vm0 = vcmp.eq.s32.totalorder %v14038_v35, 1 }
 0x454   : > { %v14119_v24 = vmax.f32 %v6461_v39, %v6293_v47  ;;  %v6291_v46 = vsel %vm6035_vm1, %v4459_v11, -inf  ;;  %v4460_v58 = vmax.f32 %v3968_v22, 0.0  ;;  %vm6051_vm1 = vcmp.eq.s32.totalorder %v14025_v12, 1 }
 0x455   : > { %v14122_v31 = vmax.f32 %v6399_v38, %v6291_v46  ;;  %v6294_v9 = vsel %vm6038_vm2, %v4462_v23, -inf  ;;  %vm6054_vm2 = vcmp.eq.s32.totalorder %v14044_v28, 1 }
 0x456   : > { %v14124_v54 = vmax.f32 %v6492_v48, %v6294_v9  ;;  %v6292_v3 = vsel %vm6036_vm3, %v4460_v58, -inf  ;;  %v8255_v27 = vpop.f32.mrb[180].mxu1  ;;  %vm6052_vm3 = vcmp.eq.s32.totalorder %v14029_v36, 1 }
 0x457   : > { %v14128_v49 = vmax.f32 %v6430_v53, %v6292_v3  ;;  %v3989_v55 = vadd.f32 %v13946_v1, %v8255_v27  ;;  %v3980_v42 = vpop.f32.mrb[181].mxu1  ;;  %v14148_v47 = vpop.permute.xlu1 %5719 }
 0x458   : > { %v3981_v39 = vadd.f32 %v13946_v1, %v3980_v42  ;;  %v8256_v61 = vpop.f32.mrb[182].mxu1  ;;  %v14158_v3 = vpop.permute.xlu0 %5722 }
 0x459   : > { %v4465_v32 = vmax.f32 %v3989_v55, 0.0  ;;  %v3992_v38 = vadd.f32 %v13946_v1, %v8256_v61  ;;  %v3983_v37 = vpop.f32.mrb[183].mxu1 }
 0x45a   : > { %v4463_v48 = vmax.f32 %v3981_v39, 0.0  ;;  %v3984_v14 = vadd.f32 %v13946_v1, %v3983_v37 }
 0x45b   : > { %v6297_v53 = vsel %vm6041_vm4, %v4465_v32, -inf  ;;  %v4466_v26 = vmax.f32 %v3992_v38, 0.0  ;;  %v14163_v61 = vpop.permute.xlu1 %5725  ;;  %vm6057_vm4 = vcmp.eq.s32.totalorder %v14070_v0, 1 }
 0x45c   : > { %v14139_v57 = vmax.f32 %v6585_v19, %v6297_v53  ;;  %v6295_v44 = vsel %vm6039_vm5, %v4463_v48, -inf  ;;  %v4464_v8 = vmax.f32 %v3984_v14, 0.0  ;;  %v14170_v53 = vpop.permute.xlu0 %5728  ;;  %vm6055_vm5 = vcmp.eq.s32.totalorder %v14054_v60, 1 }
 0x45d   : > { %v14144_v43 = vmax.f32 %v6523_v15, %v6295_v44  ;;  %v6298_v51 = vsel %vm6042_vm6, %v4466_v26, -inf  ;;  %vm6058_vm6 = vcmp.eq.s32.totalorder %v14076_v10, 1 }
 0x45e   : > { %v14146_v13 = vmax.f32 %v6616_v21, %v6298_v51  ;;  %v6296_v11 = vsel %vm6040_vm7, %v4464_v8, -inf  ;;  %v8259_v22 = vpop.f32.mrb[184].mxu1  ;;  %vm6056_vm7 = vcmp.eq.s32.totalorder %v14060_v2, 1 }
 0x45f   : > { %v14150_v23 = vmax.f32 %v6554_v20, %v6296_v11  ;;  %v4005_v50 = vadd.f32 %v13946_v1, %v8259_v22  ;;  %v3996_v19 = vpop.f32.mrb[185].mxu1 }
 0x460   : > { %v3997_v46 = vadd.f32 %v13946_v1, %v3996_v19  ;;  %v8260_v58 = vpop.f32.mrb[186].mxu1  ;;  %v14183_v6 = vpop.permute.xlu0 %5734 }
 0x461   : > { %v4469_v45 = vmax.f32 %v4005_v50, 0.0  ;;  %v4008_v30 = vadd.f32 %v13946_v1, %v8260_v58  ;;  %v3999_v15 = vpop.f32.mrb[187].mxu1 }
 0x462   : > { %v4467_v21 = vmax.f32 %v3997_v46, 0.0  ;;  %v4000_v9 = vadd.f32 %v13946_v1, %v3999_v15 }
 0x463   : > { %v6301_v20 = vsel %vm6045_vm8, %v4469_v45, -inf  ;;  %v4470_v27 = vmax.f32 %v4008_v30, 0.0  ;;  %vm6061_vm8 = vcmp.eq.s32.totalorder %v14098_v63, 1 }
 0x464   : > { %v6463_v55 = vmax.f32 %v14119_v24, %v6301_v20  ;;  %v6299_v42 = vsel %vm6043_vm9, %v4467_v21, -inf  ;;  %v4468_v39 = vmax.f32 %v4000_v9, 0.0  ;;  %vm6059_vm9 = vcmp.eq.s32.totalorder %v14085_v52, 1 }
 0x465   : > { %v6401_v40 = vmax.f32 %v14122_v31, %v6299_v42  ;;  %v6302_v32 = vsel %vm6046_vm10, %v4470_v27, -inf  ;;  %vm6062_vm10 = vcmp.eq.s32.totalorder %v14103_v18, 1 }
 0x466   : > { %v6494_v38 = vmax.f32 %v14124_v54, %v6302_v32  ;;  %v6300_v25 = vsel %vm6044_vm11, %v4468_v39, -inf  ;;  %v8263_v37 = vpop.f32.mrb[188].mxu1  ;;  %vm6060_vm11 = vcmp.eq.s32.totalorder %v14089_v7, 1 }
 0x467   : > { %v6432_v48 = vmax.f32 %v14128_v49, %v6300_v25  ;;  %v4021_v14 = vadd.f32 %v13946_v1, %v8263_v37  ;;  %v4012_v62 = vpop.f32.mrb[189].mxu1  ;;  %v14176_v49 = vpop.permute.xlu1 %5731 }
 0x468   : > { %v4013_v24 = vadd.f32 %v13946_v1, %v4012_v62  ;;  %v8264_v5 = vpop.f32.mrb[190].mxu1  ;;  %v14198_v37 = vpop.permute.xlu0 %5740 }
 0x469   : > { %v4473_v17 = vmax.f32 %v4021_v14, 0.0  ;;  %v4024_v26 = vadd.f32 %v13946_v1, %v8264_v5  ;;  %v4015_v44 = vpop.f32.mrb[191].mxu1 }
 0x46a   : > { %v4471_v31 = vmax.f32 %v4013_v24, 0.0  ;;  %v4016_v54 = vadd.f32 %v13946_v1, %v4015_v44 }
 0x46b   : > { %v6305_v8 = vsel %vm6049_vm12, %v4473_v17, -inf  ;;  %v4474_v51 = vmax.f32 %v4024_v26, 0.0  ;;  %v14188_v9 = vpop.permute.xlu1 %5737  ;;  %vm6065_vm12 = vcmp.eq.s32.totalorder %v14126_v16, 1 }
 0x46c   : > { %v6587_v11 = vmax.f32 %v14139_v57, %v6305_v8  ;;  %v6303_v22 = vsel %vm6047_vm13, %v4471_v31, -inf  ;;  %v4472_v50 = vmax.f32 %v4016_v54, 0.0  ;;  %v14214_v8 = vpop.permute.xlu0 %5746  ;;  %vm6063_vm13 = vcmp.eq.s32.totalorder %v14110_v4, 1 }
 0x46d   : > { %v6525_v19 = vmax.f32 %v14144_v43, %v6303_v22  ;;  %v6306_v41 = vsel %vm6050_vm14, %v4474_v51, -inf  ;;  %vm6066_vm14 = vcmp.eq.s32.totalorder %v14132_v59, 1 }
 0x46e   : > { %v6618_v46 = vmax.f32 %v14146_v13, %v6306_v41  ;;  %v6304_v58 = vsel %vm6048_vm15, %v4472_v50, -inf  ;;  %v8267_v45 = vpop.f32.mrb[192].mxu1  ;;  %vm6064_vm15 = vcmp.eq.s32.totalorder %v14116_v34, 1 }
 0x46f   : > { %v6556_v30 = vmax.f32 %v14150_v23, %v6304_v58  ;;  %v4037_v15 = vadd.f32 %v13946_v1, %v8267_v45  ;;  %v4028_v29 = vpop.f32.mrb[193].mxu1  ;;  %v14204_v12 = vpop.permute.xlu1 %5743 }
 0x470   : > { %v4029_v57 = vadd.f32 %v13946_v1, %v4028_v29  ;;  %v8268_v21 = vpop.f32.mrb[194].mxu1 }
 0x471   : > { %v4477_v33 = vmax.f32 %v4037_v15, 0.0  ;;  %v4040_v43 = vadd.f32 %v13946_v1, %v8268_v21  ;;  %v4031_v20 = vpop.f32.mrb[195].mxu1 }
 0x472   : > { %v4475_v13 = vmax.f32 %v4029_v57, 0.0  ;;  %v4032_v27 = vadd.f32 %v13946_v1, %v4031_v20 }
 0x473   : > { %v6309_v23 = vsel %vm6053_vm0, %v4477_v33, -inf  ;;  %v4478_v42 = vmax.f32 %v4040_v43, 0.0  ;;  %v14220_v58 = vpop.permute.xlu1 %5749  ;;  %v14230_v43 = vpop.permute.xlu0 %5752  ;;  %vm6069_vm0 = vcmp.eq.s32.totalorder %v14158_v3, 1 }
 0x474   : > { %v14195_v39 = vmax.f32 %v6463_v55, %v6309_v23  ;;  %v6307_v32 = vsel %vm6051_vm1, %v4475_v13, -inf  ;;  %v4476_v25 = vmax.f32 %v4032_v27, 0.0  ;;  %vm6067_vm1 = vcmp.eq.s32.totalorder %v14142_v56, 1 }
 0x475   : > { %v14200_v14 = vmax.f32 %v6401_v40, %v6307_v32  ;;  %v6310_v35 = vsel %vm6054_vm2, %v4478_v42, -inf  ;;  %vm6070_vm2 = vcmp.eq.s32.totalorder %v14163_v61, 1 }
 0x476   : > { %v14202_v62 = vmax.f32 %v6494_v38, %v6310_v35  ;;  %v6308_v24 = vsel %vm6052_vm3, %v4476_v25, -inf  ;;  %v8271_v5 = vpop.f32.mrb[196].mxu1  ;;  %vm6068_vm3 = vcmp.eq.s32.totalorder %v14148_v47, 1 }
 0x477   : > { %v14206_v17 = vmax.f32 %v6432_v48, %v6308_v24  ;;  %v4053_v28 = vadd.f32 %v13946_v1, %v8271_v5  ;;  %v4044_v55 = vpop.f32.mrb[197].mxu1  ;;  %v14243_v52 = vpop.permute.xlu0 %5758 }
 0x478   : > { %v4045_v26 = vadd.f32 %v13946_v1, %v4044_v55  ;;  %v8272_v44 = vpop.f32.mrb[198].mxu1 }
 0x479   : > { %v4481_v36 = vmax.f32 %v4053_v28, 0.0  ;;  %v4056_v31 = vadd.f32 %v13946_v1, %v8272_v44  ;;  %v4047_v40 = vpop.f32.mrb[199].mxu1 }
 0x47a   : > { %v4479_v38 = vmax.f32 %v4045_v26, 0.0  ;;  %v4048_v54 = vadd.f32 %v13946_v1, %v4047_v40 }
 0x47b   : > { %v6313_v48 = vsel %vm6057_vm4, %v4481_v36, -inf  ;;  %v4482_v51 = vmax.f32 %v4056_v31, 0.0  ;;  %vm6073_vm4 = vcmp.eq.s32.totalorder %v14183_v6, 1 }
 0x47c   : > { %v14217_v22 = vmax.f32 %v6587_v11, %v6313_v48  ;;  %v6311_v50 = vsel %vm6055_vm5, %v4479_v38, -inf  ;;  %v4480_v41 = vmax.f32 %v4048_v54, 0.0  ;;  %vm6071_vm5 = vcmp.eq.s32.totalorder %v14170_v53, 1 }
 0x47d   : > { %v14222_v0 = vmax.f32 %v6525_v19, %v6311_v50  ;;  %v6314_v45 = vsel %vm6058_vm6, %v4482_v51, -inf  ;;  %v14257_v50 = vpop.permute.xlu0 %5764  ;;  %vm6074_vm6 = vcmp.eq.s32.totalorder %v14188_v9, 1 }
 0x47e   : > { %v14224_v15 = vmax.f32 %v6618_v46, %v6314_v45  ;;  %v6312_v60 = vsel %vm6056_vm7, %v4480_v41, -inf  ;;  %v8275_v29 = vpop.f32.mrb[200].mxu1  ;;  %vm6072_vm7 = vcmp.eq.s32.totalorder %v14176_v49, 1 }
 0x47f   : > { %v14226_v57 = vmax.f32 %v6556_v30, %v6312_v60  ;;  %v4069_v21 = vadd.f32 %v13946_v1, %v8275_v29  ;;  %v4060_v10 = vpop.f32.mrb[201].mxu1  ;;  %v14236_v30 = vpop.permute.xlu1 %5755 }
 0x480   : > { %v4061_v11 = vadd.f32 %v13946_v1, %v4060_v10  ;;  %v8276_v33 = vpop.f32.mrb[202].mxu1 }
 0x481   : > { %v4485_v2 = vmax.f32 %v4069_v21, 0.0  ;;  %v4072_v20 = vadd.f32 %v13946_v1, %v8276_v33  ;;  %v4063_v19 = vpop.f32.mrb[203].mxu1 }
 0x482   : > { %v4483_v46 = vmax.f32 %v4061_v11, 0.0  ;;  %v4064_v13 = vadd.f32 %v13946_v1, %v4063_v19 }
 0x483   : > { %v6317_v27 = vsel %vm6061_vm8, %v4485_v2, -inf  ;;  %v4486_v23 = vmax.f32 %v4072_v20, 0.0  ;;  %v14248_v36 = vpop.permute.xlu1 %5761  ;;  %v14270_v20 = vpop.permute.xlu0 %5770  ;;  %vm6077_vm8 = vcmp.eq.s32.totalorder %v14214_v8, 1 }
 0x484   : > { %v6465_v42 = vmax.f32 %v14195_v39, %v6317_v27  ;;  %v6315_v32 = vsel %vm6059_vm9, %v4483_v46, -inf  ;;  %v4484_v25 = vmax.f32 %v4064_v13, 0.0  ;;  %vm6075_vm9 = vcmp.eq.s32.totalorder %v14198_v37, 1 }
 0x485   : > { %v6403_v35 = vmax.f32 %v14200_v14, %v6315_v32  ;;  %v6318_v63 = vsel %vm6062_vm10, %v4486_v23, -inf  ;;  %vm6078_vm10 = vcmp.eq.s32.totalorder %v14220_v58, 1 }
 0x486   : > { %v6496_v24 = vmax.f32 %v14202_v62, %v6318_v63  ;;  %v6316_v5 = vsel %vm6060_vm11, %v4484_v25, -inf  ;;  %v8279_v28 = vpop.f32.mrb[204].mxu1  ;;  %vm6076_vm11 = vcmp.eq.s32.totalorder %v14204_v12, 1 }
 0x487   : > { %v6434_v55 = vmax.f32 %v14206_v17, %v6316_v5  ;;  %v4085_v26 = vadd.f32 %v13946_v1, %v8279_v28  ;;  %v4076_v18 = vpop.f32.mrb[205].mxu1  ;;  %v14261_v4 = vpop.permute.xlu1 %5767 }
 0x488   : > { %v4077_v39 = vadd.f32 %v13946_v1, %v4076_v18  ;;  %v8280_v44 = vpop.f32.mrb[206].mxu1  ;;  %v14286_v18 = vpop.permute.xlu0 %5776 }
 0x489   : > { %v4489_v7 = vmax.f32 %v4085_v26, 0.0  ;;  %v4088_v14 = vadd.f32 %v13946_v1, %v8280_v44  ;;  %v4079_v31 = vpop.f32.mrb[207].mxu1 }
 0x48a   : > { %v4487_v62 = vmax.f32 %v4077_v39, 0.0  ;;  %v4080_v40 = vadd.f32 %v13946_v1, %v4079_v31 }
 0x48b   : > { %v6321_v17 = vsel %vm6065_vm12, %v4489_v7, -inf  ;;  %v4490_v38 = vmax.f32 %v4088_v14, 0.0  ;;  %v14276_v23 = vpop.permute.xlu1 %5773  ;;  %vm6081_vm12 = vcmp.eq.s32.totalorder %v14243_v52, 1 }
 0x48c   : > { %v6589_v54 = vmax.f32 %v14217_v22, %v6321_v17  ;;  %v6319_v48 = vsel %vm6063_vm13, %v4487_v62, -inf  ;;  %v4488_v51 = vmax.f32 %v4080_v40, 0.0  ;;  %v14302_v53 = vpop.permute.xlu0 %5782  ;;  %vm6079_vm13 = vcmp.eq.s32.totalorder %v14230_v43, 1 }
 0x48d   : > { %v6527_v41 = vmax.f32 %v14222_v0, %v6319_v48  ;;  %v6322_v16 = vsel %vm6066_vm14, %v4490_v38, -inf  ;;  %vm6082_vm14 = vcmp.eq.s32.totalorder %v14248_v36, 1 }
 0x48e   : > { %v6620_v45 = vmax.f32 %v14224_v15, %v6322_v16  ;;  %v6320_v60 = vsel %vm6064_vm15, %v4488_v51, -inf  ;;  %v8283_v29 = vpop.f32.mrb[208].mxu1  ;;  %vm6080_vm15 = vcmp.eq.s32.totalorder %v14236_v30, 1 }
 0x48f   : > { %v6558_v21 = vmax.f32 %v14226_v57, %v6320_v60  ;;  %v4101_v59 = vadd.f32 %v13946_v1, %v8283_v29  ;;  %v4092_v22 = vpop.f32.mrb[209].mxu1 }
 0x490   : > { %v4093_v10 = vadd.f32 %v13946_v1, %v4092_v22  ;;  %v8284_v11 = vpop.f32.mrb[210].mxu1 }
 0x491   : > { %v4493_v34 = vmax.f32 %v4101_v59, 0.0  ;;  %v4104_v33 = vadd.f32 %v13946_v1, %v8284_v11  ;;  %v4095_v2 = vpop.f32.mrb[211].mxu1 }
 0x492   : > { %v4491_v0 = vmax.f32 %v4093_v10, 0.0  ;;  %v4096_v15 = vadd.f32 %v13946_v1, %v4095_v2 }
 0x493   : > { %v6325_v57 = vsel %vm6069_vm0, %v4493_v34, -inf  ;;  %v4494_v19 = vmax.f32 %v4104_v33, 0.0  ;;  %vm6085_vm0 = vcmp.eq.s32.totalorder %v14270_v20, 1 }
 0x494   : > { %v14273_v46 = vmax.f32 %v6465_v42, %v6325_v57  ;;  %v6323_v13 = vsel %vm6067_vm1, %v4491_v0, -inf  ;;  %v4492_v27 = vmax.f32 %v4096_v15, 0.0  ;;  %v14317_v0 = vpop.permute.xlu0 %5788  ;;  %vm6083_vm1 = vcmp.eq.s32.totalorder %v14257_v50, 1 }
 0x495   : > { %v14278_v3 = vmax.f32 %v6403_v35, %v6323_v13  ;;  %v6326_v32 = vsel %vm6070_vm2, %v4494_v19, -inf  ;;  %vm6086_vm2 = vcmp.eq.s32.totalorder %v14276_v23, 1 }
 0x496   : > { %v14280_v25 = vmax.f32 %v6496_v24, %v6326_v32  ;;  %v6324_v56 = vsel %vm6068_vm3, %v4492_v27, -inf  ;;  %v8287_v63 = vpop.f32.mrb[212].mxu1  ;;  %vm6084_vm3 = vcmp.eq.s32.totalorder %v14261_v4, 1 }
 0x497   : > { %v14282_v5 = vmax.f32 %v6434_v55, %v6324_v56  ;;  %v4117_v28 = vadd.f32 %v13946_v1, %v8287_v63  ;;  %v4108_v61 = vpop.f32.mrb[213].mxu1  ;;  %v14292_v55 = vpop.permute.xlu1 %5779 }
 0x498   : > { %v4109_v42 = vadd.f32 %v13946_v1, %v4108_v61  ;;  %v8288_v26 = vpop.f32.mrb[214].mxu1  ;;  %v14330_v61 = vpop.permute.xlu0 %5794 }
 0x499   : > { %v4497_v47 = vmax.f32 %v4117_v28, 0.0  ;;  %v4120_v39 = vadd.f32 %v13946_v1, %v8288_v26  ;;  %v4111_v35 = vpop.f32.mrb[215].mxu1 }
 0x49a   : > { %v4495_v24 = vmax.f32 %v4109_v42, 0.0  ;;  %v4112_v44 = vadd.f32 %v13946_v1, %v4111_v35 }
 0x49b   : > { %v6329_v7 = vsel %vm6073_vm4, %v4497_v47, -inf  ;;  %v4498_v14 = vmax.f32 %v4120_v39, 0.0  ;;  %v14308_v59 = vpop.permute.xlu1 %5785  ;;  %vm6089_vm4 = vcmp.eq.s32.totalorder %v14302_v53, 1 }
 0x49c   : > { %v14295_v31 = vmax.f32 %v6589_v54, %v6329_v7  ;;  %v6327_v62 = vsel %vm6071_vm5, %v4495_v24, -inf  ;;  %v4496_v40 = vmax.f32 %v4112_v44, 0.0  ;;  %v14344_v30 = vpop.permute.xlu0 %5800  ;;  %vm6087_vm5 = vcmp.eq.s32.totalorder %v14286_v18, 1 }
 0x49d   : > { %v14298_v17 = vmax.f32 %v6527_v41, %v6327_v62  ;;  %v6330_v6 = vsel %vm6074_vm6, %v4498_v14, -inf  ;;  %v14340_v14 = vld [vmem:[#allocation13] ss:$0 sm:$0xff]  ;;  %vm6090_vm6 = vcmp.eq.s32.totalorder %v14308_v59, 1 }
 0x49e   : > { %v14300_v38 = vmax.f32 %v6620_v45, %v6330_v6  ;;  %v6328_v48 = vsel %vm6072_vm7, %v4496_v40, -inf  ;;  %v8291_v51 = vpop.f32.mrb[216].mxu1  ;;  %vm6088_vm7 = vcmp.eq.s32.totalorder %v14292_v55, 1 }
 0x49f   : > { %v14304_v16 = vmax.f32 %v6558_v21, %v6328_v48  ;;  %v4133_v60 = vadd.f32 %v13946_v1, %v8291_v51  ;;  %v4124_v9 = vpop.f32.mrb[217].mxu1  ;;  %v14321_v37 = vpop.permute.xlu1 %5791 }
 0x4a0   : > { %v4125_v54 = vadd.f32 %v13946_v1, %v4124_v9  ;;  %v8292_v29 = vpop.f32.mrb[218].mxu1  ;;  %v14360_v50 = vpop.permute.xlu0 %5806 }
 0x4a1   : > { %v4501_v49 = vmax.f32 %v4133_v60, 0.0  ;;  %v4136_v41 = vadd.f32 %v13946_v1, %v8292_v29  ;;  %v4127_v22 = vpop.f32.mrb[219].mxu1 }
 0x4a2   : > { %v4499_v45 = vmax.f32 %v4125_v54, 0.0  ;;  %v4128_v10 = vadd.f32 %v13946_v1, %v4127_v22 }
 0x4a3   : > { %v6333_v21 = vsel %vm6077_vm8, %v4501_v49, -inf  ;;  %v4502_v11 = vmax.f32 %v4136_v41, 0.0  ;;  %v14335_v35 = vpop.permute.xlu1 %5797  ;;  %vm6093_vm8 = vcmp.eq.s32.totalorder %v14330_v61, 1 }
 0x4a4   : > { %v6467_v34 = vmax.f32 %v14273_v46, %v6333_v21  ;;  %v6331_v33 = vsel %vm6075_vm9, %v4499_v45, -inf  ;;  %v4500_v2 = vmax.f32 %v4128_v10, 0.0  ;;  %vm6091_vm9 = vcmp.eq.s32.totalorder %v14317_v0, 1 }
 0x4a5   : > { %v6405_v15 = vmax.f32 %v14278_v3, %v6331_v33  ;;  %v6334_v8 = vsel %vm6078_vm10, %v4502_v11, -inf  ;;  %vm6094_vm10 = vcmp.eq.s32.totalorder %v14335_v35, 1 }
 0x4a6   : > { %v6498_v57 = vmax.f32 %v14280_v25, %v6334_v8  ;;  %v6332_v19 = vsel %vm6076_vm11, %v4500_v2, -inf  ;;  %v8295_v13 = vpop.f32.mrb[220].mxu1  ;;  %vm6092_vm11 = vcmp.eq.s32.totalorder %v14321_v37, 1 }
 0x4a7   : > { %v6436_v27 = vmax.f32 %v14282_v5, %v6332_v19  ;;  %v4149_v58 = vadd.f32 %v13946_v1, %v8295_v13  ;;  %v4140_v46 = vpop.f32.mrb[221].mxu1 }
 0x4a8   : > { %v4141_v32 = vadd.f32 %v13946_v1, %v4140_v46  ;;  %v8296_v56 = vpop.f32.mrb[222].mxu1 }
 0x4a9   : > { %v4505_v12 = vmax.f32 %v4149_v58, 0.0  ;;  %v4152_v63 = vadd.f32 %v13946_v1, %v8296_v56  ;;  %v4143_v28 = vpop.f32.mrb[223].mxu1  ;;  %v14376_v56 = vpop.permute.xlu0 %5812 }
 0x4aa   : > { %v4503_v3 = vmax.f32 %v4141_v32, 0.0  ;;  %v4144_v25 = vadd.f32 %v13946_v1, %v4143_v28 }
 0x4ab   : > { %v6337_v5 = vsel %vm6081_vm12, %v4505_v12, -inf  ;;  %v4506_v42 = vmax.f32 %v4152_v63, 0.0  ;;  %vm6097_vm12 = vcmp.eq.s32.totalorder %v14360_v50, 1 }
 0x4ac   : > { %v6591_v26 = vmax.f32 %v14295_v31, %v6337_v5  ;;  %v6335_v47 = vsel %vm6079_vm13, %v4503_v3, -inf  ;;  %v4504_v39 = vmax.f32 %v4144_v25, 0.0  ;;  %vm6095_vm13 = vcmp.eq.s32.totalorder %v14344_v30, 1 }
 0x4ad   : > { %v6529_v52 = vmax.f32 %v14298_v17, %v6335_v47  ;;  %v6338_v24 = vsel %vm6082_vm14, %v4506_v42, -inf }
 0x4ae   : > { %v6622_v1 = vmax.f32 %v14300_v38, %v6338_v24  ;;  %v6336_v43 = vsel %vm6080_vm15, %v4504_v39, -inf  ;;  %v8299_v44 = vpop.f32.mrb[224].mxu1 }
 0x4af   : > { %v6560_v7 = vmax.f32 %v14304_v16, %v6336_v43  ;;  %v4165_v36 = vadd.f32 %v14340_v14, %v8299_v44  ;;  %v4156_v31 = vpop.f32.mrb[225].mxu1  ;;  %v14350_v16 = vpop.permute.xlu1 %5803 }
 0x4b0   : > { %v4157_v62 = vadd.f32 %v14340_v14, %v4156_v31  ;;  %v8300_v40 = vpop.f32.mrb[226].mxu1  ;;  %vm6096_vm15 = vcmp.eq.s32.totalorder %v14350_v16, 1 }
 0x4b1   : > { %v4509_v6 = vmax.f32 %v4165_v36, 0.0  ;;  %v4168_v17 = vadd.f32 %v14340_v14, %v8300_v40  ;;  %v4159_v48 = vpop.f32.mrb[227].mxu1 }
 0x4b2   : > { %v4507_v38 = vmax.f32 %v4157_v62, 0.0  ;;  %v4160_v51 = vadd.f32 %v14340_v14, %v4159_v48 }
 0x4b3   : > { %v6341_v60 = vsel %vm6085_vm0, %v4509_v6, -inf  ;;  %v4510_v9 = vmax.f32 %v4168_v17, 0.0  ;;  %v14366_v2 = vpop.permute.xlu1 %5809 }
 0x4b4   : > { %v14353_v54 = vmax.f32 %v6467_v34, %v6341_v60  ;;  %v6339_v29 = vsel %vm6083_vm1, %v4507_v38, -inf  ;;  %v4508_v49 = vmax.f32 %v4160_v51, 0.0  ;;  %vm6098_vm14 = vcmp.eq.s32.totalorder %v14366_v2, 1 }
 0x4b5   : > { %v14356_v41 = vmax.f32 %v6405_v15, %v6339_v29  ;;  %v6342_v20 = vsel %vm6086_vm2, %v4510_v9, -inf  ;;  %vm6099_vm1 = vcmp.eq.s32.totalorder %v14376_v56, 1 }
 0x4b6   : > { %v14358_v22 = vmax.f32 %v6498_v57, %v6342_v20  ;;  %v6340_v45 = vsel %vm6084_vm3, %v4508_v49, -inf  ;;  %v8303_v10 = vpop.f32.mrb[228].mxu1 }
 0x4b7   : > { %v14362_v21 = vmax.f32 %v6436_v27, %v6340_v45  ;;  %v4181_v11 = vadd.f32 %v14340_v14, %v8303_v10  ;;  %v4172_v23 = vpop.f32.mrb[229].mxu1  ;;  %v14382_v18 = vpop.permute.xlu1 %5815 }
 0x4b8   : > { %v4173_v34 = vadd.f32 %v14340_v14, %v4172_v23  ;;  %v8304_v33 = vpop.f32.mrb[230].mxu1  ;;  %vm6100_vm3 = vcmp.eq.s32.totalorder %v14382_v18, 1 }
 0x4b9   : > { %v4513_v4 = vmax.f32 %v4181_v11, 0.0  ;;  %v4184_v15 = vadd.f32 %v14340_v14, %v8304_v33  ;;  %v4175_v8 = vpop.f32.mrb[231].mxu1 }
 0x4ba   : > { %v4511_v57 = vmax.f32 %v4173_v34, 0.0  ;;  %v4176_v19 = vadd.f32 %v14340_v14, %v4175_v8 }
 0x4bb   : > { %v6345_v13 = vsel %vm6089_vm4, %v4513_v4, -inf  ;;  %v4514_v27 = vmax.f32 %v4184_v15, 0.0  ;;  %v5822_v62 = vpop.permute.xlu1 %5821 }
 0x4bc   : > { %v14373_v58 = vmax.f32 %v6591_v26, %v6345_v13  ;;  %v6343_v46 = vsel %vm6087_vm5, %v4511_v57, -inf  ;;  %v4512_v32 = vmax.f32 %v4176_v19, 0.0  ;;  %vm6102_vm2 = vcmp.eq.s32.totalorder %v5822_v62, 1 }
 0x4bd   : > { %v14378_v12 = vmax.f32 %v6529_v52, %v6343_v46  ;;  %v6346_v53 = vsel %vm6090_vm6, %v4514_v27, -inf }
 0x4be   : > { %v14380_v63 = vmax.f32 %v6622_v1, %v6346_v53  ;;  %v6344_v28 = vsel %vm6088_vm7, %v4512_v32, -inf  ;;  %v8307_v3 = vpop.f32.mrb[232].mxu1  ;;  %v5819_v1 = vpop.permute.xlu0 %5818 }
 0x4bf   : > { %v14384_v25 = vmax.f32 %v6560_v7, %v6344_v28  ;;  %v4197_v59 = vadd.f32 %v14340_v14, %v8307_v3  ;;  %v4188_v5 = vpop.f32.mrb[233].mxu1  ;;  %v14406_v20 = vpop.permute.xlu1 %5827  ;;  %vm6101_vm0 = vcmp.eq.s32.totalorder %v5819_v1, 1 }
 0x4c0   : > { %v4189_v42 = vadd.f32 %v14340_v14, %v4188_v5  ;;  %v8308_v26 = vpop.f32.mrb[234].mxu1  ;;  %vm6104_vm7 = vcmp.eq.s32.totalorder %v14406_v20, 1 }
 0x4c1   : > { %v4517_v55 = vmax.f32 %v4197_v59, 0.0  ;;  %v4200_v47 = vadd.f32 %v14340_v14, %v8308_v26  ;;  %v4191_v39 = vpop.f32.mrb[235].mxu1 }
 0x4c2   : > { %v4515_v52 = vmax.f32 %v4189_v42, 0.0  ;;  %v4192_v24 = vadd.f32 %v14340_v14, %v4191_v39  ;;  %v14400_v9 = vpop.permute.xlu0 %5824 }
 0x4c3   : > { %v6349_v43 = vsel %vm6093_vm8, %v4517_v55, -inf  ;;  %v4518_v44 = vmax.f32 %v4200_v47, 0.0  ;;  %v5834_v13 = vpop.permute.xlu1 %5833  ;;  %vm6103_vm5 = vcmp.eq.s32.totalorder %v14400_v9, 1 }
 0x4c4   : > { %v6469_v7 = vmax.f32 %v14353_v54, %v6349_v43  ;;  %v6347_v36 = vsel %vm6091_vm9, %v4515_v52, -inf  ;;  %v4516_v31 = vmax.f32 %v4192_v24, 0.0  ;;  %vm6106_vm6 = vcmp.eq.s32.totalorder %v5834_v13, 1 }
 0x4c5   : > { %v6407_v40 = vmax.f32 %v14356_v41, %v6347_v36  ;;  %v6350_v61 = vsel %vm6094_vm10, %v4518_v44, -inf }
 0x4c6   : > { %v6500_v6 = vmax.f32 %v14358_v22, %v6350_v61  ;;  %v6348_v17 = vsel %vm6092_vm11, %v4516_v31, -inf  ;;  %v8311_v48 = vpop.f32.mrb[236].mxu1  ;;  %v5831_v30 = vpop.permute.xlu0 %5830 }
 0x4c7   : > { %v6438_v0 = vmax.f32 %v14362_v21, %v6348_v17  ;;  %v4213_v38 = vadd.f32 %v14340_v14, %v8311_v48  ;;  %v4204_v51 = vpop.f32.mrb[237].mxu1  ;;  %v5840_v47 = vpop.permute.xlu1 %5839  ;;  %vm6105_vm4 = vcmp.eq.s32.totalorder %v5831_v30, 1  ;;  %v6371_v30 = vld [vmem:[%s9277_s28] sm:$0xff] }
 0x4c8   : > { %v4205_v35 = vadd.f32 %v14340_v14, %v4204_v51  ;;  %v8312_v60 = vpop.f32.mrb[238].mxu1  ;;  %vm6108_vm11 = vcmp.eq.s32.totalorder %v5840_v47, 1 }
 0x4c9   : > { %v4521_v54 = vmax.f32 %v4213_v38, 0.0  ;;  %v4216_v37 = vadd.f32 %v14340_v14, %v8312_v60  ;;  %v4207_v29 = vpop.f32.mrb[239].mxu1 }
 0x4ca   : > { %v4519_v49 = vmax.f32 %v4205_v35, 0.0  ;;  %v4208_v41 = vadd.f32 %v14340_v14, %v4207_v29 }
 0x4cb   : > { %v6353_v22 = vsel %vm6097_vm12, %v4521_v54, -inf  ;;  %v4522_v45 = vmax.f32 %v4216_v37, 0.0  ;;  %v5846_v48 = vpop.permute.xlu1 %5845 }
 0x4cc   : > { %v6593_v10 = vmax.f32 %v14373_v58, %v6353_v22  ;;  %v6351_v21 = vsel %vm6095_vm13, %v4519_v49, -inf  ;;  %v4520_v11 = vmax.f32 %v4208_v41, 0.0  ;;  %vm6110_vm10 = vcmp.eq.s32.totalorder %v5846_v48, 1 }
 0x4cd   : > { %v6531_v23 = vmax.f32 %v14378_v12, %v6351_v21  ;;  %v6354_v50 = vsel %vm6098_vm14, %v4522_v45, -inf }
 0x4ce   : > { %v6624_v34 = vmax.f32 %v14380_v63, %v6354_v50  ;;  %v6352_v33 = vsel %vm6096_vm15, %v4520_v11, -inf  ;;  %v8315_v4 = vpop.f32.mrb[240].mxu1  ;;  %v6373_v50 = vld [vmem:[%s9277_s28 + $0x10] sm:$0xff] }
 0x4cf   : > { %v6562_v15 = vmax.f32 %v14384_v25, %v6352_v33  ;;  %v4229_v8 = vadd.f32 %v14340_v14, %v8315_v4  ;;  %v4220_v57 = vpop.f32.mrb[241].mxu1  ;;  %v5837_v25 = vpop.permute.xlu0 %5836 }
 0x4d0   : > { %v4221_v2 = vadd.f32 %v14340_v14, %v4220_v57  ;;  %v8316_v19 = vpop.f32.mrb[242].mxu1  ;;  %vm6107_vm9 = vcmp.eq.s32.totalorder %v5837_v25, 1  ;;  %v5852_v11 = vpop.permute.xlu1 %5851 }
 0x4d1   : > { %v4525_v27 = vmax.f32 %v4229_v8, 0.0  ;;  %v4232_v16 = vadd.f32 %v14340_v14, %v8316_v19  ;;  %v4223_v58 = vpop.f32.mrb[243].mxu1  ;;  %vm6112_vm15 = vcmp.eq.s32.totalorder %v5852_v11, 1 }
 0x4d2   : > { %v4523_v46 = vmax.f32 %v4221_v2, 0.0  ;;  %v4224_v32 = vadd.f32 %v14340_v14, %v4223_v58  ;;  %v6374_v2 = vld [vmem:[%s9277_s28 + $0x18] sm:$0xff] }
 0x4d3   : > { %v6357_v12 = vsel %vm6101_vm0, %v4525_v27, -inf  ;;  %v4526_v53 = vmax.f32 %v4232_v16, 0.0  ;;  %v5843_v31 = vpop.permute.xlu0 %5842  ;;  %v6372_v16 = vld [vmem:[%s9277_s28 + $0x8] sm:$0xff] }
 0x4d4   : > { %v14419_v63 = vmax.f32 %v6469_v7, %v6357_v12  ;;  %v6355_v28 = vsel %vm6099_vm1, %v4523_v46, -inf  ;;  %v4524_v3 = vmax.f32 %v4224_v32, 0.0  ;;  %vm6109_vm8 = vcmp.eq.s32.totalorder %v5843_v31, 1 }
 0x4d5   : > { %v14422_v59 = vmax.f32 %v6407_v40, %v6355_v28  ;;  %v6358_v5 = vsel %vm6102_vm2, %v4526_v53, -inf }
 0x4d6   : > { %v14424_v42 = vmax.f32 %v6500_v6, %v6358_v5  ;;  %v6356_v26 = vsel %vm6100_vm3, %v4524_v3, -inf  ;;  %v8319_v55 = vpop.f32.mrb[244].mxu1 }
 0x4d7   : > { %v14426_v39 = vmax.f32 %v6438_v0, %v6356_v26  ;;  %v4245_v56 = vadd.f32 %v14340_v14, %v8319_v55  ;;  %v4236_v52 = vpop.f32.mrb[245].mxu1  ;;  %v5849_v41 = vpop.permute.xlu0 %5848 }
 0x4d8   : > { %v4237_v24 = vadd.f32 %v14340_v14, %v4236_v52  ;;  %v8320_v1 = vpop.f32.mrb[246].mxu1  ;;  %vm6111_vm13 = vcmp.eq.s32.totalorder %v5849_v41, 1  ;;  %v6377_v52 = vld [vmem:[%s9277_s28 + $0x30] sm:$0xff] }
 0x4d9   : > { %v4529_v43 = vmax.f32 %v4245_v56, 0.0  ;;  %v4248_v18 = vadd.f32 %v14340_v14, %v8320_v1  ;;  %v4239_v44 = vpop.f32.mrb[247].mxu1 }
 0x4da   : > { %v4527_v7 = vmax.f32 %v4237_v24, 0.0  ;;  %v4240_v36 = vadd.f32 %v14340_v14, %v4239_v44 }
 0x4db   : > { %v6361_v62 = vsel %vm6105_vm4, %v4529_v43, -inf  ;;  %v4530_v40 = vmax.f32 %v4248_v18, 0.0  ;;  %v5855_v46 = vpop.permute.xlu0 %5854  ;;  %v6375_v18 = vld [vmem:[%s9277_s28 + $0x20] sm:$0xff] }
 0x4dc   : > { %v14433_v61 = vmax.f32 %v6593_v10, %v6361_v62  ;;  %v6359_v6 = vsel %vm6103_vm5, %v4527_v7, -inf  ;;  %v4528_v17 = vmax.f32 %v4240_v36, 0.0  ;;  %vm6113_vm12 = vcmp.eq.s32.totalorder %v5855_v46, 1  ;;  %v6378_v36 = vld [vmem:[%s9277_s28 + $0x38] sm:$0xff] }
 0x4dd   : > { %v14436_v0 = vmax.f32 %v6531_v23, %v6359_v6  ;;  %v6362_v38 = vsel %vm6106_vm6, %v4530_v40, -inf  ;;  %v6376_v6 = vld [vmem:[%s9277_s28 + $0x28] sm:$0xff] }
 0x4de   : > { %v14438_v51 = vmax.f32 %v6624_v34, %v6362_v38  ;;  %v6360_v35 = vsel %vm6104_vm7, %v4528_v17, -inf  ;;  %v8323_v60 = vpop.f32.mrb[248].mxu1 }
 0x4df   : > { %v14440_v9 = vmax.f32 %v6562_v15, %v6360_v35  ;;  %v4261_v54 = vadd.f32 %v14340_v14, %v8323_v60  ;;  %v4252_v37 = vpop.f32.mrb[249].mxu1 }
 0x4e0   : > { %v4253_v29 = vadd.f32 %v14340_v14, %v4252_v37  ;;  %v8324_v49 = vpop.f32.mrb[250].mxu1 }
 0x4e1   : > { %v4533_v20 = vmax.f32 %v4261_v54, 0.0  ;;  %v4264_v22 = vadd.f32 %v14340_v14, %v8324_v49  ;;  %v4255_v45 = vpop.f32.mrb[251].mxu1 }
 0x4e2   : > { %v4531_v10 = vmax.f32 %v4253_v29, 0.0  ;;  %v4256_v21 = vadd.f32 %v14340_v14, %v4255_v45 }
 0x4e3   : > { %v6365_v23 = vsel %vm6109_vm8, %v4533_v20, -inf  ;;  %v4534_v34 = vmax.f32 %v4264_v22, 0.0 }
 0x4e4   : > { %v6471_v33 = vmax.f32 %v14419_v63, %v6365_v23  ;;  %v6363_v4 = vsel %vm6107_vm9, %v4531_v10, -inf  ;;  %v4532_v15 = vmax.f32 %v4256_v21, 0.0 }
 0x4e5   : > { %v6409_v8 = vmax.f32 %v14422_v59, %v6363_v4  ;;  %v6366_v57 = vsel %vm6110_vm10, %v4534_v34, -inf  ;;  %v5858_v59 = vpop.permute.xlu1 %5857 }
 0x4e6   : > { %v6629_v19 = vmax.f32 %v6373_v50, %v6471_v33  ;;  %v6502_v13 = vmax.f32 %v14424_v42, %v6366_v57  ;;  %v6364_v27 = vsel %vm6108_vm11, %v4532_v15, -inf  ;;  %v8327_v58 = vpop.f32.mrb[252].mxu1  ;;  %vm6114_vm14 = vcmp.eq.s32.totalorder %v5858_v59, 1 }
 0x4e7   : > { %v6627_v32 = vmax.f32 %v6371_v30, %v6409_v8  ;;  %v6440_v12 = vmax.f32 %v14426_v39, %v6364_v27  ;;  %v4277_v53 = vadd.f32 %v14340_v14, %v8327_v58  ;;  %v4268_v63 = vpop.f32.mrb[253].mxu1 }
 0x4e8   : > { %6637 = vst [vmem:[%s9277_s28 + $0x10] sm:$0xff] %v6629_v19  ;;  %v6630_v28 = vmax.f32 %v6374_v2, %v6502_v13  ;;  %v4269_v3 = vadd.f32 %v14340_v14, %v4268_v63  ;;  %v8328_v25 = vpop.f32.mrb[254].mxu1 }
 0x4e9   : > { %6635 = vst [vmem:[%s9277_s28] sm:$0xff] %v6627_v32  ;;  %v6628_v5 = vmax.f32 %v6372_v16, %v6440_v12  ;;  %v4537_v42 = vmax.f32 %v4277_v53, 0.0  ;;  %v4280_v26 = vadd.f32 %v14340_v14, %v8328_v25  ;;  %v4271_v55 = vpop.f32.mrb[255].mxu1 }
 0x4ea   : > { %6638 = vst [vmem:[%s9277_s28 + $0x18] sm:$0xff] %v6630_v28  ;;  %v4535_v47 = vmax.f32 %v4269_v3, 0.0  ;;  %v4272_v39 = vadd.f32 %v14340_v14, %v4271_v55 }
 0x4eb   : > { %6636 = vst [vmem:[%s9277_s28 + $0x8] sm:$0xff] %v6628_v5  ;;  %v6369_v56 = vsel %vm6113_vm12, %v4537_v42, -inf  ;;  %v4538_v24 = vmax.f32 %v4280_v26, 0.0 }
 0x4ec   : > { %v6595_v1 = vmax.f32 %v14433_v61, %v6369_v56  ;;  %v6367_v43 = vsel %vm6111_vm13, %v4535_v47, -inf  ;;  %v4536_v44 = vmax.f32 %v4272_v39, 0.0 }
 0x4ed   : > { %v6533_v7 = vmax.f32 %v14436_v0, %v6367_v43  ;;  %v6370_v14 = vsel %vm6114_vm14, %v4538_v24, -inf }
 0x4ee   : > { %v6633_v31 = vmax.f32 %v6377_v52, %v6595_v1  ;;  %v6626_v62 = vmax.f32 %v14438_v51, %v6370_v14  ;;  %v6368_v40 = vsel %vm6112_vm15, %v4536_v44, -inf }
 0x4ef   : > { %v6631_v17 = vmax.f32 %v6375_v18, %v6533_v7  ;;  %v6564_v48 = vmax.f32 %v14440_v9, %v6368_v40 }
 0x4f0   : > { %6641 = vst [vmem:[%s9277_s28 + $0x30] sm:$0xff] %v6633_v31  ;;  %v6634_v61 = vmax.f32 %v6378_v36, %v6626_v62 }
 0x4f1   : > { %6639 = vst [vmem:[%s9277_s28 + $0x20] sm:$0xff] %v6631_v17  ;;  %v6632_v38 = vmax.f32 %v6376_v6, %v6564_v48 }
 0x4f2   : > { %6642 = vst [vmem:[%s9277_s28 + $0x38] sm:$0xff] %v6634_v61 }
 0x4f3   : > { %6640 = vst [vmem:[%s9277_s28 + $0x28] sm:$0xff] %v6632_v38 }
 0x4f4 PF: > { %s15133_s16 = sld [smem:[#allocation29_spill]]  ;;  %s15135_s13 = sld [smem:[#allocation36_spill]] }
 0x4f5   : > { %s15136_s11 = sld [smem:[#allocation195_spill]]  ;;  %s6657_s20 = sshll.u32 %s9277_s28, 4  ;;  %s14481_s20 = int_to_ptr.vmem [resolvable:$true] %s6657_s20 }
 0x4f6   : > { %s14485_s18 = scalar_lea.sflag [#allocation6], %s395_s9  ;;  %s8733_s27 = scalar_lea.vmem %s14481_s20, 1024 }
 0x4f7   : > { %p8734_p1 = scmp.ne.s32.totalorder %s14481_s20, %s8733_s27  ;;  %s8893_s8 = smov [#allocation15]  }
 0x4f8   : > { %s8737_s21 = sshll.u32 %s8893_s8, 4  ;;  %s8738_s21 = int_to_ptr.vmem [resolvable:$false] %s8737_s21 }
 0x4f9   : > { %s8739_s3 = scalar_lea.vmem %s8738_s21, 2048  ;;  %p8740_p10 = scmp.lt.s32.totalorder %s14481_s20, %s8738_s21 }
 0x4fa   : > { %s6873_s29 = sshll.u32 %s15133_s16, 10  ;;  %p15137_p2 = scmp.ne.s32.totalorder %s15135_s13, 0 }
 0x4fb   : > { %s14478_s15 = scalar_lea.hbm %s15136_s11, %s6873_s29  ;;  %p8741_p0 = scmp.lt.s32.totalorder %s8739_s3, %s8733_s27 }
 0x4fc   : > { %p8735_p6 = pnand %p8734_p1, %p15137_p2 }
 0x4fd   : > { %p8742_p12 = por %p8741_p0, %p8740_p10 }
 0x4fe   : > { %p8736_p13 = pneg %p8735_p6 }
 0x500   : > { %p8743_p9 = pnand %p8742_p12, %p8736_p13 }
 0x502   : > { %8746 = shalt.err (!%p8743_p9)
}
 0x503   : > { %s8747_s9 = scalar_lea.hbm %s14478_s15, 1024  ;;  %s8751_s30 = scalar_lea.hbm %s15136_s11, 2048 }
 0x504   : > { %p8748_p7 = scmp.ne.s32.totalorder %s14478_s15, %s8747_s9  ;;  %p8752_p8 = scmp.lt.u32.totalorder %s14478_s15, %s15136_s11 }
 0x505   : > { %p8753_p3 = scmp.lt.u32.totalorder %s8751_s30, %s8747_s9  ;;  %p8755_p1 = scmp.lt.u32.totalorder %s8747_s9, %s14478_s15 }
 0x506   : > { %p8749_p5 = pnand %p8748_p7, %p15137_p2 }
 0x507   : > { %p8754_p4 = por %p8753_p3, %p8752_p8 }
 0x508   : > { %p8750_p11 = pneg %p8749_p5 }
 0x509   : > { %p8756_p6 = por %p8755_p1, %p8754_p4 }
 0x50b   : > { %p8757_p13 = pnand %p8756_p6, %p8750_p11 }
 0x50d   : > { %8760 = shalt.err (!%p8757_p13)
}
 0x50e   : > { %s8894_s16 = smov 128   ;;  %s8895_s14 = smov 8  }
 0x50f   : > { %8356 = dma.vmem_to_hbm [thread:$0]  (%p15137_p2), %s14481_s20, 1024, %s14478_s15, %s14485_s18, %s8894_s16, %s8894_s16, %s8895_s14  }
 0x510 PF: > { %s15138_s29 = sld [smem:[#allocation26_spill]]  ;;  %s15139_s10 = sld [smem:[#allocation37_spill]] }
 0x511   : > { %p8383_p10 = scmp.ge.s32.totalorder %s8873_s24, 2 }
 0x516   : > { %s6672_s5 = sand.u32 1, %s15138_s29   ;;  %p15140_p0 = scmp.ne.s32.totalorder %s15139_s10, 0 }
 0x517   : > { %s6673_s27 = scalar_lea.sflag [#allocation6], %s6672_s5 }
 0x518   : > { %p8372_p12 = pnand %p8383_p10, %p15140_p0 }
 0x51a   : > { %8828 = dma.done.wait (!%p8372_p12), %s6673_s27, 1024  }
 0x51b   : > { %8830 = vsyncadd (!%p8372_p12), %s6673_s27, 4294966272  ;;  %s33_s24 = sadd.s32 1, %s8873_s24   ;;  %s15141_s15 = sld [smem:[#allocation27_spill]] }
 0x51c   : > { %p30_p9 = scmp.ge.s32.totalorder %s33_s24, 6   ;;  %s15142_s8 = sld [smem:[#allocation33_spill]] }
 0x51d   : > { %s15143_s13 = sld [smem:[#allocation34_spill]]  ;;  %s15144_s3 = sld [smem:[#allocation31_spill]] }
 0x51e   : > { %s15145_s9 = sld [smem:[#allocation32_spill]]  ;;  %s15146_s16 = smov %s8841_s17 }
 0x51f   : > { %s15148_s18 = smov %s8849_s0  ;;  %s15149_s0 = smov %s8853_s19 }
 0x520   : > { %s15151_s20 = smov %s8865_s22  ;;  %s15152_s21 = smov %s8869_s23 }
 0x521   :  { %32 = sbr.rel (!%p30_p9) target bundleno = 26 (0x1a), region = 138 }
 0x522   : > { %s15147_s17 = smov %s15142_s8 }
 0x523   : > { %s15150_s19 = smov %s15143_s13  ;;  %s15153_s22 = smov %s15144_s3 }
 0x524   : > { %s15154_s23 = smov %s15145_s9 }
 0x528   :  { %6678 = vsyncpa [#allocation5], 1 }
 0x529   :  { %6680 = vsyncpa [#allocation5 + $0x1], 1 }
 0x52a   :  { %6681 = vsyncpa [#allocation8], 1 }
 0x52b   :  { %6683 = vsyncpa [#allocation8 + $0x1], 1 }
 0x52c   :  { %6684 = vsyncpa [#allocation11], 1 }
 0x52d   :  { %6685 = vsyncpa [#allocation14], 1 }
 0x52e   :  { %6686 = vsyncpa [#allocation6], 1 }
 0x52f   :  { %6688 = vsyncpa [#allocation6 + $0x1], 1 }

</bundles_post_ra>
